<compile_context>
chip_gen: v5e
topology: v5e:2x2
jax: 0.10.0
libtpu: 0.0.40
codegen_flags: <defaults>
</compile_context>

<pallas_src>
import math
from functools import partial

import jax
import jax.numpy as jnp
from jax.experimental import pallas as pl
from jax.experimental.pallas import tpu as pltpu

LANE = 128
_BN_EPS = 1e-5


def _round_up(x, m):
    return ((x + m - 1) // m) * m


def _largest_divisor_tile(dim, unit, cap):
    """Largest divisor of `dim` that is a multiple of `unit` and <= cap."""
    best = unit
    t = unit
    while t <= cap:
        if dim % t == 0:
            best = t
        t += unit
    return best


def _pick_vmem_limit():
    # Per-generation VMEM budget: v5e/v6e have 128 MiB physical (use up to 96 MiB);
    # v7x has 64 MiB per TensorCore (stay <= ~48 MiB).  Conservative fallback if
    # the hardware query is unavailable.
    try:
        cap = pltpu.get_tpu_info().vmem_capacity_bytes
    except Exception:
        cap = 64 * 1024 * 1024
    return int(min(cap * 3 // 4, 96 * 1024 * 1024))


_VMEM_LIMIT = _pick_vmem_limit()


# ----------------------------------------------------------------------------
# Pallas kernels
# ----------------------------------------------------------------------------

def _sigmoid(y):
    # Single EUP transcendental per element (tanh form of the logistic), instead
    # of exp + approx-reciprocal; also avoids the exp(-y)=inf edge case.
    return 0.5 * jnp.tanh(0.5 * y) + 0.5


def _silu(y):
    return y * _sigmoid(y)


def _mm_kernel(x_ref, w_ref, shift_ref, o_ref, acc_ref, *, act):
    """Tiled matmul + folded-BN shift + optional SiLU."""
    @pl.when(pl.program_id(2) == 0)
    def _():
        acc_ref[...] = jnp.zeros_like(acc_ref)

    acc_ref[...] += jnp.dot(x_ref[...], w_ref[...],
                            preferred_element_type=jnp.float32)

    @pl.when(pl.program_id(2) == pl.num_programs(2) - 1)
    def _():
        y = acc_ref[...] + shift_ref[...]
        if act:
            y = _silu(y)
        o_ref[...] = y.astype(o_ref.dtype)


def _mm_res_kernel(x_ref, w_ref, shift_ref, sc_ref, o_ref, acc_ref, *, act):
    """Tiled matmul + folded-BN shift + optional SiLU + fused residual add."""
    @pl.when(pl.program_id(2) == 0)
    def _():
        acc_ref[...] = jnp.zeros_like(acc_ref)

    acc_ref[...] += jnp.dot(x_ref[...], w_ref[...],
                            preferred_element_type=jnp.float32)

    @pl.when(pl.program_id(2) == pl.num_programs(2) - 1)
    def _():
        y = acc_ref[...] + shift_ref[...]
        if act:
            y = _silu(y)
        y = y + sc_ref[...].astype(jnp.float32)          # residual add in f32
        o_ref[...] = y.astype(o_ref.dtype)


def matmul_bn_act(x2d, w2d, shift, *, act, shortcut=None):
    """y = SiLU?(x2d @ w2d + shift) [+ shortcut].  bf16 in/out, f32 accumulate."""
    M, K = x2d.shape
    K2, N = w2d.shape
    assert K == K2

    # --- tile selection ------------------------------------------------------
    # Prefer 256-wide TN/TK (v6e/v7x MXU = 2x256x256); 128-wide is already full
    # width on v5e's 4x128x128 MXU.  Tiles are exact divisors -> no dead lanes.
    if N % 256 == 0:
        TN = _largest_divisor_tile(N, 256, min(512, N))
    elif N % LANE == 0:
        TN = _largest_divisor_tile(N, LANE, min(512, N))
    else:
        TN = N
    if K % 256 == 0:
        TK = _largest_divisor_tile(K, 256, min(512, K))
    elif K % LANE == 0:
        TK = _largest_divisor_tile(K, LANE, min(512, K))
    else:
        TK = K

    # M padded only to the 8-sublane quantum; TM is a divisor of padded M.
    Mp = _round_up(M, 8)
    m_cap = 1024
    if N // TN < 2 and Mp >= 16:
        # Keep >=2 blocks along a parallel axis so both v7x TensorCores get work
        # (no-op on single-TC v5e/v6e).
        m_cap = min(m_cap, Mp // 2)
    TM = _largest_divisor_tile(Mp, 8, max(8, min(m_cap, Mp)))

    if Mp != M:
        x2d = jnp.pad(x2d, ((0, Mp - M), (0, 0)))
        if shortcut is not None:
            shortcut = jnp.pad(shortcut, ((0, Mp - M), (0, 0)))

    shift2 = shift.reshape(1, N)                         # f32, tiny

    in_specs = [
        pl.BlockSpec((TM, TK), lambda i, j, k: (i, k)),
        pl.BlockSpec((TK, TN), lambda i, j, k: (k, j)),
        pl.BlockSpec((1, TN), lambda i, j, k: (0, j)),
    ]
    args = [x2d, w2d, shift2]
    if shortcut is not None:
        in_specs.append(pl.BlockSpec((TM, TN), lambda i, j, k: (i, j)))
        args.append(shortcut)
        kernel = partial(_mm_res_kernel, act=act)
    else:
        kernel = partial(_mm_kernel, act=act)

    out = pl.pallas_call(
        kernel,
        out_shape=jax.ShapeDtypeStruct((Mp, N), jnp.bfloat16),
        grid=(Mp // TM, N // TN, K // TK),
        in_specs=in_specs,
        out_specs=pl.BlockSpec((TM, TN), lambda i, j, k: (i, j)),
        scratch_shapes=[pltpu.VMEM((TM, TN), jnp.float32)],
        compiler_params=pltpu.CompilerParams(
            dimension_semantics=("parallel", "parallel", "arbitrary"),
            vmem_limit_bytes=_VMEM_LIMIT),
    )(*args)
    return out if Mp == M else out[:M]


def _dw_kernel(p_ref, w_ref, shift_ref, o_ref, *, taps):
    """Depthwise conv as per-tap elementwise MAC on the VPU (channels on lanes)."""
    acc = p_ref[0].astype(jnp.float32) * w_ref[0].astype(jnp.float32)
    for t in range(1, taps):
        acc = acc + p_ref[t].astype(jnp.float32) * w_ref[t].astype(jnp.float32)
    y = acc + shift_ref[...]
    o_ref[...] = (y * _sigmoid(y)).astype(o_ref.dtype)


def dw_bn_act(patches, w_taps, shift):
    taps, M, C = patches.shape
    Mp = _round_up(M, 8)
    if Mp != M:
        patches = jnp.pad(patches, ((0, 0), (0, Mp - M), (0, 0)))
    m_cap = min(512, Mp // 2) if Mp >= 16 else Mp
    TM = _largest_divisor_tile(Mp, 8, max(8, m_cap))
    shift2 = shift.reshape(1, C)
    out = pl.pallas_call(
        partial(_dw_kernel, taps=taps),
        out_shape=jax.ShapeDtypeStruct((Mp, C), jnp.bfloat16),
        grid=(Mp // TM,),
        in_specs=[
            pl.BlockSpec((taps, TM, C), lambda i: (0, i, 0)),
            pl.BlockSpec((taps, 1, C), lambda i: (0, 0, 0)),
            pl.BlockSpec((1, C), lambda i: (0, 0)),
        ],
        out_specs=pl.BlockSpec((TM, C), lambda i: (i, 0)),
        compiler_params=pltpu.CompilerParams(
            dimension_semantics=("parallel",),
            vmem_limit_bytes=_VMEM_LIMIT),
    )(patches, w_taps, shift2)
    return out if Mp == M else out[:M]


def _xadd_kernel(a_ref, b_ref, o_ref):
    s = a_ref[...].astype(jnp.float32) + b_ref[...].astype(jnp.float32)
    o_ref[...] = s.astype(o_ref.dtype)


def cross_stream_add(xb, n_per_stream):
    """out[h] = stream[h] + stream[1-h] for the two stacked streams.

    One kernel replaces the previous MS_FIM merge add + both stage-input adds:
    the same array is passed twice, the second with a swapped-half index_map,
    so no swapped copy is materialized in HBM.  The merged feature is simply
    the first half of the result.
    """
    B, H, W, C = xb.shape
    assert B == 2 * n_per_stream
    Mh = n_per_stream * H * W
    a = xb.reshape(2, Mh, C)
    Mp = _round_up(Mh, 8)
    if Mp != Mh:
        a = jnp.pad(a, ((0, 0), (0, Mp - Mh), (0, 0)))
    m_cap = min(512, Mp // 2) if Mp >= 16 else Mp
    TM = _largest_divisor_tile(Mp, 8, max(8, m_cap))
    out = pl.pallas_call(
        _xadd_kernel,
        out_shape=jax.ShapeDtypeStruct((2, Mp, C), jnp.bfloat16),
        grid=(2, Mp // TM),
        in_specs=[
            pl.BlockSpec((1, TM, C), lambda h, i: (h, i, 0)),
            pl.BlockSpec((1, TM, C), lambda h, i: (1 - h, i, 0)),
        ],
        out_specs=pl.BlockSpec((1, TM, C), lambda h, i: (h, i, 0)),
        compiler_params=pltpu.CompilerParams(
            dimension_semantics=("parallel", "parallel"),
            vmem_limit_bytes=_VMEM_LIMIT),
    )(a, a)
    if Mp != Mh:
        out = out[:, :Mh]
    return out.reshape(B, H, W, C)


# ----------------------------------------------------------------------------
# Plain-JAX glue: tap extraction, block / stage wiring
# ----------------------------------------------------------------------------

def _extract_taps(x, k, stride):
    """x: [N,H,W,C] -> list of k*k shifted/strided views, each [N,Ho,Wo,C].

    TODO(synk): replace with implicit-GEMM (tap index on a grid axis + shifted
    VMEM windows inside the matmul kernel) to cut input HBM traffic ~k*k x.
    """
    pad = (k - 1) // 2
    xp = jnp.pad(x, ((0, 0), (pad, pad), (pad, pad), (0, 0)))
    H, W = x.shape[1], x.shape[2]
    Ho = (H + 2 * pad - k) // stride + 1
    Wo = (W + 2 * pad - k) // stride + 1
    taps = []
    for di in range(k):
        for dj in range(k):
            taps.append(xp[:, di:di + Ho * stride:stride,
                           dj:dj + Wo * stride:stride, :])
    return taps, Ho, Wo


def conv_bn_act(x, p, stride, act, shortcut=None):
    """Standard (groups=1) conv + folded BN + optional SiLU [+ fused residual]."""
    w = p["w"]                                # [k, k, Cin(_pad), Cout_pad] bf16
    k, _, cin, cout = w.shape
    N = x.shape[0]
    if k == 1 and stride == 1:
        patches = x
        Ho, Wo = x.shape[1], x.shape[2]
    else:
        taps, Ho, Wo = _extract_taps(x, k, stride)
        patches = jnp.concatenate(taps, axis=-1)       # [N,Ho,Wo,k*k*Cin]
    x2d = patches.reshape(N * Ho * Wo, -1)
    w2d = w.reshape(k * k * cin, cout)
    sc2d = shortcut.reshape(N * Ho * Wo, cout) if shortcut is not None else None
    y2d = matmul_bn_act(x2d, w2d, p["shift"], act=act, shortcut=sc2d)
    return y2d.reshape(N, Ho, Wo, cout)


def dwconv_bn_act(x, p, stride):
    """Depthwise conv (groups=C) + folded BN + SiLU.  x: NHWC (C lane-padded)."""
    w = p["w"]                                # [k, k, C_pad] bf16 (BN scale folded)
    k, _, C = w.shape
    N = x.shape[0]
    taps, Ho, Wo = _extract_taps(x, k, stride)
    patches = jnp.stack([t.reshape(-1, C) for t in taps], axis=0)   # [k*k, M, C]
    w_taps = w.reshape(k * k, 1, C)
    y2d = dw_bn_act(patches, w_taps, p["shift"])
    return y2d.reshape(N, Ho, Wo, C)


def fused_mbconv_fwd(x, p, stride, has_expansion, has_shortcut):
    sc = x if has_shortcut else None          # DropPath is identity in eval mode
    if has_expansion:
        r = conv_bn_act(x, p["expand"], stride, act=True)
        r = conv_bn_act(r, p["project"], 1, act=False, shortcut=sc)
    else:
        r = conv_bn_act(x, p["project"], stride, act=True, shortcut=sc)
    return r


def mbconv_fwd(x, p, stride, has_shortcut):
    # TODO(synk): fuse expand -> dw -> project into one row-tiled pallas_call so
    # the expanded activation stays in VMEM instead of round-tripping HBM.
    sc = x if has_shortcut else None
    r = conv_bn_act(x, p["expand"], 1, act=True)            # 1x1 expand
    r = dwconv_bn_act(r, p["dw"], stride)                    # depthwise
    # SE == Identity (se_ratio == 0 in the chosen config)
    r = conv_bn_act(r, p["project"], 1, act=False, shortcut=sc)   # 1x1 project
    return r


def run_stage(x, stage_params, cnf, fused):
    repeats, k, stride, expand, in_c, out_c = cnf[0], cnf[1], cnf[2], cnf[3], cnf[4], cnf[5]
    for i in range(repeats):
        s = stride if i == 0 else 1
        ic = in_c if i == 0 else out_c
        has_shortcut = (s == 1 and ic == out_c)
        p = stage_params[i]
        if fused:
            x = fused_mbconv_fwd(x, p, s, has_expansion=(expand != 1),
                                 has_shortcut=has_shortcut)
        else:
            x = mbconv_fwd(x, p, s, has_shortcut=has_shortcut)
    return x


def efficientnetv2_forward(params, x1_nchw, x2_nchw, *, model_cnf):
    n = x1_nchw.shape[0]
    x1 = jnp.transpose(x1_nchw, (0, 2, 3, 1)).astype(jnp.bfloat16)   # NCHW -> NHWC
    x2 = jnp.transpose(x2_nchw, (0, 2, 3, 1)).astype(jnp.bfloat16)

    rgb = conv_bn_act(x1, params["rgb_stem"], stride=2, act=True)     # separate stems
    xx = conv_bn_act(x2, params["x_stem"], stride=2, act=True)

    # Stream batching: RGB_stage_i and X_stage_i share parameters (same block
    # objects in the PyTorch code), so both streams run through each stage as
    # one batched kernel chain.
    xb = jnp.concatenate([rgb, xx], axis=0)

    def stage(t, idx):
        return run_stage(t, params["stages"][idx], model_cnf[idx], fused=(idx < 3))

    xb = stage(xb, 0)
    xb = stage(xb, 1)
    # TODO(synk): MS_FIM definition not provided in the reference source; stand-in
    # = cross-stream exchange + elementwise-sum merge.  One cross_stream_add per
    # merge point covers the merge feature AND both next-stage input adds.
    s2 = cross_stream_add(xb, n)
    merge1 = s2[:n]
    xb = stage(s2, 2)
    s3 = cross_stream_add(xb, n)
    merge2 = s3[:n]
    xb = stage(s3, 3)
    s4 = cross_stream_add(xb, n)
    merge3 = s4[:n]
    xb = stage(s4, 4)
    merge4 = cross_stream_add(xb, n)[:n]

    feats = [merge1, merge2, merge3, merge4]
    real_c = [model_cnf[1][5], model_cnf[2][5], model_cnf[3][5], model_cnf[4][5]]
    # Strip lane padding, NHWC -> NCHW, cast back to f32 for the caller.
    return [jnp.transpose(f[..., :c], (0, 3, 1, 2)).astype(jnp.float32)
            for f, c in zip(feats, real_c)]


# ----------------------------------------------------------------------------
# Deterministic parameter initialization (matches __init__ shapes; BN scale
# folded into weights, channels padded to the 128-lane width).
# NOTE: with real trained BN (beta/mean != 0) the folded shift entries for the
# padded lanes must be explicitly zeroed; here they are zero by construction.
# ----------------------------------------------------------------------------

def init_conv_bn(key, k, cin, cout, groups=1, pad_in=True):
    fan_out = (k * k * cout) // groups
    std = math.sqrt(2.0 / fan_out)
    # Folded BN with init weights: gamma=1, beta=0, running_mean=0, running_var=1.
    bn_scale = 1.0 / math.sqrt(1.0 + _BN_EPS)
    cout_p = _round_up(cout, LANE)
    if groups == 1:
        cin_p = _round_up(cin, LANE) if pad_in else cin
        w = jax.random.normal(key, (k, k, cin, cout), jnp.float32) * std * bn_scale
        wp = jnp.zeros((k, k, cin_p, cout_p), jnp.float32).at[:, :, :cin, :cout].set(w)
    else:  # depthwise: groups == cin == cout
        w = jax.random.normal(key, (k, k, cout), jnp.float32) * std * bn_scale
        wp = jnp.zeros((k, k, cout_p), jnp.float32).at[:, :, :cout].set(w)
    shift = jnp.zeros((cout_p,), jnp.float32)
    return {"w": wp.astype(jnp.bfloat16), "shift": shift}


def init_fused_block(key, k, ic, oc, expand):
    k0, k1 = jax.random.split(key)
    if expand != 1:
        ec = ic * expand
        return {"expand": init_conv_bn(k0, k, ic, ec),
                "project": init_conv_bn(k1, 1, ec, oc)}
    return {"project": init_conv_bn(k0, k, ic, oc)}


def init_mb_block(key, k, ic, oc, expand):
    ec = ic * expand
    k0, k1, k2 = jax.random.split(key, 3)
    return {"expand": init_conv_bn(k0, 1, ic, ec),
            "dw": init_conv_bn(k1, k, ec, ec, groups=ec),
            "project": init_conv_bn(k2, 1, ec, oc)}


def init_params(key, in_chans, model_cnf):
    keys = jax.random.split(key, 2 + len(model_cnf))
    stem_c = model_cnf[0][4]
    params = {
        "rgb_stem": init_conv_bn(keys[0], 3, in_chans, stem_c, pad_in=False),
        "x_stem": init_conv_bn(keys[1], 3, in_chans, stem_c, pad_in=False),
        "stages": [],
    }
    for si, cnf in enumerate(model_cnf):
        repeats, k, _, expand, in_c, out_c = cnf[0], cnf[1], cnf[2], cnf[3], cnf[4], cnf[5]
        fused = si < 3
        bkeys = jax.random.split(keys[2 + si], repeats)
        blocks = []
        for i in range(repeats):
            ic = in_c if i == 0 else out_c
            if fused:
                blocks.append(init_fused_block(bkeys[i], k, ic, out_c, expand))
            else:
                blocks.append(init_mb_block(bkeys[i], k, ic, out_c, expand))
        params["stages"].append(blocks)
    return params


# ----------------------------------------------------------------------------
# Main
# ----------------------------------------------------------------------------

if __name__ == "__main__":
    # Small synthetic EfficientNetV2 config:
    #   [repeats, kernel, stride, expand_ratio, input_c, out_c, operator, se_ratio]
    model_cnf = [
        [1, 3, 1, 1,  8,  8, 0, 0],   # stage1: FusedMBConv, no expansion, shortcut
        [1, 3, 2, 2,  8, 16, 0, 0],   # stage2: FusedMBConv, expansion, downsample
        [1, 3, 2, 2, 16, 16, 0, 0],   # stage3: FusedMBConv, expansion, downsample
        [1, 3, 2, 2, 16, 32, 0, 0],   # stage4: MBConv, downsample (SE = Identity)
        [1, 3, 1, 2, 32, 32, 0, 0],   # stage5: MBConv, shortcut (SE = Identity)
    ]
    in_chans = 3

    root = jax.random.PRNGKey(0)
    k_params, k_x1, k_x2 = jax.random.split(root, 3)

    params = init_params(k_params, in_chans, model_cnf)

    # PyTorch-style NCHW inputs for the two streams (RGB / X modality).
    x1 = jax.random.normal(k_x1, (2, in_chans, 32, 32), jnp.float32)
    x2 = jax.random.normal(k_x2, (2, in_chans, 32, 32), jnp.float32)

    fwd = jax.jit(partial(efficientnetv2_forward, model_cnf=model_cnf))
    features = fwd(params, x1, x2)
    features = jax.block_until_ready(features)

    expected_shapes = [(2, 16, 8, 8), (2, 16, 4, 4), (2, 32, 2, 2), (2, 32, 2, 2)]
    assert [tuple(f.shape) for f in features] == expected_shapes, \
        [tuple(f.shape) for f in features]
    assert all(bool(jnp.all(jnp.isfinite(f))) for f in features)

    print("KERNEL_OK")
</pallas_src>

<mosaic_0001>
module attributes {stable_mosaic.version = 11 : i64} {
  func.func @_mm_kernel(%arg0: i32, %arg1: i32, %arg2: i32, %arg3: memref<256x27xbf16, #tpu.memory_space<vmem>>, %arg4: memref<27x128xbf16, #tpu.memory_space<vmem>>, %arg5: memref<1x128xf32, #tpu.memory_space<vmem>>, %arg6: memref<256x128xbf16, #tpu.memory_space<vmem>>, %arg7: memref<256x128xf32, #tpu.memory_space<vmem>>) attributes {dimension_semantics = [#tpu.dimension_semantics<parallel>, #tpu.dimension_semantics<parallel>, #tpu.dimension_semantics<arbitrary>], iteration_bounds = array<i64: 2, 1, 1>, scalar_prefetch = 0 : i64, scratch_operands = 1 : i64, tpu.core_type = #tpu.core_type<tc>, window_params = [{transform_indices = @transform_0, window_bounds = array<i64: 256, 27>}, {transform_indices = @transform_1, window_bounds = array<i64: 27, 128>}, {transform_indices = @transform_2, window_bounds = array<i64: 1, 128>}, {transform_indices = @transform_3, window_bounds = array<i64: 256, 128>}]} {
    %c0_i32 = arith.constant 0 : i32
    %0 = arith.cmpi eq, %arg2, %c0_i32 : i32
    %1 = arith.extui %0 : i1 to i32
    %c0_i32_0 = arith.constant 0 : i32
    %2 = arith.cmpi ne, %1, %c0_i32_0 : i32
    scf.if %2 {
      %cst_10 = arith.constant 0.000000e+00 : f32
      %12 = vector.broadcast %cst_10 : f32 to vector<256x128xf32>
      %c0_11 = arith.constant 0 : index
      %c0_12 = arith.constant 0 : index
      %13 = vector.load %arg7[%c0_11, %c0_12] : memref<256x128xf32, #tpu.memory_space<vmem>>, vector<256x128xf32>
      tpu.vector_store %arg7[%c0_11, %c0_12], %12 {strides = array<i32>} : memref<256x128xf32, #tpu.memory_space<vmem>>, vector<256x128xf32>,
    } else {
    }
    %c0 = arith.constant 0 : index
    %c0_1 = arith.constant 0 : index
    %3 = vector.load %arg7[%c0, %c0_1] : memref<256x128xf32, #tpu.memory_space<vmem>>, vector<256x128xf32>
    %c0_2 = arith.constant 0 : index
    %c0_3 = arith.constant 0 : index
    %4 = vector.load %arg3[%c0_2, %c0_3] : memref<256x27xbf16, #tpu.memory_space<vmem>>, vector<256x27xbf16>
    %c0_4 = arith.constant 0 : index
    %c0_5 = arith.constant 0 : index
    %5 = vector.load %arg4[%c0_4, %c0_5] : memref<27x128xbf16, #tpu.memory_space<vmem>>, vector<27x128xbf16>
    %cst = arith.constant dense<0.000000e+00> : vector<256x128xf32>
    %6 = tpu.matmul %4, %5, %cst {dimension_numbers = #tpu.dot_dimension_numbers<[1], [0], [0], [1], [0, 0, 1, 1], [], []>} : vector<256x27xbf16>, vector<27x128xbf16>, vector<256x128xf32> -> vector<256x128xf32>
    %7 = arith.addf %3, %6 : vector<256x128xf32>
    %c0_6 = arith.constant 0 : index
    %c0_7 = arith.constant 0 : index
    %8 = vector.load %arg7[%c0_6, %c0_7] : memref<256x128xf32, #tpu.memory_space<vmem>>, vector<256x128xf32>
    tpu.vector_store %arg7[%c0_6, %c0_7], %7 {strides = array<i32>} : memref<256x128xf32, #tpu.memory_space<vmem>>, vector<256x128xf32>,
    %c0_i32_8 = arith.constant 0 : i32
    %9 = arith.cmpi eq, %arg2, %c0_i32_8 : i32
    %10 = arith.extui %9 : i1 to i32
    %c0_i32_9 = arith.constant 0 : i32
    %11 = arith.cmpi ne, %10, %c0_i32_9 : i32
    scf.if %11 {
      %c0_10 = arith.constant 0 : index
      %c0_11 = arith.constant 0 : index
      %12 = vector.load %arg7[%c0_10, %c0_11] : memref<256x128xf32, #tpu.memory_space<vmem>>, vector<256x128xf32>
      %c0_12 = arith.constant 0 : index
      %c0_13 = arith.constant 0 : index
      %13 = vector.load %arg5[%c0_12, %c0_13] : memref<1x128xf32, #tpu.memory_space<vmem>>, vector<1x128xf32>
      %14 = vector.broadcast %13 : vector<1x128xf32> to vector<256x128xf32>
      %15 = arith.addf %12, %14 : vector<256x128xf32>
      %cst_14 = arith.constant 5.000000e-01 : f32
      %16 = vector.broadcast %cst_14 : f32 to vector<256x128xf32>
      %17 = arith.mulf %16, %15 : vector<256x128xf32>
      %18 = math.tanh %17 : vector<256x128xf32>
      %cst_15 = arith.constant 5.000000e-01 : f32
      %19 = vector.broadcast %cst_15 : f32 to vector<256x128xf32>
      %20 = arith.mulf %19, %18 : vector<256x128xf32>
      %cst_16 = arith.constant 5.000000e-01 : f32
      %21 = vector.broadcast %cst_16 : f32 to vector<256x128xf32>
      %22 = arith.addf %20, %21 : vector<256x128xf32>
      %23 = arith.mulf %15, %22 : vector<256x128xf32>
      %24 = arith.truncf %23 : vector<256x128xf32> to vector<256x128xbf16>
      %c0_17 = arith.constant 0 : index
      %c0_18 = arith.constant 0 : index
      %25 = vector.load %arg6[%c0_17, %c0_18] : memref<256x128xbf16, #tpu.memory_space<vmem>>, vector<256x128xbf16>
      tpu.vector_store %arg6[%c0_17, %c0_18], %24 {strides = array<i32>} : memref<256x128xbf16, #tpu.memory_space<vmem>>, vector<256x128xbf16>,
    } else {
    }
    return
  }
  func.func @transform_0(%arg0: i32, %arg1: i32, %arg2: i32) -> (i32, i32) {
    %c0_i32 = arith.constant 0 : i32
    return %arg0, %arg2 : i32, i32
  }
  func.func @transform_1(%arg0: i32, %arg1: i32, %arg2: i32) -> (i32, i32) {
    %c0_i32 = arith.constant 0 : i32
    return %arg2, %arg1 : i32, i32
  }
  func.func @transform_2(%arg0: i32, %arg1: i32, %arg2: i32) -> (i32, i32) {
    %c0_i32 = arith.constant 0 : i32
    %c0_i32_0 = arith.constant 0 : i32
    return %c0_i32, %arg1 : i32, i32
  }
  func.func @transform_3(%arg0: i32, %arg1: i32, %arg2: i32) -> (i32, i32) {
    %c0_i32 = arith.constant 0 : i32
    return %arg0, %arg1 : i32, i32
  }
}

module attributes {stable_mosaic.version = 11 : i64} {
  func.func @_mm_kernel(%arg0: i32, %arg1: i32, %arg2: i32, %arg3: memref<256x27xbf16, #tpu.memory_space<vmem>>, %arg4: memref<27x128xbf16, #tpu.memory_space<vmem>>, %arg5: memref<1x128xf32, #tpu.memory_space<vmem>>, %arg6: memref<256x128xbf16, #tpu.memory_space<vmem>>, %arg7: memref<256x128xf32, #tpu.memory_space<vmem>>) attributes {dimension_semantics = [#tpu.dimension_semantics<parallel>, #tpu.dimension_semantics<parallel>, #tpu.dimension_semantics<arbitrary>], iteration_bounds = array<i64: 2, 1, 1>, scalar_prefetch = 0 : i64, scratch_operands = 1 : i64, tpu.core_type = #tpu.core_type<tc>, window_params = [{transform_indices = @transform_0, window_bounds = array<i64: 256, 27>}, {transform_indices = @transform_1, window_bounds = array<i64: 27, 128>}, {transform_indices = @transform_2, window_bounds = array<i64: 1, 128>}, {transform_indices = @transform_3, window_bounds = array<i64: 256, 128>}]} {
    %c0_i32 = arith.constant 0 : i32
    %0 = arith.cmpi eq, %arg2, %c0_i32 : i32
    %1 = arith.extui %0 : i1 to i32
    %c0_i32_0 = arith.constant 0 : i32
    %2 = arith.cmpi ne, %1, %c0_i32_0 : i32
    scf.if %2 {
      %cst_10 = arith.constant 0.000000e+00 : f32
      %12 = vector.broadcast %cst_10 : f32 to vector<256x128xf32>
      %c0_11 = arith.constant 0 : index
      %c0_12 = arith.constant 0 : index
      %13 = vector.load %arg7[%c0_11, %c0_12] : memref<256x128xf32, #tpu.memory_space<vmem>>, vector<256x128xf32>
      tpu.vector_store %arg7[%c0_11, %c0_12], %12 {strides = array<i32>} : memref<256x128xf32, #tpu.memory_space<vmem>>, vector<256x128xf32>,
    } else {
    }
    %c0 = arith.constant 0 : index
    %c0_1 = arith.constant 0 : index
    %3 = vector.load %arg7[%c0, %c0_1] : memref<256x128xf32, #tpu.memory_space<vmem>>, vector<256x128xf32>
    %c0_2 = arith.constant 0 : index
    %c0_3 = arith.constant 0 : index
    %4 = vector.load %arg3[%c0_2, %c0_3] : memref<256x27xbf16, #tpu.memory_space<vmem>>, vector<256x27xbf16>
    %c0_4 = arith.constant 0 : index
    %c0_5 = arith.constant 0 : index
    %5 = vector.load %arg4[%c0_4, %c0_5] : memref<27x128xbf16, #tpu.memory_space<vmem>>, vector<27x128xbf16>
    %cst = arith.constant dense<0.000000e+00> : vector<256x128xf32>
    %6 = tpu.matmul %4, %5, %cst {dimension_numbers = #tpu.dot_dimension_numbers<[1], [0], [0], [1], [0, 0, 1, 1], [], []>} : vector<256x27xbf16>, vector<27x128xbf16>, vector<256x128xf32> -> vector<256x128xf32>
    %7 = arith.addf %3, %6 : vector<256x128xf32>
    %c0_6 = arith.constant 0 : index
    %c0_7 = arith.constant 0 : index
    %8 = vector.load %arg7[%c0_6, %c0_7] : memref<256x128xf32, #tpu.memory_space<vmem>>, vector<256x128xf32>
    tpu.vector_store %arg7[%c0_6, %c0_7], %7 {strides = array<i32>} : memref<256x128xf32, #tpu.memory_space<vmem>>, vector<256x128xf32>,
    %c0_i32_8 = arith.constant 0 : i32
    %9 = arith.cmpi eq, %arg2, %c0_i32_8 : i32
    %10 = arith.extui %9 : i1 to i32
    %c0_i32_9 = arith.constant 0 : i32
    %11 = arith.cmpi ne, %10, %c0_i32_9 : i32
    scf.if %11 {
      %c0_10 = arith.constant 0 : index
      %c0_11 = arith.constant 0 : index
      %12 = vector.load %arg7[%c0_10, %c0_11] : memref<256x128xf32, #tpu.memory_space<vmem>>, vector<256x128xf32>
      %c0_12 = arith.constant 0 : index
      %c0_13 = arith.constant 0 : index
      %13 = vector.load %arg5[%c0_12, %c0_13] : memref<1x128xf32, #tpu.memory_space<vmem>>, vector<1x128xf32>
      %14 = vector.broadcast %13 : vector<1x128xf32> to vector<256x128xf32>
      %15 = arith.addf %12, %14 : vector<256x128xf32>
      %cst_14 = arith.constant 5.000000e-01 : f32
      %16 = vector.broadcast %cst_14 : f32 to vector<256x128xf32>
      %17 = arith.mulf %16, %15 : vector<256x128xf32>
      %18 = math.tanh %17 : vector<256x128xf32>
      %cst_15 = arith.constant 5.000000e-01 : f32
      %19 = vector.broadcast %cst_15 : f32 to vector<256x128xf32>
      %20 = arith.mulf %19, %18 : vector<256x128xf32>
      %cst_16 = arith.constant 5.000000e-01 : f32
      %21 = vector.broadcast %cst_16 : f32 to vector<256x128xf32>
      %22 = arith.addf %20, %21 : vector<256x128xf32>
      %23 = arith.mulf %15, %22 : vector<256x128xf32>
      %24 = arith.truncf %23 : vector<256x128xf32> to vector<256x128xbf16>
      %c0_17 = arith.constant 0 : index
      %c0_18 = arith.constant 0 : index
      %25 = vector.load %arg6[%c0_17, %c0_18] : memref<256x128xbf16, #tpu.memory_space<vmem>>, vector<256x128xbf16>
      tpu.vector_store %arg6[%c0_17, %c0_18], %24 {strides = array<i32>} : memref<256x128xbf16, #tpu.memory_space<vmem>>, vector<256x128xbf16>,
    } else {
    }
    return
  }
  func.func @transform_0(%arg0: i32, %arg1: i32, %arg2: i32) -> (i32, i32) {
    %c0_i32 = arith.constant 0 : i32
    return %arg0, %arg2 : i32, i32
  }
  func.func @transform_1(%arg0: i32, %arg1: i32, %arg2: i32) -> (i32, i32) {
    %c0_i32 = arith.constant 0 : i32
    return %arg2, %arg1 : i32, i32
  }
  func.func @transform_2(%arg0: i32, %arg1: i32, %arg2: i32) -> (i32, i32) {
    %c0_i32 = arith.constant 0 : i32
    %c0_i32_0 = arith.constant 0 : i32
    return %c0_i32, %arg1 : i32, i32
  }
  func.func @transform_3(%arg0: i32, %arg1: i32, %arg2: i32) -> (i32, i32) {
    %c0_i32 = arith.constant 0 : i32
    return %arg0, %arg1 : i32, i32
  }
}

module attributes {stable_mosaic.version = 11 : i64} {
  func.func @_mm_res_kernel(%arg0: i32, %arg1: i32, %arg2: i32, %arg3: memref<512x384xbf16, #tpu.memory_space<vmem>>, %arg4: memref<384x128xbf16, #tpu.memory_space<vmem>>, %arg5: memref<1x128xf32, #tpu.memory_space<vmem>>, %arg6: memref<512x128xbf16, #tpu.memory_space<vmem>>, %arg7: memref<512x128xbf16, #tpu.memory_space<vmem>>, %arg8: memref<512x128xf32, #tpu.memory_space<vmem>>) attributes {dimension_semantics = [#tpu.dimension_semantics<parallel>, #tpu.dimension_semantics<parallel>, #tpu.dimension_semantics<arbitrary>], iteration_bounds = array<i64: 2, 1, 3>, scalar_prefetch = 0 : i64, scratch_operands = 1 : i64, tpu.core_type = #tpu.core_type<tc>, window_params = [{transform_indices = @transform_0, window_bounds = array<i64: 512, 384>}, {transform_indices = @transform_1, window_bounds = array<i64: 384, 128>}, {transform_indices = @transform_2, window_bounds = array<i64: 1, 128>}, {transform_indices = @transform_3, window_bounds = array<i64: 512, 128>}, {transform_indices = @transform_4, window_bounds = array<i64: 512, 128>}]} {
    %c0_i32 = arith.constant 0 : i32
    %0 = arith.cmpi eq, %arg2, %c0_i32 : i32
    %1 = arith.extui %0 : i1 to i32
    %c0_i32_0 = arith.constant 0 : i32
    %2 = arith.cmpi ne, %1, %c0_i32_0 : i32
    scf.if %2 {
      %cst_9 = arith.constant 0.000000e+00 : f32
      %12 = vector.broadcast %cst_9 : f32 to vector<512x128xf32>
      %c0_10 = arith.constant 0 : index
      %c0_11 = arith.constant 0 : index
      %13 = vector.load %arg8[%c0_10, %c0_11] : memref<512x128xf32, #tpu.memory_space<vmem>>, vector<512x128xf32>
      tpu.vector_store %arg8[%c0_10, %c0_11], %12 {strides = array<i32>} : memref<512x128xf32, #tpu.memory_space<vmem>>, vector<512x128xf32>,
    } else {
    }
    %c0 = arith.constant 0 : index
    %c0_1 = arith.constant 0 : index
    %3 = vector.load %arg8[%c0, %c0_1] : memref<512x128xf32, #tpu.memory_space<vmem>>, vector<512x128xf32>
    %c0_2 = arith.constant 0 : index
    %c0_3 = arith.constant 0 : index
    %4 = vector.load %arg3[%c0_2, %c0_3] : memref<512x384xbf16, #tpu.memory_space<vmem>>, vector<512x384xbf16>
    %c0_4 = arith.constant 0 : index
    %c0_5 = arith.constant 0 : index
    %5 = vector.load %arg4[%c0_4, %c0_5] : memref<384x128xbf16, #tpu.memory_space<vmem>>, vector<384x128xbf16>
    %cst = arith.constant dense<0.000000e+00> : vector<512x128xf32>
    %6 = tpu.matmul %4, %5, %cst {dimension_numbers = #tpu.dot_dimension_numbers<[1], [0], [0], [1], [0, 0, 1, 1], [], []>} : vector<512x384xbf16>, vector<384x128xbf16>, vector<512x128xf32> -> vector<512x128xf32>
    %7 = arith.addf %3, %6 : vector<512x128xf32>
    %c0_6 = arith.constant 0 : index
    %c0_7 = arith.constant 0 : index
    %8 = vector.load %arg8[%c0_6, %c0_7] : memref<512x128xf32, #tpu.memory_space<vmem>>, vector<512x128xf32>
    tpu.vector_store %arg8[%c0_6, %c0_7], %7 {strides = array<i32>} : memref<512x128xf32, #tpu.memory_space<vmem>>, vector<512x128xf32>,
    %c2_i32 = arith.constant 2 : i32
    %9 = arith.cmpi eq, %arg2, %c2_i32 : i32
    %10 = arith.extui %9 : i1 to i32
    %c0_i32_8 = arith.constant 0 : i32
    %11 = arith.cmpi ne, %10, %c0_i32_8 : i32
    scf.if %11 {
      %c0_9 = arith.constant 0 : index
      %c0_10 = arith.constant 0 : index
      %12 = vector.load %arg8[%c0_9, %c0_10] : memref<512x128xf32, #tpu.memory_space<vmem>>, vector<512x128xf32>
      %c0_11 = arith.constant 0 : index
      %c0_12 = arith.constant 0 : index
      %13 = vector.load %arg5[%c0_11, %c0_12] : memref<1x128xf32, #tpu.memory_space<vmem>>, vector<1x128xf32>
      %14 = vector.broadcast %13 : vector<1x128xf32> to vector<512x128xf32>
      %15 = arith.addf %12, %14 : vector<512x128xf32>
      %cst_13 = arith.constant 5.000000e-01 : f32
      %16 = vector.broadcast %cst_13 : f32 to vector<512x128xf32>
      %17 = arith.mulf %16, %15 : vector<512x128xf32>
      %18 = math.tanh %17 : vector<512x128xf32>
      %cst_14 = arith.constant 5.000000e-01 : f32
      %19 = vector.broadcast %cst_14 : f32 to vector<512x128xf32>
      %20 = arith.mulf %19, %18 : vector<512x128xf32>
      %cst_15 = arith.constant 5.000000e-01 : f32
      %21 = vector.broadcast %cst_15 : f32 to vector<512x128xf32>
      %22 = arith.addf %20, %21 : vector<512x128xf32>
      %23 = arith.mulf %15, %22 : vector<512x128xf32>
      %c0_16 = arith.constant 0 : index
      %c0_17 = arith.constant 0 : index
      %24 = vector.load %arg6[%c0_16, %c0_17] : memref<512x128xbf16, #tpu.memory_space<vmem>>, vector<512x128xbf16>
      %25 = arith.extf %24 : vector<512x128xbf16> to vector<512x128xf32>
      %26 = arith.addf %23, %25 : vector<512x128xf32>
      %27 = arith.truncf %26 : vector<512x128xf32> to vector<512x128xbf16>
      %c0_18 = arith.constant 0 : index
      %c0_19 = arith.constant 0 : index
      %28 = vector.load %arg7[%c0_18, %c0_19] : memref<512x128xbf16, #tpu.memory_space<vmem>>, vector<512x128xbf16>
      tpu.vector_store %arg7[%c0_18, %c0_19], %27 {strides = array<i32>} : memref<512x128xbf16, #tpu.memory_space<vmem>>, vector<512x128xbf16>,
    } else {
    }
    return
  }
  func.func @transform_0(%arg0: i32, %arg1: i32, %arg2: i32) -> (i32, i32) {
    %c0_i32 = arith.constant 0 : i32
    return %arg0, %arg2 : i32, i32
  }
  func.func @transform_1(%arg0: i32, %arg1: i32, %arg2: i32) -> (i32, i32) {
    %c0_i32 = arith.constant 0 : i32
    return %arg2, %arg1 : i32, i32
  }
  func.func @transform_2(%arg0: i32, %arg1: i32, %arg2: i32) -> (i32, i32) {
    %c0_i32 = arith.constant 0 : i32
    %c0_i32_0 = arith.constant 0 : i32
    return %c0_i32, %arg1 : i32, i32
  }
  func.func @transform_3(%arg0: i32, %arg1: i32, %arg2: i32) -> (i32, i32) {
    %c0_i32 = arith.constant 0 : i32
    return %arg0, %arg1 : i32, i32
  }
  func.func @transform_4(%arg0: i32, %arg1: i32, %arg2: i32) -> (i32, i32) {
    %c0_i32 = arith.constant 0 : i32
    return %arg0, %arg1 : i32, i32
  }
}

module attributes {stable_mosaic.version = 11 : i64} {
  func.func @_mm_kernel(%arg0: i32, %arg1: i32, %arg2: i32, %arg3: memref<128x384xbf16, #tpu.memory_space<vmem>>, %arg4: memref<384x128xbf16, #tpu.memory_space<vmem>>, %arg5: memref<1x128xf32, #tpu.memory_space<vmem>>, %arg6: memref<128x128xbf16, #tpu.memory_space<vmem>>, %arg7: memref<128x128xf32, #tpu.memory_space<vmem>>) attributes {dimension_semantics = [#tpu.dimension_semantics<parallel>, #tpu.dimension_semantics<parallel>, #tpu.dimension_semantics<arbitrary>], iteration_bounds = array<i64: 2, 1, 3>, scalar_prefetch = 0 : i64, scratch_operands = 1 : i64, tpu.core_type = #tpu.core_type<tc>, window_params = [{transform_indices = @transform_0, window_bounds = array<i64: 128, 384>}, {transform_indices = @transform_1, window_bounds = array<i64: 384, 128>}, {transform_indices = @transform_2, window_bounds = array<i64: 1, 128>}, {transform_indices = @transform_3, window_bounds = array<i64: 128, 128>}]} {
    %c0_i32 = arith.constant 0 : i32
    %0 = arith.cmpi eq, %arg2, %c0_i32 : i32
    %1 = arith.extui %0 : i1 to i32
    %c0_i32_0 = arith.constant 0 : i32
    %2 = arith.cmpi ne, %1, %c0_i32_0 : i32
    scf.if %2 {
      %cst_9 = arith.constant 0.000000e+00 : f32
      %12 = vector.broadcast %cst_9 : f32 to vector<128x128xf32>
      %c0_10 = arith.constant 0 : index
      %c0_11 = arith.constant 0 : index
      %13 = vector.load %arg7[%c0_10, %c0_11] : memref<128x128xf32, #tpu.memory_space<vmem>>, vector<128x128xf32>
      tpu.vector_store %arg7[%c0_10, %c0_11], %12 {strides = array<i32>} : memref<128x128xf32, #tpu.memory_space<vmem>>, vector<128x128xf32>,
    } else {
    }
    %c0 = arith.constant 0 : index
    %c0_1 = arith.constant 0 : index
    %3 = vector.load %arg7[%c0, %c0_1] : memref<128x128xf32, #tpu.memory_space<vmem>>, vector<128x128xf32>
    %c0_2 = arith.constant 0 : index
    %c0_3 = arith.constant 0 : index
    %4 = vector.load %arg3[%c0_2, %c0_3] : memref<128x384xbf16, #tpu.memory_space<vmem>>, vector<128x384xbf16>
    %c0_4 = arith.constant 0 : index
    %c0_5 = arith.constant 0 : index
    %5 = vector.load %arg4[%c0_4, %c0_5] : memref<384x128xbf16, #tpu.memory_space<vmem>>, vector<384x128xbf16>
    %cst = arith.constant dense<0.000000e+00> : vector<128x128xf32>
    %6 = tpu.matmul %4, %5, %cst {dimension_numbers = #tpu.dot_dimension_numbers<[1], [0], [0], [1], [0, 0, 1, 1], [], []>} : vector<128x384xbf16>, vector<384x128xbf16>, vector<128x128xf32> -> vector<128x128xf32>
    %7 = arith.addf %3, %6 : vector<128x128xf32>
    %c0_6 = arith.constant 0 : index
    %c0_7 = arith.constant 0 : index
    %8 = vector.load %arg7[%c0_6, %c0_7] : memref<128x128xf32, #tpu.memory_space<vmem>>, vector<128x128xf32>
    tpu.vector_store %arg7[%c0_6, %c0_7], %7 {strides = array<i32>} : memref<128x128xf32, #tpu.memory_space<vmem>>, vector<128x128xf32>,
    %c2_i32 = arith.constant 2 : i32
    %9 = arith.cmpi eq, %arg2, %c2_i32 : i32
    %10 = arith.extui %9 : i1 to i32
    %c0_i32_8 = arith.constant 0 : i32
    %11 = arith.cmpi ne, %10, %c0_i32_8 : i32
    scf.if %11 {
      %c0_9 = arith.constant 0 : index
      %c0_10 = arith.constant 0 : index
      %12 = vector.load %arg7[%c0_9, %c0_10] : memref<128x128xf32, #tpu.memory_space<vmem>>, vector<128x128xf32>
      %c0_11 = arith.constant 0 : index
      %c0_12 = arith.constant 0 : index
      %13 = vector.load %arg5[%c0_11, %c0_12] : memref<1x128xf32, #tpu.memory_space<vmem>>, vector<1x128xf32>
      %14 = vector.broadcast %13 : vector<1x128xf32> to vector<128x128xf32>
      %15 = arith.addf %12, %14 : vector<128x128xf32>
      %cst_13 = arith.constant 5.000000e-01 : f32
      %16 = vector.broadcast %cst_13 : f32 to vector<128x128xf32>
      %17 = arith.mulf %16, %15 : vector<128x128xf32>
      %18 = math.tanh %17 : vector<128x128xf32>
      %cst_14 = arith.constant 5.000000e-01 : f32
      %19 = vector.broadcast %cst_14 : f32 to vector<128x128xf32>
      %20 = arith.mulf %19, %18 : vector<128x128xf32>
      %cst_15 = arith.constant 5.000000e-01 : f32
      %21 = vector.broadcast %cst_15 : f32 to vector<128x128xf32>
      %22 = arith.addf %20, %21 : vector<128x128xf32>
      %23 = arith.mulf %15, %22 : vector<128x128xf32>
      %24 = arith.truncf %23 : vector<128x128xf32> to vector<128x128xbf16>
      %c0_16 = arith.constant 0 : index
      %c0_17 = arith.constant 0 : index
      %25 = vector.load %arg6[%c0_16, %c0_17] : memref<128x128xbf16, #tpu.memory_space<vmem>>, vector<128x128xbf16>
      tpu.vector_store %arg6[%c0_16, %c0_17], %24 {strides = array<i32>} : memref<128x128xbf16, #tpu.memory_space<vmem>>, vector<128x128xbf16>,
    } else {
    }
    return
  }
  func.func @transform_0(%arg0: i32, %arg1: i32, %arg2: i32) -> (i32, i32) {
    %c0_i32 = arith.constant 0 : i32
    return %arg0, %arg2 : i32, i32
  }
  func.func @transform_1(%arg0: i32, %arg1: i32, %arg2: i32) -> (i32, i32) {
    %c0_i32 = arith.constant 0 : i32
    return %arg2, %arg1 : i32, i32
  }
  func.func @transform_2(%arg0: i32, %arg1: i32, %arg2: i32) -> (i32, i32) {
    %c0_i32 = arith.constant 0 : i32
    %c0_i32_0 = arith.constant 0 : i32
    return %c0_i32, %arg1 : i32, i32
  }
  func.func @transform_3(%arg0: i32, %arg1: i32, %arg2: i32) -> (i32, i32) {
    %c0_i32 = arith.constant 0 : i32
    return %arg0, %arg1 : i32, i32
  }
}

module attributes {stable_mosaic.version = 11 : i64} {
  func.func @_mm_kernel(%arg0: i32, %arg1: i32, %arg2: i32, %arg3: memref<128x128xbf16, #tpu.memory_space<vmem>>, %arg4: memref<128x128xbf16, #tpu.memory_space<vmem>>, %arg5: memref<1x128xf32, #tpu.memory_space<vmem>>, %arg6: memref<128x128xbf16, #tpu.memory_space<vmem>>, %arg7: memref<128x128xf32, #tpu.memory_space<vmem>>) attributes {dimension_semantics = [#tpu.dimension_semantics<parallel>, #tpu.dimension_semantics<parallel>, #tpu.dimension_semantics<arbitrary>], iteration_bounds = array<i64: 2, 1, 1>, scalar_prefetch = 0 : i64, scratch_operands = 1 : i64, tpu.core_type = #tpu.core_type<tc>, window_params = [{transform_indices = @transform_0, window_bounds = array<i64: 128, 128>}, {transform_indices = @transform_1, window_bounds = array<i64: 128, 128>}, {transform_indices = @transform_2, window_bounds = array<i64: 1, 128>}, {transform_indices = @transform_3, window_bounds = array<i64: 128, 128>}]} {
    %c0_i32 = arith.constant 0 : i32
    %0 = arith.cmpi eq, %arg2, %c0_i32 : i32
    %1 = arith.extui %0 : i1 to i32
    %c0_i32_0 = arith.constant 0 : i32
    %2 = arith.cmpi ne, %1, %c0_i32_0 : i32
    scf.if %2 {
      %cst_10 = arith.constant 0.000000e+00 : f32
      %12 = vector.broadcast %cst_10 : f32 to vector<128x128xf32>
      %c0_11 = arith.constant 0 : index
      %c0_12 = arith.constant 0 : index
      %13 = vector.load %arg7[%c0_11, %c0_12] : memref<128x128xf32, #tpu.memory_space<vmem>>, vector<128x128xf32>
      tpu.vector_store %arg7[%c0_11, %c0_12], %12 {strides = array<i32>} : memref<128x128xf32, #tpu.memory_space<vmem>>, vector<128x128xf32>,
    } else {
    }
    %c0 = arith.constant 0 : index
    %c0_1 = arith.constant 0 : index
    %3 = vector.load %arg7[%c0, %c0_1] : memref<128x128xf32, #tpu.memory_space<vmem>>, vector<128x128xf32>
    %c0_2 = arith.constant 0 : index
    %c0_3 = arith.constant 0 : index
    %4 = vector.load %arg3[%c0_2, %c0_3] : memref<128x128xbf16, #tpu.memory_space<vmem>>, vector<128x128xbf16>
    %c0_4 = arith.constant 0 : index
    %c0_5 = arith.constant 0 : index
    %5 = vector.load %arg4[%c0_4, %c0_5] : memref<128x128xbf16, #tpu.memory_space<vmem>>, vector<128x128xbf16>
    %cst = arith.constant dense<0.000000e+00> : vector<128x128xf32>
    %6 = tpu.matmul %4, %5, %cst {dimension_numbers = #tpu.dot_dimension_numbers<[1], [0], [0], [1], [0, 0, 1, 1], [], []>} : vector<128x128xbf16>, vector<128x128xbf16>, vector<128x128xf32> -> vector<128x128xf32>
    %7 = arith.addf %3, %6 : vector<128x128xf32>
    %c0_6 = arith.constant 0 : index
    %c0_7 = arith.constant 0 : index
    %8 = vector.load %arg7[%c0_6, %c0_7] : memref<128x128xf32, #tpu.memory_space<vmem>>, vector<128x128xf32>
    tpu.vector_store %arg7[%c0_6, %c0_7], %7 {strides = array<i32>} : memref<128x128xf32, #tpu.memory_space<vmem>>, vector<128x128xf32>,
    %c0_i32_8 = arith.constant 0 : i32
    %9 = arith.cmpi eq, %arg2, %c0_i32_8 : i32
    %10 = arith.extui %9 : i1 to i32
    %c0_i32_9 = arith.constant 0 : i32
    %11 = arith.cmpi ne, %10, %c0_i32_9 : i32
    scf.if %11 {
      %c0_10 = arith.constant 0 : index
      %c0_11 = arith.constant 0 : index
      %12 = vector.load %arg7[%c0_10, %c0_11] : memref<128x128xf32, #tpu.memory_space<vmem>>, vector<128x128xf32>
      %c0_12 = arith.constant 0 : index
      %c0_13 = arith.constant 0 : index
      %13 = vector.load %arg5[%c0_12, %c0_13] : memref<1x128xf32, #tpu.memory_space<vmem>>, vector<1x128xf32>
      %14 = vector.broadcast %13 : vector<1x128xf32> to vector<128x128xf32>
      %15 = arith.addf %12, %14 : vector<128x128xf32>
      %16 = arith.truncf %15 : vector<128x128xf32> to vector<128x128xbf16>
      %c0_14 = arith.constant 0 : index
      %c0_15 = arith.constant 0 : index
      %17 = vector.load %arg6[%c0_14, %c0_15] : memref<128x128xbf16, #tpu.memory_space<vmem>>, vector<128x128xbf16>
      tpu.vector_store %arg6[%c0_14, %c0_15], %16 {strides = array<i32>} : memref<128x128xbf16, #tpu.memory_space<vmem>>, vector<128x128xbf16>,
    } else {
    }
    return
  }
  func.func @transform_0(%arg0: i32, %arg1: i32, %arg2: i32) -> (i32, i32) {
    %c0_i32 = arith.constant 0 : i32
    return %arg0, %arg2 : i32, i32
  }
  func.func @transform_1(%arg0: i32, %arg1: i32, %arg2: i32) -> (i32, i32) {
    %c0_i32 = arith.constant 0 : i32
    return %arg2, %arg1 : i32, i32
  }
  func.func @transform_2(%arg0: i32, %arg1: i32, %arg2: i32) -> (i32, i32) {
    %c0_i32 = arith.constant 0 : i32
    %c0_i32_0 = arith.constant 0 : i32
    return %c0_i32, %arg1 : i32, i32
  }
  func.func @transform_3(%arg0: i32, %arg1: i32, %arg2: i32) -> (i32, i32) {
    %c0_i32 = arith.constant 0 : i32
    return %arg0, %arg1 : i32, i32
  }
}

module attributes {stable_mosaic.version = 11 : i64} {
  func.func @_xadd_kernel(%arg0: i32, %arg1: i32, %arg2: memref<1x64x128xbf16, #tpu.memory_space<vmem>>, %arg3: memref<1x64x128xbf16, #tpu.memory_space<vmem>>, %arg4: memref<1x64x128xbf16, #tpu.memory_space<vmem>>) attributes {dimension_semantics = [#tpu.dimension_semantics<parallel>, #tpu.dimension_semantics<parallel>], iteration_bounds = array<i64: 2, 2>, scalar_prefetch = 0 : i64, scratch_operands = 0 : i64, tpu.core_type = #tpu.core_type<tc>, window_params = [{transform_indices = @transform_0, window_bounds = array<i64: 1, 64, 128>}, {transform_indices = @transform_1, window_bounds = array<i64: 1, 64, 128>}, {transform_indices = @transform_2, window_bounds = array<i64: 1, 64, 128>}]} {
    %c0 = arith.constant 0 : index
    %c0_0 = arith.constant 0 : index
    %c0_1 = arith.constant 0 : index
    %0 = vector.load %arg2[%c0, %c0_0, %c0_1] : memref<1x64x128xbf16, #tpu.memory_space<vmem>>, vector<1x64x128xbf16>
    %1 = arith.extf %0 : vector<1x64x128xbf16> to vector<1x64x128xf32>
    %c0_2 = arith.constant 0 : index
    %c0_3 = arith.constant 0 : index
    %c0_4 = arith.constant 0 : index
    %2 = vector.load %arg3[%c0_2, %c0_3, %c0_4] : memref<1x64x128xbf16, #tpu.memory_space<vmem>>, vector<1x64x128xbf16>
    %3 = arith.extf %2 : vector<1x64x128xbf16> to vector<1x64x128xf32>
    %4 = arith.addf %1, %3 : vector<1x64x128xf32>
    %5 = arith.truncf %4 : vector<1x64x128xf32> to vector<1x64x128xbf16>
    %c0_5 = arith.constant 0 : index
    %c0_6 = arith.constant 0 : index
    %c0_7 = arith.constant 0 : index
    %6 = vector.load %arg4[%c0_5, %c0_6, %c0_7] : memref<1x64x128xbf16, #tpu.memory_space<vmem>>, vector<1x64x128xbf16>
    tpu.vector_store %arg4[%c0_5, %c0_6, %c0_7], %5 {strides = array<i32>} : memref<1x64x128xbf16, #tpu.memory_space<vmem>>, vector<1x64x128xbf16>,
    return
  }
  func.func @transform_0(%arg0: i32, %arg1: i32) -> (i32, i32, i32) {
    %c0_i32 = arith.constant 0 : i32
    %c0_i32_0 = arith.constant 0 : i32
    return %arg0, %arg1, %c0_i32 : i32, i32, i32
  }
  func.func @transform_1(%arg0: i32, %arg1: i32) -> (i32, i32, i32) {
    %c1_i32 = arith.constant 1 : i32
    %0 = arith.subi %c1_i32, %arg0 : i32
    %c0_i32 = arith.constant 0 : i32
    %c0_i32_0 = arith.constant 0 : i32
    return %0, %arg1, %c0_i32 : i32, i32, i32
  }
  func.func @transform_2(%arg0: i32, %arg1: i32) -> (i32, i32, i32) {
    %c0_i32 = arith.constant 0 : i32
    %c0_i32_0 = arith.constant 0 : i32
    return %arg0, %arg1, %c0_i32 : i32, i32, i32
  }
}

module attributes {stable_mosaic.version = 11 : i64} {
  func.func @_mm_kernel(%arg0: i32, %arg1: i32, %arg2: i32, %arg3: memref<32x128xbf16, #tpu.memory_space<vmem>>, %arg4: memref<128x128xbf16, #tpu.memory_space<vmem>>, %arg5: memref<1x128xf32, #tpu.memory_space<vmem>>, %arg6: memref<32x128xbf16, #tpu.memory_space<vmem>>, %arg7: memref<32x128xf32, #tpu.memory_space<vmem>>) attributes {dimension_semantics = [#tpu.dimension_semantics<parallel>, #tpu.dimension_semantics<parallel>, #tpu.dimension_semantics<arbitrary>], iteration_bounds = array<i64: 2, 1, 1>, scalar_prefetch = 0 : i64, scratch_operands = 1 : i64, tpu.core_type = #tpu.core_type<tc>, window_params = [{transform_indices = @transform_0, window_bounds = array<i64: 32, 128>}, {transform_indices = @transform_1, window_bounds = array<i64: 128, 128>}, {transform_indices = @transform_2, window_bounds = array<i64: 1, 128>}, {transform_indices = @transform_3, window_bounds = array<i64: 32, 128>}]} {
    %c0_i32 = arith.constant 0 : i32
    %0 = arith.cmpi eq, %arg2, %c0_i32 : i32
    %1 = arith.extui %0 : i1 to i32
    %c0_i32_0 = arith.constant 0 : i32
    %2 = arith.cmpi ne, %1, %c0_i32_0 : i32
    scf.if %2 {
      %cst_10 = arith.constant 0.000000e+00 : f32
      %12 = vector.broadcast %cst_10 : f32 to vector<32x128xf32>
      %c0_11 = arith.constant 0 : index
      %c0_12 = arith.constant 0 : index
      %13 = vector.load %arg7[%c0_11, %c0_12] : memref<32x128xf32, #tpu.memory_space<vmem>>, vector<32x128xf32>
      tpu.vector_store %arg7[%c0_11, %c0_12], %12 {strides = array<i32>} : memref<32x128xf32, #tpu.memory_space<vmem>>, vector<32x128xf32>,
    } else {
    }
    %c0 = arith.constant 0 : index
    %c0_1 = arith.constant 0 : index
    %3 = vector.load %arg7[%c0, %c0_1] : memref<32x128xf32, #tpu.memory_space<vmem>>, vector<32x128xf32>
    %c0_2 = arith.constant 0 : index
    %c0_3 = arith.constant 0 : index
    %4 = vector.load %arg3[%c0_2, %c0_3] : memref<32x128xbf16, #tpu.memory_space<vmem>>, vector<32x128xbf16>
    %c0_4 = arith.constant 0 : index
    %c0_5 = arith.constant 0 : index
    %5 = vector.load %arg4[%c0_4, %c0_5] : memref<128x128xbf16, #tpu.memory_space<vmem>>, vector<128x128xbf16>
    %cst = arith.constant dense<0.000000e+00> : vector<32x128xf32>
    %6 = tpu.matmul %4, %5, %cst {dimension_numbers = #tpu.dot_dimension_numbers<[1], [0], [0], [1], [0, 0, 1, 1], [], []>} : vector<32x128xbf16>, vector<128x128xbf16>, vector<32x128xf32> -> vector<32x128xf32>
    %7 = arith.addf %3, %6 : vector<32x128xf32>
    %c0_6 = arith.constant 0 : index
    %c0_7 = arith.constant 0 : index
    %8 = vector.load %arg7[%c0_6, %c0_7] : memref<32x128xf32, #tpu.memory_space<vmem>>, vector<32x128xf32>
    tpu.vector_store %arg7[%c0_6, %c0_7], %7 {strides = array<i32>} : memref<32x128xf32, #tpu.memory_space<vmem>>, vector<32x128xf32>,
    %c0_i32_8 = arith.constant 0 : i32
    %9 = arith.cmpi eq, %arg2, %c0_i32_8 : i32
    %10 = arith.extui %9 : i1 to i32
    %c0_i32_9 = arith.constant 0 : i32
    %11 = arith.cmpi ne, %10, %c0_i32_9 : i32
    scf.if %11 {
      %c0_10 = arith.constant 0 : index
      %c0_11 = arith.constant 0 : index
      %12 = vector.load %arg7[%c0_10, %c0_11] : memref<32x128xf32, #tpu.memory_space<vmem>>, vector<32x128xf32>
      %c0_12 = arith.constant 0 : index
      %c0_13 = arith.constant 0 : index
      %13 = vector.load %arg5[%c0_12, %c0_13] : memref<1x128xf32, #tpu.memory_space<vmem>>, vector<1x128xf32>
      %14 = vector.broadcast %13 : vector<1x128xf32> to vector<32x128xf32>
      %15 = arith.addf %12, %14 : vector<32x128xf32>
      %16 = arith.truncf %15 : vector<32x128xf32> to vector<32x128xbf16>
      %c0_14 = arith.constant 0 : index
      %c0_15 = arith.constant 0 : index
      %17 = vector.load %arg6[%c0_14, %c0_15] : memref<32x128xbf16, #tpu.memory_space<vmem>>, vector<32x128xbf16>
      tpu.vector_store %arg6[%c0_14, %c0_15], %16 {strides = array<i32>} : memref<32x128xbf16, #tpu.memory_space<vmem>>, vector<32x128xbf16>,
    } else {
    }
    return
  }
  func.func @transform_0(%arg0: i32, %arg1: i32, %arg2: i32) -> (i32, i32) {
    %c0_i32 = arith.constant 0 : i32
    return %arg0, %arg2 : i32, i32
  }
  func.func @transform_1(%arg0: i32, %arg1: i32, %arg2: i32) -> (i32, i32) {
    %c0_i32 = arith.constant 0 : i32
    return %arg2, %arg1 : i32, i32
  }
  func.func @transform_2(%arg0: i32, %arg1: i32, %arg2: i32) -> (i32, i32) {
    %c0_i32 = arith.constant 0 : i32
    %c0_i32_0 = arith.constant 0 : i32
    return %c0_i32, %arg1 : i32, i32
  }
  func.func @transform_3(%arg0: i32, %arg1: i32, %arg2: i32) -> (i32, i32) {
    %c0_i32 = arith.constant 0 : i32
    return %arg0, %arg1 : i32, i32
  }
}

module attributes {stable_mosaic.version = 11 : i64} {
  func.func @_xadd_kernel(%arg0: i32, %arg1: i32, %arg2: memref<1x16x128xbf16, #tpu.memory_space<vmem>>, %arg3: memref<1x16x128xbf16, #tpu.memory_space<vmem>>, %arg4: memref<1x16x128xbf16, #tpu.memory_space<vmem>>) attributes {dimension_semantics = [#tpu.dimension_semantics<parallel>, #tpu.dimension_semantics<parallel>], iteration_bounds = array<i64: 2, 2>, scalar_prefetch = 0 : i64, scratch_operands = 0 : i64, tpu.core_type = #tpu.core_type<tc>, window_params = [{transform_indices = @transform_0, window_bounds = array<i64: 1, 16, 128>}, {transform_indices = @transform_1, window_bounds = array<i64: 1, 16, 128>}, {transform_indices = @transform_2, window_bounds = array<i64: 1, 16, 128>}]} {
    %c0 = arith.constant 0 : index
    %c0_0 = arith.constant 0 : index
    %c0_1 = arith.constant 0 : index
    %0 = vector.load %arg2[%c0, %c0_0, %c0_1] : memref<1x16x128xbf16, #tpu.memory_space<vmem>>, vector<1x16x128xbf16>
    %1 = arith.extf %0 : vector<1x16x128xbf16> to vector<1x16x128xf32>
    %c0_2 = arith.constant 0 : index
    %c0_3 = arith.constant 0 : index
    %c0_4 = arith.constant 0 : index
    %2 = vector.load %arg3[%c0_2, %c0_3, %c0_4] : memref<1x16x128xbf16, #tpu.memory_space<vmem>>, vector<1x16x128xbf16>
    %3 = arith.extf %2 : vector<1x16x128xbf16> to vector<1x16x128xf32>
    %4 = arith.addf %1, %3 : vector<1x16x128xf32>
    %5 = arith.truncf %4 : vector<1x16x128xf32> to vector<1x16x128xbf16>
    %c0_5 = arith.constant 0 : index
    %c0_6 = arith.constant 0 : index
    %c0_7 = arith.constant 0 : index
    %6 = vector.load %arg4[%c0_5, %c0_6, %c0_7] : memref<1x16x128xbf16, #tpu.memory_space<vmem>>, vector<1x16x128xbf16>
    tpu.vector_store %arg4[%c0_5, %c0_6, %c0_7], %5 {strides = array<i32>} : memref<1x16x128xbf16, #tpu.memory_space<vmem>>, vector<1x16x128xbf16>,
    return
  }
  func.func @transform_0(%arg0: i32, %arg1: i32) -> (i32, i32, i32) {
    %c0_i32 = arith.constant 0 : i32
    %c0_i32_0 = arith.constant 0 : i32
    return %arg0, %arg1, %c0_i32 : i32, i32, i32
  }
  func.func @transform_1(%arg0: i32, %arg1: i32) -> (i32, i32, i32) {
    %c1_i32 = arith.constant 1 : i32
    %0 = arith.subi %c1_i32, %arg0 : i32
    %c0_i32 = arith.constant 0 : i32
    %c0_i32_0 = arith.constant 0 : i32
    return %0, %arg1, %c0_i32 : i32, i32, i32
  }
  func.func @transform_2(%arg0: i32, %arg1: i32) -> (i32, i32, i32) {
    %c0_i32 = arith.constant 0 : i32
    %c0_i32_0 = arith.constant 0 : i32
    return %arg0, %arg1, %c0_i32 : i32, i32, i32
  }
}

module attributes {stable_mosaic.version = 11 : i64} {
  func.func @_mm_kernel(%arg0: i32, %arg1: i32, %arg2: i32, %arg3: memref<32x384xbf16, #tpu.memory_space<vmem>>, %arg4: memref<384x128xbf16, #tpu.memory_space<vmem>>, %arg5: memref<1x128xf32, #tpu.memory_space<vmem>>, %arg6: memref<32x128xbf16, #tpu.memory_space<vmem>>, %arg7: memref<32x128xf32, #tpu.memory_space<vmem>>) attributes {dimension_semantics = [#tpu.dimension_semantics<parallel>, #tpu.dimension_semantics<parallel>, #tpu.dimension_semantics<arbitrary>], iteration_bounds = array<i64: 2, 1, 3>, scalar_prefetch = 0 : i64, scratch_operands = 1 : i64, tpu.core_type = #tpu.core_type<tc>, window_params = [{transform_indices = @transform_0, window_bounds = array<i64: 32, 384>}, {transform_indices = @transform_1, window_bounds = array<i64: 384, 128>}, {transform_indices = @transform_2, window_bounds = array<i64: 1, 128>}, {transform_indices = @transform_3, window_bounds = array<i64: 32, 128>}]} {
    %c0_i32 = arith.constant 0 : i32
    %0 = arith.cmpi eq, %arg2, %c0_i32 : i32
    %1 = arith.extui %0 : i1 to i32
    %c0_i32_0 = arith.constant 0 : i32
    %2 = arith.cmpi ne, %1, %c0_i32_0 : i32
    scf.if %2 {
      %cst_9 = arith.constant 0.000000e+00 : f32
      %12 = vector.broadcast %cst_9 : f32 to vector<32x128xf32>
      %c0_10 = arith.constant 0 : index
      %c0_11 = arith.constant 0 : index
      %13 = vector.load %arg7[%c0_10, %c0_11] : memref<32x128xf32, #tpu.memory_space<vmem>>, vector<32x128xf32>
      tpu.vector_store %arg7[%c0_10, %c0_11], %12 {strides = array<i32>} : memref<32x128xf32, #tpu.memory_space<vmem>>, vector<32x128xf32>,
    } else {
    }
    %c0 = arith.constant 0 : index
    %c0_1 = arith.constant 0 : index
    %3 = vector.load %arg7[%c0, %c0_1] : memref<32x128xf32, #tpu.memory_space<vmem>>, vector<32x128xf32>
    %c0_2 = arith.constant 0 : index
    %c0_3 = arith.constant 0 : index
    %4 = vector.load %arg3[%c0_2, %c0_3] : memref<32x384xbf16, #tpu.memory_space<vmem>>, vector<32x384xbf16>
    %c0_4 = arith.constant 0 : index
    %c0_5 = arith.constant 0 : index
    %5 = vector.load %arg4[%c0_4, %c0_5] : memref<384x128xbf16, #tpu.memory_space<vmem>>, vector<384x128xbf16>
    %cst = arith.constant dense<0.000000e+00> : vector<32x128xf32>
    %6 = tpu.matmul %4, %5, %cst {dimension_numbers = #tpu.dot_dimension_numbers<[1], [0], [0], [1], [0, 0, 1, 1], [], []>} : vector<32x384xbf16>, vector<384x128xbf16>, vector<32x128xf32> -> vector<32x128xf32>
    %7 = arith.addf %3, %6 : vector<32x128xf32>
    %c0_6 = arith.constant 0 : index
    %c0_7 = arith.constant 0 : index
    %8 = vector.load %arg7[%c0_6, %c0_7] : memref<32x128xf32, #tpu.memory_space<vmem>>, vector<32x128xf32>
    tpu.vector_store %arg7[%c0_6, %c0_7], %7 {strides = array<i32>} : memref<32x128xf32, #tpu.memory_space<vmem>>, vector<32x128xf32>,
    %c2_i32 = arith.constant 2 : i32
    %9 = arith.cmpi eq, %arg2, %c2_i32 : i32
    %10 = arith.extui %9 : i1 to i32
    %c0_i32_8 = arith.constant 0 : i32
    %11 = arith.cmpi ne, %10, %c0_i32_8 : i32
    scf.if %11 {
      %c0_9 = arith.constant 0 : index
      %c0_10 = arith.constant 0 : index
      %12 = vector.load %arg7[%c0_9, %c0_10] : memref<32x128xf32, #tpu.memory_space<vmem>>, vector<32x128xf32>
      %c0_11 = arith.constant 0 : index
      %c0_12 = arith.constant 0 : index
      %13 = vector.load %arg5[%c0_11, %c0_12] : memref<1x128xf32, #tpu.memory_space<vmem>>, vector<1x128xf32>
      %14 = vector.broadcast %13 : vector<1x128xf32> to vector<32x128xf32>
      %15 = arith.addf %12, %14 : vector<32x128xf32>
      %cst_13 = arith.constant 5.000000e-01 : f32
      %16 = vector.broadcast %cst_13 : f32 to vector<32x128xf32>
      %17 = arith.mulf %16, %15 : vector<32x128xf32>
      %18 = math.tanh %17 : vector<32x128xf32>
      %cst_14 = arith.constant 5.000000e-01 : f32
      %19 = vector.broadcast %cst_14 : f32 to vector<32x128xf32>
      %20 = arith.mulf %19, %18 : vector<32x128xf32>
      %cst_15 = arith.constant 5.000000e-01 : f32
      %21 = vector.broadcast %cst_15 : f32 to vector<32x128xf32>
      %22 = arith.addf %20, %21 : vector<32x128xf32>
      %23 = arith.mulf %15, %22 : vector<32x128xf32>
      %24 = arith.truncf %23 : vector<32x128xf32> to vector<32x128xbf16>
      %c0_16 = arith.constant 0 : index
      %c0_17 = arith.constant 0 : index
      %25 = vector.load %arg6[%c0_16, %c0_17] : memref<32x128xbf16, #tpu.memory_space<vmem>>, vector<32x128xbf16>
      tpu.vector_store %arg6[%c0_16, %c0_17], %24 {strides = array<i32>} : memref<32x128xbf16, #tpu.memory_space<vmem>>, vector<32x128xbf16>,
    } else {
    }
    return
  }
  func.func @transform_0(%arg0: i32, %arg1: i32, %arg2: i32) -> (i32, i32) {
    %c0_i32 = arith.constant 0 : i32
    return %arg0, %arg2 : i32, i32
  }
  func.func @transform_1(%arg0: i32, %arg1: i32, %arg2: i32) -> (i32, i32) {
    %c0_i32 = arith.constant 0 : i32
    return %arg2, %arg1 : i32, i32
  }
  func.func @transform_2(%arg0: i32, %arg1: i32, %arg2: i32) -> (i32, i32) {
    %c0_i32 = arith.constant 0 : i32
    %c0_i32_0 = arith.constant 0 : i32
    return %c0_i32, %arg1 : i32, i32
  }
  func.func @transform_3(%arg0: i32, %arg1: i32, %arg2: i32) -> (i32, i32) {
    %c0_i32 = arith.constant 0 : i32
    return %arg0, %arg1 : i32, i32
  }
}

module attributes {stable_mosaic.version = 11 : i64} {
  func.func @_mm_kernel(%arg0: i32, %arg1: i32, %arg2: i32, %arg3: memref<32x128xbf16, #tpu.memory_space<vmem>>, %arg4: memref<128x128xbf16, #tpu.memory_space<vmem>>, %arg5: memref<1x128xf32, #tpu.memory_space<vmem>>, %arg6: memref<32x128xbf16, #tpu.memory_space<vmem>>, %arg7: memref<32x128xf32, #tpu.memory_space<vmem>>) attributes {dimension_semantics = [#tpu.dimension_semantics<parallel>, #tpu.dimension_semantics<parallel>, #tpu.dimension_semantics<arbitrary>], iteration_bounds = array<i64: 2, 1, 1>, scalar_prefetch = 0 : i64, scratch_operands = 1 : i64, tpu.core_type = #tpu.core_type<tc>, window_params = [{transform_indices = @transform_0, window_bounds = array<i64: 32, 128>}, {transform_indices = @transform_1, window_bounds = array<i64: 128, 128>}, {transform_indices = @transform_2, window_bounds = array<i64: 1, 128>}, {transform_indices = @transform_3, window_bounds = array<i64: 32, 128>}]} {
    %c0_i32 = arith.constant 0 : i32
    %0 = arith.cmpi eq, %arg2, %c0_i32 : i32
    %1 = arith.extui %0 : i1 to i32
    %c0_i32_0 = arith.constant 0 : i32
    %2 = arith.cmpi ne, %1, %c0_i32_0 : i32
    scf.if %2 {
      %cst_10 = arith.constant 0.000000e+00 : f32
      %12 = vector.broadcast %cst_10 : f32 to vector<32x128xf32>
      %c0_11 = arith.constant 0 : index
      %c0_12 = arith.constant 0 : index
      %13 = vector.load %arg7[%c0_11, %c0_12] : memref<32x128xf32, #tpu.memory_space<vmem>>, vector<32x128xf32>
      tpu.vector_store %arg7[%c0_11, %c0_12], %12 {strides = array<i32>} : memref<32x128xf32, #tpu.memory_space<vmem>>, vector<32x128xf32>,
    } else {
    }
    %c0 = arith.constant 0 : index
    %c0_1 = arith.constant 0 : index
    %3 = vector.load %arg7[%c0, %c0_1] : memref<32x128xf32, #tpu.memory_space<vmem>>, vector<32x128xf32>
    %c0_2 = arith.constant 0 : index
    %c0_3 = arith.constant 0 : index
    %4 = vector.load %arg3[%c0_2, %c0_3] : memref<32x128xbf16, #tpu.memory_space<vmem>>, vector<32x128xbf16>
    %c0_4 = arith.constant 0 : index
    %c0_5 = arith.constant 0 : index
    %5 = vector.load %arg4[%c0_4, %c0_5] : memref<128x128xbf16, #tpu.memory_space<vmem>>, vector<128x128xbf16>
    %cst = arith.constant dense<0.000000e+00> : vector<32x128xf32>
    %6 = tpu.matmul %4, %5, %cst {dimension_numbers = #tpu.dot_dimension_numbers<[1], [0], [0], [1], [0, 0, 1, 1], [], []>} : vector<32x128xbf16>, vector<128x128xbf16>, vector<32x128xf32> -> vector<32x128xf32>
    %7 = arith.addf %3, %6 : vector<32x128xf32>
    %c0_6 = arith.constant 0 : index
    %c0_7 = arith.constant 0 : index
    %8 = vector.load %arg7[%c0_6, %c0_7] : memref<32x128xf32, #tpu.memory_space<vmem>>, vector<32x128xf32>
    tpu.vector_store %arg7[%c0_6, %c0_7], %7 {strides = array<i32>} : memref<32x128xf32, #tpu.memory_space<vmem>>, vector<32x128xf32>,
    %c0_i32_8 = arith.constant 0 : i32
    %9 = arith.cmpi eq, %arg2, %c0_i32_8 : i32
    %10 = arith.extui %9 : i1 to i32
    %c0_i32_9 = arith.constant 0 : i32
    %11 = arith.cmpi ne, %10, %c0_i32_9 : i32
    scf.if %11 {
      %c0_10 = arith.constant 0 : index
      %c0_11 = arith.constant 0 : index
      %12 = vector.load %arg7[%c0_10, %c0_11] : memref<32x128xf32, #tpu.memory_space<vmem>>, vector<32x128xf32>
      %c0_12 = arith.constant 0 : index
      %c0_13 = arith.constant 0 : index
      %13 = vector.load %arg5[%c0_12, %c0_13] : memref<1x128xf32, #tpu.memory_space<vmem>>, vector<1x128xf32>
      %14 = vector.broadcast %13 : vector<1x128xf32> to vector<32x128xf32>
      %15 = arith.addf %12, %14 : vector<32x128xf32>
      %cst_14 = arith.constant 5.000000e-01 : f32
      %16 = vector.broadcast %cst_14 : f32 to vector<32x128xf32>
      %17 = arith.mulf %16, %15 : vector<32x128xf32>
      %18 = math.tanh %17 : vector<32x128xf32>
      %cst_15 = arith.constant 5.000000e-01 : f32
      %19 = vector.broadcast %cst_15 : f32 to vector<32x128xf32>
      %20 = arith.mulf %19, %18 : vector<32x128xf32>
      %cst_16 = arith.constant 5.000000e-01 : f32
      %21 = vector.broadcast %cst_16 : f32 to vector<32x128xf32>
      %22 = arith.addf %20, %21 : vector<32x128xf32>
      %23 = arith.mulf %15, %22 : vector<32x128xf32>
      %24 = arith.truncf %23 : vector<32x128xf32> to vector<32x128xbf16>
      %c0_17 = arith.constant 0 : index
      %c0_18 = arith.constant 0 : index
      %25 = vector.load %arg6[%c0_17, %c0_18] : memref<32x128xbf16, #tpu.memory_space<vmem>>, vector<32x128xbf16>
      tpu.vector_store %arg6[%c0_17, %c0_18], %24 {strides = array<i32>} : memref<32x128xbf16, #tpu.memory_space<vmem>>, vector<32x128xbf16>,
    } else {
    }
    return
  }
  func.func @transform_0(%arg0: i32, %arg1: i32, %arg2: i32) -> (i32, i32) {
    %c0_i32 = arith.constant 0 : i32
    return %arg0, %arg2 : i32, i32
  }
  func.func @transform_1(%arg0: i32, %arg1: i32, %arg2: i32) -> (i32, i32) {
    %c0_i32 = arith.constant 0 : i32
    return %arg2, %arg1 : i32, i32
  }
  func.func @transform_2(%arg0: i32, %arg1: i32, %arg2: i32) -> (i32, i32) {
    %c0_i32 = arith.constant 0 : i32
    %c0_i32_0 = arith.constant 0 : i32
    return %c0_i32, %arg1 : i32, i32
  }
  func.func @transform_3(%arg0: i32, %arg1: i32, %arg2: i32) -> (i32, i32) {
    %c0_i32 = arith.constant 0 : i32
    return %arg0, %arg1 : i32, i32
  }
}

module attributes {stable_mosaic.version = 11 : i64} {
  func.func @_xadd_kernel(%arg0: i32, %arg1: i32, %arg2: memref<1x8x128xbf16, #tpu.memory_space<vmem>>, %arg3: memref<1x8x128xbf16, #tpu.memory_space<vmem>>, %arg4: memref<1x8x128xbf16, #tpu.memory_space<vmem>>) attributes {dimension_semantics = [#tpu.dimension_semantics<parallel>, #tpu.dimension_semantics<parallel>], iteration_bounds = array<i64: 2, 1>, scalar_prefetch = 0 : i64, scratch_operands = 0 : i64, tpu.core_type = #tpu.core_type<tc>, window_params = [{transform_indices = @transform_0, window_bounds = array<i64: 1, 8, 128>}, {transform_indices = @transform_1, window_bounds = array<i64: 1, 8, 128>}, {transform_indices = @transform_2, window_bounds = array<i64: 1, 8, 128>}]} {
    %c0 = arith.constant 0 : index
    %c0_0 = arith.constant 0 : index
    %c0_1 = arith.constant 0 : index
    %0 = vector.load %arg2[%c0, %c0_0, %c0_1] : memref<1x8x128xbf16, #tpu.memory_space<vmem>>, vector<1x8x128xbf16>
    %1 = arith.extf %0 : vector<1x8x128xbf16> to vector<1x8x128xf32>
    %c0_2 = arith.constant 0 : index
    %c0_3 = arith.constant 0 : index
    %c0_4 = arith.constant 0 : index
    %2 = vector.load %arg3[%c0_2, %c0_3, %c0_4] : memref<1x8x128xbf16, #tpu.memory_space<vmem>>, vector<1x8x128xbf16>
    %3 = arith.extf %2 : vector<1x8x128xbf16> to vector<1x8x128xf32>
    %4 = arith.addf %1, %3 : vector<1x8x128xf32>
    %5 = arith.truncf %4 : vector<1x8x128xf32> to vector<1x8x128xbf16>
    %c0_5 = arith.constant 0 : index
    %c0_6 = arith.constant 0 : index
    %c0_7 = arith.constant 0 : index
    %6 = vector.load %arg4[%c0_5, %c0_6, %c0_7] : memref<1x8x128xbf16, #tpu.memory_space<vmem>>, vector<1x8x128xbf16>
    tpu.vector_store %arg4[%c0_5, %c0_6, %c0_7], %5 {strides = array<i32>} : memref<1x8x128xbf16, #tpu.memory_space<vmem>>, vector<1x8x128xbf16>,
    return
  }
  func.func @transform_0(%arg0: i32, %arg1: i32) -> (i32, i32, i32) {
    %c0_i32 = arith.constant 0 : i32
    %c0_i32_0 = arith.constant 0 : i32
    return %arg0, %arg1, %c0_i32 : i32, i32, i32
  }
  func.func @transform_1(%arg0: i32, %arg1: i32) -> (i32, i32, i32) {
    %c1_i32 = arith.constant 1 : i32
    %0 = arith.subi %c1_i32, %arg0 : i32
    %c0_i32 = arith.constant 0 : i32
    %c0_i32_0 = arith.constant 0 : i32
    return %0, %arg1, %c0_i32 : i32, i32, i32
  }
  func.func @transform_2(%arg0: i32, %arg1: i32) -> (i32, i32, i32) {
    %c0_i32 = arith.constant 0 : i32
    %c0_i32_0 = arith.constant 0 : i32
    return %arg0, %arg1, %c0_i32 : i32, i32, i32
  }
}

module attributes {stable_mosaic.version = 11 : i64} {
  func.func @_dw_kernel(%arg0: i32, %arg1: memref<9x8x128xbf16, #tpu.memory_space<vmem>>, %arg2: memref<9x1x128xbf16, #tpu.memory_space<vmem>>, %arg3: memref<1x128xf32, #tpu.memory_space<vmem>>, %arg4: memref<8x128xbf16, #tpu.memory_space<vmem>>) attributes {dimension_semantics = [#tpu.dimension_semantics<parallel>], iteration_bounds = array<i64: 2>, scalar_prefetch = 0 : i64, scratch_operands = 0 : i64, tpu.core_type = #tpu.core_type<tc>, window_params = [{transform_indices = @transform_0, window_bounds = array<i64: 9, 8, 128>}, {pipeline_mode = #tpu.pipeline_mode<synchronous>, transform_indices = @transform_1, window_bounds = array<i64: 9, 1, 128>}, {pipeline_mode = #tpu.pipeline_mode<synchronous>, transform_indices = @transform_2, window_bounds = array<i64: 1, 128>}, {transform_indices = @transform_3, window_bounds = array<i64: 8, 128>}]} {
    %c0 = arith.constant 0 : index
    %c0_0 = arith.constant 0 : index
    %c0_1 = arith.constant 0 : index
    %0 = vector.load %arg1[%c0, %c0_0, %c0_1] : memref<9x8x128xbf16, #tpu.memory_space<vmem>>, vector<1x8x128xbf16>
    %1 = vector.shape_cast %0 : vector<1x8x128xbf16> to vector<8x128xbf16>
    %2 = arith.extf %1 : vector<8x128xbf16> to vector<8x128xf32>
    %c0_2 = arith.constant 0 : index
    %c0_3 = arith.constant 0 : index
    %c0_4 = arith.constant 0 : index
    %3 = vector.load %arg2[%c0_2, %c0_3, %c0_4] : memref<9x1x128xbf16, #tpu.memory_space<vmem>>, vector<1x1x128xbf16>
    %4 = vector.shape_cast %3 : vector<1x1x128xbf16> to vector<1x128xbf16>
    %5 = arith.extf %4 : vector<1x128xbf16> to vector<1x128xf32>
    %6 = vector.broadcast %5 : vector<1x128xf32> to vector<8x128xf32>
    %7 = arith.mulf %2, %6 : vector<8x128xf32>
    %c1 = arith.constant 1 : index
    %c0_5 = arith.constant 0 : index
    %c0_6 = arith.constant 0 : index
    %8 = vector.load %arg1[%c1, %c0_5, %c0_6] : memref<9x8x128xbf16, #tpu.memory_space<vmem>>, vector<1x8x128xbf16>
    %9 = vector.shape_cast %8 : vector<1x8x128xbf16> to vector<8x128xbf16>
    %10 = arith.extf %9 : vector<8x128xbf16> to vector<8x128xf32>
    %c1_7 = arith.constant 1 : index
    %c0_8 = arith.constant 0 : index
    %c0_9 = arith.constant 0 : index
    %11 = vector.load %arg2[%c1_7, %c0_8, %c0_9] : memref<9x1x128xbf16, #tpu.memory_space<vmem>>, vector<1x1x128xbf16>
    %12 = vector.shape_cast %11 : vector<1x1x128xbf16> to vector<1x128xbf16>
    %13 = arith.extf %12 : vector<1x128xbf16> to vector<1x128xf32>
    %14 = vector.broadcast %13 : vector<1x128xf32> to vector<8x128xf32>
    %15 = arith.mulf %10, %14 : vector<8x128xf32>
    %16 = arith.addf %7, %15 : vector<8x128xf32>
    %c2 = arith.constant 2 : index
    %c0_10 = arith.constant 0 : index
    %c0_11 = arith.constant 0 : index
    %17 = vector.load %arg1[%c2, %c0_10, %c0_11] : memref<9x8x128xbf16, #tpu.memory_space<vmem>>, vector<1x8x128xbf16>
    %18 = vector.shape_cast %17 : vector<1x8x128xbf16> to vector<8x128xbf16>
    %19 = arith.extf %18 : vector<8x128xbf16> to vector<8x128xf32>
    %c2_12 = arith.constant 2 : index
    %c0_13 = arith.constant 0 : index
    %c0_14 = arith.constant 0 : index
    %20 = vector.load %arg2[%c2_12, %c0_13, %c0_14] : memref<9x1x128xbf16, #tpu.memory_space<vmem>>, vector<1x1x128xbf16>
    %21 = vector.shape_cast %20 : vector<1x1x128xbf16> to vector<1x128xbf16>
    %22 = arith.extf %21 : vector<1x128xbf16> to vector<1x128xf32>
    %23 = vector.broadcast %22 : vector<1x128xf32> to vector<8x128xf32>
    %24 = arith.mulf %19, %23 : vector<8x128xf32>
    %25 = arith.addf %16, %24 : vector<8x128xf32>
    %c3 = arith.constant 3 : index
    %c0_15 = arith.constant 0 : index
    %c0_16 = arith.constant 0 : index
    %26 = vector.load %arg1[%c3, %c0_15, %c0_16] : memref<9x8x128xbf16, #tpu.memory_space<vmem>>, vector<1x8x128xbf16>
    %27 = vector.shape_cast %26 : vector<1x8x128xbf16> to vector<8x128xbf16>
    %28 = arith.extf %27 : vector<8x128xbf16> to vector<8x128xf32>
    %c3_17 = arith.constant 3 : index
    %c0_18 = arith.constant 0 : index
    %c0_19 = arith.constant 0 : index
    %29 = vector.load %arg2[%c3_17, %c0_18, %c0_19] : memref<9x1x128xbf16, #tpu.memory_space<vmem>>, vector<1x1x128xbf16>
    %30 = vector.shape_cast %29 : vector<1x1x128xbf16> to vector<1x128xbf16>
    %31 = arith.extf %30 : vector<1x128xbf16> to vector<1x128xf32>
    %32 = vector.broadcast %31 : vector<1x128xf32> to vector<8x128xf32>
    %33 = arith.mulf %28, %32 : vector<8x128xf32>
    %34 = arith.addf %25, %33 : vector<8x128xf32>
    %c4 = arith.constant 4 : index
    %c0_20 = arith.constant 0 : index
    %c0_21 = arith.constant 0 : index
    %35 = vector.load %arg1[%c4, %c0_20, %c0_21] : memref<9x8x128xbf16, #tpu.memory_space<vmem>>, vector<1x8x128xbf16>
    %36 = vector.shape_cast %35 : vector<1x8x128xbf16> to vector<8x128xbf16>
    %37 = arith.extf %36 : vector<8x128xbf16> to vector<8x128xf32>
    %c4_22 = arith.constant 4 : index
    %c0_23 = arith.constant 0 : index
    %c0_24 = arith.constant 0 : index
    %38 = vector.load %arg2[%c4_22, %c0_23, %c0_24] : memref<9x1x128xbf16, #tpu.memory_space<vmem>>, vector<1x1x128xbf16>
    %39 = vector.shape_cast %38 : vector<1x1x128xbf16> to vector<1x128xbf16>
    %40 = arith.extf %39 : vector<1x128xbf16> to vector<1x128xf32>
    %41 = vector.broadcast %40 : vector<1x128xf32> to vector<8x128xf32>
    %42 = arith.mulf %37, %41 : vector<8x128xf32>
    %43 = arith.addf %34, %42 : vector<8x128xf32>
    %c5 = arith.constant 5 : index
    %c0_25 = arith.constant 0 : index
    %c0_26 = arith.constant 0 : index
    %44 = vector.load %arg1[%c5, %c0_25, %c0_26] : memref<9x8x128xbf16, #tpu.memory_space<vmem>>, vector<1x8x128xbf16>
    %45 = vector.shape_cast %44 : vector<1x8x128xbf16> to vector<8x128xbf16>
    %46 = arith.extf %45 : vector<8x128xbf16> to vector<8x128xf32>
    %c5_27 = arith.constant 5 : index
    %c0_28 = arith.constant 0 : index
    %c0_29 = arith.constant 0 : index
    %47 = vector.load %arg2[%c5_27, %c0_28, %c0_29] : memref<9x1x128xbf16, #tpu.memory_space<vmem>>, vector<1x1x128xbf16>
    %48 = vector.shape_cast %47 : vector<1x1x128xbf16> to vector<1x128xbf16>
    %49 = arith.extf %48 : vector<1x128xbf16> to vector<1x128xf32>
    %50 = vector.broadcast %49 : vector<1x128xf32> to vector<8x128xf32>
    %51 = arith.mulf %46, %50 : vector<8x128xf32>
    %52 = arith.addf %43, %51 : vector<8x128xf32>
    %c6 = arith.constant 6 : index
    %c0_30 = arith.constant 0 : index
    %c0_31 = arith.constant 0 : index
    %53 = vector.load %arg1[%c6, %c0_30, %c0_31] : memref<9x8x128xbf16, #tpu.memory_space<vmem>>, vector<1x8x128xbf16>
    %54 = vector.shape_cast %53 : vector<1x8x128xbf16> to vector<8x128xbf16>
    %55 = arith.extf %54 : vector<8x128xbf16> to vector<8x128xf32>
    %c6_32 = arith.constant 6 : index
    %c0_33 = arith.constant 0 : index
    %c0_34 = arith.constant 0 : index
    %56 = vector.load %arg2[%c6_32, %c0_33, %c0_34] : memref<9x1x128xbf16, #tpu.memory_space<vmem>>, vector<1x1x128xbf16>
    %57 = vector.shape_cast %56 : vector<1x1x128xbf16> to vector<1x128xbf16>
    %58 = arith.extf %57 : vector<1x128xbf16> to vector<1x128xf32>
    %59 = vector.broadcast %58 : vector<1x128xf32> to vector<8x128xf32>
    %60 = arith.mulf %55, %59 : vector<8x128xf32>
    %61 = arith.addf %52, %60 : vector<8x128xf32>
    %c7 = arith.constant 7 : index
    %c0_35 = arith.constant 0 : index
    %c0_36 = arith.constant 0 : index
    %62 = vector.load %arg1[%c7, %c0_35, %c0_36] : memref<9x8x128xbf16, #tpu.memory_space<vmem>>, vector<1x8x128xbf16>
    %63 = vector.shape_cast %62 : vector<1x8x128xbf16> to vector<8x128xbf16>
    %64 = arith.extf %63 : vector<8x128xbf16> to vector<8x128xf32>
    %c7_37 = arith.constant 7 : index
    %c0_38 = arith.constant 0 : index
    %c0_39 = arith.constant 0 : index
    %65 = vector.load %arg2[%c7_37, %c0_38, %c0_39] : memref<9x1x128xbf16, #tpu.memory_space<vmem>>, vector<1x1x128xbf16>
    %66 = vector.shape_cast %65 : vector<1x1x128xbf16> to vector<1x128xbf16>
    %67 = arith.extf %66 : vector<1x128xbf16> to vector<1x128xf32>
    %68 = vector.broadcast %67 : vector<1x128xf32> to vector<8x128xf32>
    %69 = arith.mulf %64, %68 : vector<8x128xf32>
    %70 = arith.addf %61, %69 : vector<8x128xf32>
    %c8 = arith.constant 8 : index
    %c0_40 = arith.constant 0 : index
    %c0_41 = arith.constant 0 : index
    %71 = vector.load %arg1[%c8, %c0_40, %c0_41] : memref<9x8x128xbf16, #tpu.memory_space<vmem>>, vector<1x8x128xbf16>
    %72 = vector.shape_cast %71 : vector<1x8x128xbf16> to vector<8x128xbf16>
    %73 = arith.extf %72 : vector<8x128xbf16> to vector<8x128xf32>
    %c8_42 = arith.constant 8 : index
    %c0_43 = arith.constant 0 : index
    %c0_44 = arith.constant 0 : index
    %74 = vector.load %arg2[%c8_42, %c0_43, %c0_44] : memref<9x1x128xbf16, #tpu.memory_space<vmem>>, vector<1x1x128xbf16>
    %75 = vector.shape_cast %74 : vector<1x1x128xbf16> to vector<1x128xbf16>
    %76 = arith.extf %75 : vector<1x128xbf16> to vector<1x128xf32>
    %77 = vector.broadcast %76 : vector<1x128xf32> to vector<8x128xf32>
    %78 = arith.mulf %73, %77 : vector<8x128xf32>
    %79 = arith.addf %70, %78 : vector<8x128xf32>
    %c0_45 = arith.constant 0 : index
    %c0_46 = arith.constant 0 : index
    %80 = vector.load %arg3[%c0_45, %c0_46] : memref<1x128xf32, #tpu.memory_space<vmem>>, vector<1x128xf32>
    %81 = vector.broadcast %80 : vector<1x128xf32> to vector<8x128xf32>
    %82 = arith.addf %79, %81 : vector<8x128xf32>
    %cst = arith.constant 5.000000e-01 : f32
    %83 = vector.broadcast %cst : f32 to vector<8x128xf32>
    %84 = arith.mulf %83, %82 : vector<8x128xf32>
    %85 = math.tanh %84 : vector<8x128xf32>
    %cst_47 = arith.constant 5.000000e-01 : f32
    %86 = vector.broadcast %cst_47 : f32 to vector<8x128xf32>
    %87 = arith.mulf %86, %85 : vector<8x128xf32>
    %cst_48 = arith.constant 5.000000e-01 : f32
    %88 = vector.broadcast %cst_48 : f32 to vector<8x128xf32>
    %89 = arith.addf %87, %88 : vector<8x128xf32>
    %90 = arith.mulf %82, %89 : vector<8x128xf32>
    %91 = arith.truncf %90 : vector<8x128xf32> to vector<8x128xbf16>
    %c0_49 = arith.constant 0 : index
    %c0_50 = arith.constant 0 : index
    %92 = vector.load %arg4[%c0_49, %c0_50] : memref<8x128xbf16, #tpu.memory_space<vmem>>, vector<8x128xbf16>
    tpu.vector_store %arg4[%c0_49, %c0_50], %91 {strides = array<i32>} : memref<8x128xbf16, #tpu.memory_space<vmem>>, vector<8x128xbf16>,
    return
  }
  func.func @transform_0(%arg0: i32) -> (i32, i32, i32) {
    %c0_i32 = arith.constant 0 : i32
    %c0_i32_0 = arith.constant 0 : i32
    %c0_i32_1 = arith.constant 0 : i32
    return %c0_i32, %arg0, %c0_i32_0 : i32, i32, i32
  }
  func.func @transform_1(%arg0: i32) -> (i32, i32, i32) {
    %c0_i32 = arith.constant 0 : i32
    %c0_i32_0 = arith.constant 0 : i32
    %c0_i32_1 = arith.constant 0 : i32
    %c0_i32_2 = arith.constant 0 : i32
    return %c0_i32, %c0_i32_0, %c0_i32_1 : i32, i32, i32
  }
  func.func @transform_2(%arg0: i32) -> (i32, i32) {
    %c0_i32 = arith.constant 0 : i32
    %c0_i32_0 = arith.constant 0 : i32
    %c0_i32_1 = arith.constant 0 : i32
    return %c0_i32, %c0_i32_0 : i32, i32
  }
  func.func @transform_3(%arg0: i32) -> (i32, i32) {
    %c0_i32 = arith.constant 0 : i32
    %c0_i32_0 = arith.constant 0 : i32
    return %arg0, %c0_i32 : i32, i32
  }
}

module attributes {stable_mosaic.version = 11 : i64} {
  func.func @_mm_kernel(%arg0: i32, %arg1: i32, %arg2: i32, %arg3: memref<8x128xbf16, #tpu.memory_space<vmem>>, %arg4: memref<128x128xbf16, #tpu.memory_space<vmem>>, %arg5: memref<1x128xf32, #tpu.memory_space<vmem>>, %arg6: memref<8x128xbf16, #tpu.memory_space<vmem>>, %arg7: memref<8x128xf32, #tpu.memory_space<vmem>>) attributes {dimension_semantics = [#tpu.dimension_semantics<parallel>, #tpu.dimension_semantics<parallel>, #tpu.dimension_semantics<arbitrary>], iteration_bounds = array<i64: 2, 1, 1>, scalar_prefetch = 0 : i64, scratch_operands = 1 : i64, tpu.core_type = #tpu.core_type<tc>, window_params = [{transform_indices = @transform_0, window_bounds = array<i64: 8, 128>}, {transform_indices = @transform_1, window_bounds = array<i64: 128, 128>}, {transform_indices = @transform_2, window_bounds = array<i64: 1, 128>}, {transform_indices = @transform_3, window_bounds = array<i64: 8, 128>}]} {
    %c0_i32 = arith.constant 0 : i32
    %0 = arith.cmpi eq, %arg2, %c0_i32 : i32
    %1 = arith.extui %0 : i1 to i32
    %c0_i32_0 = arith.constant 0 : i32
    %2 = arith.cmpi ne, %1, %c0_i32_0 : i32
    scf.if %2 {
      %cst_10 = arith.constant 0.000000e+00 : f32
      %12 = vector.broadcast %cst_10 : f32 to vector<8x128xf32>
      %c0_11 = arith.constant 0 : index
      %c0_12 = arith.constant 0 : index
      %13 = vector.load %arg7[%c0_11, %c0_12] : memref<8x128xf32, #tpu.memory_space<vmem>>, vector<8x128xf32>
      tpu.vector_store %arg7[%c0_11, %c0_12], %12 {strides = array<i32>} : memref<8x128xf32, #tpu.memory_space<vmem>>, vector<8x128xf32>,
    } else {
    }
    %c0 = arith.constant 0 : index
    %c0_1 = arith.constant 0 : index
    %3 = vector.load %arg7[%c0, %c0_1] : memref<8x128xf32, #tpu.memory_space<vmem>>, vector<8x128xf32>
    %c0_2 = arith.constant 0 : index
    %c0_3 = arith.constant 0 : index
    %4 = vector.load %arg3[%c0_2, %c0_3] : memref<8x128xbf16, #tpu.memory_space<vmem>>, vector<8x128xbf16>
    %c0_4 = arith.constant 0 : index
    %c0_5 = arith.constant 0 : index
    %5 = vector.load %arg4[%c0_4, %c0_5] : memref<128x128xbf16, #tpu.memory_space<vmem>>, vector<128x128xbf16>
    %cst = arith.constant dense<0.000000e+00> : vector<8x128xf32>
    %6 = tpu.matmul %4, %5, %cst {dimension_numbers = #tpu.dot_dimension_numbers<[1], [0], [0], [1], [0, 0, 1, 1], [], []>} : vector<8x128xbf16>, vector<128x128xbf16>, vector<8x128xf32> -> vector<8x128xf32>
    %7 = arith.addf %3, %6 : vector<8x128xf32>
    %c0_6 = arith.constant 0 : index
    %c0_7 = arith.constant 0 : index
    %8 = vector.load %arg7[%c0_6, %c0_7] : memref<8x128xf32, #tpu.memory_space<vmem>>, vector<8x128xf32>
    tpu.vector_store %arg7[%c0_6, %c0_7], %7 {strides = array<i32>} : memref<8x128xf32, #tpu.memory_space<vmem>>, vector<8x128xf32>,
    %c0_i32_8 = arith.constant 0 : i32
    %9 = arith.cmpi eq, %arg2, %c0_i32_8 : i32
    %10 = arith.extui %9 : i1 to i32
    %c0_i32_9 = arith.constant 0 : i32
    %11 = arith.cmpi ne, %10, %c0_i32_9 : i32
    scf.if %11 {
      %c0_10 = arith.constant 0 : index
      %c0_11 = arith.constant 0 : index
      %12 = vector.load %arg7[%c0_10, %c0_11] : memref<8x128xf32, #tpu.memory_space<vmem>>, vector<8x128xf32>
      %c0_12 = arith.constant 0 : index
      %c0_13 = arith.constant 0 : index
      %13 = vector.load %arg5[%c0_12, %c0_13] : memref<1x128xf32, #tpu.memory_space<vmem>>, vector<1x128xf32>
      %14 = vector.broadcast %13 : vector<1x128xf32> to vector<8x128xf32>
      %15 = arith.addf %12, %14 : vector<8x128xf32>
      %cst_14 = arith.constant 5.000000e-01 : f32
      %16 = vector.broadcast %cst_14 : f32 to vector<8x128xf32>
      %17 = arith.mulf %16, %15 : vector<8x128xf32>
      %18 = math.tanh %17 : vector<8x128xf32>
      %cst_15 = arith.constant 5.000000e-01 : f32
      %19 = vector.broadcast %cst_15 : f32 to vector<8x128xf32>
      %20 = arith.mulf %19, %18 : vector<8x128xf32>
      %cst_16 = arith.constant 5.000000e-01 : f32
      %21 = vector.broadcast %cst_16 : f32 to vector<8x128xf32>
      %22 = arith.addf %20, %21 : vector<8x128xf32>
      %23 = arith.mulf %15, %22 : vector<8x128xf32>
      %24 = arith.truncf %23 : vector<8x128xf32> to vector<8x128xbf16>
      %c0_17 = arith.constant 0 : index
      %c0_18 = arith.constant 0 : index
      %25 = vector.load %arg6[%c0_17, %c0_18] : memref<8x128xbf16, #tpu.memory_space<vmem>>, vector<8x128xbf16>
      tpu.vector_store %arg6[%c0_17, %c0_18], %24 {strides = array<i32>} : memref<8x128xbf16, #tpu.memory_space<vmem>>, vector<8x128xbf16>,
    } else {
    }
    return
  }
  func.func @transform_0(%arg0: i32, %arg1: i32, %arg2: i32) -> (i32, i32) {
    %c0_i32 = arith.constant 0 : i32
    return %arg0, %arg2 : i32, i32
  }
  func.func @transform_1(%arg0: i32, %arg1: i32, %arg2: i32) -> (i32, i32) {
    %c0_i32 = arith.constant 0 : i32
    return %arg2, %arg1 : i32, i32
  }
  func.func @transform_2(%arg0: i32, %arg1: i32, %arg2: i32) -> (i32, i32) {
    %c0_i32 = arith.constant 0 : i32
    %c0_i32_0 = arith.constant 0 : i32
    return %c0_i32, %arg1 : i32, i32
  }
  func.func @transform_3(%arg0: i32, %arg1: i32, %arg2: i32) -> (i32, i32) {
    %c0_i32 = arith.constant 0 : i32
    return %arg0, %arg1 : i32, i32
  }
}

module attributes {stable_mosaic.version = 11 : i64} {
  func.func @_mm_kernel(%arg0: i32, %arg1: i32, %arg2: i32, %arg3: memref<8x128xbf16, #tpu.memory_space<vmem>>, %arg4: memref<128x128xbf16, #tpu.memory_space<vmem>>, %arg5: memref<1x128xf32, #tpu.memory_space<vmem>>, %arg6: memref<8x128xbf16, #tpu.memory_space<vmem>>, %arg7: memref<8x128xf32, #tpu.memory_space<vmem>>) attributes {dimension_semantics = [#tpu.dimension_semantics<parallel>, #tpu.dimension_semantics<parallel>, #tpu.dimension_semantics<arbitrary>], iteration_bounds = array<i64: 2, 1, 1>, scalar_prefetch = 0 : i64, scratch_operands = 1 : i64, tpu.core_type = #tpu.core_type<tc>, window_params = [{transform_indices = @transform_0, window_bounds = array<i64: 8, 128>}, {transform_indices = @transform_1, window_bounds = array<i64: 128, 128>}, {transform_indices = @transform_2, window_bounds = array<i64: 1, 128>}, {transform_indices = @transform_3, window_bounds = array<i64: 8, 128>}]} {
    %c0_i32 = arith.constant 0 : i32
    %0 = arith.cmpi eq, %arg2, %c0_i32 : i32
    %1 = arith.extui %0 : i1 to i32
    %c0_i32_0 = arith.constant 0 : i32
    %2 = arith.cmpi ne, %1, %c0_i32_0 : i32
    scf.if %2 {
      %cst_10 = arith.constant 0.000000e+00 : f32
      %12 = vector.broadcast %cst_10 : f32 to vector<8x128xf32>
      %c0_11 = arith.constant 0 : index
      %c0_12 = arith.constant 0 : index
      %13 = vector.load %arg7[%c0_11, %c0_12] : memref<8x128xf32, #tpu.memory_space<vmem>>, vector<8x128xf32>
      tpu.vector_store %arg7[%c0_11, %c0_12], %12 {strides = array<i32>} : memref<8x128xf32, #tpu.memory_space<vmem>>, vector<8x128xf32>,
    } else {
    }
    %c0 = arith.constant 0 : index
    %c0_1 = arith.constant 0 : index
    %3 = vector.load %arg7[%c0, %c0_1] : memref<8x128xf32, #tpu.memory_space<vmem>>, vector<8x128xf32>
    %c0_2 = arith.constant 0 : index
    %c0_3 = arith.constant 0 : index
    %4 = vector.load %arg3[%c0_2, %c0_3] : memref<8x128xbf16, #tpu.memory_space<vmem>>, vector<8x128xbf16>
    %c0_4 = arith.constant 0 : index
    %c0_5 = arith.constant 0 : index
    %5 = vector.load %arg4[%c0_4, %c0_5] : memref<128x128xbf16, #tpu.memory_space<vmem>>, vector<128x128xbf16>
    %cst = arith.constant dense<0.000000e+00> : vector<8x128xf32>
    %6 = tpu.matmul %4, %5, %cst {dimension_numbers = #tpu.dot_dimension_numbers<[1], [0], [0], [1], [0, 0, 1, 1], [], []>} : vector<8x128xbf16>, vector<128x128xbf16>, vector<8x128xf32> -> vector<8x128xf32>
    %7 = arith.addf %3, %6 : vector<8x128xf32>
    %c0_6 = arith.constant 0 : index
    %c0_7 = arith.constant 0 : index
    %8 = vector.load %arg7[%c0_6, %c0_7] : memref<8x128xf32, #tpu.memory_space<vmem>>, vector<8x128xf32>
    tpu.vector_store %arg7[%c0_6, %c0_7], %7 {strides = array<i32>} : memref<8x128xf32, #tpu.memory_space<vmem>>, vector<8x128xf32>,
    %c0_i32_8 = arith.constant 0 : i32
    %9 = arith.cmpi eq, %arg2, %c0_i32_8 : i32
    %10 = arith.extui %9 : i1 to i32
    %c0_i32_9 = arith.constant 0 : i32
    %11 = arith.cmpi ne, %10, %c0_i32_9 : i32
    scf.if %11 {
      %c0_10 = arith.constant 0 : index
      %c0_11 = arith.constant 0 : index
      %12 = vector.load %arg7[%c0_10, %c0_11] : memref<8x128xf32, #tpu.memory_space<vmem>>, vector<8x128xf32>
      %c0_12 = arith.constant 0 : index
      %c0_13 = arith.constant 0 : index
      %13 = vector.load %arg5[%c0_12, %c0_13] : memref<1x128xf32, #tpu.memory_space<vmem>>, vector<1x128xf32>
      %14 = vector.broadcast %13 : vector<1x128xf32> to vector<8x128xf32>
      %15 = arith.addf %12, %14 : vector<8x128xf32>
      %16 = arith.truncf %15 : vector<8x128xf32> to vector<8x128xbf16>
      %c0_14 = arith.constant 0 : index
      %c0_15 = arith.constant 0 : index
      %17 = vector.load %arg6[%c0_14, %c0_15] : memref<8x128xbf16, #tpu.memory_space<vmem>>, vector<8x128xbf16>
      tpu.vector_store %arg6[%c0_14, %c0_15], %16 {strides = array<i32>} : memref<8x128xbf16, #tpu.memory_space<vmem>>, vector<8x128xbf16>,
    } else {
    }
    return
  }
  func.func @transform_0(%arg0: i32, %arg1: i32, %arg2: i32) -> (i32, i32) {
    %c0_i32 = arith.constant 0 : i32
    return %arg0, %arg2 : i32, i32
  }
  func.func @transform_1(%arg0: i32, %arg1: i32, %arg2: i32) -> (i32, i32) {
    %c0_i32 = arith.constant 0 : i32
    return %arg2, %arg1 : i32, i32
  }
  func.func @transform_2(%arg0: i32, %arg1: i32, %arg2: i32) -> (i32, i32) {
    %c0_i32 = arith.constant 0 : i32
    %c0_i32_0 = arith.constant 0 : i32
    return %c0_i32, %arg1 : i32, i32
  }
  func.func @transform_3(%arg0: i32, %arg1: i32, %arg2: i32) -> (i32, i32) {
    %c0_i32 = arith.constant 0 : i32
    return %arg0, %arg1 : i32, i32
  }
}

module attributes {stable_mosaic.version = 11 : i64} {
  func.func @_mm_res_kernel(%arg0: i32, %arg1: i32, %arg2: i32, %arg3: memref<8x128xbf16, #tpu.memory_space<vmem>>, %arg4: memref<128x128xbf16, #tpu.memory_space<vmem>>, %arg5: memref<1x128xf32, #tpu.memory_space<vmem>>, %arg6: memref<8x128xbf16, #tpu.memory_space<vmem>>, %arg7: memref<8x128xbf16, #tpu.memory_space<vmem>>, %arg8: memref<8x128xf32, #tpu.memory_space<vmem>>) attributes {dimension_semantics = [#tpu.dimension_semantics<parallel>, #tpu.dimension_semantics<parallel>, #tpu.dimension_semantics<arbitrary>], iteration_bounds = array<i64: 2, 1, 1>, scalar_prefetch = 0 : i64, scratch_operands = 1 : i64, tpu.core_type = #tpu.core_type<tc>, window_params = [{transform_indices = @transform_0, window_bounds = array<i64: 8, 128>}, {transform_indices = @transform_1, window_bounds = array<i64: 128, 128>}, {transform_indices = @transform_2, window_bounds = array<i64: 1, 128>}, {transform_indices = @transform_3, window_bounds = array<i64: 8, 128>}, {transform_indices = @transform_4, window_bounds = array<i64: 8, 128>}]} {
    %c0_i32 = arith.constant 0 : i32
    %0 = arith.cmpi eq, %arg2, %c0_i32 : i32
    %1 = arith.extui %0 : i1 to i32
    %c0_i32_0 = arith.constant 0 : i32
    %2 = arith.cmpi ne, %1, %c0_i32_0 : i32
    scf.if %2 {
      %cst_10 = arith.constant 0.000000e+00 : f32
      %12 = vector.broadcast %cst_10 : f32 to vector<8x128xf32>
      %c0_11 = arith.constant 0 : index
      %c0_12 = arith.constant 0 : index
      %13 = vector.load %arg8[%c0_11, %c0_12] : memref<8x128xf32, #tpu.memory_space<vmem>>, vector<8x128xf32>
      tpu.vector_store %arg8[%c0_11, %c0_12], %12 {strides = array<i32>} : memref<8x128xf32, #tpu.memory_space<vmem>>, vector<8x128xf32>,
    } else {
    }
    %c0 = arith.constant 0 : index
    %c0_1 = arith.constant 0 : index
    %3 = vector.load %arg8[%c0, %c0_1] : memref<8x128xf32, #tpu.memory_space<vmem>>, vector<8x128xf32>
    %c0_2 = arith.constant 0 : index
    %c0_3 = arith.constant 0 : index
    %4 = vector.load %arg3[%c0_2, %c0_3] : memref<8x128xbf16, #tpu.memory_space<vmem>>, vector<8x128xbf16>
    %c0_4 = arith.constant 0 : index
    %c0_5 = arith.constant 0 : index
    %5 = vector.load %arg4[%c0_4, %c0_5] : memref<128x128xbf16, #tpu.memory_space<vmem>>, vector<128x128xbf16>
    %cst = arith.constant dense<0.000000e+00> : vector<8x128xf32>
    %6 = tpu.matmul %4, %5, %cst {dimension_numbers = #tpu.dot_dimension_numbers<[1], [0], [0], [1], [0, 0, 1, 1], [], []>} : vector<8x128xbf16>, vector<128x128xbf16>, vector<8x128xf32> -> vector<8x128xf32>
    %7 = arith.addf %3, %6 : vector<8x128xf32>
    %c0_6 = arith.constant 0 : index
    %c0_7 = arith.constant 0 : index
    %8 = vector.load %arg8[%c0_6, %c0_7] : memref<8x128xf32, #tpu.memory_space<vmem>>, vector<8x128xf32>
    tpu.vector_store %arg8[%c0_6, %c0_7], %7 {strides = array<i32>} : memref<8x128xf32, #tpu.memory_space<vmem>>, vector<8x128xf32>,
    %c0_i32_8 = arith.constant 0 : i32
    %9 = arith.cmpi eq, %arg2, %c0_i32_8 : i32
    %10 = arith.extui %9 : i1 to i32
    %c0_i32_9 = arith.constant 0 : i32
    %11 = arith.cmpi ne, %10, %c0_i32_9 : i32
    scf.if %11 {
      %c0_10 = arith.constant 0 : index
      %c0_11 = arith.constant 0 : index
      %12 = vector.load %arg8[%c0_10, %c0_11] : memref<8x128xf32, #tpu.memory_space<vmem>>, vector<8x128xf32>
      %c0_12 = arith.constant 0 : index
      %c0_13 = arith.constant 0 : index
      %13 = vector.load %arg5[%c0_12, %c0_13] : memref<1x128xf32, #tpu.memory_space<vmem>>, vector<1x128xf32>
      %14 = vector.broadcast %13 : vector<1x128xf32> to vector<8x128xf32>
      %15 = arith.addf %12, %14 : vector<8x128xf32>
      %c0_14 = arith.constant 0 : index
      %c0_15 = arith.constant 0 : index
      %16 = vector.load %arg6[%c0_14, %c0_15] : memref<8x128xbf16, #tpu.memory_space<vmem>>, vector<8x128xbf16>
      %17 = arith.extf %16 : vector<8x128xbf16> to vector<8x128xf32>
      %18 = arith.addf %15, %17 : vector<8x128xf32>
      %19 = arith.truncf %18 : vector<8x128xf32> to vector<8x128xbf16>
      %c0_16 = arith.constant 0 : index
      %c0_17 = arith.constant 0 : index
      %20 = vector.load %arg7[%c0_16, %c0_17] : memref<8x128xbf16, #tpu.memory_space<vmem>>, vector<8x128xbf16>
      tpu.vector_store %arg7[%c0_16, %c0_17], %19 {strides = array<i32>} : memref<8x128xbf16, #tpu.memory_space<vmem>>, vector<8x128xbf16>,
    } else {
    }
    return
  }
  func.func @transform_0(%arg0: i32, %arg1: i32, %arg2: i32) -> (i32, i32) {
    %c0_i32 = arith.constant 0 : i32
    return %arg0, %arg2 : i32, i32
  }
  func.func @transform_1(%arg0: i32, %arg1: i32, %arg2: i32) -> (i32, i32) {
    %c0_i32 = arith.constant 0 : i32
    return %arg2, %arg1 : i32, i32
  }
  func.func @transform_2(%arg0: i32, %arg1: i32, %arg2: i32) -> (i32, i32) {
    %c0_i32 = arith.constant 0 : i32
    %c0_i32_0 = arith.constant 0 : i32
    return %c0_i32, %arg1 : i32, i32
  }
  func.func @transform_3(%arg0: i32, %arg1: i32, %arg2: i32) -> (i32, i32) {
    %c0_i32 = arith.constant 0 : i32
    return %arg0, %arg1 : i32, i32
  }
  func.func @transform_4(%arg0: i32, %arg1: i32, %arg2: i32) -> (i32, i32) {
    %c0_i32 = arith.constant 0 : i32
    return %arg0, %arg1 : i32, i32
  }
}

</mosaic_0001>

<bundles_post_ra>
// kernel: efficientnetv2_forward.17
= control target key start
LH: loop header
LB: loop body
LE: loop exit
PB: predicated region body
PF: predicated region fallthrough
CT: control target
= control target key end

     0   :  { %8 = vsyncpa [#allocation4], 0  ;;  %s1480_s12 = smov 0   ;;  %s1482_s13 = smov 0   ;;  %s1711_s0 = inlined_call_operand.vmem [shape: bf16[512,27], index: 0, kind: input, shape index: {}]   ;;  %s1712_s1 = inlined_call_operand.vmem [shape: bf16[27,128], index: 1, kind: input, shape index: {}]   ;;  %s1713_s2 = inlined_call_operand.hbm [shape: f32[1,128], index: 2, kind: input, shape index: {}]   ;;  %s1714_s3 = inlined_call_operand.vmem [shape: bf16[512,128], index: 3, kind: output, shape index: {}]  }
   0x1   :  { %s1484_s14 = smov 0  }
   0x2 LB: > { %s1078_s15 = sadd.s32 4294967295, %s1456_s14   ;;  %s33_s16 = sadd.s32 1, %s1452_s13  ;;  %s1456_s14 = sphi %s1484_s14, %s14_s14   ;;  %s1452_s13 = sphi %s1482_s13, %s1716_s13   ;;  %s1448_s12 = sphi %s1480_s12, %s1715_s12  }
   0x3   : > { %p35_p0 = scmp.ge.s32.totalorder %s33_s16, 2  ;;  %p1080_p1 = scmp.ge.s32.totalorder %s1456_s14, 1 }
   0x4   : > { %p148_p2 = scmp.lt.s32.totalorder %s1456_s14, 3  ;;  %p1307_p4 = scmp.eq.s32.totalorder %s1078_s15, 0 }
   0x5   : > { %s1718_s16 = smov (%p35_p0, %s33_s16), 0  ;;  %s173_s19 = sshll.u32 %s1713_s2, 4  ;;  %s174_s19 = int_to_ptr.hbm [resolvable:$true] %s173_s19 }
   0x6   : > { %p149_p3 = pnand %p1080_p1, %p148_p2  ;;  %s1458_s20 = smov [#allocation3]  }
   0x7   : > { %s175_s21 = sshll.u32 %s1458_s20, 4  ;;  %s176_s21 = int_to_ptr.vmem [resolvable:$true] %s175_s21 }
   0x8   : > { %p1303_p5 = pneg %p149_p3  ;;  %200 = sbr.rel (%p149_p3) target bundleno = 237 (0xed), region = 32 }
   0xa   : > { %p1304_p6 = pnand %p1307_p4, %p1303_p5 }
   0xc   : > { %1306 = dma.hbm_to_vmem [thread:$0]  (!%p1304_p6), %s174_s19, 16, %s176_s21, [#allocation4]  }
   0xd   : > { %1443 = dma.done.wait (%p1307_p4), [#allocation4], 16  }
   0xe   : > { %1445 = vsyncadd (%p1307_p4), [#allocation4], 4294967280  ;;  %s1086_s22 = sshll.u32 %s1448_s12, 5  ;;  %vm511_vm0 = vcmask 1044480   ;;  %vm512_vm1 = vcmask 1045504   ;;  %v1459_v0 = vmov 65535  }
   0xf   : > { %p240_p7 = scmp.lt.s32.totalorder %s1086_s22, 63  ;;  %v513_v1 = vsel %vm511_vm0, 4294967295, %v1459_v0  ;;  %v1160_v2 = vld [vmem:[%s1712_s1 + $0x8] sm:$0xf]  ;;  %v1197_v3 = vld [vmem:[%s1712_s1 + $0x8] sm:$0x30] }
  0x10   : > { %v514_v4 = vsel %vm512_vm1, %v513_v1, 0  ;;  %v1161_v5 = vor.u32 %v1197_v3, %v1160_v2  ;;  %v1196_v7 = vld [vmem:[%s1712_s1] sm:$0xff]  ;;  %vm462_vm2 = vcmask 220160  }
  0x11   : > { %s1720_s22 = smov (!%p240_p7, %s1086_s22), 63  ;;  %v1553_v24 = vld [vmem:[#allocation3] ss:$0 sm:$0xff] }
  0x12   : > { %s1087_s27 = sshll.u32 %s1720_s22, 2  ;;  %v516_v6 = vand.u32 %v1161_v5, %v514_v4 }
  0x13   : > { %s1519_s5 = scalar_lea.vmem %s1711_s0, %s1087_s27  ;;  %s1597_s8 = scalar_lea.vmem %s1714_s3, %s1087_s27 }
  0x14   : > { %524 = vmatpush.bf16.msra.mxu0 %v516_v6  ;;  %1293 = vmatpush.bf16.msra.mxu1 %v516_v6  ;;  %v1180_v8 = vld [vmem:[%s1519_s5] sm:$0xff]  ;;  %v1181_v12 = vld [vmem:[%s1519_s5 + $0x8] sm:$0xff]  ;;  %v1182_v16 = vld [vmem:[%s1519_s5 + $0x10] sm:$0xff] }
  0x15   : > { %1294 = vmatpush.bf16.msra.mxu2 %v516_v6  ;;  %1295 = vmatpush.bf16.msra.mxu3 %v516_v6  ;;  %v1184_v9 = vld [vmem:[%s1519_s5 + $0x20] sm:$0xff]  ;;  %v1185_v13 = vld [vmem:[%s1519_s5 + $0x28] sm:$0xff]  ;;  %v1186_v17 = vld [vmem:[%s1519_s5 + $0x30] sm:$0xff] }
  0x16   : > { %v1188_v10 = vld [vmem:[%s1519_s5 + $0x40] sm:$0xff]  ;;  %v1189_v14 = vld [vmem:[%s1519_s5 + $0x48] sm:$0xff]  ;;  %v1190_v18 = vld [vmem:[%s1519_s5 + $0x50] sm:$0xff] }
  0x17   : > { %v1192_v11 = vld [vmem:[%s1519_s5 + $0x60] sm:$0xff]  ;;  %v1193_v15 = vld [vmem:[%s1519_s5 + $0x68] sm:$0xff]  ;;  %v1194_v19 = vld [vmem:[%s1519_s5 + $0x70] sm:$0xff] }
  0x18   : > { %525 = vmatpush.bf16.msra.mxu0 %v1196_v7  ;;  %1296 = vmatpush.bf16.msra.mxu1 %v1196_v7  ;;  %v1183_v20 = vld [vmem:[%s1519_s5 + $0x18] sm:$0xff] }
  0x19   : > { %1297 = vmatpush.bf16.msra.mxu2 %v1196_v7  ;;  %1298 = vmatpush.bf16.msra.mxu3 %v1196_v7  ;;  %v1187_v21 = vld [vmem:[%s1519_s5 + $0x38] sm:$0xff] }
  0x1a   : > { %v1191_v22 = vld [vmem:[%s1519_s5 + $0x58] sm:$0xff] }
  0x1b   : > { %1162 = vmatmul.msk.bf16.vlgmr.msra.gmra.mxu0 %vm462_vm2, %v1180_v8  ;;  %1166 = vmatmul.msk.bf16.vlgmr.msra.gmra.mxu1 %vm462_vm2, %v1184_v9  ;;  %v1195_v23 = vld [vmem:[%s1519_s5 + $0x78] sm:$0xff] }
  0x1c   : > { %1170 = vmatmul.msk.bf16.vlgmr.msra.gmra.mxu2 %vm462_vm2, %v1188_v10  ;;  %1174 = vmatmul.msk.bf16.vlgmr.msra.gmra.mxu3 %vm462_vm2, %v1192_v11 }
  0x2b   : > { %1163 = vmatmul.msk.bf16.gmra.mxu0 %vm462_vm2, %v1181_v12  ;;  %1167 = vmatmul.msk.bf16.gmra.mxu1 %vm462_vm2, %v1185_v13 }
  0x2c   : > { %1171 = vmatmul.msk.bf16.gmra.mxu2 %vm462_vm2, %v1189_v14  ;;  %1175 = vmatmul.msk.bf16.gmra.mxu3 %vm462_vm2, %v1193_v15 }
  0x3b   : > { %1164 = vmatmul.msk.bf16.gmra.mxu0 %vm462_vm2, %v1182_v16  ;;  %1168 = vmatmul.msk.bf16.gmra.mxu1 %vm462_vm2, %v1186_v17 }
  0x3c   : > { %1172 = vmatmul.msk.bf16.gmra.mxu2 %vm462_vm2, %v1190_v18  ;;  %1176 = vmatmul.msk.bf16.gmra.mxu3 %vm462_vm2, %v1194_v19 }
  0x4b   : > { %1165 = vmatmul.msk.bf16.gmra.mxu0 %vm462_vm2, %v1183_v20  ;;  %1169 = vmatmul.msk.bf16.gmra.mxu1 %vm462_vm2, %v1187_v21 }
  0x4c   : > { %1173 = vmatmul.msk.bf16.gmra.mxu2 %vm462_vm2, %v1191_v22  ;;  %1177 = vmatmul.msk.bf16.gmra.mxu3 %vm462_vm2, %v1195_v23 }
  0x98   : > { %v527_v25 = vpop.f32.mrf.mxu0  ;;  %v547_v26 = vpop.f32.mrf.mxu1 }
  0x99   : > { %v710_v27 = vadd.f32 %v1553_v24, %v527_v25  ;;  %v718_v28 = vadd.f32 %v1553_v24, %v547_v26 }
  0x9b   : > { %v742_v29 = vmul.f32 0.5, %v710_v27  ;;  %v750_v30 = vmul.f32 0.5, %v718_v28 }
  0x9d   : > { %1336 = vtanh.f32 %v742_v29 }
  0x9e   : > { %1338 = vtanh.f32 %v750_v30 }
  0x9f   : > { %v567_v31 = vpop.f32.mrf.mxu2  ;;  %v587_v32 = vpop.f32.mrf.mxu3 }
  0xa0   : > { %v1558_v33 = vadd.f32 %v1553_v24, %v567_v31  ;;  %v1561_v34 = vadd.f32 %v1553_v24, %v587_v32  ;;  %v529_v35 = vpop.f32.mrf.mxu0  ;;  %v549_v36 = vpop.f32.mrf.mxu1 }
  0xa1   : > { %v711_v37 = vadd.f32 %v1553_v24, %v529_v35  ;;  %v719_v38 = vadd.f32 %v1553_v24, %v549_v36 }
  0xa2   : > { %v758_v39 = vmul.f32 0.5, %v1558_v33  ;;  %v766_v40 = vmul.f32 0.5, %v1561_v34 }
  0xa3   : > { %v743_v41 = vmul.f32 0.5, %v711_v37  ;;  %v751_v42 = vmul.f32 0.5, %v719_v38  ;;  %v1337_v43 = vpop.eup %1336 }
  0xa4   : > { %1340 = vtanh.f32 %v758_v39  ;;  %v1339_v44 = vpop.eup %1338  ;;  %v806_v45 = vmul.f32 0.5, %v1337_v43 }
  0xa5   : > { %1342 = vtanh.f32 %v766_v40  ;;  %v814_v52 = vmul.f32 0.5, %v1339_v44 }
  0xa6   : > { %1344 = vtanh.f32 %v743_v41  ;;  %v838_v59 = vadd.f32 0.5, %v806_v45 }
  0xa7   : > { %1346 = vtanh.f32 %v751_v42  ;;  %v569_v46 = vpop.f32.mrf.mxu2  ;;  %v589_v47 = vpop.f32.mrf.mxu3  ;;  %v846_v0 = vadd.f32 0.5, %v814_v52 }
  0xa8   : > { %v727_v48 = vadd.f32 %v1553_v24, %v569_v46  ;;  %v1569_v49 = vadd.f32 %v1553_v24, %v589_v47  ;;  %v532_v50 = vpop.f32.mrf.mxu0  ;;  %v552_v51 = vpop.f32.mrf.mxu1  ;;  %v870_v4 = vmul.f32 %v838_v59, %v710_v27 }
  0xa9   : > { %v1572_v53 = vadd.f32 %v1553_v24, %v532_v50  ;;  %v1575_v54 = vadd.f32 %v1553_v24, %v552_v51  ;;  %v878_v14 = vmul.f32 %v846_v0, %v718_v28 }
  0xaa   : > { %v1341_v55 = vpop.eup %1340  ;;  %v759_v56 = vmul.f32 0.5, %v727_v48  ;;  %v767_v57 = vmul.f32 0.5, %v1569_v49 }
  0xab   : > { %v1343_v58 = vpop.eup %1342  ;;  %v744_v60 = vmul.f32 0.5, %v1572_v53  ;;  %v752_v62 = vmul.f32 0.5, %v1575_v54  ;;  %v822_v2 = vmul.f32 0.5, %v1341_v55 }
  0xac   : > { %v1345_v61 = vpop.eup %1344  ;;  %1348 = vtanh.f32 %v759_v56  ;;  %v830_v5 = vmul.f32 0.5, %v1343_v58 }
  0xad   : > { %v1347_v63 = vpop.eup %1346  ;;  %v807_v1 = vmul.f32 0.5, %v1345_v61  ;;  %1350 = vtanh.f32 %v767_v57  ;;  %v854_v19 = vadd.f32 0.5, %v822_v2 }
  0xae   : > { %v815_v3 = vmul.f32 0.5, %v1347_v63  ;;  %1352 = vtanh.f32 %v744_v60  ;;  %v862_v30 = vadd.f32 0.5, %v830_v5 }
  0xaf   : > { %v839_v6 = vadd.f32 0.5, %v807_v1  ;;  %v572_v7 = vpop.f32.mrf.mxu2  ;;  %v592_v8 = vpop.f32.mrf.mxu3  ;;  %1354 = vtanh.f32 %v752_v62 }
  0xb0   : > { %v847_v9 = vadd.f32 0.5, %v815_v3  ;;  %v1581_v10 = vadd.f32 %v1553_v24, %v572_v7  ;;  %v1584_v11 = vadd.f32 %v1553_v24, %v592_v8  ;;  %v534_v12 = vpop.f32.mrf.mxu0  ;;  %v554_v13 = vpop.f32.mrf.mxu1  ;;  %v894_v43 = vmul.f32 %v862_v30, %v1561_v34 }
  0xb1   : > { %v871_v15 = vmul.f32 %v839_v6, %v711_v37  ;;  %v1587_v16 = vadd.f32 %v1553_v24, %v534_v12  ;;  %v1590_v17 = vadd.f32 %v1553_v24, %v554_v13 }
  0xb2   : > { %v1349_v18 = vpop.eup %1348  ;;  %v879_v20 = vmul.f32 %v847_v9, %v719_v38  ;;  %v760_v21 = vmul.f32 0.5, %v1581_v10  ;;  %v768_v22 = vmul.f32 0.5, %v1584_v11  ;;  %v886_v38 = vmul.f32 %v854_v19, %v1558_v33 }
  0xb3   : > { %v1351_v23 = vpop.eup %1350  ;;  %v1201_v25 = vpack.c.bf16 %v871_v15, %v870_v4  ;;  %v823_v26 = vmul.f32 0.5, %v1349_v18  ;;  %v745_v27 = vmul.f32 0.5, %v1587_v16  ;;  %v753_v28 = vmul.f32 0.5, %v1590_v17 }
  0xb4   : > { %v1353_v29 = vpop.eup %1352  ;;  %v1221_v31 = vpack.c.bf16 %v879_v20, %v878_v14  ;;  %v831_v32 = vmul.f32 0.5, %v1351_v23  ;;  %1356 = vtanh.f32 %v760_v21 }
  0xb5   : > { %1202 = vst [vmem:[%s1597_s8] sm:$0xff] %v1201_v25   ;;  %v855_v35 = vadd.f32 0.5, %v823_v26  ;;  %1358 = vtanh.f32 %v768_v22  ;;  %v1355_v36 = vpop.eup %1354  ;;  %v808_v40 = vmul.f32 0.5, %v1353_v29 }
  0xb6   : > { %1281 = vst [vmem:[%s1597_s8 + $0x20] sm:$0xff] %v1221_v31   ;;  %v863_v37 = vadd.f32 0.5, %v831_v32  ;;  %1360 = vtanh.f32 %v745_v27 }
  0xb7   : > { %v887_v39 = vmul.f32 %v855_v35, %v727_v48  ;;  %1362 = vtanh.f32 %v753_v28  ;;  %v574_v41 = vpop.f32.mrf.mxu2  ;;  %v594_v42 = vpop.f32.mrf.mxu3  ;;  %v816_v48 = vmul.f32 0.5, %v1355_v36  ;;  %v840_v58 = vadd.f32 0.5, %v808_v40 }
  0xb8   : > { %v895_v44 = vmul.f32 %v863_v37, %v1569_v49  ;;  %v1609_v45 = vadd.f32 %v1553_v24, %v574_v41  ;;  %v1612_v46 = vadd.f32 %v1553_v24, %v594_v42  ;;  %v537_v47 = vpop.f32.mrf.mxu0  ;;  %v557_v50 = vpop.f32.mrf.mxu1 }
  0xb9   : > { %v1241_v33 = vpack.c.bf16 %v887_v39, %v886_v38  ;;  %v1615_v51 = vadd.f32 %v1553_v24, %v537_v47  ;;  %v1618_v52 = vadd.f32 %v1553_v24, %v557_v50  ;;  %v848_v63 = vadd.f32 0.5, %v816_v48 }
  0xba   : > { %v1357_v34 = vpop.eup %1356  ;;  %v1261_v55 = vpack.c.bf16 %v895_v44, %v894_v43  ;;  %v761_v49 = vmul.f32 0.5, %v1609_v45  ;;  %v769_v56 = vmul.f32 0.5, %v1612_v46  ;;  %v872_v3 = vmul.f32 %v840_v58, %v1572_v53 }
  0xbb   : > { %v1359_v57 = vpop.eup %1358  ;;  %1285 = vst [vmem:[%s1597_s8 + $0x40] sm:$0xff] %v1241_v33   ;;  %v746_v59 = vmul.f32 0.5, %v1615_v51  ;;  %v754_v60 = vmul.f32 0.5, %v1618_v52  ;;  %v824_v1 = vmul.f32 0.5, %v1357_v34  ;;  %v880_v15 = vmul.f32 %v848_v63, %v1575_v54 }
  0xbc   : > { %v1361_v61 = vpop.eup %1360  ;;  %1289 = vst [vmem:[%s1597_s8 + $0x60] sm:$0xff] %v1261_v55   ;;  %1364 = vtanh.f32 %v761_v49  ;;  %v832_v7 = vmul.f32 0.5, %v1359_v57 }
  0xbd   : > { %v1363_v62 = vpop.eup %1362  ;;  %v809_v0 = vmul.f32 0.5, %v1361_v61  ;;  %1366 = vtanh.f32 %v769_v56  ;;  %v856_v21 = vadd.f32 0.5, %v824_v1 }
  0xbe   : > { %v817_v2 = vmul.f32 0.5, %v1363_v62  ;;  %1368 = vtanh.f32 %v746_v59  ;;  %v864_v30 = vadd.f32 0.5, %v832_v7 }
  0xbf   : > { %v841_v4 = vadd.f32 0.5, %v809_v0  ;;  %1370 = vtanh.f32 %v754_v60  ;;  %v577_v5 = vpop.f32.mrf.mxu2  ;;  %v597_v6 = vpop.f32.mrf.mxu3  ;;  %v888_v36 = vmul.f32 %v856_v21, %v1581_v10 }
  0xc0   : > { %v849_v8 = vadd.f32 0.5, %v817_v2  ;;  %v1628_v9 = vadd.f32 %v1553_v24, %v577_v5  ;;  %v1631_v12 = vadd.f32 %v1553_v24, %v597_v6  ;;  %v539_v13 = vpop.f32.mrf.mxu0  ;;  %v559_v14 = vpop.f32.mrf.mxu1  ;;  %v896_v43 = vmul.f32 %v864_v30, %v1584_v11 }
  0xc1   : > { %v873_v18 = vmul.f32 %v841_v4, %v1587_v16  ;;  %v1636_v53 = vadd.f32 %v1553_v24, %v539_v13  ;;  %v1639_v19 = vadd.f32 %v1553_v24, %v559_v14 }
  0xc2   : > { %v1365_v20 = vpop.eup %1364  ;;  %v881_v22 = vmul.f32 %v849_v8, %v1590_v17  ;;  %v762_v23 = vmul.f32 0.5, %v1628_v9  ;;  %v770_v25 = vmul.f32 0.5, %v1631_v12 }
  0xc3   : > { %v1367_v26 = vpop.eup %1366  ;;  %v1206_v54 = vpack.c.bf16 %v873_v18, %v872_v3  ;;  %v825_v27 = vmul.f32 0.5, %v1365_v20  ;;  %v747_v16 = vmul.f32 0.5, %v1636_v53  ;;  %v755_v28 = vmul.f32 0.5, %v1639_v19 }
  0xc4   : > { %v1369_v29 = vpop.eup %1368  ;;  %v1226_v31 = vpack.c.bf16 %v881_v22, %v880_v15  ;;  %v833_v32 = vmul.f32 0.5, %v1367_v26  ;;  %1372 = vtanh.f32 %v762_v23 }
  0xc5   : > { %v1371_v35 = vpop.eup %1370  ;;  %1278 = vst [vmem:[%s1597_s8 + $0x8] sm:$0xff] %v1206_v54   ;;  %v857_v17 = vadd.f32 0.5, %v825_v27  ;;  %1374 = vtanh.f32 %v770_v25  ;;  %v810_v39 = vmul.f32 0.5, %v1369_v29 }
  0xc6   : > { %1282 = vst [vmem:[%s1597_s8 + $0x28] sm:$0xff] %v1226_v31   ;;  %v865_v37 = vadd.f32 0.5, %v833_v32  ;;  %1376 = vtanh.f32 %v747_v16  ;;  %v818_v40 = vmul.f32 0.5, %v1371_v35 }
  0xc7   : > { %v889_v38 = vmul.f32 %v857_v17, %v1609_v45  ;;  %1378 = vtanh.f32 %v755_v28  ;;  %v579_v41 = vpop.f32.mrf.mxu2  ;;  %v599_v42 = vpop.f32.mrf.mxu3  ;;  %v842_v57 = vadd.f32 0.5, %v810_v39 }
  0xc8   : > { %v897_v44 = vmul.f32 %v865_v37, %v1612_v46  ;;  %v1653_v47 = vadd.f32 %v1553_v24, %v579_v41  ;;  %v1656_v10 = vadd.f32 %v1553_v24, %v599_v42  ;;  %v542_v50 = vpop.f32.mrf.mxu0  ;;  %v562_v33 = vpop.f32.mrf.mxu1  ;;  %v850_v58 = vadd.f32 0.5, %v818_v40 }
  0xc9   : > { %v1246_v45 = vpack.c.bf16 %v889_v38, %v888_v36  ;;  %v1659_v48 = vadd.f32 %v1553_v24, %v542_v50  ;;  %v1662_v34 = vadd.f32 %v1553_v24, %v562_v33  ;;  %v874_v2 = vmul.f32 %v842_v57, %v1615_v51 }
  0xca   : > { %v1373_v55 = vpop.eup %1372  ;;  %v1266_v11 = vpack.c.bf16 %v897_v44, %v896_v43  ;;  %v763_v46 = vmul.f32 0.5, %v1653_v47  ;;  %v771_v49 = vmul.f32 0.5, %v1656_v10  ;;  %v882_v3 = vmul.f32 %v850_v58, %v1618_v52 }
  0xcb   : > { %v1375_v56 = vpop.eup %1374  ;;  %1286 = vst [vmem:[%s1597_s8 + $0x48] sm:$0xff] %v1246_v45   ;;  %v748_v60 = vmul.f32 0.5, %v1659_v48  ;;  %v756_v63 = vmul.f32 0.5, %v1662_v34  ;;  %v826_v0 = vmul.f32 0.5, %v1373_v55 }
  0xcc   : > { %v1377_v59 = vpop.eup %1376  ;;  %1290 = vst [vmem:[%s1597_s8 + $0x68] sm:$0xff] %v1266_v11   ;;  %1380 = vtanh.f32 %v763_v46  ;;  %v834_v4 = vmul.f32 0.5, %v1375_v56 }
  0xcd   : > { %v1379_v61 = vpop.eup %1378  ;;  %v811_v62 = vmul.f32 0.5, %v1377_v59  ;;  %1382 = vtanh.f32 %v771_v49  ;;  %v858_v22 = vadd.f32 0.5, %v826_v0 }
  0xce   : > { %v819_v1 = vmul.f32 0.5, %v1379_v61  ;;  %1384 = vtanh.f32 %v748_v60  ;;  %v866_v29 = vadd.f32 0.5, %v834_v4 }
  0xcf   : > { %v843_v5 = vadd.f32 0.5, %v811_v62  ;;  %v582_v6 = vpop.f32.mrf.mxu2  ;;  %v602_v7 = vpop.f32.mrf.mxu3  ;;  %1386 = vtanh.f32 %v756_v63  ;;  %v890_v36 = vmul.f32 %v858_v22, %v1628_v9 }
  0xd0   : > { %v851_v8 = vadd.f32 0.5, %v819_v1  ;;  %v1673_v13 = vadd.f32 %v1553_v24, %v582_v6  ;;  %v1676_v14 = vadd.f32 %v1553_v24, %v602_v7  ;;  %v544_v15 = vpop.f32.mrf.mxu0  ;;  %v564_v18 = vpop.f32.mrf.mxu1  ;;  %v898_v40 = vmul.f32 %v866_v29, %v1631_v12 }
  0xd1   : > { %v875_v20 = vmul.f32 %v843_v5, %v1636_v53  ;;  %v717_v51 = vadd.f32 %v1553_v24, %v544_v15  ;;  %v725_v52 = vadd.f32 %v1553_v24, %v564_v18 }
  0xd2   : > { %v1381_v21 = vpop.eup %1380  ;;  %v883_v23 = vmul.f32 %v851_v8, %v1639_v19  ;;  %v764_v25 = vmul.f32 0.5, %v1673_v13  ;;  %v772_v26 = vmul.f32 0.5, %v1676_v14 }
  0xd3   : > { %v1383_v54 = vpop.eup %1382  ;;  %v1211_v27 = vpack.c.bf16 %v875_v20, %v874_v2  ;;  %v827_v16 = vmul.f32 0.5, %v1381_v21  ;;  %v749_v28 = vmul.f32 0.5, %v717_v51  ;;  %v757_v53 = vmul.f32 0.5, %v725_v52 }
  0xd4   : > { %v1231_v30 = vpack.c.bf16 %v883_v23, %v882_v3  ;;  %v835_v31 = vmul.f32 0.5, %v1383_v54  ;;  %1388 = vtanh.f32 %v764_v25  ;;  %v1385_v35 = vpop.eup %1384 }
  0xd5   : > { %1279 = vst [vmem:[%s1597_s8 + $0x10] sm:$0xff] %v1211_v27   ;;  %v859_v32 = vadd.f32 0.5, %v827_v16  ;;  %1390 = vtanh.f32 %v772_v26  ;;  %v1387_v17 = vpop.eup %1386  ;;  %v812_v50 = vmul.f32 0.5, %v1385_v35 }
  0xd6   : > { %1283 = vst [vmem:[%s1597_s8 + $0x30] sm:$0xff] %v1231_v30   ;;  %v867_v19 = vadd.f32 0.5, %v835_v31  ;;  %1392 = vtanh.f32 %v749_v28  ;;  %v820_v9 = vmul.f32 0.5, %v1387_v17 }
  0xd7   : > { %v891_v37 = vmul.f32 %v859_v32, %v1653_v47  ;;  %1394 = vtanh.f32 %v757_v53  ;;  %v584_v38 = vpop.f32.mrf.mxu2  ;;  %v604_v39 = vpop.f32.mrf.mxu3  ;;  %v844_v12 = vadd.f32 0.5, %v812_v50 }
  0xd8   : > { %v899_v41 = vmul.f32 %v867_v19, %v1656_v10  ;;  %v733_v42 = vadd.f32 %v1553_v24, %v584_v38  ;;  %v741_v43 = vadd.f32 %v1553_v24, %v604_v39  ;;  %v852_v10 = vadd.f32 0.5, %v820_v9 }
  0xd9   : > { %v1251_v44 = vpack.c.bf16 %v891_v37, %v890_v36  ;;  %v876_v61 = vmul.f32 %v844_v12, %v1659_v48 }
  0xda   : > { %v1389_v33 = vpop.eup %1388  ;;  %v1271_v45 = vpack.c.bf16 %v899_v41, %v898_v40  ;;  %v765_v55 = vmul.f32 0.5, %v733_v42  ;;  %v773_v47 = vmul.f32 0.5, %v741_v43  ;;  %v884_v0 = vmul.f32 %v852_v10, %v1662_v34 }
  0xdb   : > { %v1391_v11 = vpop.eup %1390  ;;  %1287 = vst [vmem:[%s1597_s8 + $0x50] sm:$0xff] %v1251_v44   ;;  %v828_v58 = vmul.f32 0.5, %v1389_v33 }
  0xdc   : > { %v1393_v46 = vpop.eup %1392  ;;  %1291 = vst [vmem:[%s1597_s8 + $0x70] sm:$0xff] %v1271_v45   ;;  %1396 = vtanh.f32 %v765_v55  ;;  %v836_v59 = vmul.f32 0.5, %v1391_v11 }
  0xdd   : > { %v1395_v49 = vpop.eup %1394  ;;  %v813_v56 = vmul.f32 0.5, %v1393_v46  ;;  %1398 = vtanh.f32 %v773_v47  ;;  %v860_v3 = vadd.f32 0.5, %v828_v58 }
  0xde   : > { %v821_v57 = vmul.f32 0.5, %v1395_v49  ;;  %v868_v6 = vadd.f32 0.5, %v836_v59 }
  0xdf   : > { %v845_v24 = vadd.f32 0.5, %v813_v56  ;;  %v892_v48 = vmul.f32 %v860_v3, %v1673_v13 }
  0xe0   : > { %v853_v60 = vadd.f32 0.5, %v821_v57 }
  0xe1   : > { %v877_v62 = vmul.f32 %v845_v24, %v717_v51  ;;  %v900_v51 = vmul.f32 %v868_v6, %v1676_v14 }
  0xe2   : > { %v1397_v63 = vpop.eup %1396  ;;  %v885_v1 = vmul.f32 %v853_v60, %v725_v52 }
  0xe3   : > { %v1399_v2 = vpop.eup %1398  ;;  %v1216_v4 = vpack.c.bf16 %v877_v62, %v876_v61  ;;  %v829_v5 = vmul.f32 0.5, %v1397_v63 }
  0xe4   : > { %v1236_v7 = vpack.c.bf16 %v885_v1, %v884_v0  ;;  %v837_v8 = vmul.f32 0.5, %v1399_v2 }
  0xe5   : > { %1280 = vst [vmem:[%s1597_s8 + $0x18] sm:$0xff] %v1216_v4   ;;  %v861_v15 = vadd.f32 0.5, %v829_v5 }
  0xe6   : > { %1284 = vst [vmem:[%s1597_s8 + $0x38] sm:$0xff] %v1236_v7   ;;  %v869_v18 = vadd.f32 0.5, %v837_v8 }
  0xe7   : > { %v893_v20 = vmul.f32 %v861_v15, %v733_v42 }
  0xe8   : > { %v901_v34 = vmul.f32 %v869_v18, %v741_v43 }
  0xe9   : > { %v1256_v52 = vpack.c.bf16 %v893_v20, %v892_v48 }
  0xea   : > { %v1276_v21 = vpack.c.bf16 %v901_v34, %v900_v51 }
  0xeb   : > { %1288 = vst [vmem:[%s1597_s8 + $0x58] sm:$0xff] %v1256_v52  }
  0xec   : > { %1292 = vst [vmem:[%s1597_s8 + $0x78] sm:$0xff] %v1276_v21  }
  0xed PF: > { %s14_s14 = sadd.s32 1, %s1456_s14   ;;  %s1715_s12 = smov %s1452_s13 }
  0xee   : > { %p11_p8 = scmp.ge.s32.totalorder %s14_s14, 4   ;;  %s1716_s13 = smov %s1718_s16 }
  0xf0   :  { %13 = sbr.rel (!%p11_p8) target bundleno = 2 (0x2), region = 79 }
  0xf5   :  { %994 = vsyncpa [#allocation4], 1 }
  0xf6   :  { %996 = vsyncpa [#allocation4 + $0x1], 1 }

// kernel: efficientnetv2_forward.18
= control target key start
LH: loop header
LB: loop body
LE: loop exit
PB: predicated region body
PF: predicated region fallthrough
CT: control target
= control target key end

     0   :  { %s1425_s12 = smov 0   ;;  %s1427_s13 = smov 0   ;;  %s1655_s0 = inlined_call_operand.vmem [shape: bf16[512,27], index: 0, kind: input, shape index: {}]   ;;  %s1656_s1 = inlined_call_operand.vmem [shape: bf16[27,128], index: 1, kind: input, shape index: {}]   ;;  %s1657_s2 = inlined_call_operand.vmem [shape: f32[1,128], index: 2, kind: input, shape index: {}]   ;;  %s1658_s3 = inlined_call_operand.vmem [shape: bf16[512,128], index: 3, kind: output, shape index: {}]  }
   0x1   :  { %s1429_s14 = smov 0  }
   0x2 LB: > { %s32_s15 = sadd.s32 1, %s1398_s13  ;;  %p1076_p0 = scmp.ge.s32.totalorder %s1402_s14, 1  ;;  %s1402_s14 = sphi %s1429_s14, %s13_s14   ;;  %s1398_s13 = sphi %s1427_s13, %s1660_s13   ;;  %s1394_s12 = sphi %s1425_s12, %s1659_s12  }
   0x3   : > { %p34_p1 = scmp.ge.s32.totalorder %s32_s15, 2  ;;  %p188_p2 = scmp.lt.s32.totalorder %s1402_s14, 3 }
   0x5   : > { %s1662_s15 = smov (%p34_p1, %s32_s15), 0  ;;  %p189_p3 = pnand %p1076_p0, %p188_p2 }
   0x6   : > { %s1077_s20 = sshll.u32 (!%p189_p3), %s1394_s12, 5 }
   0x7   : > { %192 = sbr.rel (%p189_p3) target bundleno = 235 (0xeb), region = 32  ;;  %p230_p4 = scmp.lt.s32.totalorder (!%p189_p3), %s1077_s20, 63 }
   0xc   : > { %v1151_v0 = vld [vmem:[%s1656_s1 + $0x8] sm:$0xf]  ;;  %v1188_v1 = vld [vmem:[%s1656_s1 + $0x8] sm:$0x30]  ;;  %vm504_vm0 = vcmask 1044480   ;;  %vm505_vm1 = vcmask 1045504  }
   0xd   : > { %v1152_v2 = vor.u32 %v1188_v1, %v1151_v0  ;;  %v1404_v3 = vmov 65535   ;;  %s1664_s20 = smov (!%p230_p4, %s1077_s20), 63  ;;  %v1187_v7 = vld [vmem:[%s1656_s1] sm:$0xff]  ;;  %vm455_vm2 = vcmask 220160  }
   0xe   : > { %v506_v4 = vsel %vm504_vm0, 4294967295, %v1404_v3  ;;  %s1078_s23 = sshll.u32 %s1664_s20, 2  ;;  %v1497_v24 = vld [vmem:[%s1657_s2] ss:$0 sm:$0xff] }
   0xf   : > { %v507_v5 = vsel %vm505_vm1, %v506_v4, 0  ;;  %s1460_s26 = scalar_lea.vmem %s1655_s0, %s1078_s23  ;;  %s1541_s4 = scalar_lea.vmem %s1658_s3, %s1078_s23 }
  0x10   : > { %v509_v6 = vand.u32 %v1152_v2, %v507_v5  ;;  %v1171_v8 = vld [vmem:[%s1460_s26] sm:$0xff]  ;;  %v1172_v12 = vld [vmem:[%s1460_s26 + $0x8] sm:$0xff]  ;;  %v1173_v16 = vld [vmem:[%s1460_s26 + $0x10] sm:$0xff] }
  0x11   : > { %v1175_v9 = vld [vmem:[%s1460_s26 + $0x20] sm:$0xff]  ;;  %v1176_v13 = vld [vmem:[%s1460_s26 + $0x28] sm:$0xff]  ;;  %v1177_v17 = vld [vmem:[%s1460_s26 + $0x30] sm:$0xff] }
  0x12   : > { %517 = vmatpush.bf16.msra.mxu0 %v509_v6  ;;  %1284 = vmatpush.bf16.msra.mxu1 %v509_v6  ;;  %v1179_v10 = vld [vmem:[%s1460_s26 + $0x40] sm:$0xff]  ;;  %v1180_v14 = vld [vmem:[%s1460_s26 + $0x48] sm:$0xff]  ;;  %v1181_v18 = vld [vmem:[%s1460_s26 + $0x50] sm:$0xff] }
  0x13   : > { %1285 = vmatpush.bf16.msra.mxu2 %v509_v6  ;;  %1286 = vmatpush.bf16.msra.mxu3 %v509_v6  ;;  %v1183_v11 = vld [vmem:[%s1460_s26 + $0x60] sm:$0xff]  ;;  %v1184_v15 = vld [vmem:[%s1460_s26 + $0x68] sm:$0xff]  ;;  %v1185_v19 = vld [vmem:[%s1460_s26 + $0x70] sm:$0xff] }
  0x14   : > { %v1174_v20 = vld [vmem:[%s1460_s26 + $0x18] sm:$0xff] }
  0x15   : > { %v1178_v21 = vld [vmem:[%s1460_s26 + $0x38] sm:$0xff] }
  0x16   : > { %518 = vmatpush.bf16.msra.mxu0 %v1187_v7  ;;  %1287 = vmatpush.bf16.msra.mxu1 %v1187_v7  ;;  %v1182_v22 = vld [vmem:[%s1460_s26 + $0x58] sm:$0xff] }
  0x17   : > { %1288 = vmatpush.bf16.msra.mxu2 %v1187_v7  ;;  %1289 = vmatpush.bf16.msra.mxu3 %v1187_v7  ;;  %v1186_v23 = vld [vmem:[%s1460_s26 + $0x78] sm:$0xff] }
  0x19   : > { %1153 = vmatmul.msk.bf16.vlgmr.msra.gmra.mxu0 %vm455_vm2, %v1171_v8  ;;  %1157 = vmatmul.msk.bf16.vlgmr.msra.gmra.mxu1 %vm455_vm2, %v1175_v9 }
  0x1a   : > { %1161 = vmatmul.msk.bf16.vlgmr.msra.gmra.mxu2 %vm455_vm2, %v1179_v10  ;;  %1165 = vmatmul.msk.bf16.vlgmr.msra.gmra.mxu3 %vm455_vm2, %v1183_v11 }
  0x29   : > { %1154 = vmatmul.msk.bf16.gmra.mxu0 %vm455_vm2, %v1172_v12  ;;  %1158 = vmatmul.msk.bf16.gmra.mxu1 %vm455_vm2, %v1176_v13 }
  0x2a   : > { %1162 = vmatmul.msk.bf16.gmra.mxu2 %vm455_vm2, %v1180_v14  ;;  %1166 = vmatmul.msk.bf16.gmra.mxu3 %vm455_vm2, %v1184_v15 }
  0x39   : > { %1155 = vmatmul.msk.bf16.gmra.mxu0 %vm455_vm2, %v1173_v16  ;;  %1159 = vmatmul.msk.bf16.gmra.mxu1 %vm455_vm2, %v1177_v17 }
  0x3a   : > { %1163 = vmatmul.msk.bf16.gmra.mxu2 %vm455_vm2, %v1181_v18  ;;  %1167 = vmatmul.msk.bf16.gmra.mxu3 %vm455_vm2, %v1185_v19 }
  0x49   : > { %1156 = vmatmul.msk.bf16.gmra.mxu0 %vm455_vm2, %v1174_v20  ;;  %1160 = vmatmul.msk.bf16.gmra.mxu1 %vm455_vm2, %v1178_v21 }
  0x4a   : > { %1164 = vmatmul.msk.bf16.gmra.mxu2 %vm455_vm2, %v1182_v22  ;;  %1168 = vmatmul.msk.bf16.gmra.mxu3 %vm455_vm2, %v1186_v23 }
  0x96   : > { %v520_v25 = vpop.f32.mrf.mxu0  ;;  %v540_v26 = vpop.f32.mrf.mxu1 }
  0x97   : > { %v703_v27 = vadd.f32 %v1497_v24, %v520_v25  ;;  %v711_v28 = vadd.f32 %v1497_v24, %v540_v26 }
  0x99   : > { %v735_v29 = vmul.f32 0.5, %v703_v27  ;;  %v743_v30 = vmul.f32 0.5, %v711_v28 }
  0x9b   : > { %1316 = vtanh.f32 %v735_v29 }
  0x9c   : > { %1318 = vtanh.f32 %v743_v30 }
  0x9d   : > { %v560_v31 = vpop.f32.mrf.mxu2  ;;  %v580_v32 = vpop.f32.mrf.mxu3 }
  0x9e   : > { %v1502_v33 = vadd.f32 %v1497_v24, %v560_v31  ;;  %v1505_v34 = vadd.f32 %v1497_v24, %v580_v32  ;;  %v522_v35 = vpop.f32.mrf.mxu0  ;;  %v542_v36 = vpop.f32.mrf.mxu1 }
  0x9f   : > { %v704_v37 = vadd.f32 %v1497_v24, %v522_v35  ;;  %v712_v38 = vadd.f32 %v1497_v24, %v542_v36 }
  0xa0   : > { %v751_v39 = vmul.f32 0.5, %v1502_v33  ;;  %v759_v40 = vmul.f32 0.5, %v1505_v34 }
  0xa1   : > { %v736_v41 = vmul.f32 0.5, %v704_v37  ;;  %v744_v42 = vmul.f32 0.5, %v712_v38  ;;  %v1317_v43 = vpop.eup %1316 }
  0xa2   : > { %1320 = vtanh.f32 %v751_v39  ;;  %v1319_v44 = vpop.eup %1318  ;;  %v799_v45 = vmul.f32 0.5, %v1317_v43 }
  0xa3   : > { %1322 = vtanh.f32 %v759_v40  ;;  %v807_v52 = vmul.f32 0.5, %v1319_v44 }
  0xa4   : > { %1324 = vtanh.f32 %v736_v41  ;;  %v831_v59 = vadd.f32 0.5, %v799_v45 }
  0xa5   : > { %1326 = vtanh.f32 %v744_v42  ;;  %v562_v46 = vpop.f32.mrf.mxu2  ;;  %v582_v47 = vpop.f32.mrf.mxu3  ;;  %v839_v0 = vadd.f32 0.5, %v807_v52 }
  0xa6   : > { %v720_v48 = vadd.f32 %v1497_v24, %v562_v46  ;;  %v1513_v49 = vadd.f32 %v1497_v24, %v582_v47  ;;  %v525_v50 = vpop.f32.mrf.mxu0  ;;  %v545_v51 = vpop.f32.mrf.mxu1  ;;  %v863_v4 = vmul.f32 %v831_v59, %v703_v27 }
  0xa7   : > { %v1516_v53 = vadd.f32 %v1497_v24, %v525_v50  ;;  %v1519_v54 = vadd.f32 %v1497_v24, %v545_v51  ;;  %v871_v14 = vmul.f32 %v839_v0, %v711_v28 }
  0xa8   : > { %v1321_v55 = vpop.eup %1320  ;;  %v752_v56 = vmul.f32 0.5, %v720_v48  ;;  %v760_v57 = vmul.f32 0.5, %v1513_v49 }
  0xa9   : > { %v1323_v58 = vpop.eup %1322  ;;  %v737_v60 = vmul.f32 0.5, %v1516_v53  ;;  %v745_v62 = vmul.f32 0.5, %v1519_v54  ;;  %v815_v2 = vmul.f32 0.5, %v1321_v55 }
  0xaa   : > { %v1325_v61 = vpop.eup %1324  ;;  %1328 = vtanh.f32 %v752_v56  ;;  %v823_v5 = vmul.f32 0.5, %v1323_v58 }
  0xab   : > { %v1327_v63 = vpop.eup %1326  ;;  %v800_v1 = vmul.f32 0.5, %v1325_v61  ;;  %1330 = vtanh.f32 %v760_v57  ;;  %v847_v19 = vadd.f32 0.5, %v815_v2 }
  0xac   : > { %v808_v3 = vmul.f32 0.5, %v1327_v63  ;;  %1332 = vtanh.f32 %v737_v60  ;;  %v855_v30 = vadd.f32 0.5, %v823_v5 }
  0xad   : > { %v832_v6 = vadd.f32 0.5, %v800_v1  ;;  %v565_v7 = vpop.f32.mrf.mxu2  ;;  %v585_v8 = vpop.f32.mrf.mxu3  ;;  %1334 = vtanh.f32 %v745_v62 }
  0xae   : > { %v840_v9 = vadd.f32 0.5, %v808_v3  ;;  %v1525_v10 = vadd.f32 %v1497_v24, %v565_v7  ;;  %v1528_v11 = vadd.f32 %v1497_v24, %v585_v8  ;;  %v527_v12 = vpop.f32.mrf.mxu0  ;;  %v547_v13 = vpop.f32.mrf.mxu1  ;;  %v887_v43 = vmul.f32 %v855_v30, %v1505_v34 }
  0xaf   : > { %v864_v15 = vmul.f32 %v832_v6, %v704_v37  ;;  %v1531_v16 = vadd.f32 %v1497_v24, %v527_v12  ;;  %v1534_v17 = vadd.f32 %v1497_v24, %v547_v13 }
  0xb0   : > { %v1329_v18 = vpop.eup %1328  ;;  %v872_v20 = vmul.f32 %v840_v9, %v712_v38  ;;  %v753_v21 = vmul.f32 0.5, %v1525_v10  ;;  %v761_v22 = vmul.f32 0.5, %v1528_v11  ;;  %v879_v38 = vmul.f32 %v847_v19, %v1502_v33 }
  0xb1   : > { %v1331_v23 = vpop.eup %1330  ;;  %v1192_v25 = vpack.c.bf16 %v864_v15, %v863_v4  ;;  %v816_v26 = vmul.f32 0.5, %v1329_v18  ;;  %v738_v27 = vmul.f32 0.5, %v1531_v16  ;;  %v746_v28 = vmul.f32 0.5, %v1534_v17 }
  0xb2   : > { %v1333_v29 = vpop.eup %1332  ;;  %v1212_v31 = vpack.c.bf16 %v872_v20, %v871_v14  ;;  %v824_v32 = vmul.f32 0.5, %v1331_v23  ;;  %1336 = vtanh.f32 %v753_v21 }
  0xb3   : > { %1193 = vst [vmem:[%s1541_s4] sm:$0xff] %v1192_v25   ;;  %v848_v35 = vadd.f32 0.5, %v816_v26  ;;  %1338 = vtanh.f32 %v761_v22  ;;  %v1335_v36 = vpop.eup %1334  ;;  %v801_v40 = vmul.f32 0.5, %v1333_v29 }
  0xb4   : > { %1272 = vst [vmem:[%s1541_s4 + $0x20] sm:$0xff] %v1212_v31   ;;  %v856_v37 = vadd.f32 0.5, %v824_v32  ;;  %1340 = vtanh.f32 %v738_v27 }
  0xb5   : > { %v880_v39 = vmul.f32 %v848_v35, %v720_v48  ;;  %1342 = vtanh.f32 %v746_v28  ;;  %v567_v41 = vpop.f32.mrf.mxu2  ;;  %v587_v42 = vpop.f32.mrf.mxu3  ;;  %v809_v48 = vmul.f32 0.5, %v1335_v36  ;;  %v833_v58 = vadd.f32 0.5, %v801_v40 }
  0xb6   : > { %v888_v44 = vmul.f32 %v856_v37, %v1513_v49  ;;  %v1553_v45 = vadd.f32 %v1497_v24, %v567_v41  ;;  %v1556_v46 = vadd.f32 %v1497_v24, %v587_v42  ;;  %v530_v47 = vpop.f32.mrf.mxu0  ;;  %v550_v50 = vpop.f32.mrf.mxu1 }
  0xb7   : > { %v1232_v33 = vpack.c.bf16 %v880_v39, %v879_v38  ;;  %v1559_v51 = vadd.f32 %v1497_v24, %v530_v47  ;;  %v1562_v52 = vadd.f32 %v1497_v24, %v550_v50  ;;  %v841_v63 = vadd.f32 0.5, %v809_v48 }
  0xb8   : > { %v1337_v34 = vpop.eup %1336  ;;  %v1252_v55 = vpack.c.bf16 %v888_v44, %v887_v43  ;;  %v754_v49 = vmul.f32 0.5, %v1553_v45  ;;  %v762_v56 = vmul.f32 0.5, %v1556_v46  ;;  %v865_v3 = vmul.f32 %v833_v58, %v1516_v53 }
  0xb9   : > { %v1339_v57 = vpop.eup %1338  ;;  %1276 = vst [vmem:[%s1541_s4 + $0x40] sm:$0xff] %v1232_v33   ;;  %v739_v59 = vmul.f32 0.5, %v1559_v51  ;;  %v747_v60 = vmul.f32 0.5, %v1562_v52  ;;  %v817_v1 = vmul.f32 0.5, %v1337_v34  ;;  %v873_v15 = vmul.f32 %v841_v63, %v1519_v54 }
  0xba   : > { %v1341_v61 = vpop.eup %1340  ;;  %1280 = vst [vmem:[%s1541_s4 + $0x60] sm:$0xff] %v1252_v55   ;;  %1344 = vtanh.f32 %v754_v49  ;;  %v825_v7 = vmul.f32 0.5, %v1339_v57 }
  0xbb   : > { %v1343_v62 = vpop.eup %1342  ;;  %v802_v0 = vmul.f32 0.5, %v1341_v61  ;;  %1346 = vtanh.f32 %v762_v56  ;;  %v849_v21 = vadd.f32 0.5, %v817_v1 }
  0xbc   : > { %v810_v2 = vmul.f32 0.5, %v1343_v62  ;;  %1348 = vtanh.f32 %v739_v59  ;;  %v857_v30 = vadd.f32 0.5, %v825_v7 }
  0xbd   : > { %v834_v4 = vadd.f32 0.5, %v802_v0  ;;  %1350 = vtanh.f32 %v747_v60  ;;  %v570_v5 = vpop.f32.mrf.mxu2  ;;  %v590_v6 = vpop.f32.mrf.mxu3  ;;  %v881_v36 = vmul.f32 %v849_v21, %v1525_v10 }
  0xbe   : > { %v842_v8 = vadd.f32 0.5, %v810_v2  ;;  %v1572_v9 = vadd.f32 %v1497_v24, %v570_v5  ;;  %v1575_v12 = vadd.f32 %v1497_v24, %v590_v6  ;;  %v532_v13 = vpop.f32.mrf.mxu0  ;;  %v552_v14 = vpop.f32.mrf.mxu1  ;;  %v889_v43 = vmul.f32 %v857_v30, %v1528_v11 }
  0xbf   : > { %v866_v18 = vmul.f32 %v834_v4, %v1531_v16  ;;  %v1580_v53 = vadd.f32 %v1497_v24, %v532_v13  ;;  %v1583_v19 = vadd.f32 %v1497_v24, %v552_v14 }
  0xc0   : > { %v1345_v20 = vpop.eup %1344  ;;  %v874_v22 = vmul.f32 %v842_v8, %v1534_v17  ;;  %v755_v23 = vmul.f32 0.5, %v1572_v9  ;;  %v763_v25 = vmul.f32 0.5, %v1575_v12 }
  0xc1   : > { %v1347_v26 = vpop.eup %1346  ;;  %v1197_v54 = vpack.c.bf16 %v866_v18, %v865_v3  ;;  %v818_v27 = vmul.f32 0.5, %v1345_v20  ;;  %v740_v16 = vmul.f32 0.5, %v1580_v53  ;;  %v748_v28 = vmul.f32 0.5, %v1583_v19 }
  0xc2   : > { %v1349_v29 = vpop.eup %1348  ;;  %v1217_v31 = vpack.c.bf16 %v874_v22, %v873_v15  ;;  %v826_v32 = vmul.f32 0.5, %v1347_v26  ;;  %1352 = vtanh.f32 %v755_v23 }
  0xc3   : > { %v1351_v35 = vpop.eup %1350  ;;  %1269 = vst [vmem:[%s1541_s4 + $0x8] sm:$0xff] %v1197_v54   ;;  %v850_v17 = vadd.f32 0.5, %v818_v27  ;;  %1354 = vtanh.f32 %v763_v25  ;;  %v803_v39 = vmul.f32 0.5, %v1349_v29 }
  0xc4   : > { %1273 = vst [vmem:[%s1541_s4 + $0x28] sm:$0xff] %v1217_v31   ;;  %v858_v37 = vadd.f32 0.5, %v826_v32  ;;  %1356 = vtanh.f32 %v740_v16  ;;  %v811_v40 = vmul.f32 0.5, %v1351_v35 }
  0xc5   : > { %v882_v38 = vmul.f32 %v850_v17, %v1553_v45  ;;  %1358 = vtanh.f32 %v748_v28  ;;  %v572_v41 = vpop.f32.mrf.mxu2  ;;  %v592_v42 = vpop.f32.mrf.mxu3  ;;  %v835_v57 = vadd.f32 0.5, %v803_v39 }
  0xc6   : > { %v890_v44 = vmul.f32 %v858_v37, %v1556_v46  ;;  %v1597_v47 = vadd.f32 %v1497_v24, %v572_v41  ;;  %v1600_v10 = vadd.f32 %v1497_v24, %v592_v42  ;;  %v535_v50 = vpop.f32.mrf.mxu0  ;;  %v555_v33 = vpop.f32.mrf.mxu1  ;;  %v843_v58 = vadd.f32 0.5, %v811_v40 }
  0xc7   : > { %v1237_v45 = vpack.c.bf16 %v882_v38, %v881_v36  ;;  %v1603_v48 = vadd.f32 %v1497_v24, %v535_v50  ;;  %v1606_v34 = vadd.f32 %v1497_v24, %v555_v33  ;;  %v867_v2 = vmul.f32 %v835_v57, %v1559_v51 }
  0xc8   : > { %v1353_v55 = vpop.eup %1352  ;;  %v1257_v11 = vpack.c.bf16 %v890_v44, %v889_v43  ;;  %v756_v46 = vmul.f32 0.5, %v1597_v47  ;;  %v764_v49 = vmul.f32 0.5, %v1600_v10  ;;  %v875_v3 = vmul.f32 %v843_v58, %v1562_v52 }
  0xc9   : > { %v1355_v56 = vpop.eup %1354  ;;  %1277 = vst [vmem:[%s1541_s4 + $0x48] sm:$0xff] %v1237_v45   ;;  %v741_v60 = vmul.f32 0.5, %v1603_v48  ;;  %v749_v63 = vmul.f32 0.5, %v1606_v34  ;;  %v819_v0 = vmul.f32 0.5, %v1353_v55 }
  0xca   : > { %v1357_v59 = vpop.eup %1356  ;;  %1281 = vst [vmem:[%s1541_s4 + $0x68] sm:$0xff] %v1257_v11   ;;  %1360 = vtanh.f32 %v756_v46  ;;  %v827_v4 = vmul.f32 0.5, %v1355_v56 }
  0xcb   : > { %v1359_v61 = vpop.eup %1358  ;;  %v804_v62 = vmul.f32 0.5, %v1357_v59  ;;  %1362 = vtanh.f32 %v764_v49  ;;  %v851_v22 = vadd.f32 0.5, %v819_v0 }
  0xcc   : > { %v812_v1 = vmul.f32 0.5, %v1359_v61  ;;  %1364 = vtanh.f32 %v741_v60  ;;  %v859_v29 = vadd.f32 0.5, %v827_v4 }
  0xcd   : > { %v836_v5 = vadd.f32 0.5, %v804_v62  ;;  %v575_v6 = vpop.f32.mrf.mxu2  ;;  %v595_v7 = vpop.f32.mrf.mxu3  ;;  %1366 = vtanh.f32 %v749_v63  ;;  %v883_v36 = vmul.f32 %v851_v22, %v1572_v9 }
  0xce   : > { %v844_v8 = vadd.f32 0.5, %v812_v1  ;;  %v1617_v13 = vadd.f32 %v1497_v24, %v575_v6  ;;  %v1620_v14 = vadd.f32 %v1497_v24, %v595_v7  ;;  %v537_v15 = vpop.f32.mrf.mxu0  ;;  %v557_v18 = vpop.f32.mrf.mxu1  ;;  %v891_v40 = vmul.f32 %v859_v29, %v1575_v12 }
  0xcf   : > { %v868_v20 = vmul.f32 %v836_v5, %v1580_v53  ;;  %v710_v51 = vadd.f32 %v1497_v24, %v537_v15  ;;  %v718_v52 = vadd.f32 %v1497_v24, %v557_v18 }
  0xd0   : > { %v1361_v21 = vpop.eup %1360  ;;  %v876_v23 = vmul.f32 %v844_v8, %v1583_v19  ;;  %v757_v25 = vmul.f32 0.5, %v1617_v13  ;;  %v765_v26 = vmul.f32 0.5, %v1620_v14 }
  0xd1   : > { %v1363_v54 = vpop.eup %1362  ;;  %v1202_v27 = vpack.c.bf16 %v868_v20, %v867_v2  ;;  %v820_v16 = vmul.f32 0.5, %v1361_v21  ;;  %v742_v28 = vmul.f32 0.5, %v710_v51  ;;  %v750_v53 = vmul.f32 0.5, %v718_v52 }
  0xd2   : > { %v1222_v30 = vpack.c.bf16 %v876_v23, %v875_v3  ;;  %v828_v31 = vmul.f32 0.5, %v1363_v54  ;;  %1368 = vtanh.f32 %v757_v25  ;;  %v1365_v35 = vpop.eup %1364 }
  0xd3   : > { %1270 = vst [vmem:[%s1541_s4 + $0x10] sm:$0xff] %v1202_v27   ;;  %v852_v32 = vadd.f32 0.5, %v820_v16  ;;  %1370 = vtanh.f32 %v765_v26  ;;  %v1367_v17 = vpop.eup %1366  ;;  %v805_v50 = vmul.f32 0.5, %v1365_v35 }
  0xd4   : > { %1274 = vst [vmem:[%s1541_s4 + $0x30] sm:$0xff] %v1222_v30   ;;  %v860_v19 = vadd.f32 0.5, %v828_v31  ;;  %1372 = vtanh.f32 %v742_v28  ;;  %v813_v9 = vmul.f32 0.5, %v1367_v17 }
  0xd5   : > { %v884_v37 = vmul.f32 %v852_v32, %v1597_v47  ;;  %1374 = vtanh.f32 %v750_v53  ;;  %v577_v38 = vpop.f32.mrf.mxu2  ;;  %v597_v39 = vpop.f32.mrf.mxu3  ;;  %v837_v12 = vadd.f32 0.5, %v805_v50 }
  0xd6   : > { %v892_v41 = vmul.f32 %v860_v19, %v1600_v10  ;;  %v726_v42 = vadd.f32 %v1497_v24, %v577_v38  ;;  %v734_v43 = vadd.f32 %v1497_v24, %v597_v39  ;;  %v845_v10 = vadd.f32 0.5, %v813_v9 }
  0xd7   : > { %v1242_v44 = vpack.c.bf16 %v884_v37, %v883_v36  ;;  %v869_v61 = vmul.f32 %v837_v12, %v1603_v48 }
  0xd8   : > { %v1369_v33 = vpop.eup %1368  ;;  %v1262_v45 = vpack.c.bf16 %v892_v41, %v891_v40  ;;  %v758_v55 = vmul.f32 0.5, %v726_v42  ;;  %v766_v47 = vmul.f32 0.5, %v734_v43  ;;  %v877_v0 = vmul.f32 %v845_v10, %v1606_v34 }
  0xd9   : > { %v1371_v11 = vpop.eup %1370  ;;  %1278 = vst [vmem:[%s1541_s4 + $0x50] sm:$0xff] %v1242_v44   ;;  %v821_v58 = vmul.f32 0.5, %v1369_v33 }
  0xda   : > { %v1373_v46 = vpop.eup %1372  ;;  %1282 = vst [vmem:[%s1541_s4 + $0x70] sm:$0xff] %v1262_v45   ;;  %1376 = vtanh.f32 %v758_v55  ;;  %v829_v59 = vmul.f32 0.5, %v1371_v11 }
  0xdb   : > { %v1375_v49 = vpop.eup %1374  ;;  %v806_v56 = vmul.f32 0.5, %v1373_v46  ;;  %1378 = vtanh.f32 %v766_v47  ;;  %v853_v3 = vadd.f32 0.5, %v821_v58 }
  0xdc   : > { %v814_v57 = vmul.f32 0.5, %v1375_v49  ;;  %v861_v6 = vadd.f32 0.5, %v829_v59 }
  0xdd   : > { %v838_v24 = vadd.f32 0.5, %v806_v56  ;;  %v885_v48 = vmul.f32 %v853_v3, %v1617_v13 }
  0xde   : > { %v846_v60 = vadd.f32 0.5, %v814_v57 }
  0xdf   : > { %v870_v62 = vmul.f32 %v838_v24, %v710_v51  ;;  %v893_v51 = vmul.f32 %v861_v6, %v1620_v14 }
  0xe0   : > { %v1377_v63 = vpop.eup %1376  ;;  %v878_v1 = vmul.f32 %v846_v60, %v718_v52 }
  0xe1   : > { %v1379_v2 = vpop.eup %1378  ;;  %v1207_v4 = vpack.c.bf16 %v870_v62, %v869_v61  ;;  %v822_v5 = vmul.f32 0.5, %v1377_v63 }
  0xe2   : > { %v1227_v7 = vpack.c.bf16 %v878_v1, %v877_v0  ;;  %v830_v8 = vmul.f32 0.5, %v1379_v2 }
  0xe3   : > { %1271 = vst [vmem:[%s1541_s4 + $0x18] sm:$0xff] %v1207_v4   ;;  %v854_v15 = vadd.f32 0.5, %v822_v5 }
  0xe4   : > { %1275 = vst [vmem:[%s1541_s4 + $0x38] sm:$0xff] %v1227_v7   ;;  %v862_v18 = vadd.f32 0.5, %v830_v8 }
  0xe5   : > { %v886_v20 = vmul.f32 %v854_v15, %v726_v42 }
  0xe6   : > { %v894_v34 = vmul.f32 %v862_v18, %v734_v43 }
  0xe7   : > { %v1247_v52 = vpack.c.bf16 %v886_v20, %v885_v48 }
  0xe8   : > { %v1267_v21 = vpack.c.bf16 %v894_v34, %v893_v51 }
  0xe9   : > { %1279 = vst [vmem:[%s1541_s4 + $0x58] sm:$0xff] %v1247_v52  }
  0xea   : > { %1283 = vst [vmem:[%s1541_s4 + $0x78] sm:$0xff] %v1267_v21  }
  0xeb PF: > { %s13_s14 = sadd.s32 1, %s1402_s14   ;;  %s1659_s12 = smov %s1398_s13 }
  0xec   : > { %p10_p5 = scmp.ge.s32.totalorder %s13_s14, 4   ;;  %s1660_s13 = smov %s1662_s15 }
  0xee   :  { %12 = sbr.rel (!%p10_p5) target bundleno = 2 (0x2), region = 76 }

// kernel: efficientnetv2_forward.22
= control target key start
LH: loop header
LB: loop body
LE: loop exit
PB: predicated region body
PF: predicated region fallthrough
CT: control target
= control target key end

     0   :  { %s562_s9 = smov 0   ;;  %s564_s10 = smov 0   ;;  %s623_s0 = inlined_call_operand.vmem [shape: bf16[2,128,128], index: 0, kind: input, shape index: {}, may-alias: {0,1}]   ;;  %s624_s1 = inlined_call_operand.vmem [shape: bf16[2,128,128], index: 1, kind: input, shape index: {}, may-alias: {0,1}]   ;;  %s625_s2 = inlined_call_operand.vmem [shape: bf16[2,128,128], index: 2, kind: output, shape index: {}]  }
   0x1   :  { %s566_s11 = smov 0   ;;  %s568_s12 = smov 0  }
   0x2   :  { %s570_s13 = smov 0  }
   0x3 LB: > { %s21_s14 = sadd.s32 1, %s537_s11  ;;  %s24_s15 = sadd.s32 1, %s541_s12  ;;  %s545_s13 = sphi %s570_s13, %s12_s13   ;;  %s541_s12 = sphi %s568_s12, %s629_s12   ;;  %s537_s11 = sphi %s566_s11, %s628_s11   ;;  %s533_s10 = sphi %s564_s10, %s627_s10   ;;  %s529_s9 = sphi %s562_s9, %s626_s9  }
   0x4   : > { %p22_p0 = scmp.ge.s32.totalorder %s21_s14, 2  ;;  %p394_p1 = scmp.ge.s32.totalorder %s545_s13, 1 }
   0x5   : > { %p154_p2 = scmp.lt.s32.totalorder %s545_s13, 5 }
   0x6   : > { %s631_s14 = smov (%p22_p0, %s21_s14), 0  ;;  %s633_s15 = smov (!%p22_p0, %s24_s15), %s541_s12 }
   0x7   : > { %p155_p3 = pnand %p394_p1, %p154_p2  ;;  %p26_p4 = scmp.ge.s32.totalorder %s633_s15, 2 }
   0x8   : > { %s395_s16 = sshll.u32 (!%p155_p3), %s529_s9, 3  ;;  %p195_p5 = scmp.lt.s32.totalorder (!%p155_p3), %s533_s10, 1 }
   0x9   : > { %s635_s15 = smov (%p26_p4, %s633_s15), 0  ;;  %158 = sbr.rel (%p155_p3) target bundleno = 32 (0x20), region = 28 }
   0xa   : > { %p197_p6 = scmp.lt.s32.totalorder (!%p155_p3), %s395_s16, 15  ;;  %s204_s17 = ssub.s32 (!%p155_p3), 1, %s533_s10 }
   0xb   : > { %p206_p7 = scmp.lt.s32.totalorder (!%p155_p3), %s204_s17, 1 }
   0xe   : > { %s637_s10 = smov (!%p195_p5, %s533_s10), 1  ;;  %s639_s16 = smov (!%p197_p6, %s395_s16), 15 }
   0xf   : > { %s396_s18 = sshll.u32 %s637_s10, 4  ;;  %s641_s17 = smov (!%p206_p7, %s204_s17), 1 }
  0x10   : > { %s592_s19 = sadd.s32 %s396_s18, %s639_s16  ;;  %s399_s24 = sshll.u32 %s641_s17, 4 }
  0x11   : > { %s397_s20 = sshll.u32 %s592_s19, 2  ;;  %s211_s25 = sadd.s32 %s399_s24, %s639_s16 }
  0x12   : > { %s202_s23 = scalar_lea.vmem %s623_s0, %s397_s20  ;;  %s400_s26 = sshll.u32 %s211_s25, 2 }
  0x13   : > { %v407_v0 = vld [vmem:[%s202_s23] sm:$0xff]   ;;  %v458_v1 = vld [vmem:[%s202_s23 + $0x8] sm:$0xff]   ;;  %v459_v2 = vld [vmem:[%s202_s23 + $0x10] sm:$0xff]   ;;  %s213_s29 = scalar_lea.vmem %s624_s1, %s400_s26  ;;  %s224_s4 = scalar_lea.vmem %s625_s2, %s397_s20 }
  0x14   : > { %v460_v3 = vld [vmem:[%s202_s23 + $0x18] sm:$0xff]   ;;  %v408_v4 = vunpack.c.l.bf16 %v407_v0  ;;  %v409_v5 = vunpack.c.h.bf16 %v407_v0  ;;  %v412_v6 = vunpack.c.l.bf16 %v458_v1  ;;  %v413_v7 = vunpack.c.h.bf16 %v458_v1  ;;  %v423_v8 = vld [vmem:[%s213_s29] sm:$0xff]   ;;  %v461_v9 = vld [vmem:[%s213_s29 + $0x8] sm:$0xff]  }
  0x15   : > { %v416_v10 = vunpack.c.l.bf16 %v459_v2  ;;  %v417_v11 = vunpack.c.h.bf16 %v459_v2  ;;  %v462_v12 = vld [vmem:[%s213_s29 + $0x10] sm:$0xff]   ;;  %v420_v13 = vunpack.c.l.bf16 %v460_v3  ;;  %v421_v14 = vunpack.c.h.bf16 %v460_v3  ;;  %v463_v19 = vld [vmem:[%s213_s29 + $0x18] sm:$0xff]  }
  0x16   : > { %v424_v15 = vunpack.c.l.bf16 %v423_v8  ;;  %v425_v16 = vunpack.c.h.bf16 %v423_v8  ;;  %v428_v17 = vunpack.c.l.bf16 %v461_v9  ;;  %v429_v18 = vunpack.c.h.bf16 %v461_v9 }
  0x17   : > { %v432_v20 = vunpack.c.l.bf16 %v462_v12  ;;  %v433_v21 = vunpack.c.h.bf16 %v462_v12  ;;  %v436_v22 = vunpack.c.l.bf16 %v463_v19  ;;  %v437_v23 = vunpack.c.h.bf16 %v463_v19 }
  0x18   : > { %v258_v24 = vadd.f32 %v424_v15, %v408_v4  ;;  %v259_v25 = vadd.f32 %v425_v16, %v409_v5  ;;  %v260_v26 = vadd.f32 %v428_v17, %v412_v6  ;;  %v261_v27 = vadd.f32 %v429_v18, %v413_v7 }
  0x19   : > { %v262_v28 = vadd.f32 %v432_v20, %v416_v10  ;;  %v263_v29 = vadd.f32 %v433_v21, %v417_v11  ;;  %v264_v30 = vadd.f32 %v436_v22, %v420_v13  ;;  %v265_v31 = vadd.f32 %v437_v23, %v421_v14 }
  0x1a   : > { %v441_v32 = vpack.c.bf16 %v259_v25, %v258_v24  ;;  %v446_v33 = vpack.c.bf16 %v261_v27, %v260_v26 }
  0x1b   : > { %v451_v34 = vpack.c.bf16 %v263_v29, %v262_v28  ;;  %v456_v35 = vpack.c.bf16 %v265_v31, %v264_v30 }
  0x1c   : > { %442 = vst [vmem:[%s224_s4] sm:$0xff] %v441_v32  }
  0x1d   : > { %464 = vst [vmem:[%s224_s4 + $0x8] sm:$0xff] %v446_v33  }
  0x1e   : > { %465 = vst [vmem:[%s224_s4 + $0x10] sm:$0xff] %v451_v34  }
  0x1f   : > { %466 = vst [vmem:[%s224_s4 + $0x18] sm:$0xff] %v456_v35  }
  0x20 PF: > { %s12_s13 = sadd.s32 1, %s545_s13   ;;  %s626_s9 = smov %s537_s11 }
  0x21   : > { %p9_p8 = scmp.ge.s32.totalorder %s12_s13, 6   ;;  %s627_s10 = smov %s541_s12 }
  0x22   : > { %s628_s11 = smov %s631_s14  ;;  %s629_s12 = smov %s635_s15 }
  0x23   :  { %11 = sbr.rel (!%p9_p8) target bundleno = 3 (0x3), region = 61 }

// kernel: efficientnetv2_forward.19
= control target key start
LH: loop header
LB: loop body
LE: loop exit
PB: predicated region body
PF: predicated region fallthrough
CT: control target
= control target key end

     0   :  { %s4500_s15 = smov 0   ;;  %s4502_s16 = smov 0   ;;  %s5735_s0 = inlined_call_operand.vmem [shape: bf16[1024,1152], index: 0, kind: input, shape index: {}]   ;;  %s5736_s1 = inlined_call_operand.vmem [shape: bf16[1152,128], index: 1, kind: input, shape index: {}]   ;;  %s5737_s2 = inlined_call_operand.vmem [shape: f32[1,128], index: 2, kind: input, shape index: {}]   ;;  %s5738_s3 = inlined_call_operand.vmem [shape: bf16[1024,128], index: 3, kind: input, shape index: {}]   ;;  %s5739_s4 = inlined_call_operand.vmem [shape: bf16[1024,128], index: 4, kind: output, shape index: {}]  }
   0x1   :  { %s4504_s17 = smov 0   ;;  %s4506_s18 = smov 0  }
   0x2   :  { %s4508_s19 = smov 0   ;;  %s4510_s20 = smov 0  }
   0x3   :  { %s4512_s21 = smov 0  }
   0x4 LB: > { %s26_s22 = sadd.s32 1, %s4464_s19  ;;  %s33_s23 = sadd.s32 1, %s4468_s20  ;;  %s4472_s21 = sphi %s4512_s21, %s14_s21   ;;  %s4468_s20 = sphi %s4510_s20, %s5745_s20   ;;  %s4464_s19 = sphi %s4508_s19, %s5744_s19   ;;  %s4460_s18 = sphi %s4506_s18, %s5743_s18   ;;  %s4456_s17 = sphi %s4504_s17, %s5742_s17   ;;  %s4452_s16 = sphi %s4502_s16, %s5741_s16   ;;  %s4448_s15 = sphi %s4500_s15, %s5740_s15  }
   0x5   : > { %p27_p0 = scmp.ge.s32.totalorder %s26_s22, 3  ;;  %p49_p1 = scmp.ne.s32.totalorder %s4452_s16, %s4448_s15 }
   0x6   : > { %p50_p2 = scmp.eq.s32.totalorder %s4472_s21, 0  ;;  %s42_s27 = sadd.s32 1, %s4452_s16 }
   0x7   : > { %s5747_s22 = smov (%p27_p0, %s26_s22), 0  ;;  %s5749_s23 = smov (!%p27_p0, %s33_s23), %s4468_s20 }
   0x8   : > { %p51_p3 = por %p50_p2, %p49_p1  ;;  %p35_p4 = scmp.ge.s32.totalorder %s5749_s23, 2 }
   0x9   : > { %s38_s24 = ssub.s32 %s4464_s19, %s5747_s22  ;;  %p3112_p6 = scmp.ge.s32.totalorder %s4472_s21, 6 }
   0xa   : > { %s5751_s23 = smov (%p35_p4, %s5749_s23), 0 }
   0xb   : > { %s37_s25 = ssub.s32 %s4468_s20, %s5751_s23  ;;  %191 = sbr.rel (%p3112_p6) target bundleno = 153 (0x99), region = 20 }
   0xc   : > { %s39_s26 = sor.u32 %s38_s24, %s37_s25 }
   0xd   : > { %p40_p5 = scmp.eq.s32.totalorder %s39_s26, 0 }
   0xf   : > { %s4551_s28 = scalar_select %p40_p5, %s4452_s16, %s42_s27  }
  0x10   : > { %194 = sbr.rel (!%p51_p3) target bundleno = 153 (0x99), region = 24  ;;  %s196_s29 = sand.u32 (%p51_p3), 1, %s4452_s16  }
  0x11   : > { %s200_s30 = smul.u32 (%p51_p3), 3, %s4464_s19 }
  0x12   : > { %s4228_s5 = smul.u32 (%p51_p3), 768, %s196_s29 }
  0x13   : > { %s4229_s6 = smul.u32 (%p51_p3), 576, %s4468_s20 }
  0x14   : > { %s4565_s12 = scalar_lea.vmem (%p51_p3), [#allocation3], %s4228_s5 }
  0x15   : > { %s202_s7 = sadd.s32 %s4229_s6, %s200_s30 }
  0x16   : > { %s3115_s8 = sshll.u32 %s202_s7, 2 }
  0x17   : > { %s4560_s11 = scalar_lea.vmem %s5735_s0, %s3115_s8 }
  0x18   : > { %v219_v0 = vld [vmem:[%s4560_s11] sm:$0xff]  ;;  %v223_v2 = vld [vmem:[%s4560_s11 + $0x48] sm:$0xff]  ;;  %v227_v4 = vld [vmem:[%s4560_s11 + $0x90] sm:$0xff] }
  0x19   : > { %v221_v1 = vld [vmem:[%s4560_s11 + $0x24] sm:$0xff]  ;;  %220 = vst [vmem:[%s4565_s12] sm:$0xff] %v219_v0  ;;  %v225_v3 = vld [vmem:[%s4560_s11 + $0x6c] sm:$0xff]  ;;  %v229_v5 = vld [vmem:[%s4560_s11 + $0xb4] sm:$0xff] }
  0x1a   : > { %222 = vst [vmem:[%s4565_s12 + $0xc] sm:$0xff] %v221_v1  ;;  %v231_v6 = vld [vmem:[%s4560_s11 + $0xd8] sm:$0xff]  ;;  %v235_v8 = vld [vmem:[%s4560_s11 + $0x120] sm:$0xff]  ;;  %v239_v10 = vld [vmem:[%s4560_s11 + $0x168] sm:$0xff] }
  0x1b   : > { %224 = vst [vmem:[%s4565_s12 + $0x18] sm:$0xff] %v223_v2  ;;  %v233_v7 = vld [vmem:[%s4560_s11 + $0xfc] sm:$0xff]  ;;  %v237_v9 = vld [vmem:[%s4560_s11 + $0x144] sm:$0xff]  ;;  %v241_v11 = vld [vmem:[%s4560_s11 + $0x18c] sm:$0xff] }
  0x1c   : > { %226 = vst [vmem:[%s4565_s12 + $0x24] sm:$0xff] %v225_v3  ;;  %v243_v12 = vld [vmem:[%s4560_s11 + $0x1b0] sm:$0xff]  ;;  %v247_v14 = vld [vmem:[%s4560_s11 + $0x1f8] sm:$0xff]  ;;  %v251_v16 = vld [vmem:[%s4560_s11 + $0x240] sm:$0xff] }
  0x1d   : > { %228 = vst [vmem:[%s4565_s12 + $0x30] sm:$0xff] %v227_v4  ;;  %v245_v13 = vld [vmem:[%s4560_s11 + $0x1d4] sm:$0xff]  ;;  %v249_v15 = vld [vmem:[%s4560_s11 + $0x21c] sm:$0xff]  ;;  %v253_v17 = vld [vmem:[%s4560_s11 + $0x264] sm:$0xff] }
  0x1e   : > { %230 = vst [vmem:[%s4565_s12 + $0x3c] sm:$0xff] %v229_v5  ;;  %v255_v18 = vld [vmem:[%s4560_s11 + $0x288] sm:$0xff]  ;;  %v259_v20 = vld [vmem:[%s4560_s11 + $0x2d0] sm:$0xff]  ;;  %v263_v22 = vld [vmem:[%s4560_s11 + $0x318] sm:$0xff] }
  0x1f   : > { %232 = vst [vmem:[%s4565_s12 + $0x48] sm:$0xff] %v231_v6  ;;  %v257_v19 = vld [vmem:[%s4560_s11 + $0x2ac] sm:$0xff]  ;;  %v261_v21 = vld [vmem:[%s4560_s11 + $0x2f4] sm:$0xff]  ;;  %v265_v23 = vld [vmem:[%s4560_s11 + $0x33c] sm:$0xff] }
  0x20   : > { %234 = vst [vmem:[%s4565_s12 + $0x54] sm:$0xff] %v233_v7  ;;  %v267_v24 = vld [vmem:[%s4560_s11 + $0x360] sm:$0xff]  ;;  %v271_v26 = vld [vmem:[%s4560_s11 + $0x3a8] sm:$0xff]  ;;  %v275_v28 = vld [vmem:[%s4560_s11 + $0x3f0] sm:$0xff] }
  0x21   : > { %236 = vst [vmem:[%s4565_s12 + $0x60] sm:$0xff] %v235_v8  ;;  %v269_v25 = vld [vmem:[%s4560_s11 + $0x384] sm:$0xff]  ;;  %v273_v27 = vld [vmem:[%s4560_s11 + $0x3cc] sm:$0xff]  ;;  %v277_v29 = vld [vmem:[%s4560_s11 + $0x414] sm:$0xff] }
  0x22   : > { %238 = vst [vmem:[%s4565_s12 + $0x6c] sm:$0xff] %v237_v9  ;;  %v279_v30 = vld [vmem:[%s4560_s11 + $0x438] sm:$0xff]  ;;  %v283_v32 = vld [vmem:[%s4560_s11 + $0x480] sm:$0xff]  ;;  %v287_v34 = vld [vmem:[%s4560_s11 + $0x4c8] sm:$0xff] }
  0x23   : > { %240 = vst [vmem:[%s4565_s12 + $0x78] sm:$0xff] %v239_v10  ;;  %v281_v31 = vld [vmem:[%s4560_s11 + $0x45c] sm:$0xff]  ;;  %v285_v33 = vld [vmem:[%s4560_s11 + $0x4a4] sm:$0xff]  ;;  %v289_v35 = vld [vmem:[%s4560_s11 + $0x4ec] sm:$0xff] }
  0x24   : > { %242 = vst [vmem:[%s4565_s12 + $0x84] sm:$0xff] %v241_v11  ;;  %v291_v36 = vld [vmem:[%s4560_s11 + $0x510] sm:$0xff]  ;;  %v295_v38 = vld [vmem:[%s4560_s11 + $0x558] sm:$0xff]  ;;  %v299_v40 = vld [vmem:[%s4560_s11 + $0x5a0] sm:$0xff] }
  0x25   : > { %244 = vst [vmem:[%s4565_s12 + $0x90] sm:$0xff] %v243_v12  ;;  %v293_v37 = vld [vmem:[%s4560_s11 + $0x534] sm:$0xff]  ;;  %v297_v39 = vld [vmem:[%s4560_s11 + $0x57c] sm:$0xff]  ;;  %v301_v41 = vld [vmem:[%s4560_s11 + $0x5c4] sm:$0xff] }
  0x26   : > { %246 = vst [vmem:[%s4565_s12 + $0x9c] sm:$0xff] %v245_v13  ;;  %v303_v42 = vld [vmem:[%s4560_s11 + $0x5e8] sm:$0xff]  ;;  %v307_v44 = vld [vmem:[%s4560_s11 + $0x630] sm:$0xff]  ;;  %v311_v46 = vld [vmem:[%s4560_s11 + $0x678] sm:$0xff] }
  0x27   : > { %248 = vst [vmem:[%s4565_s12 + $0xa8] sm:$0xff] %v247_v14  ;;  %v305_v43 = vld [vmem:[%s4560_s11 + $0x60c] sm:$0xff]  ;;  %v309_v45 = vld [vmem:[%s4560_s11 + $0x654] sm:$0xff]  ;;  %v313_v47 = vld [vmem:[%s4560_s11 + $0x69c] sm:$0xff] }
  0x28   : > { %250 = vst [vmem:[%s4565_s12 + $0xb4] sm:$0xff] %v249_v15  ;;  %v315_v48 = vld [vmem:[%s4560_s11 + $0x6c0] sm:$0xff]  ;;  %v319_v50 = vld [vmem:[%s4560_s11 + $0x708] sm:$0xff]  ;;  %v323_v52 = vld [vmem:[%s4560_s11 + $0x750] sm:$0xff] }
  0x29   : > { %252 = vst [vmem:[%s4565_s12 + $0xc0] sm:$0xff] %v251_v16  ;;  %v317_v49 = vld [vmem:[%s4560_s11 + $0x6e4] sm:$0xff]  ;;  %v321_v51 = vld [vmem:[%s4560_s11 + $0x72c] sm:$0xff]  ;;  %v325_v53 = vld [vmem:[%s4560_s11 + $0x774] sm:$0xff] }
  0x2a   : > { %254 = vst [vmem:[%s4565_s12 + $0xcc] sm:$0xff] %v253_v17  ;;  %v327_v54 = vld [vmem:[%s4560_s11 + $0x798] sm:$0xff]  ;;  %v331_v56 = vld [vmem:[%s4560_s11 + $0x7e0] sm:$0xff]  ;;  %v335_v58 = vld [vmem:[%s4560_s11 + $0x828] sm:$0xff] }
  0x2b   : > { %256 = vst [vmem:[%s4565_s12 + $0xd8] sm:$0xff] %v255_v18  ;;  %v329_v55 = vld [vmem:[%s4560_s11 + $0x7bc] sm:$0xff]  ;;  %v333_v57 = vld [vmem:[%s4560_s11 + $0x804] sm:$0xff]  ;;  %v337_v59 = vld [vmem:[%s4560_s11 + $0x84c] sm:$0xff] }
  0x2c   : > { %258 = vst [vmem:[%s4565_s12 + $0xe4] sm:$0xff] %v257_v19  ;;  %v339_v60 = vld [vmem:[%s4560_s11 + $0x870] sm:$0xff]  ;;  %v343_v62 = vld [vmem:[%s4560_s11 + $0x8b8] sm:$0xff]  ;;  %v3116_v0 = vld [vmem:[%s4560_s11 + $0x8] sm:$0xf] }
  0x2d   : > { %260 = vst [vmem:[%s4565_s12 + $0xf0] sm:$0xff] %v259_v20  ;;  %v341_v61 = vld [vmem:[%s4560_s11 + $0x894] sm:$0xff]  ;;  %v345_v63 = vld [vmem:[%s4560_s11 + $0x8dc] sm:$0xff]  ;;  %v3118_v1 = vld [vmem:[%s4560_s11 + $0x2c] sm:$0xf] }
  0x2e   : > { %262 = vst [vmem:[%s4565_s12 + $0xfc] sm:$0xff] %v261_v21  ;;  %v3120_v2 = vld [vmem:[%s4560_s11 + $0x50] sm:$0xf]  ;;  %v3122_v3 = vld [vmem:[%s4560_s11 + $0x74] sm:$0xf] }
  0x2f   : > { %264 = vst [vmem:[%s4565_s12 + $0x108] sm:$0xff] %v263_v22  ;;  %v3124_v4 = vld [vmem:[%s4560_s11 + $0x98] sm:$0xf]  ;;  %v3126_v5 = vld [vmem:[%s4560_s11 + $0xbc] sm:$0xf] }
  0x30   : > { %266 = vst [vmem:[%s4565_s12 + $0x114] sm:$0xff] %v265_v23  ;;  %v3128_v6 = vld [vmem:[%s4560_s11 + $0xe0] sm:$0xf]  ;;  %v3130_v7 = vld [vmem:[%s4560_s11 + $0x104] sm:$0xf] }
  0x31   : > { %268 = vst [vmem:[%s4565_s12 + $0x120] sm:$0xff] %v267_v24  ;;  %v3132_v8 = vld [vmem:[%s4560_s11 + $0x128] sm:$0xf]  ;;  %v3134_v9 = vld [vmem:[%s4560_s11 + $0x14c] sm:$0xf] }
  0x32   : > { %270 = vst [vmem:[%s4565_s12 + $0x12c] sm:$0xff] %v269_v25  ;;  %v3136_v10 = vld [vmem:[%s4560_s11 + $0x170] sm:$0xf]  ;;  %v3138_v11 = vld [vmem:[%s4560_s11 + $0x194] sm:$0xf] }
  0x33   : > { %272 = vst [vmem:[%s4565_s12 + $0x138] sm:$0xff] %v271_v26  ;;  %v3140_v12 = vld [vmem:[%s4560_s11 + $0x1b8] sm:$0xf]  ;;  %v3142_v13 = vld [vmem:[%s4560_s11 + $0x1dc] sm:$0xf] }
  0x34   : > { %274 = vst [vmem:[%s4565_s12 + $0x144] sm:$0xff] %v273_v27  ;;  %v3144_v14 = vld [vmem:[%s4560_s11 + $0x200] sm:$0xf]  ;;  %v3146_v15 = vld [vmem:[%s4560_s11 + $0x224] sm:$0xf] }
  0x35   : > { %276 = vst [vmem:[%s4565_s12 + $0x150] sm:$0xff] %v275_v28  ;;  %v3148_v16 = vld [vmem:[%s4560_s11 + $0x248] sm:$0xf]  ;;  %v3150_v17 = vld [vmem:[%s4560_s11 + $0x26c] sm:$0xf] }
  0x36   : > { %278 = vst [vmem:[%s4565_s12 + $0x15c] sm:$0xff] %v277_v29  ;;  %v3152_v18 = vld [vmem:[%s4560_s11 + $0x290] sm:$0xf]  ;;  %v3154_v19 = vld [vmem:[%s4560_s11 + $0x2b4] sm:$0xf] }
  0x37   : > { %280 = vst [vmem:[%s4565_s12 + $0x168] sm:$0xff] %v279_v30  ;;  %v3156_v20 = vld [vmem:[%s4560_s11 + $0x2d8] sm:$0xf]  ;;  %v3158_v21 = vld [vmem:[%s4560_s11 + $0x2fc] sm:$0xf] }
  0x38   : > { %282 = vst [vmem:[%s4565_s12 + $0x174] sm:$0xff] %v281_v31  ;;  %v3160_v22 = vld [vmem:[%s4560_s11 + $0x320] sm:$0xf]  ;;  %v3162_v23 = vld [vmem:[%s4560_s11 + $0x344] sm:$0xf] }
  0x39   : > { %284 = vst [vmem:[%s4565_s12 + $0x180] sm:$0xff] %v283_v32  ;;  %v3164_v24 = vld [vmem:[%s4560_s11 + $0x368] sm:$0xf]  ;;  %v3166_v25 = vld [vmem:[%s4560_s11 + $0x38c] sm:$0xf] }
  0x3a   : > { %286 = vst [vmem:[%s4565_s12 + $0x18c] sm:$0xff] %v285_v33  ;;  %v3168_v26 = vld [vmem:[%s4560_s11 + $0x3b0] sm:$0xf]  ;;  %v3170_v27 = vld [vmem:[%s4560_s11 + $0x3d4] sm:$0xf] }
  0x3b   : > { %288 = vst [vmem:[%s4565_s12 + $0x198] sm:$0xff] %v287_v34  ;;  %v3172_v28 = vld [vmem:[%s4560_s11 + $0x3f8] sm:$0xf]  ;;  %v3174_v29 = vld [vmem:[%s4560_s11 + $0x41c] sm:$0xf] }
  0x3c   : > { %290 = vst [vmem:[%s4565_s12 + $0x1a4] sm:$0xff] %v289_v35  ;;  %v3176_v30 = vld [vmem:[%s4560_s11 + $0x440] sm:$0xf]  ;;  %v3178_v31 = vld [vmem:[%s4560_s11 + $0x464] sm:$0xf] }
  0x3d   : > { %292 = vst [vmem:[%s4565_s12 + $0x1b0] sm:$0xff] %v291_v36  ;;  %v3180_v32 = vld [vmem:[%s4560_s11 + $0x488] sm:$0xf]  ;;  %v3182_v33 = vld [vmem:[%s4560_s11 + $0x4ac] sm:$0xf] }
  0x3e   : > { %294 = vst [vmem:[%s4565_s12 + $0x1bc] sm:$0xff] %v293_v37  ;;  %v3184_v34 = vld [vmem:[%s4560_s11 + $0x4d0] sm:$0xf]  ;;  %v3186_v35 = vld [vmem:[%s4560_s11 + $0x4f4] sm:$0xf] }
  0x3f   : > { %296 = vst [vmem:[%s4565_s12 + $0x1c8] sm:$0xff] %v295_v38  ;;  %v3188_v36 = vld [vmem:[%s4560_s11 + $0x518] sm:$0xf]  ;;  %v3190_v37 = vld [vmem:[%s4560_s11 + $0x53c] sm:$0xf] }
  0x40   : > { %298 = vst [vmem:[%s4565_s12 + $0x1d4] sm:$0xff] %v297_v39  ;;  %v3192_v38 = vld [vmem:[%s4560_s11 + $0x560] sm:$0xf]  ;;  %v3194_v39 = vld [vmem:[%s4560_s11 + $0x584] sm:$0xf] }
  0x41   : > { %300 = vst [vmem:[%s4565_s12 + $0x1e0] sm:$0xff] %v299_v40  ;;  %v3196_v40 = vld [vmem:[%s4560_s11 + $0x5a8] sm:$0xf] }
  0x42   : > { %302 = vst [vmem:[%s4565_s12 + $0x1ec] sm:$0xff] %v301_v41  ;;  %v3198_v41 = vld [vmem:[%s4560_s11 + $0x5cc] sm:$0xf] }
  0x43   : > { %304 = vst [vmem:[%s4565_s12 + $0x1f8] sm:$0xff] %v303_v42  ;;  %v3200_v42 = vld [vmem:[%s4560_s11 + $0x5f0] sm:$0xf] }
  0x44   : > { %306 = vst [vmem:[%s4565_s12 + $0x204] sm:$0xff] %v305_v43  ;;  %v3202_v43 = vld [vmem:[%s4560_s11 + $0x614] sm:$0xf] }
  0x45   : > { %308 = vst [vmem:[%s4565_s12 + $0x210] sm:$0xff] %v307_v44  ;;  %v3204_v44 = vld [vmem:[%s4560_s11 + $0x638] sm:$0xf] }
  0x46   : > { %310 = vst [vmem:[%s4565_s12 + $0x21c] sm:$0xff] %v309_v45  ;;  %v3206_v45 = vld [vmem:[%s4560_s11 + $0x65c] sm:$0xf] }
  0x47   : > { %312 = vst [vmem:[%s4565_s12 + $0x228] sm:$0xff] %v311_v46  ;;  %v3208_v46 = vld [vmem:[%s4560_s11 + $0x680] sm:$0xf] }
  0x48   : > { %314 = vst [vmem:[%s4565_s12 + $0x234] sm:$0xff] %v313_v47  ;;  %v3210_v47 = vld [vmem:[%s4560_s11 + $0x6a4] sm:$0xf] }
  0x49   : > { %316 = vst [vmem:[%s4565_s12 + $0x240] sm:$0xff] %v315_v48  ;;  %v3212_v48 = vld [vmem:[%s4560_s11 + $0x6c8] sm:$0xf] }
  0x4a   : > { %318 = vst [vmem:[%s4565_s12 + $0x24c] sm:$0xff] %v317_v49  ;;  %v3214_v49 = vld [vmem:[%s4560_s11 + $0x6ec] sm:$0xf] }
  0x4b   : > { %320 = vst [vmem:[%s4565_s12 + $0x258] sm:$0xff] %v319_v50  ;;  %v3216_v50 = vld [vmem:[%s4560_s11 + $0x710] sm:$0xf] }
  0x4c   : > { %322 = vst [vmem:[%s4565_s12 + $0x264] sm:$0xff] %v321_v51  ;;  %v3218_v51 = vld [vmem:[%s4560_s11 + $0x734] sm:$0xf] }
  0x4d   : > { %324 = vst [vmem:[%s4565_s12 + $0x270] sm:$0xff] %v323_v52  ;;  %v3220_v52 = vld [vmem:[%s4560_s11 + $0x758] sm:$0xf] }
  0x4e   : > { %326 = vst [vmem:[%s4565_s12 + $0x27c] sm:$0xff] %v325_v53  ;;  %v3222_v53 = vld [vmem:[%s4560_s11 + $0x77c] sm:$0xf] }
  0x4f   : > { %328 = vst [vmem:[%s4565_s12 + $0x288] sm:$0xff] %v327_v54  ;;  %v3224_v54 = vld [vmem:[%s4560_s11 + $0x7a0] sm:$0xf] }
  0x50   : > { %330 = vst [vmem:[%s4565_s12 + $0x294] sm:$0xff] %v329_v55  ;;  %v3226_v55 = vld [vmem:[%s4560_s11 + $0x7c4] sm:$0xf] }
  0x51   : > { %332 = vst [vmem:[%s4565_s12 + $0x2a0] sm:$0xff] %v331_v56  ;;  %v3228_v56 = vld [vmem:[%s4560_s11 + $0x7e8] sm:$0xf] }
  0x52   : > { %334 = vst [vmem:[%s4565_s12 + $0x2ac] sm:$0xff] %v333_v57  ;;  %v3230_v57 = vld [vmem:[%s4560_s11 + $0x80c] sm:$0xf] }
  0x53   : > { %336 = vst [vmem:[%s4565_s12 + $0x2b8] sm:$0xff] %v335_v58  ;;  %v3232_v58 = vld [vmem:[%s4560_s11 + $0x830] sm:$0xf] }
  0x54   : > { %338 = vst [vmem:[%s4565_s12 + $0x2c4] sm:$0xff] %v337_v59  ;;  %v3234_v59 = vld [vmem:[%s4560_s11 + $0x854] sm:$0xf] }
  0x55   : > { %340 = vst [vmem:[%s4565_s12 + $0x2d0] sm:$0xff] %v339_v60  ;;  %v3236_v60 = vld [vmem:[%s4560_s11 + $0x878] sm:$0xf] }
  0x56   : > { %342 = vst [vmem:[%s4565_s12 + $0x2dc] sm:$0xff] %v341_v61  ;;  %v3238_v61 = vld [vmem:[%s4560_s11 + $0x89c] sm:$0xf] }
  0x57   : > { %344 = vst [vmem:[%s4565_s12 + $0x2e8] sm:$0xff] %v343_v62  ;;  %v3240_v62 = vld [vmem:[%s4560_s11 + $0x8c0] sm:$0xf] }
  0x58   : > { %346 = vst [vmem:[%s4565_s12 + $0x2f4] sm:$0xff] %v345_v63  ;;  %v3242_v63 = vld [vmem:[%s4560_s11 + $0x8e4] sm:$0xf] }
  0x59   : > { %3117 = vst [vmem:[%s4565_s12 + $0x8] sm:$0xf] %v3116_v0 }
  0x5a   : > { %3119 = vst [vmem:[%s4565_s12 + $0x14] sm:$0xf] %v3118_v1 }
  0x5b   : > { %3121 = vst [vmem:[%s4565_s12 + $0x20] sm:$0xf] %v3120_v2 }
  0x5c   : > { %3123 = vst [vmem:[%s4565_s12 + $0x2c] sm:$0xf] %v3122_v3 }
  0x5d   : > { %3125 = vst [vmem:[%s4565_s12 + $0x38] sm:$0xf] %v3124_v4 }
  0x5e   : > { %3127 = vst [vmem:[%s4565_s12 + $0x44] sm:$0xf] %v3126_v5 }
  0x5f   : > { %3129 = vst [vmem:[%s4565_s12 + $0x50] sm:$0xf] %v3128_v6 }
  0x60   : > { %3131 = vst [vmem:[%s4565_s12 + $0x5c] sm:$0xf] %v3130_v7 }
  0x61   : > { %3133 = vst [vmem:[%s4565_s12 + $0x68] sm:$0xf] %v3132_v8 }
  0x62   : > { %3135 = vst [vmem:[%s4565_s12 + $0x74] sm:$0xf] %v3134_v9 }
  0x63   : > { %3137 = vst [vmem:[%s4565_s12 + $0x80] sm:$0xf] %v3136_v10 }
  0x64   : > { %3139 = vst [vmem:[%s4565_s12 + $0x8c] sm:$0xf] %v3138_v11 }
  0x65   : > { %3141 = vst [vmem:[%s4565_s12 + $0x98] sm:$0xf] %v3140_v12 }
  0x66   : > { %3143 = vst [vmem:[%s4565_s12 + $0xa4] sm:$0xf] %v3142_v13 }
  0x67   : > { %3145 = vst [vmem:[%s4565_s12 + $0xb0] sm:$0xf] %v3144_v14 }
  0x68   : > { %3147 = vst [vmem:[%s4565_s12 + $0xbc] sm:$0xf] %v3146_v15 }
  0x69   : > { %3149 = vst [vmem:[%s4565_s12 + $0xc8] sm:$0xf] %v3148_v16 }
  0x6a   : > { %3151 = vst [vmem:[%s4565_s12 + $0xd4] sm:$0xf] %v3150_v17 }
  0x6b   : > { %3153 = vst [vmem:[%s4565_s12 + $0xe0] sm:$0xf] %v3152_v18 }
  0x6c   : > { %3155 = vst [vmem:[%s4565_s12 + $0xec] sm:$0xf] %v3154_v19 }
  0x6d   : > { %3157 = vst [vmem:[%s4565_s12 + $0xf8] sm:$0xf] %v3156_v20 }
  0x6e   : > { %3159 = vst [vmem:[%s4565_s12 + $0x104] sm:$0xf] %v3158_v21 }
  0x6f   : > { %3161 = vst [vmem:[%s4565_s12 + $0x110] sm:$0xf] %v3160_v22 }
  0x70   : > { %3163 = vst [vmem:[%s4565_s12 + $0x11c] sm:$0xf] %v3162_v23 }
  0x71   : > { %3165 = vst [vmem:[%s4565_s12 + $0x128] sm:$0xf] %v3164_v24 }
  0x72   : > { %3167 = vst [vmem:[%s4565_s12 + $0x134] sm:$0xf] %v3166_v25 }
  0x73   : > { %3169 = vst [vmem:[%s4565_s12 + $0x140] sm:$0xf] %v3168_v26 }
  0x74   : > { %3171 = vst [vmem:[%s4565_s12 + $0x14c] sm:$0xf] %v3170_v27 }
  0x75   : > { %3173 = vst [vmem:[%s4565_s12 + $0x158] sm:$0xf] %v3172_v28 }
  0x76   : > { %3175 = vst [vmem:[%s4565_s12 + $0x164] sm:$0xf] %v3174_v29 }
  0x77   : > { %3177 = vst [vmem:[%s4565_s12 + $0x170] sm:$0xf] %v3176_v30 }
  0x78   : > { %3179 = vst [vmem:[%s4565_s12 + $0x17c] sm:$0xf] %v3178_v31 }
  0x79   : > { %3181 = vst [vmem:[%s4565_s12 + $0x188] sm:$0xf] %v3180_v32 }
  0x7a   : > { %3183 = vst [vmem:[%s4565_s12 + $0x194] sm:$0xf] %v3182_v33 }
  0x7b   : > { %3185 = vst [vmem:[%s4565_s12 + $0x1a0] sm:$0xf] %v3184_v34 }
  0x7c   : > { %3187 = vst [vmem:[%s4565_s12 + $0x1ac] sm:$0xf] %v3186_v35 }
  0x7d   : > { %3189 = vst [vmem:[%s4565_s12 + $0x1b8] sm:$0xf] %v3188_v36 }
  0x7e   : > { %3191 = vst [vmem:[%s4565_s12 + $0x1c4] sm:$0xf] %v3190_v37 }
  0x7f   : > { %3193 = vst [vmem:[%s4565_s12 + $0x1d0] sm:$0xf] %v3192_v38 }
  0x80   : > { %3195 = vst [vmem:[%s4565_s12 + $0x1dc] sm:$0xf] %v3194_v39 }
  0x81   : > { %3197 = vst [vmem:[%s4565_s12 + $0x1e8] sm:$0xf] %v3196_v40 }
  0x82   : > { %3199 = vst [vmem:[%s4565_s12 + $0x1f4] sm:$0xf] %v3198_v41 }
  0x83   : > { %3201 = vst [vmem:[%s4565_s12 + $0x200] sm:$0xf] %v3200_v42 }
  0x84   : > { %3203 = vst [vmem:[%s4565_s12 + $0x20c] sm:$0xf] %v3202_v43 }
  0x85   : > { %3205 = vst [vmem:[%s4565_s12 + $0x218] sm:$0xf] %v3204_v44 }
  0x86   : > { %3207 = vst [vmem:[%s4565_s12 + $0x224] sm:$0xf] %v3206_v45 }
  0x87   : > { %3209 = vst [vmem:[%s4565_s12 + $0x230] sm:$0xf] %v3208_v46 }
  0x88   : > { %3211 = vst [vmem:[%s4565_s12 + $0x23c] sm:$0xf] %v3210_v47 }
  0x89   : > { %3213 = vst [vmem:[%s4565_s12 + $0x248] sm:$0xf] %v3212_v48 }
  0x8a   : > { %3215 = vst [vmem:[%s4565_s12 + $0x254] sm:$0xf] %v3214_v49 }
  0x8b   : > { %3217 = vst [vmem:[%s4565_s12 + $0x260] sm:$0xf] %v3216_v50 }
  0x8c   : > { %3219 = vst [vmem:[%s4565_s12 + $0x26c] sm:$0xf] %v3218_v51 }
  0x8d   : > { %3221 = vst [vmem:[%s4565_s12 + $0x278] sm:$0xf] %v3220_v52 }
  0x8e   : > { %3223 = vst [vmem:[%s4565_s12 + $0x284] sm:$0xf] %v3222_v53 }
  0x8f   : > { %3225 = vst [vmem:[%s4565_s12 + $0x290] sm:$0xf] %v3224_v54 }
  0x90   : > { %3227 = vst [vmem:[%s4565_s12 + $0x29c] sm:$0xf] %v3226_v55 }
  0x91   : > { %3229 = vst [vmem:[%s4565_s12 + $0x2a8] sm:$0xf] %v3228_v56 }
  0x92   : > { %3231 = vst [vmem:[%s4565_s12 + $0x2b4] sm:$0xf] %v3230_v57 }
  0x93   : > { %3233 = vst [vmem:[%s4565_s12 + $0x2c0] sm:$0xf] %v3232_v58 }
  0x94   : > { %3235 = vst [vmem:[%s4565_s12 + $0x2cc] sm:$0xf] %v3234_v59 }
  0x95   : > { %3237 = vst [vmem:[%s4565_s12 + $0x2d8] sm:$0xf] %v3236_v60 }
  0x96   : > { %3239 = vst [vmem:[%s4565_s12 + $0x2e4] sm:$0xf] %v3238_v61 }
  0x97   : > { %3241 = vst [vmem:[%s4565_s12 + $0x2f0] sm:$0xf] %v3240_v62 }
  0x98   : > { %3243 = vst [vmem:[%s4565_s12 + $0x2fc] sm:$0xf] %v3242_v63 }
  0x99 PF: > { %p3244_p7 = scmp.ge.s32.totalorder %s4472_s21, 1  ;;  %p511_p8 = scmp.lt.s32.totalorder %s4472_s21, 7 }
  0x9b   : > { %p512_p9 = pnand %p3244_p7, %p511_p8 }
  0x9c   : > { %s518_s13 = sand.u32 (!%p512_p9), 1, %s4448_s15   ;;  %s567_s14 = smul.u32 (!%p512_p9), 48, %s4456_s17 }
  0x9d   : > { %515 = sbr.rel (%p512_p9) target bundleno = 929 (0x3a1), region = 58  ;;  %s3246_s25 = sshll.u32 (!%p512_p9), %s4460_s18, 6 }
  0x9e   : > { %s4230_s24 = smul.u32 (!%p512_p9), 768, %s518_s13  ;;  %p568_p10 = scmp.lt.s32.totalorder (!%p512_p9), %s567_s14, 143 }
  0x9f   : > { %p580_p11 = scmp.lt.s32.totalorder (!%p512_p9), %s3246_s25, 127  ;;  %p3250_p12 = scmp.ne.s32.totalorder (!%p512_p9), %s4456_s17, 0 }
  0xa0   : > { %s4840_s10 = scalar_lea.vmem (!%p512_p9), [#allocation3], %s4230_s24 }
  0xa2   : > { %s5753_s14 = smov (!%p568_p10, %s567_s14), 143  ;;  %s5755_s25 = smov (!%p580_p11, %s3246_s25), 127 }
  0xa3   : > { %s3245_s26 = sshll.u32 %s5753_s14, 2  ;;  %s3247_s5 = sshll.u32 %s5755_s25, 2 }
  0xa4   : > { %s4828_s30 = scalar_lea.vmem %s5736_s1, %s3245_s26  ;;  %s4833_s8 = scalar_lea.vmem %s5738_s3, %s3247_s5 }
  0xa5   : > { %s4838_s18 = scalar_lea.vmem %s5739_s4, %s3247_s5  ;;  %600 = sbr.rel (%p3250_p12) target bundleno = 235 (0xeb), region = 66 }
  0xaa   : > { %v4474_v0 = vmov 0.0  }
  0xab   : > { %601 = vst [vmem:[#allocation2 + $0xb0] sm:$0xff] %v4474_v0 }
  0xac   : > { %602 = vst [vmem:[#allocation2 + $0x1b0] sm:$0xff] %v4474_v0 }
  0xad   : > { %603 = vst [vmem:[#allocation2 + $0xd8] sm:$0xff] %v4474_v0 }
  0xae   : > { %604 = vst [vmem:[#allocation2 + $0x18] sm:$0xff] %v4474_v0 }
  0xaf   : > { %605 = vst [vmem:[#allocation2 + $0x50] sm:$0xff] %v4474_v0 }
  0xb0   : > { %606 = vst [vmem:[#allocation2 + $0x168] sm:$0xff] %v4474_v0 }
  0xb1   : > { %607 = vst [vmem:[#allocation2 + $0x130] sm:$0xff] %v4474_v0 }
  0xb2   : > { %608 = vst [vmem:[#allocation2 + $0x48] sm:$0xff] %v4474_v0 }
  0xb3   : > { %609 = vst [vmem:[#allocation2 + $0x180] sm:$0xff] %v4474_v0 }
  0xb4   : > { %610 = vst [vmem:[#allocation2 + $0x110] sm:$0xff] %v4474_v0 }
  0xb5   : > { %611 = vst [vmem:[#allocation2 + $0x118] sm:$0xff] %v4474_v0 }
  0xb6   : > { %612 = vst [vmem:[#allocation2 + $0x98] sm:$0xff] %v4474_v0 }
  0xb7   : > { %613 = vst [vmem:[#allocation2 + $0x120] sm:$0xff] %v4474_v0 }
  0xb8   : > { %614 = vst [vmem:[#allocation2 + $0x150] sm:$0xff] %v4474_v0 }
  0xb9   : > { %615 = vst [vmem:[#allocation2 + $0x108] sm:$0xff] %v4474_v0 }
  0xba   : > { %616 = vst [vmem:[#allocation2 + $0x60] sm:$0xff] %v4474_v0 }
  0xbb   : > { %617 = vst [vmem:[#allocation2 + $0xe0] sm:$0xff] %v4474_v0 }
  0xbc   : > { %618 = vst [vmem:[#allocation2 + $0x188] sm:$0xff] %v4474_v0 }
  0xbd   : > { %619 = vst [vmem:[#allocation2 + $0x138] sm:$0xff] %v4474_v0 }
  0xbe   : > { %620 = vst [vmem:[#allocation2 + $0x140] sm:$0xff] %v4474_v0 }
  0xbf   : > { %621 = vst [vmem:[#allocation2 + $0x80] sm:$0xff] %v4474_v0 }
  0xc0   : > { %622 = vst [vmem:[#allocation2 + $0x1a8] sm:$0xff] %v4474_v0 }
  0xc1   : > { %623 = vst [vmem:[#allocation2 + $0x1b8] sm:$0xff] %v4474_v0 }
  0xc2   : > { %624 = vst [vmem:[#allocation2 + $0x28] sm:$0xff] %v4474_v0 }
  0xc3   : > { %625 = vst [vmem:[#allocation2 + $0x1e8] sm:$0xff] %v4474_v0 }
  0xc4   : > { %626 = vst [vmem:[#allocation2 + $0xf8] sm:$0xff] %v4474_v0 }
  0xc5   : > { %627 = vst [vmem:[#allocation2 + $0x160] sm:$0xff] %v4474_v0 }
  0xc6   : > { %628 = vst [vmem:[#allocation2 + $0x30] sm:$0xff] %v4474_v0 }
  0xc7   : > { %629 = vst [vmem:[#allocation2 + $0x1e0] sm:$0xff] %v4474_v0 }
  0xc8   : > { %630 = vst [vmem:[#allocation2] sm:$0xff] %v4474_v0 }
  0xc9   : > { %631 = vst [vmem:[#allocation2 + $0xf0] sm:$0xff] %v4474_v0 }
  0xca   : > { %632 = vst [vmem:[#allocation2 + $0x8] sm:$0xff] %v4474_v0 }
  0xcb   : > { %633 = vst [vmem:[#allocation2 + $0x148] sm:$0xff] %v4474_v0 }
  0xcc   : > { %634 = vst [vmem:[#allocation2 + $0x1d0] sm:$0xff] %v4474_v0 }
  0xcd   : > { %635 = vst [vmem:[#allocation2 + $0x100] sm:$0xff] %v4474_v0 }
  0xce   : > { %636 = vst [vmem:[#allocation2 + $0xc8] sm:$0xff] %v4474_v0 }
  0xcf   : > { %637 = vst [vmem:[#allocation2 + $0x40] sm:$0xff] %v4474_v0 }
  0xd0   : > { %638 = vst [vmem:[#allocation2 + $0x1f8] sm:$0xff] %v4474_v0 }
  0xd1   : > { %639 = vst [vmem:[#allocation2 + $0x20] sm:$0xff] %v4474_v0 }
  0xd2   : > { %640 = vst [vmem:[#allocation2 + $0x128] sm:$0xff] %v4474_v0 }
  0xd3   : > { %641 = vst [vmem:[#allocation2 + $0x1a0] sm:$0xff] %v4474_v0 }
  0xd4   : > { %642 = vst [vmem:[#allocation2 + $0x1f0] sm:$0xff] %v4474_v0 }
  0xd5   : > { %643 = vst [vmem:[#allocation2 + $0xe8] sm:$0xff] %v4474_v0 }
  0xd6   : > { %644 = vst [vmem:[#allocation2 + $0x78] sm:$0xff] %v4474_v0 }
  0xd7   : > { %645 = vst [vmem:[#allocation2 + $0x70] sm:$0xff] %v4474_v0 }
  0xd8   : > { %646 = vst [vmem:[#allocation2 + $0x90] sm:$0xff] %v4474_v0 }
  0xd9   : > { %647 = vst [vmem:[#allocation2 + $0x1d8] sm:$0xff] %v4474_v0 }
  0xda   : > { %648 = vst [vmem:[#allocation2 + $0xd0] sm:$0xff] %v4474_v0 }
  0xdb   : > { %649 = vst [vmem:[#allocation2 + $0xb8] sm:$0xff] %v4474_v0 }
  0xdc   : > { %650 = vst [vmem:[#allocation2 + $0x88] sm:$0xff] %v4474_v0 }
  0xdd   : > { %651 = vst [vmem:[#allocation2 + $0xa8] sm:$0xff] %v4474_v0 }
  0xde   : > { %652 = vst [vmem:[#allocation2 + $0x1c8] sm:$0xff] %v4474_v0 }
  0xdf   : > { %653 = vst [vmem:[#allocation2 + $0x170] sm:$0xff] %v4474_v0 }
  0xe0   : > { %654 = vst [vmem:[#allocation2 + $0x178] sm:$0xff] %v4474_v0 }
  0xe1   : > { %655 = vst [vmem:[#allocation2 + $0x68] sm:$0xff] %v4474_v0 }
  0xe2   : > { %656 = vst [vmem:[#allocation2 + $0x190] sm:$0xff] %v4474_v0 }
  0xe3   : > { %657 = vst [vmem:[#allocation2 + $0x198] sm:$0xff] %v4474_v0 }
  0xe4   : > { %658 = vst [vmem:[#allocation2 + $0x38] sm:$0xff] %v4474_v0 }
  0xe5   : > { %659 = vst [vmem:[#allocation2 + $0xc0] sm:$0xff] %v4474_v0 }
  0xe6   : > { %660 = vst [vmem:[#allocation2 + $0x1c0] sm:$0xff] %v4474_v0 }
  0xe7   : > { %661 = vst [vmem:[#allocation2 + $0x158] sm:$0xff] %v4474_v0 }
  0xe8   : > { %662 = vst [vmem:[#allocation2 + $0x10] sm:$0xff] %v4474_v0 }
  0xe9   : > { %663 = vst [vmem:[#allocation2 + $0x58] sm:$0xff] %v4474_v0 }
  0xea   : > { %664 = vst [vmem:[#allocation2 + $0xa0] sm:$0xff] %v4474_v0 }
  0xeb PF: > { %v3837_v1 = vld [vmem:[%s4828_s30 + $0x38] sm:$0xff]  ;;  %v3836_v4 = vld [vmem:[%s4828_s30 + $0x30] sm:$0xff]  ;;  %v3835_v7 = vld [vmem:[%s4828_s30 + $0x28] sm:$0xff]  ;;  %p3731_p13 = scmp.ne.s32.totalorder %s4456_s17, 2 }
  0xec   : > { %v4909_v2 = vld [vmem:[%s4828_s30 + $0x78] sm:$0xff]  ;;  %1561 = vmatpush.bf16.msra.mxu0 %v3837_v1  ;;  %4204 = vmatpush.bf16.msra.mxu3 %v3837_v1  ;;  %v4918_v5 = vld [vmem:[%s4828_s30 + $0x70] sm:$0xff]  ;;  %v3843_v8 = vld [vmem:[%s4828_s30 + $0x68] sm:$0xff] }
  0xed   : > { %v4912_v3 = vld [vmem:[%s4828_s30 + $0xb8] sm:$0xff]  ;;  %1730 = vmatpush.bf16.msra.mxu1 %v4909_v2  ;;  %v4921_v6 = vld [vmem:[%s4828_s30 + $0xb0] sm:$0xff]  ;;  %v4928_v9 = vld [vmem:[%s4828_s30 + $0xa8] sm:$0xff] }
  0xee   : > { %1899 = vmatpush.bf16.msra.mxu2 %v4912_v3  ;;  %v3834_v10 = vld [vmem:[%s4828_s30 + $0x20] sm:$0xff]  ;;  %v3833_v13 = vld [vmem:[%s4828_s30 + $0x18] sm:$0xff]  ;;  %v3832_v16 = vld [vmem:[%s4828_s30 + $0x10] sm:$0xff] }
  0xef   : > { %v3842_v11 = vld [vmem:[%s4828_s30 + $0x60] sm:$0xff]  ;;  %v3841_v14 = vld [vmem:[%s4828_s30 + $0x58] sm:$0xff]  ;;  %v3840_v17 = vld [vmem:[%s4828_s30 + $0x50] sm:$0xff] }
  0xf0   : > { %1562 = vmatpush.bf16.msra.mxu0 %v3836_v4  ;;  %4205 = vmatpush.bf16.msra.mxu3 %v3836_v4  ;;  %v4934_v12 = vld [vmem:[%s4828_s30 + $0xa0] sm:$0xff]  ;;  %v4940_v15 = vld [vmem:[%s4828_s30 + $0x98] sm:$0xff]  ;;  %v4946_v18 = vld [vmem:[%s4828_s30 + $0x90] sm:$0xff] }
  0xf1   : > { %1731 = vmatpush.bf16.msra.mxu1 %v4918_v5  ;;  %v3831_v19 = vld [vmem:[%s4828_s30 + $0x8] sm:$0xff]  ;;  %v3830_v22 = vld [vmem:[%s4828_s30] sm:$0xff]  ;;  %v3255_v30 = vld [vmem:[%s4840_s10 + $0xc] sm:$0xf0] }
  0xf2   : > { %1900 = vmatpush.bf16.msra.mxu2 %v4921_v6  ;;  %v3839_v20 = vld [vmem:[%s4828_s30 + $0x48] sm:$0xff]  ;;  %v3838_v23 = vld [vmem:[%s4828_s30 + $0x40] sm:$0xff]  ;;  %v3736_v32 = vld [vmem:[%s4840_s10 + $0x10] sm:$0xf0] }
  0xf3   : > { %v4952_v21 = vld [vmem:[%s4828_s30 + $0x88] sm:$0xff]  ;;  %v4957_v24 = vld [vmem:[%s4828_s30 + $0x80] sm:$0xff]  ;;  %v3265_v37 = vld [vmem:[%s4840_s10 + $0x18] sm:$0xf] }
  0xf4   : > { %1563 = vmatpush.bf16.msra.mxu0 %v3835_v7  ;;  %4206 = vmatpush.bf16.msra.mxu3 %v3835_v7  ;;  %v3253_v25 = vld [vmem:[%s4840_s10] sm:$0xf]  ;;  %v3735_v26 = vld [vmem:[%s4840_s10 + $0x8] sm:$0xf0]  ;;  %v3734_v29 = vld [vmem:[%s4840_s10 + $0x4] sm:$0xf] }
  0xf5   : > { %1732 = vmatpush.bf16.msra.mxu1 %v3843_v8  ;;  %v3541_v27 = vld [vmem:[%s4840_s10 + $0x240] sm:$0xf]  ;;  %v3807_v28 = vld [vmem:[%s4840_s10 + $0x248] sm:$0xf0]  ;;  %v3261_v31 = vld [vmem:[%s4840_s10 + $0x8] sm:$0xf]  ;;  %v3254_v33 = vor.u32 %v3735_v26, %v3253_v25  ;;  %v3258_v35 = vor.u32 %v3734_v29, %v3255_v30 }
  0xf6   : > { %1901 = vmatpush.bf16.msra.mxu2 %v4928_v9  ;;  %v3542_v34 = vor.u32 %v3807_v28, %v3541_v27  ;;  %v3262_v36 = vor.u32 %v3736_v32, %v3261_v31  ;;  %v3738_v38 = vld [vmem:[%s4840_s10 + $0x20] sm:$0xf0]  ;;  %v3553_v39 = vld [vmem:[%s4840_s10 + $0x258] sm:$0xf]  ;;  %v3737_v41 = vld [vmem:[%s4840_s10 + $0x1c] sm:$0xf] }
  0xf7   : > { %v3810_v40 = vld [vmem:[%s4840_s10 + $0x260] sm:$0xf0]  ;;  %v3267_v42 = vld [vmem:[%s4840_s10 + $0x24] sm:$0xf0]  ;;  %v3273_v43 = vld [vmem:[%s4840_s10 + $0x20] sm:$0xf]  ;;  %v3266_v45 = vor.u32 %v3738_v38, %v3265_v37 }
  0xf8   : > { %1564 = vmatpush.bf16.msra.mxu0 %v3834_v10  ;;  %4207 = vmatpush.bf16.msra.mxu3 %v3834_v10  ;;  %v3739_v44 = vld [vmem:[%s4840_s10 + $0x28] sm:$0xf0]  ;;  %v3554_v46 = vor.u32 %v3810_v40, %v3553_v39  ;;  %v3270_v47 = vor.u32 %v3737_v41, %v3267_v42  ;;  %v3277_v49 = vld [vmem:[%s4840_s10 + $0x30] sm:$0xf]  ;;  %v3741_v50 = vld [vmem:[%s4840_s10 + $0x38] sm:$0xf0] }
  0xf9   : > { %1733 = vmatpush.bf16.msra.mxu1 %v3842_v11  ;;  %v3274_v48 = vor.u32 %v3739_v44, %v3273_v43  ;;  %v3565_v51 = vld [vmem:[%s4840_s10 + $0x270] sm:$0xf]  ;;  %v3813_v52 = vld [vmem:[%s4840_s10 + $0x278] sm:$0xf0]  ;;  %v3740_v53 = vld [vmem:[%s4840_s10 + $0x34] sm:$0xf]  ;;  %v3278_v57 = vor.u32 %v3741_v50, %v3277_v49 }
  0xfa   : > { %1902 = vmatpush.bf16.msra.mxu2 %v4934_v12  ;;  %v3279_v54 = vld [vmem:[%s4840_s10 + $0x3c] sm:$0xf0]  ;;  %v3285_v55 = vld [vmem:[%s4840_s10 + $0x38] sm:$0xf]  ;;  %v3742_v56 = vld [vmem:[%s4840_s10 + $0x40] sm:$0xf0]  ;;  %v3566_v58 = vor.u32 %v3813_v52, %v3565_v51 }
  0xfb   : > { %v3282_v59 = vor.u32 %v3740_v53, %v3279_v54  ;;  %v3286_v60 = vor.u32 %v3742_v56, %v3285_v55  ;;  %v3289_v61 = vld [vmem:[%s4840_s10 + $0x48] sm:$0xf]  ;;  %v3744_v62 = vld [vmem:[%s4840_s10 + $0x50] sm:$0xf0]  ;;  %v3743_v1 = vld [vmem:[%s4840_s10 + $0x4c] sm:$0xf] }
  0xfc   : > { %1565 = vmatpush.bf16.msra.mxu0 %v3833_v13  ;;  %4208 = vmatpush.bf16.msra.mxu3 %v3833_v13  ;;  %v3577_v63 = vld [vmem:[%s4840_s10 + $0x288] sm:$0xf]  ;;  %v3816_v0 = vld [vmem:[%s4840_s10 + $0x290] sm:$0xf0]  ;;  %v3745_v4 = vld [vmem:[%s4840_s10 + $0x58] sm:$0xf0] }
  0xfd   : > { %1734 = vmatpush.bf16.msra.mxu1 %v3841_v14  ;;  %v3747_v10 = vld [vmem:[%s4840_s10 + $0x68] sm:$0xf0]  ;;  %v3746_v13 = vld [vmem:[%s4840_s10 + $0x64] sm:$0xf]  ;;  %v3749_v26 = vld [vmem:[%s4840_s10 + $0x7c] sm:$0xf] }
  0xfe   : > { %1903 = vmatpush.bf16.msra.mxu2 %v4940_v15  ;;  %v3822_v25 = vld [vmem:[%s4840_s10 + $0x2c0] sm:$0xf0]  ;;  %v3321_v27 = vld [vmem:[%s4840_s10 + $0x80] sm:$0xf]  ;;  %v3751_v28 = vld [vmem:[%s4840_s10 + $0x88] sm:$0xf0] }
  0xff   : > { %v3322_v32 = vor.u32 %v3751_v28, %v3321_v27  ;;  %v3752_v37 = vld [vmem:[%s4840_s10 + $0x94] sm:$0xf]  ;;  %v3327_v38 = vld [vmem:[%s4840_s10 + $0x9c] sm:$0xf0]  ;;  %v3333_v39 = vld [vmem:[%s4840_s10 + $0x98] sm:$0xf] }
 0x100   : > { %1566 = vmatpush.bf16.msra.mxu0 %v3832_v16  ;;  %4209 = vmatpush.bf16.msra.mxu3 %v3832_v16  ;;  %v3748_v16 = vld [vmem:[%s4840_s10 + $0x70] sm:$0xf0]  ;;  %v3754_v40 = vld [vmem:[%s4840_s10 + $0xa0] sm:$0xf0]  ;;  %v3330_v43 = vor.u32 %v3752_v37, %v3327_v38  ;;  %v3755_v49 = vld [vmem:[%s4840_s10 + $0xac] sm:$0xf] }
 0x101   : > { %1735 = vmatpush.bf16.msra.mxu1 %v3840_v17  ;;  %v3334_v44 = vor.u32 %v3754_v40, %v3333_v39  ;;  %v3339_v50 = vld [vmem:[%s4840_s10 + $0xb4] sm:$0xf0]  ;;  %v3345_v51 = vld [vmem:[%s4840_s10 + $0xb0] sm:$0xf]  ;;  %v3757_v52 = vld [vmem:[%s4840_s10 + $0xb8] sm:$0xf0] }
 0x102   : > { %1904 = vmatpush.bf16.msra.mxu2 %v4946_v18  ;;  %v3342_v55 = vor.u32 %v3755_v49, %v3339_v50  ;;  %v3346_v56 = vor.u32 %v3757_v52, %v3345_v51  ;;  %v667_v37 = vld [vmem:[#allocation2 + $0xd8] sm:$0xff]  ;;  %v3766_v50 = vld [vmem:[%s4840_s10 + $0x100] sm:$0xf0] }
 0x103   : > { %v3381_v49 = vld [vmem:[%s4840_s10 + $0xf8] sm:$0xf] }
 0x104   : > { %1567 = vmatpush.bf16.msra.mxu0 %v3831_v19  ;;  %4210 = vmatpush.bf16.msra.mxu3 %v3831_v19 }
 0x105   : > { %1736 = vmatpush.bf16.msra.mxu1 %v3839_v20 }
 0x106   : > { %1905 = vmatpush.bf16.msra.mxu2 %v4952_v21 }
 0x108   : > { %1568 = vmatpush.bf16.msra.mxu0 %v3830_v22  ;;  %4211 = vmatpush.bf16.msra.mxu3 %v3830_v22  ;;  %v3750_v22 = vld [vmem:[%s4840_s10 + $0x80] sm:$0xf0] }
 0x109   : > { %1737 = vmatpush.bf16.msra.mxu1 %v3838_v23 }
 0x10a   : > { %1906 = vmatpush.bf16.msra.mxu2 %v4957_v24 }
 0x10b   : > { %1569 = vmatmul.bf16.vlgmr.msra.gmra.mxu0 %v3254_v33  ;;  %1689 = vmatmul.bf16.vlgmr.msra.gmra.mxu3 %v3542_v34  ;;  %v3325_v33 = vld [vmem:[%s4840_s10 + $0x90] sm:$0xf]  ;;  %v3753_v34 = vld [vmem:[%s4840_s10 + $0x98] sm:$0xf0] }
 0x10c   : > { %4212 = vmatpush.bf16.msrb.mxu3 %v4909_v2  ;;  %1738 = vmatmul.bf16.vlgmr.msra.gmra.mxu1 %v3258_v35  ;;  %v3291_v2 = vld [vmem:[%s4840_s10 + $0x54] sm:$0xf0]  ;;  %v3613_v35 = vld [vmem:[%s4840_s10 + $0x2d0] sm:$0xf]  ;;  %v3326_v41 = vor.u32 %v3753_v34, %v3325_v33 }
 0x10d   : > { %1907 = vmatmul.bf16.vlgmr.msra.gmra.mxu2 %v3262_v36  ;;  %v3294_v7 = vor.u32 %v3743_v1, %v3291_v2  ;;  %v3825_v36 = vld [vmem:[%s4840_s10 + $0x2d8] sm:$0xf0] }
 0x10e   : > { %v3614_v42 = vor.u32 %v3825_v36, %v3613_v35 }
 0x110   : > { %4213 = vmatpush.bf16.msrb.mxu3 %v4918_v5  ;;  %v3290_v5 = vor.u32 %v3744_v62, %v3289_v61  ;;  %v3543_v61 = vld [vmem:[%s4840_s10 + $0x24c] sm:$0xf0] }
 0x111   : > { %v3351_v62 = vld [vmem:[%s4840_s10 + $0xcc] sm:$0xf0] }
 0x114   : > { %4214 = vmatpush.bf16.msrb.mxu3 %v3843_v8 }
 0x118   : > { %4215 = vmatpush.bf16.msrb.mxu3 %v3842_v11  ;;  %v3589_v11 = vld [vmem:[%s4840_s10 + $0x2a0] sm:$0xf] }
 0x11b   : > { %1574 = vmatmul.bf16.gmra.mxu0 %v3266_v45  ;;  %1694 = vmatmul.bf16.gmra.mxu3 %v3554_v46  ;;  %v3337_v45 = vld [vmem:[%s4840_s10 + $0xa8] sm:$0xf]  ;;  %v3756_v46 = vld [vmem:[%s4840_s10 + $0xb0] sm:$0xf0] }
 0x11c   : > { %4216 = vmatpush.bf16.msrb.mxu3 %v3841_v14  ;;  %1743 = vmatmul.bf16.gmra.mxu1 %v3270_v47  ;;  %v3303_v14 = vld [vmem:[%s4840_s10 + $0x6c] sm:$0xf0]  ;;  %v3625_v47 = vld [vmem:[%s4840_s10 + $0x2e8] sm:$0xf]  ;;  %v3338_v53 = vor.u32 %v3756_v46, %v3337_v45  ;;  %v3764_v45 = vld [vmem:[%s4840_s10 + $0xf4] sm:$0xf] }
 0x11d   : > { %1912 = vmatmul.bf16.gmra.mxu2 %v3274_v48  ;;  %v3306_v19 = vor.u32 %v3746_v13, %v3303_v14  ;;  %v3828_v48 = vld [vmem:[%s4840_s10 + $0x2f0] sm:$0xf0] }
 0x11e   : > { %v3626_v54 = vor.u32 %v3828_v48, %v3625_v47  ;;  %v3812_v46 = vld [vmem:[%s4840_s10 + $0x274] sm:$0xf]  ;;  %v3567_v47 = vld [vmem:[%s4840_s10 + $0x27c] sm:$0xf0] }
 0x11f   : > { %v3375_v48 = vld [vmem:[%s4840_s10 + $0xfc] sm:$0xf0] }
 0x120   : > { %4217 = vmatpush.bf16.msrb.mxu3 %v3840_v17 }
 0x124   : > { %4218 = vmatpush.bf16.msrb.mxu3 %v3839_v20 }
 0x128   : > { %4219 = vmatpush.bf16.msrb.mxu3 %v3838_v23  ;;  %v3601_v23 = vld [vmem:[%s4840_s10 + $0x2b8] sm:$0xf] }
 0x129   : > { %v3602_v30 = vor.u32 %v3822_v25, %v3601_v23 }
 0x12b   : > { %1579 = vmatmul.bf16.gmra.mxu0 %v3278_v57  ;;  %1699 = vmatmul.bf16.gmra.mxu3 %v3566_v58  ;;  %v3349_v57 = vld [vmem:[%s4840_s10 + $0xc0] sm:$0xf]  ;;  %v3759_v58 = vld [vmem:[%s4840_s10 + $0xc8] sm:$0xf0] }
 0x12c   : > { %4220 = vmatpush.bf16.msra.mxu3 %v4912_v3  ;;  %1748 = vmatmul.bf16.gmra.mxu1 %v3282_v59  ;;  %v3297_v3 = vld [vmem:[%s4840_s10 + $0x50] sm:$0xf]  ;;  %v3758_v59 = vld [vmem:[%s4840_s10 + $0xc4] sm:$0xf]  ;;  %v3350_v1 = vor.u32 %v3759_v58, %v3349_v57 }
 0x12d   : > { %1917 = vmatmul.bf16.gmra.mxu2 %v3286_v60  ;;  %v3298_v8 = vor.u32 %v3745_v4, %v3297_v3  ;;  %v3806_v60 = vld [vmem:[%s4840_s10 + $0x244] sm:$0xf]  ;;  %v3354_v4 = vor.u32 %v3758_v59, %v3351_v62  ;;  %v3378_v59 = vor.u32 %v3764_v45, %v3375_v48  ;;  %v3772_v45 = vld [vmem:[%s4840_s10 + $0x130] sm:$0xf0]  ;;  %v672_v48 = vld [vmem:[#allocation2 + $0x48] sm:$0xff] }
 0x12e   : > { %v3546_v2 = vor.u32 %v3806_v60, %v3543_v61  ;;  %v3382_v60 = vor.u32 %v3766_v50, %v3381_v49 }
 0x130   : > { %4221 = vmatpush.bf16.msra.mxu3 %v4921_v6  ;;  %v3578_v6 = vor.u32 %v3816_v0, %v3577_v63  ;;  %v3357_v63 = vld [vmem:[%s4840_s10 + $0xc8] sm:$0xf]  ;;  %v3760_v0 = vld [vmem:[%s4840_s10 + $0xd0] sm:$0xf0] }
 0x134   : > { %4222 = vmatpush.bf16.msra.mxu3 %v4928_v9  ;;  %v3301_v9 = vld [vmem:[%s4840_s10 + $0x60] sm:$0xf] }
 0x135   : > { %v3302_v17 = vor.u32 %v3747_v10, %v3301_v9  ;;  %v665_v9 = vld [vmem:[#allocation2 + $0xb0] sm:$0xff] }
 0x138   : > { %4223 = vmatpush.bf16.msra.mxu3 %v4934_v12  ;;  %v3819_v12 = vld [vmem:[%s4840_s10 + $0x2a8] sm:$0xf0] }
 0x13b   : > { %1584 = vmatmul.bf16.gmra.mxu0 %v3290_v5  ;;  %1704 = vmatmul.bf16.gmra.mxu3 %v3578_v6  ;;  %v3358_v5 = vor.u32 %v3760_v0, %v3357_v63 }
 0x13c   : > { %4224 = vmatpush.bf16.msra.mxu3 %v4940_v15  ;;  %1753 = vmatmul.bf16.gmra.mxu1 %v3294_v7  ;;  %v3309_v15 = vld [vmem:[%s4840_s10 + $0x68] sm:$0xf] }
 0x13d   : > { %1922 = vmatmul.bf16.gmra.mxu2 %v3298_v8  ;;  %v3310_v20 = vor.u32 %v3748_v16, %v3309_v15  ;;  %v3361_v15 = vld [vmem:[%s4840_s10 + $0xd8] sm:$0xf]  ;;  %v3762_v16 = vld [vmem:[%s4840_s10 + $0xe0] sm:$0xf0] }
 0x13e   : > { %v3362_v27 = vor.u32 %v3762_v16, %v3361_v15  ;;  %v3769_v15 = vld [vmem:[%s4840_s10 + $0x118] sm:$0xf0] }
 0x140   : > { %4225 = vmatpush.bf16.msra.mxu3 %v4946_v18  ;;  %v3590_v18 = vor.u32 %v3819_v12, %v3589_v11 }
 0x144   : > { %4226 = vmatpush.bf16.msra.mxu3 %v4952_v21  ;;  %v3313_v21 = vld [vmem:[%s4840_s10 + $0x78] sm:$0xf] }
 0x145   : > { %v3314_v29 = vor.u32 %v3750_v22, %v3313_v21  ;;  %v3369_v21 = vld [vmem:[%s4840_s10 + $0xe0] sm:$0xf]  ;;  %v3763_v22 = vld [vmem:[%s4840_s10 + $0xe8] sm:$0xf0] }
 0x148   : > { %4227 = vmatpush.bf16.msra.mxu3 %v4957_v24  ;;  %v3315_v24 = vld [vmem:[%s4840_s10 + $0x84] sm:$0xf0] }
 0x149   : > { %v3318_v31 = vor.u32 %v3749_v26, %v3315_v24  ;;  %v666_v26 = vld [vmem:[#allocation2 + $0x1b0] sm:$0xff] }
 0x14b   : > { %1589 = vmatmul.bf16.gmra.mxu0 %v3302_v17  ;;  %1709 = vmatmul.bf16.gmra.mxu3 %v3590_v18  ;;  %v3761_v17 = vld [vmem:[%s4840_s10 + $0xdc] sm:$0xf] }
 0x14c   : > { %1758 = vmatmul.bf16.gmra.mxu1 %v3306_v19  ;;  %v3809_v18 = vld [vmem:[%s4840_s10 + $0x25c] sm:$0xf]  ;;  %v3555_v19 = vld [vmem:[%s4840_s10 + $0x264] sm:$0xf0] }
 0x14d   : > { %1927 = vmatmul.bf16.gmra.mxu2 %v3310_v20  ;;  %v3363_v20 = vld [vmem:[%s4840_s10 + $0xe4] sm:$0xf0]  ;;  %v3558_v28 = vor.u32 %v3809_v18, %v3555_v19 }
 0x14e   : > { %v670_v18 = vld [vmem:[#allocation2 + $0x168] sm:$0xff] }
 0x15b   : > { %1594 = vmatmul.bf16.gmra.mxu0 %v3314_v29  ;;  %1714 = vmatmul.bf16.gmra.mxu3 %v3602_v30 }
 0x15c   : > { %1763 = vmatmul.bf16.gmra.mxu1 %v3318_v31  ;;  %v3366_v31 = vor.u32 %v3761_v17, %v3363_v20 }
 0x15d   : > { %1932 = vmatmul.bf16.gmra.mxu2 %v3322_v32  ;;  %v3370_v32 = vor.u32 %v3763_v22, %v3369_v21 }
 0x16b   : > { %1599 = vmatmul.bf16.gmra.mxu0 %v3326_v41  ;;  %1719 = vmatmul.bf16.gmra.mxu3 %v3614_v42 }
 0x16c   : > { %1768 = vmatmul.bf16.gmra.mxu1 %v3330_v43  ;;  %v3373_v43 = vld [vmem:[%s4840_s10 + $0xf0] sm:$0xf] }
 0x16d   : > { %1937 = vmatmul.bf16.gmra.mxu2 %v3334_v44  ;;  %v3765_v44 = vld [vmem:[%s4840_s10 + $0xf8] sm:$0xf0] }
 0x17b   : > { %1604 = vmatmul.bf16.gmra.mxu0 %v3338_v53  ;;  %1724 = vmatmul.bf16.gmra.mxu3 %v3626_v54  ;;  %v668_v53 = vld [vmem:[#allocation2 + $0x18] sm:$0xff] }
 0x17c   : > { %1773 = vmatmul.bf16.gmra.mxu1 %v3342_v55  ;;  %v3374_v55 = vor.u32 %v3765_v44, %v3373_v43  ;;  %v3399_v43 = vld [vmem:[%s4840_s10 + $0x12c] sm:$0xf0]  ;;  %v3405_v44 = vld [vmem:[%s4840_s10 + $0x128] sm:$0xf] }
 0x17d   : > { %1942 = vmatmul.bf16.gmra.mxu2 %v3346_v56  ;;  %v3570_v56 = vor.u32 %v3812_v46, %v3567_v47 }
 0x188   : > { %v1570_v3 = vpop.f32.mrf.mxu0 }
 0x189   : > { %v1739_v6 = vpop.f32.mrf.mxu1 }
 0x18a   : > { %v1740_v7 = vadd.f32 %v1739_v6, %v1570_v3 }
 0x18b   : > { %1609 = vmatmul.bf16.gmra.mxu0 %v3350_v1  ;;  %1858 = vmatmul.bf16.vlgmr.msrb.gmra.mxu3 %v3546_v2  ;;  %v669_v1 = vld [vmem:[#allocation2 + $0x50] sm:$0xff] }
 0x18c   : > { %1778 = vmatmul.bf16.gmra.mxu1 %v3354_v4 }
 0x18d   : > { %1947 = vmatmul.bf16.gmra.mxu2 %v3358_v5 }
 0x18e   : > { %v5043_v8 = vpop.f32.mrf.mxu3 }
 0x190   : > { %v1908_v10 = vpop.f32.mrf.mxu2  ;;  %v1572_v12 = vpop.f32.mrf.mxu0 }
 0x191   : > { %v1909_v11 = vadd.f32 %v1908_v10, %v1740_v7  ;;  %v1741_v13 = vpop.f32.mrf.mxu1  ;;  %v3385_v7 = vld [vmem:[%s4840_s10 + $0x108] sm:$0xf]  ;;  %v3767_v10 = vld [vmem:[%s4840_s10 + $0x10c] sm:$0xf] }
 0x192   : > { %v1742_v23 = vadd.f32 %v1741_v13, %v1572_v12  ;;  %v3579_v12 = vld [vmem:[%s4840_s10 + $0x294] sm:$0xf0] }
 0x193   : > { %v2068_v14 = vadd.f32 %v1909_v11, %v665_v9  ;;  %v3768_v9 = vld [vmem:[%s4840_s10 + $0x110] sm:$0xf0]  ;;  %v3815_v11 = vld [vmem:[%s4840_s10 + $0x28c] sm:$0xf]  ;;  %v3387_v13 = vld [vmem:[%s4840_s10 + $0x114] sm:$0xf0] }
 0x194   : > { %v3386_v20 = vor.u32 %v3768_v9, %v3385_v7  ;;  %v3582_v21 = vor.u32 %v3815_v11, %v3579_v12  ;;  %v3821_v7 = vld [vmem:[%s4840_s10 + $0x2bc] sm:$0xf]  ;;  %v3603_v9 = vld [vmem:[%s4840_s10 + $0x2c4] sm:$0xf0]  ;;  %v3417_v11 = vld [vmem:[%s4840_s10 + $0x140] sm:$0xf] }
 0x195   : > { %2132 = vst [vmem:[#allocation2 + $0xb0] sm:$0xff] %v2068_v14  ;;  %v3393_v14 = vld [vmem:[%s4840_s10 + $0x110] sm:$0xf]  ;;  %v3775_v12 = vld [vmem:[%s4840_s10 + $0x148] sm:$0xf0] }
 0x196   : > { %v5053_v25 = vpop.f32.mrf.mxu3 }
 0x198   : > { %v1910_v24 = vpop.f32.mrf.mxu2  ;;  %v1575_v30 = vpop.f32.mrf.mxu0 }
 0x199   : > { %v1911_v29 = vadd.f32 %v1910_v24, %v1742_v23  ;;  %v1744_v33 = vpop.f32.mrf.mxu1  ;;  %v3394_v24 = vor.u32 %v3769_v15, %v3393_v14  ;;  %v674_v15 = vld [vmem:[#allocation2 + $0x110] sm:$0xff] }
 0x19a   : > { %v1745_v35 = vadd.f32 %v1744_v33, %v1575_v30 }
 0x19b   : > { %v2069_v34 = vadd.f32 %v1911_v29, %v666_v26  ;;  %1614 = vmatmul.bf16.gmra.mxu0 %v3362_v27  ;;  %1863 = vmatmul.bf16.gmra.mxu3 %v3558_v28  ;;  %v3390_v26 = vor.u32 %v3767_v10, %v3387_v13  ;;  %v3411_v10 = vld [vmem:[%s4840_s10 + $0x144] sm:$0xf0] }
 0x19c   : > { %1783 = vmatmul.bf16.gmra.mxu1 %v3366_v31  ;;  %v671_v31 = vld [vmem:[#allocation2 + $0x130] sm:$0xff] }
 0x19d   : > { %2133 = vst [vmem:[#allocation2 + $0x1b0] sm:$0xff] %v2069_v34  ;;  %1952 = vmatmul.bf16.gmra.mxu2 %v3370_v32 }
 0x19e   : > { %v5055_v36 = vpop.f32.mrf.mxu3 }
 0x1a0   : > { %v1913_v38 = vpop.f32.mrf.mxu2  ;;  %v1577_v40 = vpop.f32.mrf.mxu0 }
 0x1a1   : > { %v1914_v39 = vadd.f32 %v1913_v38, %v1745_v35  ;;  %v1746_v41 = vpop.f32.mrf.mxu1  ;;  %v3397_v38 = vld [vmem:[%s4840_s10 + $0x120] sm:$0xf] }
 0x1a2   : > { %v1747_v51 = vadd.f32 %v1746_v41, %v1577_v40  ;;  %v3770_v40 = vld [vmem:[%s4840_s10 + $0x124] sm:$0xf] }
 0x1a3   : > { %v2070_v42 = vadd.f32 %v1914_v39, %v667_v37  ;;  %v3771_v39 = vld [vmem:[%s4840_s10 + $0x128] sm:$0xf0]  ;;  %v3818_v41 = vld [vmem:[%s4840_s10 + $0x2a4] sm:$0xf] }
 0x1a4   : > { %v3398_v50 = vor.u32 %v3771_v39, %v3397_v38  ;;  %v3777_v38 = vld [vmem:[%s4840_s10 + $0x158] sm:$0xf0]  ;;  %v3776_v39 = vld [vmem:[%s4840_s10 + $0x154] sm:$0xf] }
 0x1a5   : > { %2134 = vst [vmem:[#allocation2 + $0xd8] sm:$0xff] %v2070_v42  ;;  %v3591_v42 = vld [vmem:[%s4840_s10 + $0x2ac] sm:$0xf0] }
 0x1a6   : > { %v5065_v52 = vpop.f32.mrf.mxu3 }
 0x1a8   : > { %v1915_v54 = vpop.f32.mrf.mxu2  ;;  %v1580_v58 = vpop.f32.mrf.mxu0 }
 0x1a9   : > { %v1916_v57 = vadd.f32 %v1915_v54, %v1747_v51  ;;  %v1749_v61 = vpop.f32.mrf.mxu1  ;;  %v3594_v51 = vor.u32 %v3818_v41, %v3591_v42  ;;  %v3615_v41 = vld [vmem:[%s4840_s10 + $0x2dc] sm:$0xf0] }
 0x1aa   : > { %v1750_v63 = vadd.f32 %v1749_v61, %v1580_v58  ;;  %v673_v61 = vld [vmem:[#allocation2 + $0x180] sm:$0xff] }
 0x1ab   : > { %v2071_v62 = vadd.f32 %v1916_v57, %v668_v53  ;;  %1619 = vmatmul.bf16.gmra.mxu0 %v3374_v55  ;;  %1868 = vmatmul.bf16.gmra.mxu3 %v3570_v56  ;;  %v3402_v55 = vor.u32 %v3770_v40, %v3399_v43  ;;  %v3406_v56 = vor.u32 %v3772_v45, %v3405_v44  ;;  %v3824_v40 = vld [vmem:[%s4840_s10 + $0x2d4] sm:$0xf]  ;;  %v3423_v42 = vld [vmem:[%s4840_s10 + $0x15c] sm:$0xf0]  ;;  %v3429_v43 = vld [vmem:[%s4840_s10 + $0x158] sm:$0xf] }
 0x1ac   : > { %1788 = vmatmul.bf16.gmra.mxu1 %v3378_v59  ;;  %v3778_v44 = vld [vmem:[%s4840_s10 + $0x160] sm:$0xf0] }
 0x1ad   : > { %2135 = vst [vmem:[#allocation2 + $0x18] sm:$0xff] %v2071_v62  ;;  %1957 = vmatmul.bf16.gmra.mxu2 %v3382_v60 }
 0x1ae   : > { %v5067_v0 = vpop.f32.mrf.mxu3 }
 0x1b0   : > { %v1918_v2 = vpop.f32.mrf.mxu2  ;;  %v1582_v4 = vpop.f32.mrf.mxu0 }
 0x1b1   : > { %v1919_v3 = vadd.f32 %v1918_v2, %v1750_v63  ;;  %v1751_v5 = vpop.f32.mrf.mxu1 }
 0x1b2   : > { %v1752_v16 = vadd.f32 %v1751_v5, %v1582_v4  ;;  %v3409_v4 = vld [vmem:[%s4840_s10 + $0x138] sm:$0xf]  ;;  %v3774_v5 = vld [vmem:[%s4840_s10 + $0x140] sm:$0xf0] }
 0x1b3   : > { %v2072_v6 = vadd.f32 %v1919_v3, %v669_v1 }
 0x1b5   : > { %2136 = vst [vmem:[#allocation2 + $0x50] sm:$0xff] %v2072_v6  ;;  %v3773_v6 = vld [vmem:[%s4840_s10 + $0x13c] sm:$0xf] }
 0x1b6   : > { %v5077_v17 = vpop.f32.mrf.mxu3 }
 0x1b8   : > { %v1920_v19 = vpop.f32.mrf.mxu2  ;;  %v1585_v23 = vpop.f32.mrf.mxu0 }
 0x1b9   : > { %v1921_v22 = vadd.f32 %v1920_v19, %v1752_v16  ;;  %v1754_v27 = vpop.f32.mrf.mxu1  ;;  %v3606_v19 = vor.u32 %v3821_v7, %v3603_v9  ;;  %v3779_v7 = vld [vmem:[%s4840_s10 + $0x16c] sm:$0xf] }
 0x1ba   : > { %v1755_v29 = vadd.f32 %v1754_v27, %v1585_v23  ;;  %v3418_v23 = vor.u32 %v3775_v12, %v3417_v11  ;;  %v3827_v9 = vld [vmem:[%s4840_s10 + $0x2ec] sm:$0xf]  ;;  %v3435_v11 = vld [vmem:[%s4840_s10 + $0x174] sm:$0xf0]  ;;  %v3441_v12 = vld [vmem:[%s4840_s10 + $0x170] sm:$0xf] }
 0x1bb   : > { %v2073_v28 = vadd.f32 %v1921_v22, %v670_v18  ;;  %1624 = vmatmul.bf16.gmra.mxu0 %v3386_v20  ;;  %1873 = vmatmul.bf16.gmra.mxu3 %v3582_v21  ;;  %v3410_v18 = vor.u32 %v3774_v5, %v3409_v4  ;;  %v3414_v22 = vor.u32 %v3773_v6, %v3411_v10  ;;  %v3433_v5 = vld [vmem:[%s4840_s10 + $0x168] sm:$0xf]  ;;  %v3780_v6 = vld [vmem:[%s4840_s10 + $0x170] sm:$0xf0]  ;;  %v3627_v10 = vld [vmem:[%s4840_s10 + $0x2f4] sm:$0xf0] }
 0x1bc   : > { %1793 = vmatmul.bf16.gmra.mxu1 %v3390_v26 }
 0x1bd   : > { %2137 = vst [vmem:[#allocation2 + $0x168] sm:$0xff] %v2073_v28  ;;  %1962 = vmatmul.bf16.gmra.mxu2 %v3394_v24 }
 0x1be   : > { %v5079_v30 = vpop.f32.mrf.mxu3 }
 0x1c0   : > { %v1923_v32 = vpop.f32.mrf.mxu2  ;;  %v1587_v34 = vpop.f32.mrf.mxu0 }
 0x1c1   : > { %v1924_v33 = vadd.f32 %v1923_v32, %v1755_v29  ;;  %v1756_v35 = vpop.f32.mrf.mxu1  ;;  %v675_v29 = vld [vmem:[#allocation2 + $0x118] sm:$0xff] }
 0x1c2   : > { %v1757_v46 = vadd.f32 %v1756_v35, %v1587_v34 }
 0x1c3   : > { %v2074_v37 = vadd.f32 %v1924_v33, %v671_v31 }
 0x1c5   : > { %2138 = vst [vmem:[#allocation2 + $0x130] sm:$0xff] %v2074_v37  ;;  %v3421_v37 = vld [vmem:[%s4840_s10 + $0x150] sm:$0xf] }
 0x1c6   : > { %v5089_v47 = vpop.f32.mrf.mxu3 }
 0x1c8   : > { %v1925_v49 = vpop.f32.mrf.mxu2  ;;  %v1590_v54 = vpop.f32.mrf.mxu0 }
 0x1c9   : > { %v1926_v53 = vadd.f32 %v1925_v49, %v1757_v46  ;;  %v1759_v57 = vpop.f32.mrf.mxu1 }
 0x1ca   : > { %v1760_v59 = vadd.f32 %v1759_v57, %v1590_v54 }
 0x1cb   : > { %v2075_v58 = vadd.f32 %v1926_v53, %v672_v48  ;;  %1629 = vmatmul.bf16.gmra.mxu0 %v3398_v50  ;;  %1878 = vmatmul.bf16.gmra.mxu3 %v3594_v51  ;;  %v676_v48 = vld [vmem:[#allocation2 + $0x98] sm:$0xff]  ;;  %v3422_v50 = vor.u32 %v3777_v38, %v3421_v37  ;;  %v3618_v51 = vor.u32 %v3824_v40, %v3615_v41  ;;  %v3445_v40 = vld [vmem:[%s4840_s10 + $0x180] sm:$0xf]  ;;  %v3783_v41 = vld [vmem:[%s4840_s10 + $0x188] sm:$0xf0] }
 0x1cc   : > { %1798 = vmatmul.bf16.gmra.mxu1 %v3402_v55  ;;  %v3426_v55 = vor.u32 %v3776_v39, %v3423_v42  ;;  %v3782_v42 = vld [vmem:[%s4840_s10 + $0x184] sm:$0xf] }
 0x1cd   : > { %2139 = vst [vmem:[#allocation2 + $0x48] sm:$0xff] %v2075_v58  ;;  %1967 = vmatmul.bf16.gmra.mxu2 %v3406_v56  ;;  %v3430_v56 = vor.u32 %v3778_v44, %v3429_v43  ;;  %v3549_v43 = vld [vmem:[%s4840_s10 + $0x248] sm:$0xf]  ;;  %v3808_v44 = vld [vmem:[%s4840_s10 + $0x250] sm:$0xf0] }
 0x1ce   : > { %v5091_v60 = vpop.f32.mrf.mxu3 }
 0x1d0   : > { %v1928_v62 = vpop.f32.mrf.mxu2  ;;  %v1592_v1 = vpop.f32.mrf.mxu0 }
 0x1d1   : > { %v1929_v63 = vadd.f32 %v1928_v62, %v1760_v59  ;;  %v1761_v2 = vpop.f32.mrf.mxu1  ;;  %v677_v62 = vld [vmem:[#allocation2 + $0x120] sm:$0xff] }
 0x1d2   : > { %v1762_v13 = vadd.f32 %v1761_v2, %v1592_v1 }
 0x1d3   : > { %v2076_v3 = vadd.f32 %v1929_v63, %v673_v61 }
 0x1d5   : > { %2140 = vst [vmem:[#allocation2 + $0x180] sm:$0xff] %v2076_v3 }
 0x1d6   : > { %v5101_v14 = vpop.f32.mrf.mxu3 }
 0x1d8   : > { %v1930_v16 = vpop.f32.mrf.mxu2  ;;  %v1595_v21 = vpop.f32.mrf.mxu0 }
 0x1d9   : > { %v1931_v20 = vadd.f32 %v1930_v16, %v1762_v13  ;;  %v1764_v26 = vpop.f32.mrf.mxu1  ;;  %v3781_v13 = vld [vmem:[%s4840_s10 + $0x178] sm:$0xf0] }
 0x1da   : > { %v1765_v27 = vadd.f32 %v1764_v26, %v1595_v21  ;;  %v3630_v21 = vor.u32 %v3827_v9, %v3627_v10  ;;  %v3438_v26 = vor.u32 %v3779_v7, %v3435_v11  ;;  %v3457_v11 = vld [vmem:[%s4840_s10 + $0x198] sm:$0xf] }
 0x1db   : > { %v2077_v24 = vadd.f32 %v1931_v20, %v674_v15  ;;  %1634 = vmatmul.bf16.gmra.mxu0 %v3410_v18  ;;  %1883 = vmatmul.bf16.gmra.mxu3 %v3606_v19  ;;  %v678_v18 = vld [vmem:[#allocation2 + $0x150] sm:$0xff]  ;;  %v3434_v20 = vor.u32 %v3780_v6, %v3433_v5 }
 0x1dc   : > { %1803 = vmatmul.bf16.gmra.mxu1 %v3414_v22 }
 0x1dd   : > { %2141 = vst [vmem:[#allocation2 + $0x110] sm:$0xff] %v2077_v24  ;;  %1972 = vmatmul.bf16.gmra.mxu2 %v3418_v23  ;;  %v3442_v24 = vor.u32 %v3781_v13, %v3441_v12  ;;  %v3786_v12 = vld [vmem:[%s4840_s10 + $0x1a0] sm:$0xf0]  ;;  %v3785_v13 = vld [vmem:[%s4840_s10 + $0x19c] sm:$0xf] }
 0x1de   : > { %v5103_v28 = vpop.f32.mrf.mxu3 }
 0x1e0   : > { %v1933_v31 = vpop.f32.mrf.mxu2  ;;  %v1597_v33 = vpop.f32.mrf.mxu0 }
 0x1e1   : > { %v1934_v32 = vadd.f32 %v1933_v31, %v1765_v27  ;;  %v1766_v34 = vpop.f32.mrf.mxu1 }
 0x1e2   : > { %v1767_v45 = vadd.f32 %v1766_v34, %v1597_v33  ;;  %v679_v33 = vld [vmem:[#allocation2 + $0x108] sm:$0xff] }
 0x1e3   : > { %v2078_v35 = vadd.f32 %v1934_v32, %v675_v29 }
 0x1e5   : > { %2142 = vst [vmem:[#allocation2 + $0x118] sm:$0xff] %v2078_v35 }
 0x1e6   : > { %v5113_v46 = vpop.f32.mrf.mxu3 }
 0x1e8   : > { %v1935_v49 = vpop.f32.mrf.mxu2  ;;  %v1600_v54 = vpop.f32.mrf.mxu0 }
 0x1e9   : > { %v1936_v53 = vadd.f32 %v1935_v49, %v1767_v45  ;;  %v1769_v57 = vpop.f32.mrf.mxu1  ;;  %v3447_v45 = vld [vmem:[%s4840_s10 + $0x18c] sm:$0xf0]  ;;  %v3784_v49 = vld [vmem:[%s4840_s10 + $0x190] sm:$0xf0] }
 0x1ea   : > { %v1770_v59 = vadd.f32 %v1769_v57, %v1600_v54 }
 0x1eb   : > { %v2079_v58 = vadd.f32 %v1936_v53, %v676_v48  ;;  %1639 = vmatmul.bf16.gmra.mxu0 %v3422_v50  ;;  %1888 = vmatmul.bf16.gmra.mxu3 %v3618_v51  ;;  %v3453_v48 = vld [vmem:[%s4840_s10 + $0x188] sm:$0xf]  ;;  %v680_v53 = vld [vmem:[#allocation2 + $0x60] sm:$0xff] }
 0x1ec   : > { %1808 = vmatmul.bf16.gmra.mxu1 %v3426_v55  ;;  %v3446_v55 = vor.u32 %v3783_v41, %v3445_v40  ;;  %v683_v41 = vld [vmem:[#allocation2 + $0x138] sm:$0xff] }
 0x1ed   : > { %2143 = vst [vmem:[#allocation2 + $0x98] sm:$0xff] %v2079_v58  ;;  %1977 = vmatmul.bf16.gmra.mxu2 %v3430_v56  ;;  %v3550_v56 = vor.u32 %v3808_v44, %v3549_v43 }
 0x1ee   : > { %v5115_v61 = vpop.f32.mrf.mxu3 }
 0x1f0   : > { %v1938_v63 = vpop.f32.mrf.mxu2  ;;  %v1602_v2 = vpop.f32.mrf.mxu0 }
 0x1f1   : > { %v1939_v1 = vadd.f32 %v1938_v63, %v1770_v59  ;;  %v1771_v3 = vpop.f32.mrf.mxu1  ;;  %v3450_v59 = vor.u32 %v3782_v42, %v3447_v45 }
 0x1f2   : > { %v1772_v15 = vadd.f32 %v1771_v3, %v1602_v2 }
 0x1f3   : > { %v2080_v4 = vadd.f32 %v1939_v1, %v677_v62  ;;  %v3454_v62 = vor.u32 %v3784_v49, %v3453_v48  ;;  %v3469_v49 = vld [vmem:[%s4840_s10 + $0x1b0] sm:$0xf] }
 0x1f5   : > { %2144 = vst [vmem:[#allocation2 + $0x120] sm:$0xff] %v2080_v4  ;;  %v681_v4 = vld [vmem:[#allocation2 + $0xe0] sm:$0xff] }
 0x1f6   : > { %v5125_v16 = vpop.f32.mrf.mxu3 }
 0x1f8   : > { %v1940_v19 = vpop.f32.mrf.mxu2  ;;  %v1605_v23 = vpop.f32.mrf.mxu0 }
 0x1f9   : > { %v1941_v22 = vadd.f32 %v1940_v19, %v1772_v15  ;;  %v1774_v27 = vpop.f32.mrf.mxu1  ;;  %v3561_v15 = vld [vmem:[%s4840_s10 + $0x260] sm:$0xf]  ;;  %v3459_v19 = vld [vmem:[%s4840_s10 + $0x1a4] sm:$0xf0] }
 0x1fa   : > { %v1775_v31 = vadd.f32 %v1774_v27, %v1605_v23  ;;  %v3458_v27 = vor.u32 %v3786_v12, %v3457_v11 }
 0x1fb   : > { %v2081_v29 = vadd.f32 %v1941_v22, %v678_v18  ;;  %1644 = vmatmul.bf16.gmra.mxu0 %v3434_v20  ;;  %1893 = vmatmul.bf16.gmra.mxu3 %v3630_v21  ;;  %v3811_v18 = vld [vmem:[%s4840_s10 + $0x268] sm:$0xf0]  ;;  %v3465_v20 = vld [vmem:[%s4840_s10 + $0x1a0] sm:$0xf] }
 0x1fc   : > { %1813 = vmatmul.bf16.gmra.mxu1 %v3438_v26  ;;  %v3787_v21 = vld [vmem:[%s4840_s10 + $0x1a8] sm:$0xf0] }
 0x1fd   : > { %2145 = vst [vmem:[#allocation2 + $0x150] sm:$0xff] %v2081_v29  ;;  %1982 = vmatmul.bf16.gmra.mxu2 %v3442_v24  ;;  %v682_v26 = vld [vmem:[#allocation2 + $0x188] sm:$0xff]  ;;  %v3562_v29 = vor.u32 %v3811_v18, %v3561_v15  ;;  %v685_v15 = vld [vmem:[#allocation2 + $0x80] sm:$0xff] }
 0x1fe   : > { %v5127_v32 = vpop.f32.mrf.mxu3 }
 0x200   : > { %v1943_v34 = vpop.f32.mrf.mxu2  ;;  %v1607_v37 = vpop.f32.mrf.mxu0 }
 0x201   : > { %v1944_v35 = vadd.f32 %v1943_v34, %v1775_v31  ;;  %v1776_v38 = vpop.f32.mrf.mxu1  ;;  %v3462_v34 = vor.u32 %v3785_v13, %v3459_v19 }
 0x202   : > { %v1777_v50 = vadd.f32 %v1776_v38, %v1607_v37 }
 0x203   : > { %v2082_v39 = vadd.f32 %v1944_v35, %v679_v33  ;;  %v3466_v35 = vor.u32 %v3787_v21, %v3465_v20 }
 0x205   : > { %2146 = vst [vmem:[#allocation2 + $0x108] sm:$0xff] %v2082_v39 }
 0x206   : > { %v5137_v51 = vpop.f32.mrf.mxu3 }
 0x208   : > { %v1945_v54 = vpop.f32.mrf.mxu2  ;;  %v1610_v58 = vpop.f32.mrf.mxu0 }
 0x209   : > { %v1946_v57 = vadd.f32 %v1945_v54, %v1777_v50  ;;  %v1779_v63 = vpop.f32.mrf.mxu1  ;;  %v3789_v50 = vld [vmem:[%s4840_s10 + $0x1b8] sm:$0xf0]  ;;  %v3573_v54 = vld [vmem:[%s4840_s10 + $0x278] sm:$0xf] }
 0x20a   : > { %v1780_v2 = vadd.f32 %v1779_v63, %v1610_v58  ;;  %v3790_v58 = vld [vmem:[%s4840_s10 + $0x1c0] sm:$0xf0] }
 0x20b   : > { %v2083_v1 = vadd.f32 %v1946_v57, %v680_v53  ;;  %1649 = vmatmul.bf16.gmra.mxu0 %v3446_v55  ;;  %2027 = vmatmul.bf16.vlgmr.msra.gmra.mxu3 %v3550_v56  ;;  %v3788_v53 = vld [vmem:[%s4840_s10 + $0x1b4] sm:$0xf]  ;;  %v3814_v55 = vld [vmem:[%s4840_s10 + $0x280] sm:$0xf0]  ;;  %v3471_v56 = vld [vmem:[%s4840_s10 + $0x1bc] sm:$0xf0] }
 0x20c   : > { %1818 = vmatmul.bf16.gmra.mxu1 %v3450_v59  ;;  %v3477_v57 = vld [vmem:[%s4840_s10 + $0x1b8] sm:$0xf]  ;;  %v684_v63 = vld [vmem:[#allocation2 + $0x140] sm:$0xff] }
 0x20d   : > { %2147 = vst [vmem:[#allocation2 + $0x60] sm:$0xff] %v2083_v1  ;;  %1987 = vmatmul.bf16.gmra.mxu2 %v3454_v62 }
 0x20e   : > { %v5139_v3 = vpop.f32.mrf.mxu3 }
 0x210   : > { %v1948_v5 = vpop.f32.mrf.mxu2  ;;  %v1612_v7 = vpop.f32.mrf.mxu0 }
 0x211   : > { %v1949_v6 = vadd.f32 %v1948_v5, %v1780_v2  ;;  %v1781_v9 = vpop.f32.mrf.mxu1  ;;  %v3470_v2 = vor.u32 %v3789_v50, %v3469_v49 }
 0x212   : > { %v1782_v22 = vadd.f32 %v1781_v9, %v1612_v7  ;;  %v3474_v7 = vor.u32 %v3788_v53, %v3471_v56  ;;  %v3478_v9 = vor.u32 %v3790_v58, %v3477_v57  ;;  %v687_v56 = vld [vmem:[#allocation2 + $0x1b8] sm:$0xff] }
 0x213   : > { %v2084_v10 = vadd.f32 %v1949_v6, %v681_v4  ;;  %v3574_v4 = vor.u32 %v3814_v55, %v3573_v54 }
 0x215   : > { %2148 = vst [vmem:[#allocation2 + $0xe0] sm:$0xff] %v2084_v10 }
 0x216   : > { %v5149_v23 = vpop.f32.mrf.mxu3 }
 0x218   : > { %v1950_v24 = vpop.f32.mrf.mxu2  ;;  %v1615_v33 = vpop.f32.mrf.mxu0 }
 0x219   : > { %v1951_v31 = vadd.f32 %v1950_v24, %v1782_v22  ;;  %v1784_v37 = vpop.f32.mrf.mxu1  ;;  %v3792_v24 = vld [vmem:[%s4840_s10 + $0x1d0] sm:$0xf0] }
 0x21a   : > { %v1785_v39 = vadd.f32 %v1784_v37, %v1615_v33  ;;  %v3483_v33 = vld [vmem:[%s4840_s10 + $0x1d4] sm:$0xf0] }
 0x21b   : > { %v2085_v38 = vadd.f32 %v1951_v31, %v682_v26  ;;  %1654 = vmatmul.bf16.gmra.mxu0 %v3458_v27  ;;  %2032 = vmatmul.bf16.gmra.mxu3 %v3562_v29  ;;  %v3481_v26 = vld [vmem:[%s4840_s10 + $0x1c8] sm:$0xf]  ;;  %v3791_v27 = vld [vmem:[%s4840_s10 + $0x1cc] sm:$0xf]  ;;  %v3585_v29 = vld [vmem:[%s4840_s10 + $0x290] sm:$0xf] }
 0x21c   : > { %1823 = vmatmul.bf16.gmra.mxu1 %v3462_v34  ;;  %v3817_v31 = vld [vmem:[%s4840_s10 + $0x298] sm:$0xf0]  ;;  %v3489_v34 = vld [vmem:[%s4840_s10 + $0x1d0] sm:$0xf] }
 0x21d   : > { %2149 = vst [vmem:[#allocation2 + $0x188] sm:$0xff] %v2085_v38  ;;  %1992 = vmatmul.bf16.gmra.mxu2 %v3466_v35  ;;  %v3793_v35 = vld [vmem:[%s4840_s10 + $0x1d8] sm:$0xf0] }
 0x21e   : > { %v5151_v40 = vpop.f32.mrf.mxu3  ;;  %v3490_v49 = vor.u32 %v3793_v35, %v3489_v34  ;;  %v689_v35 = vld [vmem:[#allocation2 + $0x1e8] sm:$0xff] }
 0x220   : > { %v1953_v42 = vpop.f32.mrf.mxu2  ;;  %v1617_v44 = vpop.f32.mrf.mxu0 }
 0x221   : > { %v1954_v43 = vadd.f32 %v1953_v42, %v1785_v39  ;;  %v1786_v45 = vpop.f32.mrf.mxu1  ;;  %v686_v39 = vld [vmem:[#allocation2 + $0x1a8] sm:$0xff]  ;;  %v3482_v42 = vor.u32 %v3792_v24, %v3481_v26 }
 0x222   : > { %v1787_v59 = vadd.f32 %v1786_v45, %v1617_v44 }
 0x223   : > { %v2086_v48 = vadd.f32 %v1954_v43, %v683_v41  ;;  %v3586_v43 = vor.u32 %v3817_v31, %v3585_v29 }
 0x225   : > { %2150 = vst [vmem:[#allocation2 + $0x138] sm:$0xff] %v2086_v48  ;;  %v3486_v48 = vor.u32 %v3791_v27, %v3483_v33 }
 0x226   : > { %v5161_v62 = vpop.f32.mrf.mxu3 }
 0x228   : > { %v1955_v1 = vpop.f32.mrf.mxu2  ;;  %v1620_v6 = vpop.f32.mrf.mxu0 }
 0x229   : > { %v1956_v5 = vadd.f32 %v1955_v1, %v1787_v59  ;;  %v1789_v10 = vpop.f32.mrf.mxu1 }
 0x22a   : > { %v1790_v12 = vadd.f32 %v1789_v10, %v1620_v6  ;;  %v3597_v6 = vld [vmem:[%s4840_s10 + $0x2a8] sm:$0xf] }
 0x22b   : > { %v2087_v11 = vadd.f32 %v1956_v5, %v684_v63  ;;  %1659 = vmatmul.bf16.gmra.mxu0 %v3470_v2  ;;  %2037 = vmatmul.bf16.gmra.mxu3 %v3574_v4  ;;  %v3493_v2 = vld [vmem:[%s4840_s10 + $0x1e0] sm:$0xf]  ;;  %v3795_v4 = vld [vmem:[%s4840_s10 + $0x1e8] sm:$0xf0]  ;;  %v3794_v5 = vld [vmem:[%s4840_s10 + $0x1e4] sm:$0xf] }
 0x22c   : > { %1828 = vmatmul.bf16.gmra.mxu1 %v3474_v7  ;;  %v3820_v7 = vld [vmem:[%s4840_s10 + $0x2b0] sm:$0xf0]  ;;  %v3501_v10 = vld [vmem:[%s4840_s10 + $0x1e8] sm:$0xf] }
 0x22d   : > { %2151 = vst [vmem:[#allocation2 + $0x140] sm:$0xff] %v2087_v11  ;;  %1997 = vmatmul.bf16.gmra.mxu2 %v3478_v9  ;;  %v3495_v9 = vld [vmem:[%s4840_s10 + $0x1ec] sm:$0xf0]  ;;  %v3796_v11 = vld [vmem:[%s4840_s10 + $0x1f0] sm:$0xf0] }
 0x22e   : > { %v5163_v13 = vpop.f32.mrf.mxu3  ;;  %v3498_v24 = vor.u32 %v3794_v5, %v3495_v9  ;;  %v3502_v27 = vor.u32 %v3796_v11, %v3501_v10 }
 0x230   : > { %v1958_v18 = vpop.f32.mrf.mxu2  ;;  %v1622_v20 = vpop.f32.mrf.mxu0 }
 0x231   : > { %v1959_v19 = vadd.f32 %v1958_v18, %v1790_v12  ;;  %v1791_v21 = vpop.f32.mrf.mxu1  ;;  %v688_v18 = vld [vmem:[#allocation2 + $0x28] sm:$0xff] }
 0x232   : > { %v1792_v37 = vadd.f32 %v1791_v21, %v1622_v20  ;;  %v3494_v20 = vor.u32 %v3795_v4, %v3493_v2  ;;  %v3598_v21 = vor.u32 %v3820_v7, %v3597_v6 }
 0x233   : > { %v2088_v22 = vadd.f32 %v1959_v19, %v685_v15 }
 0x235   : > { %2152 = vst [vmem:[#allocation2 + $0x80] sm:$0xff] %v2088_v22 }
 0x236   : > { %v5173_v38 = vpop.f32.mrf.mxu3 }
 0x238   : > { %v1960_v41 = vpop.f32.mrf.mxu2  ;;  %v1625_v45 = vpop.f32.mrf.mxu0 }
 0x239   : > { %v1961_v44 = vadd.f32 %v1960_v41, %v1792_v37  ;;  %v1794_v50 = vpop.f32.mrf.mxu1 }
 0x23a   : > { %v1795_v54 = vadd.f32 %v1794_v50, %v1625_v45  ;;  %v3798_v45 = vld [vmem:[%s4840_s10 + $0x200] sm:$0xf0]  ;;  %v3823_v50 = vld [vmem:[%s4840_s10 + $0x2c8] sm:$0xf0] }
 0x23b   : > { %v2089_v53 = vadd.f32 %v1961_v44, %v686_v39  ;;  %1664 = vmatmul.bf16.gmra.mxu0 %v3482_v42  ;;  %2042 = vmatmul.bf16.gmra.mxu3 %v3586_v43  ;;  %v3505_v44 = vld [vmem:[%s4840_s10 + $0x1f8] sm:$0xf] }
 0x23c   : > { %1833 = vmatmul.bf16.gmra.mxu1 %v3486_v48  ;;  %v3797_v48 = vld [vmem:[%s4840_s10 + $0x1fc] sm:$0xf] }
 0x23d   : > { %2153 = vst [vmem:[#allocation2 + $0x1a8] sm:$0xff] %v2089_v53  ;;  %2002 = vmatmul.bf16.gmra.mxu2 %v3490_v49  ;;  %v3609_v49 = vld [vmem:[%s4840_s10 + $0x2c0] sm:$0xf]  ;;  %v3507_v53 = vld [vmem:[%s4840_s10 + $0x204] sm:$0xf0] }
 0x23e   : > { %v5175_v55 = vpop.f32.mrf.mxu3  ;;  %v3610_v2 = vor.u32 %v3823_v50, %v3609_v49  ;;  %v3510_v6 = vor.u32 %v3797_v48, %v3507_v53 }
 0x240   : > { %v1963_v57 = vpop.f32.mrf.mxu2  ;;  %v1627_v59 = vpop.f32.mrf.mxu0 }
 0x241   : > { %v1964_v58 = vadd.f32 %v1963_v57, %v1795_v54  ;;  %v1796_v63 = vpop.f32.mrf.mxu1  ;;  %v3513_v54 = vld [vmem:[%s4840_s10 + $0x200] sm:$0xf] }
 0x242   : > { %v1797_v12 = vadd.f32 %v1796_v63, %v1627_v59  ;;  %v690_v59 = vld [vmem:[#allocation2 + $0xf8] sm:$0xff] }
 0x243   : > { %v2090_v1 = vadd.f32 %v1964_v58, %v687_v56  ;;  %v3799_v56 = vld [vmem:[%s4840_s10 + $0x208] sm:$0xf0] }
 0x244   : > { %v3514_v7 = vor.u32 %v3799_v56, %v3513_v54 }
 0x245   : > { %2154 = vst [vmem:[#allocation2 + $0x1b8] sm:$0xff] %v2090_v1  ;;  %v3506_v1 = vor.u32 %v3798_v45, %v3505_v44 }
 0x246   : > { %v5185_v15 = vpop.f32.mrf.mxu3 }
 0x248   : > { %v1965_v19 = vpop.f32.mrf.mxu2  ;;  %v1630_v26 = vpop.f32.mrf.mxu0 }
 0x249   : > { %v1966_v22 = vadd.f32 %v1965_v19, %v1797_v12  ;;  %v1799_v29 = vpop.f32.mrf.mxu1 }
 0x24a   : > { %v1800_v33 = vadd.f32 %v1799_v29, %v1630_v26  ;;  %v3800_v29 = vld [vmem:[%s4840_s10 + $0x214] sm:$0xf] }
 0x24b   : > { %v2091_v31 = vadd.f32 %v1966_v22, %v688_v18  ;;  %1669 = vmatmul.bf16.gmra.mxu0 %v3494_v20  ;;  %2047 = vmatmul.bf16.gmra.mxu3 %v3598_v21  ;;  %v691_v18 = vld [vmem:[#allocation2 + $0x160] sm:$0xff] }
 0x24c   : > { %1838 = vmatmul.bf16.gmra.mxu1 %v3498_v24  ;;  %v3517_v24 = vld [vmem:[%s4840_s10 + $0x210] sm:$0xf] }
 0x24d   : > { %2155 = vst [vmem:[#allocation2 + $0x28] sm:$0xff] %v2091_v31  ;;  %2007 = vmatmul.bf16.gmra.mxu2 %v3502_v27  ;;  %v3801_v27 = vld [vmem:[%s4840_s10 + $0x218] sm:$0xf0]  ;;  %v3621_v31 = vld [vmem:[%s4840_s10 + $0x2d8] sm:$0xf] }
 0x24e   : > { %v5187_v34 = vpop.f32.mrf.mxu3  ;;  %v3518_v45 = vor.u32 %v3801_v27, %v3517_v24  ;;  %v694_v27 = vld [vmem:[#allocation2] sm:$0xff] }
 0x250   : > { %v1968_v37 = vpop.f32.mrf.mxu2  ;;  %v1632_v41 = vpop.f32.mrf.mxu0 }
 0x251   : > { %v1969_v39 = vadd.f32 %v1968_v37, %v1800_v33  ;;  %v1801_v42 = vpop.f32.mrf.mxu1  ;;  %v3826_v33 = vld [vmem:[%s4840_s10 + $0x2e0] sm:$0xf0]  ;;  %v3525_v37 = vld [vmem:[%s4840_s10 + $0x218] sm:$0xf] }
 0x252   : > { %v1802_v57 = vadd.f32 %v1801_v42, %v1632_v41  ;;  %v3622_v48 = vor.u32 %v3826_v33, %v3621_v31 }
 0x253   : > { %v2092_v43 = vadd.f32 %v1969_v39, %v689_v35  ;;  %v3519_v35 = vld [vmem:[%s4840_s10 + $0x21c] sm:$0xf0]  ;;  %v3802_v39 = vld [vmem:[%s4840_s10 + $0x220] sm:$0xf0] }
 0x254   : > { %v3522_v53 = vor.u32 %v3800_v29, %v3519_v35  ;;  %v3526_v54 = vor.u32 %v3802_v39, %v3525_v37 }
 0x255   : > { %2156 = vst [vmem:[#allocation2 + $0x1e8] sm:$0xff] %v2092_v43  ;;  %v692_v43 = vld [vmem:[#allocation2 + $0x30] sm:$0xff] }
 0x256   : > { %v5197_v58 = vpop.f32.mrf.mxu3 }
 0x258   : > { %v1970_v63 = vpop.f32.mrf.mxu2  ;;  %v1635_v5 = vpop.f32.mrf.mxu0 }
 0x259   : > { %v1971_v4 = vadd.f32 %v1970_v63, %v1802_v57  ;;  %v1804_v9 = vpop.f32.mrf.mxu1 }
 0x25a   : > { %v1805_v11 = vadd.f32 %v1804_v9, %v1635_v5  ;;  %v3529_v9 = vld [vmem:[%s4840_s10 + $0x228] sm:$0xf] }
 0x25b   : > { %v2093_v10 = vadd.f32 %v1971_v4, %v690_v59  ;;  %1674 = vmatmul.bf16.gmra.mxu0 %v3506_v1  ;;  %2052 = vmatmul.bf16.gmra.mxu3 %v3610_v2  ;;  %v693_v1 = vld [vmem:[#allocation2 + $0x1e0] sm:$0xff] }
 0x25c   : > { %1843 = vmatmul.bf16.gmra.mxu1 %v3510_v6 }
 0x25d   : > { %2157 = vst [vmem:[#allocation2 + $0xf8] sm:$0xff] %v2093_v10  ;;  %2012 = vmatmul.bf16.gmra.mxu2 %v3514_v7  ;;  %v3804_v10 = vld [vmem:[%s4840_s10 + $0x230] sm:$0xf0] }
 0x25e   : > { %v5199_v12 = vpop.f32.mrf.mxu3  ;;  %v3530_v31 = vor.u32 %v3804_v10, %v3529_v9 }
 0x260   : > { %v1973_v19 = vpop.f32.mrf.mxu2  ;;  %v1637_v21 = vpop.f32.mrf.mxu0 }
 0x261   : > { %v1974_v20 = vadd.f32 %v1973_v19, %v1805_v11  ;;  %v1806_v22 = vpop.f32.mrf.mxu1  ;;  %v3803_v11 = vld [vmem:[%s4840_s10 + $0x22c] sm:$0xf]  ;;  %v3829_v19 = vld [vmem:[%s4840_s10 + $0x2f8] sm:$0xf0] }
 0x262   : > { %v1807_v41 = vadd.f32 %v1806_v22, %v1637_v21  ;;  %v3537_v21 = vld [vmem:[%s4840_s10 + $0x230] sm:$0xf]  ;;  %v3805_v22 = vld [vmem:[%s4840_s10 + $0x238] sm:$0xf0] }
 0x263   : > { %v2094_v26 = vadd.f32 %v1974_v20, %v691_v18  ;;  %v3633_v18 = vld [vmem:[%s4840_s10 + $0x2f0] sm:$0xf]  ;;  %v3531_v20 = vld [vmem:[%s4840_s10 + $0x234] sm:$0xf0] }
 0x264   : > { %v3634_v33 = vor.u32 %v3829_v19, %v3633_v18  ;;  %v3534_v39 = vor.u32 %v3803_v11, %v3531_v20  ;;  %v1860_v11 = vadd.f32 %v5139_v3, %v5043_v8  ;;  %v713_v18 = vld [vmem:[#allocation2 + $0xb8] sm:$0xff]  ;;  %v697_v20 = vld [vmem:[#allocation2 + $0x148] sm:$0xff] }
 0x265   : > { %2158 = vst [vmem:[#allocation2 + $0x160] sm:$0xff] %v2094_v26 }
 0x266   : > { %v5209_v42 = vpop.f32.mrf.mxu3 }
 0x268   : > { %v1975_v44 = vpop.f32.mrf.mxu2  ;;  %v1640_v50 = vpop.f32.mrf.mxu0 }
 0x269   : > { %v1976_v49 = vadd.f32 %v1975_v44, %v1807_v41  ;;  %v1809_v56 = vpop.f32.mrf.mxu1  ;;  %v3538_v41 = vor.u32 %v3805_v22, %v3537_v21 }
 0x26a   : > { %v1810_v59 = vadd.f32 %v1809_v56, %v1640_v50 }
 0x26b   : > { %v2095_v57 = vadd.f32 %v1976_v49, %v692_v43  ;;  %1679 = vmatmul.bf16.gmra.mxu0 %v3518_v45  ;;  %2057 = vmatmul.bf16.gmra.mxu3 %v3622_v48  ;;  %v695_v49 = vld [vmem:[#allocation2 + $0xf0] sm:$0xff] }
 0x26c   : > { %1848 = vmatmul.bf16.gmra.mxu1 %v3522_v53 }
 0x26d   : > { %2159 = vst [vmem:[#allocation2 + $0x30] sm:$0xff] %v2095_v57  ;;  %2017 = vmatmul.bf16.gmra.mxu2 %v3526_v54 }
 0x26e   : > { %v5211_v63 = vpop.f32.mrf.mxu3 }
 0x270   : > { %v1978_v2 = vpop.f32.mrf.mxu2  ;;  %v1642_v5 = vpop.f32.mrf.mxu0 }
 0x271   : > { %v1979_v4 = vadd.f32 %v1978_v2, %v1810_v59  ;;  %v1811_v6 = vpop.f32.mrf.mxu1  ;;  %v696_v2 = vld [vmem:[#allocation2 + $0x8] sm:$0xff] }
 0x272   : > { %v1812_v26 = vadd.f32 %v1811_v6, %v1642_v5 }
 0x273   : > { %v2096_v7 = vadd.f32 %v1979_v4, %v693_v1 }
 0x275   : > { %2160 = vst [vmem:[#allocation2 + $0x1e0] sm:$0xff] %v2096_v7 }
 0x276   : > { %v5221_v24 = vpop.f32.mrf.mxu3 }
 0x278   : > { %v1980_v29 = vpop.f32.mrf.mxu2  ;;  %v1645_v37 = vpop.f32.mrf.mxu0 }
 0x279   : > { %v1981_v35 = vadd.f32 %v1980_v29, %v1812_v26  ;;  %v1814_v43 = vpop.f32.mrf.mxu1 }
 0x27a   : > { %v1815_v45 = vadd.f32 %v1814_v43, %v1645_v37  ;;  %v698_v43 = vld [vmem:[#allocation2 + $0x1d0] sm:$0xff] }
 0x27b   : > { %v2097_v44 = vadd.f32 %v1981_v35, %v694_v27  ;;  %1684 = vmatmul.bf16.gmra.mxu0 %v3530_v31  ;;  %2062 = vmatmul.bf16.gmra.mxu3 %v3634_v33  ;;  %v1862_v35 = vadd.f32 %v5149_v23, %v5053_v25  ;;  %v699_v25 = vld [vmem:[#allocation2 + $0x100] sm:$0xff] }
 0x27c   : > { %1853 = vmatmul.bf16.gmra.mxu1 %v3534_v39  ;;  %v714_v39 = vld [vmem:[#allocation2 + $0x88] sm:$0xff] }
 0x27d   : > { %2161 = vst [vmem:[#allocation2] sm:$0xff] %v2097_v44  ;;  %2022 = vmatmul.bf16.gmra.mxu2 %v3538_v41 }
 0x27e   : > { %v5223_v48 = vpop.f32.mrf.mxu3 }
 0x280   : > { %v1983_v50 = vpop.f32.mrf.mxu2  ;;  %v1647_v54 = vpop.f32.mrf.mxu0 }
 0x281   : > { %v1984_v53 = vadd.f32 %v1983_v50, %v1815_v45  ;;  %v1816_v56 = vpop.f32.mrf.mxu1 }
 0x282   : > { %v1817_v59 = vadd.f32 %v1816_v56, %v1647_v54  ;;  %v1865_v56 = vadd.f32 %v5151_v40, %v5055_v36 }
 0x283   : > { %v2098_v57 = vadd.f32 %v1984_v53, %v695_v49 }
 0x285   : > { %2162 = vst [vmem:[#allocation2 + $0xf0] sm:$0xff] %v2098_v57  ;;  %v715_v57 = vld [vmem:[#allocation2 + $0xa8] sm:$0xff] }
 0x286   : > { %v5225_v1 = vpop.f32.mrf.mxu3 }
 0x288   : > { %v1985_v4 = vpop.f32.mrf.mxu2  ;;  %v1650_v6 = vpop.f32.mrf.mxu0 }
 0x289   : > { %v1986_v5 = vadd.f32 %v1985_v4, %v1817_v59  ;;  %v1819_v7 = vpop.f32.mrf.mxu1 }
 0x28a   : > { %v1820_v10 = vadd.f32 %v1819_v7, %v1650_v6 }
 0x28b   : > { %v2099_v9 = vadd.f32 %v1986_v5, %v696_v2 }
 0x28d   : > { %2163 = vst [vmem:[#allocation2 + $0x8] sm:$0xff] %v2099_v9 }
 0x28e   : > { %v2028_v19 = vpop.f32.mrf.mxu3 }
 0x28f   : > { %v2029_v22 = vadd.f32 %v2028_v19, %v1860_v11 }
 0x290   : > { %v1988_v21 = vpop.f32.mrf.mxu2  ;;  %v1652_v27 = vpop.f32.mrf.mxu0 }
 0x291   : > { %v1989_v26 = vadd.f32 %v1988_v21, %v1820_v10  ;;  %v2116_v29 = vadd.f32 %v2029_v22, %v713_v18  ;;  %v1821_v31 = vpop.f32.mrf.mxu1  ;;  %v1867_v10 = vadd.f32 %v5161_v62, %v5065_v52  ;;  %v716_v18 = vld [vmem:[#allocation2 + $0x1c8] sm:$0xff]  ;;  %v701_v52 = vld [vmem:[#allocation2 + $0x40] sm:$0xff] }
 0x292   : > { %v1822_v37 = vadd.f32 %v1821_v31, %v1652_v27 }
 0x293   : > { %v2100_v33 = vadd.f32 %v1989_v26, %v697_v20  ;;  %2180 = vst [vmem:[#allocation2 + $0xb8] sm:$0xff] %v2116_v29  ;;  %v700_v20 = vld [vmem:[#allocation2 + $0xc8] sm:$0xff] }
 0x295   : > { %2164 = vst [vmem:[#allocation2 + $0x148] sm:$0xff] %v2100_v33  ;;  %v1870_v33 = vadd.f32 %v5163_v13, %v5067_v0 }
 0x296   : > { %v2030_v41 = vpop.f32.mrf.mxu3 }
 0x297   : > { %v2031_v3 = vadd.f32 %v2030_v41, %v1862_v35  ;;  %v717_v35 = vld [vmem:[#allocation2 + $0x170] sm:$0xff] }
 0x298   : > { %v1990_v8 = vpop.f32.mrf.mxu2  ;;  %v1655_v45 = vpop.f32.mrf.mxu0 }
 0x299   : > { %v1991_v44 = vadd.f32 %v1990_v8, %v1822_v37  ;;  %v2117_v49 = vadd.f32 %v2031_v3, %v714_v39  ;;  %v1824_v50 = vpop.f32.mrf.mxu1 }
 0x29a   : > { %v1825_v54 = vadd.f32 %v1824_v50, %v1655_v45  ;;  %v1872_v45 = vadd.f32 %v5173_v38, %v5077_v17  ;;  %v718_v50 = vld [vmem:[#allocation2 + $0x178] sm:$0xff]  ;;  %v703_v17 = vld [vmem:[#allocation2 + $0x20] sm:$0xff] }
 0x29b   : > { %v2101_v53 = vadd.f32 %v1991_v44, %v698_v43  ;;  %2181 = vst [vmem:[#allocation2 + $0x88] sm:$0xff] %v2117_v49 }
 0x29d   : > { %2165 = vst [vmem:[#allocation2 + $0x1d0] sm:$0xff] %v2101_v53 }
 0x29e   : > { %v2033_v59 = vpop.f32.mrf.mxu3 }
 0x29f   : > { %v2034_v2 = vadd.f32 %v2033_v59, %v1865_v56 }
 0x2a0   : > { %v1993_v23 = vpop.f32.mrf.mxu2  ;;  %v1657_v5 = vpop.f32.mrf.mxu0 }
 0x2a1   : > { %v1994_v4 = vadd.f32 %v1993_v23, %v1825_v54  ;;  %v2118_v6 = vadd.f32 %v2034_v2, %v715_v57  ;;  %v1826_v7 = vpop.f32.mrf.mxu1  ;;  %v702_v54 = vld [vmem:[#allocation2 + $0x1f8] sm:$0xff] }
 0x2a2   : > { %v1827_v11 = vadd.f32 %v1826_v7, %v1657_v5  ;;  %v719_v5 = vld [vmem:[#allocation2 + $0x68] sm:$0xff] }
 0x2a3   : > { %v2102_v9 = vadd.f32 %v1994_v4, %v699_v25  ;;  %2182 = vst [vmem:[#allocation2 + $0xa8] sm:$0xff] %v2118_v6  ;;  %v1875_v4 = vadd.f32 %v5175_v55, %v5079_v30 }
 0x2a5   : > { %2166 = vst [vmem:[#allocation2 + $0x100] sm:$0xff] %v2102_v9 }
 0x2a6   : > { %v2035_v19 = vpop.f32.mrf.mxu3 }
 0x2a7   : > { %v2036_v40 = vadd.f32 %v2035_v19, %v1867_v10 }
 0x2a8   : > { %v1995_v36 = vpop.f32.mrf.mxu2  ;;  %v1660_v22 = vpop.f32.mrf.mxu0 }
 0x2a9   : > { %v1996_v21 = vadd.f32 %v1995_v36, %v1827_v11  ;;  %v2119_v26 = vadd.f32 %v2036_v40, %v716_v18  ;;  %v1829_v27 = vpop.f32.mrf.mxu1  ;;  %v720_v40 = vld [vmem:[#allocation2 + $0x190] sm:$0xff] }
 0x2aa   : > { %v1830_v31 = vadd.f32 %v1829_v27, %v1660_v22  ;;  %v704_v22 = vld [vmem:[#allocation2 + $0x128] sm:$0xff] }
 0x2ab   : > { %v2103_v29 = vadd.f32 %v1996_v21, %v700_v20  ;;  %2183 = vst [vmem:[#allocation2 + $0x1c8] sm:$0xff] %v2119_v26  ;;  %v1877_v20 = vadd.f32 %v5185_v15, %v5089_v47  ;;  %v705_v47 = vld [vmem:[#allocation2 + $0x1a0] sm:$0xff] }
 0x2ad   : > { %2167 = vst [vmem:[#allocation2 + $0xc8] sm:$0xff] %v2103_v29 }
 0x2ae   : > { %v2038_v37 = vpop.f32.mrf.mxu3 }
 0x2af   : > { %v2039_v39 = vadd.f32 %v2038_v37, %v1870_v33  ;;  %v1880_v37 = vadd.f32 %v5187_v34, %v5091_v60 }
 0x2b0   : > { %v1998_v62 = vpop.f32.mrf.mxu2  ;;  %v1662_v43 = vpop.f32.mrf.mxu0 }
 0x2b1   : > { %v1999_v41 = vadd.f32 %v1998_v62, %v1830_v31  ;;  %v2120_v8 = vadd.f32 %v2039_v39, %v717_v35  ;;  %v1831_v3 = vpop.f32.mrf.mxu1 }
 0x2b2   : > { %v1832_v49 = vadd.f32 %v1831_v3, %v1662_v43 }
 0x2b3   : > { %v2104_v44 = vadd.f32 %v1999_v41, %v701_v52  ;;  %2184 = vst [vmem:[#allocation2 + $0x170] sm:$0xff] %v2120_v8  ;;  %v721_v52 = vld [vmem:[#allocation2 + $0x198] sm:$0xff] }
 0x2b5   : > { %2168 = vst [vmem:[#allocation2 + $0x40] sm:$0xff] %v2104_v44 }
 0x2b6   : > { %v2040_v53 = vpop.f32.mrf.mxu3 }
 0x2b7   : > { %v2041_v13 = vadd.f32 %v2040_v53, %v1872_v45  ;;  %v1882_v45 = vadd.f32 %v5197_v58, %v5101_v14  ;;  %v707_v14 = vld [vmem:[#allocation2 + $0xe8] sm:$0xff] }
 0x2b8   : > { %v2000_v0 = vpop.f32.mrf.mxu2  ;;  %v1665_v57 = vpop.f32.mrf.mxu0 }
 0x2b9   : > { %v2001_v56 = vadd.f32 %v2000_v0, %v1832_v49  ;;  %v2121_v59 = vadd.f32 %v2041_v13, %v718_v50  ;;  %v1834_v25 = vpop.f32.mrf.mxu1  ;;  %v722_v50 = vld [vmem:[#allocation2 + $0x38] sm:$0xff] }
 0x2ba   : > { %v1835_v2 = vadd.f32 %v1834_v25, %v1665_v57 }
 0x2bb   : > { %v2105_v23 = vadd.f32 %v2001_v56, %v702_v54  ;;  %2185 = vst [vmem:[#allocation2 + $0x178] sm:$0xff] %v2121_v59  ;;  %v706_v54 = vld [vmem:[#allocation2 + $0x1f0] sm:$0xff] }
 0x2bd   : > { %2169 = vst [vmem:[#allocation2 + $0x1f8] sm:$0xff] %v2105_v23  ;;  %v1885_v23 = vadd.f32 %v5199_v12, %v5103_v28 }
 0x2be   : > { %v2043_v6 = vpop.f32.mrf.mxu3 }
 0x2bf   : > { %v2044_v7 = vadd.f32 %v2043_v6, %v1875_v4 }
 0x2c0   : > { %v2003_v38 = vpop.f32.mrf.mxu2  ;;  %v1667_v10 = vpop.f32.mrf.mxu0 }
 0x2c1   : > { %v2004_v9 = vadd.f32 %v2003_v38, %v1835_v2  ;;  %v2122_v11 = vadd.f32 %v2044_v7, %v719_v5  ;;  %v1836_v18 = vpop.f32.mrf.mxu1  ;;  %v723_v2 = vld [vmem:[#allocation2 + $0xc0] sm:$0xff] }
 0x2c2   : > { %v1837_v36 = vadd.f32 %v1836_v18, %v1667_v10  ;;  %v1887_v10 = vadd.f32 %v5209_v42, %v5113_v46  ;;  %v724_v18 = vld [vmem:[#allocation2 + $0x1c0] sm:$0xff]  ;;  %v709_v46 = vld [vmem:[#allocation2 + $0x70] sm:$0xff] }
 0x2c3   : > { %v2106_v19 = vadd.f32 %v2004_v9, %v703_v17  ;;  %2186 = vst [vmem:[#allocation2 + $0x68] sm:$0xff] %v2122_v11 }
 0x2c5   : > { %2170 = vst [vmem:[#allocation2 + $0x20] sm:$0xff] %v2106_v19 }
 0x2c6   : > { %v2045_v21 = vpop.f32.mrf.mxu3 }
 0x2c7   : > { %v2046_v55 = vadd.f32 %v2045_v21, %v1877_v20  ;;  %v708_v20 = vld [vmem:[#allocation2 + $0x78] sm:$0xff] }
 0x2c8   : > { %v2005_v30 = vpop.f32.mrf.mxu2  ;;  %v1670_v27 = vpop.f32.mrf.mxu0 }
 0x2c9   : > { %v2006_v26 = vadd.f32 %v2005_v30, %v1837_v36  ;;  %v2123_v29 = vadd.f32 %v2046_v55, %v720_v40  ;;  %v1839_v31 = vpop.f32.mrf.mxu1 }
 0x2ca   : > { %v1840_v35 = vadd.f32 %v1839_v31, %v1670_v27  ;;  %v725_v27 = vld [vmem:[#allocation2 + $0x158] sm:$0xff] }
 0x2cb   : > { %v2107_v33 = vadd.f32 %v2006_v26, %v704_v22  ;;  %2187 = vst [vmem:[#allocation2 + $0x190] sm:$0xff] %v2123_v29  ;;  %v1890_v26 = vadd.f32 %v5211_v63, %v5115_v61 }
 0x2cd   : > { %2171 = vst [vmem:[#allocation2 + $0x128] sm:$0xff] %v2107_v33 }
 0x2ce   : > { %v2048_v62 = vpop.f32.mrf.mxu3 }
 0x2cf   : > { %v2049_v39 = vadd.f32 %v2048_v62, %v1880_v37 }
 0x2d0   : > { %v2008_v15 = vpop.f32.mrf.mxu2  ;;  %v1672_v43 = vpop.f32.mrf.mxu0 }
 0x2d1   : > { %v2009_v41 = vadd.f32 %v2008_v15, %v1840_v35  ;;  %v2124_v8 = vadd.f32 %v2049_v39, %v721_v52  ;;  %v1841_v3 = vpop.f32.mrf.mxu1  ;;  %v726_v39 = vld [vmem:[#allocation2 + $0x10] sm:$0xff] }
 0x2d2   : > { %v1842_v49 = vadd.f32 %v1841_v3, %v1672_v43  ;;  %v710_v43 = vld [vmem:[#allocation2 + $0x90] sm:$0xff] }
 0x2d3   : > { %v2108_v44 = vadd.f32 %v2009_v41, %v705_v47  ;;  %2188 = vst [vmem:[#allocation2 + $0x198] sm:$0xff] %v2124_v8  ;;  %v1892_v47 = vadd.f32 %v5221_v24, %v5125_v16  ;;  %v711_v16 = vld [vmem:[#allocation2 + $0x1d8] sm:$0xff] }
 0x2d5   : > { %2172 = vst [vmem:[#allocation2 + $0x1a0] sm:$0xff] %v2108_v44 }
 0x2d6   : > { %v2050_v53 = vpop.f32.mrf.mxu3 }
 0x2d7   : > { %v2051_v34 = vadd.f32 %v2050_v53, %v1882_v45  ;;  %v1895_v53 = vadd.f32 %v5223_v48, %v5127_v32 }
 0x2d8   : > { %v2010_v60 = vpop.f32.mrf.mxu2  ;;  %v1675_v13 = vpop.f32.mrf.mxu0 }
 0x2d9   : > { %v2011_v0 = vadd.f32 %v2010_v60, %v1842_v49  ;;  %v2125_v56 = vadd.f32 %v2051_v34, %v722_v50  ;;  %v1844_v57 = vpop.f32.mrf.mxu1 }
 0x2da   : > { %v1845_v25 = vadd.f32 %v1844_v57, %v1675_v13 }
 0x2db   : > { %v2109_v59 = vadd.f32 %v2011_v0, %v706_v54  ;;  %2189 = vst [vmem:[#allocation2 + $0x38] sm:$0xff] %v2125_v56  ;;  %v727_v54 = vld [vmem:[#allocation2 + $0x58] sm:$0xff] }
 0x2dd   : > { %2173 = vst [vmem:[#allocation2 + $0x1f0] sm:$0xff] %v2109_v59 }
 0x2de   : > { %v2053_v4 = vpop.f32.mrf.mxu3 }
 0x2df   : > { %v2054_v5 = vadd.f32 %v2053_v4, %v1885_v23 }
 0x2e0   : > { %v2013_v58 = vpop.f32.mrf.mxu2  ;;  %v1677_v17 = vpop.f32.mrf.mxu0 }
 0x2e1   : > { %v2014_v6 = vadd.f32 %v2013_v58, %v1845_v25  ;;  %v2126_v38 = vadd.f32 %v2054_v5, %v723_v2  ;;  %v1846_v7 = vpop.f32.mrf.mxu1  ;;  %v1897_v25 = vadd.f32 %v5225_v1, %v5137_v51  ;;  %v728_v2 = vld [vmem:[#allocation2 + $0xa0] sm:$0xff] }
 0x2e2   : > { %v1847_v11 = vadd.f32 %v1846_v7, %v1677_v17 }
 0x2e3   : > { %v2110_v9 = vadd.f32 %v2014_v6, %v707_v14  ;;  %2190 = vst [vmem:[#allocation2 + $0xc0] sm:$0xff] %v2126_v38  ;;  %v712_v14 = vld [vmem:[#allocation2 + $0xd0] sm:$0xff] }
 0x2e5   : > { %2174 = vst [vmem:[#allocation2 + $0xe8] sm:$0xff] %v2110_v9 }
 0x2e6   : > { %v2055_v19 = vpop.f32.mrf.mxu3 }
 0x2e7   : > { %v2056_v12 = vadd.f32 %v2055_v19, %v1887_v10 }
 0x2e8   : > { %v2015_v28 = vpop.f32.mrf.mxu2  ;;  %v1680_v40 = vpop.f32.mrf.mxu0 }
 0x2e9   : > { %v2016_v36 = vadd.f32 %v2015_v28, %v1847_v11  ;;  %v2127_v21 = vadd.f32 %v2056_v12, %v724_v18  ;;  %v1849_v22 = vpop.f32.mrf.mxu1 }
 0x2ea   : > { %v1850_v55 = vadd.f32 %v1849_v22, %v1680_v40 }
 0x2eb   : > { %v2111_v30 = vadd.f32 %v2016_v36, %v708_v20  ;;  %2191 = vst [vmem:[#allocation2 + $0x1c0] sm:$0xff] %v2127_v21 }
 0x2ed   : > { %2175 = vst [vmem:[#allocation2 + $0x78] sm:$0xff] %v2111_v30 }
 0x2ee   : > { %v2058_v29 = vpop.f32.mrf.mxu3 }
 0x2ef   : > { %v2059_v31 = vadd.f32 %v2058_v29, %v1890_v26 }
 0x2f0   : > { %v2018_v42 = vpop.f32.mrf.mxu2  ;;  %v1682_v35 = vpop.f32.mrf.mxu0 }
 0x2f1   : > { %v2019_v33 = vadd.f32 %v2018_v42, %v1850_v55  ;;  %v2128_v37 = vadd.f32 %v2059_v31, %v725_v27  ;;  %v1851_v52 = vpop.f32.mrf.mxu1 }
 0x2f2   : > { %v1852_v15 = vadd.f32 %v1851_v52, %v1682_v35 }
 0x2f3   : > { %v2112_v62 = vadd.f32 %v2019_v33, %v709_v46  ;;  %2192 = vst [vmem:[#allocation2 + $0x158] sm:$0xff] %v2128_v37 }
 0x2f5   : > { %2176 = vst [vmem:[#allocation2 + $0x70] sm:$0xff] %v2112_v62 }
 0x2f6   : > { %v2060_v41 = vpop.f32.mrf.mxu3 }
 0x2f7   : > { %v2061_v63 = vadd.f32 %v2060_v41, %v1892_v47 }
 0x2f8   : > { %v2020_v61 = vpop.f32.mrf.mxu2  ;;  %v1685_v44 = vpop.f32.mrf.mxu0 }
 0x2f9   : > { %v2021_v8 = vadd.f32 %v2020_v61, %v1852_v15  ;;  %v2129_v3 = vadd.f32 %v2061_v63, %v726_v39  ;;  %v1854_v45 = vpop.f32.mrf.mxu1 }
 0x2fa   : > { %v1855_v50 = vadd.f32 %v1854_v45, %v1685_v44 }
 0x2fb   : > { %v2113_v49 = vadd.f32 %v2021_v8, %v710_v43  ;;  %2193 = vst [vmem:[#allocation2 + $0x10] sm:$0xff] %v2129_v3 }
 0x2fd   : > { %2177 = vst [vmem:[#allocation2 + $0x90] sm:$0xff] %v2113_v49 }
 0x2fe   : > { %v2063_v60 = vpop.f32.mrf.mxu3 }
 0x2ff   : > { %v2064_v34 = vadd.f32 %v2063_v60, %v1895_v53 }
 0x300   : > { %v2023_v24 = vpop.f32.mrf.mxu2  ;;  %v1687_v57 = vpop.f32.mrf.mxu0 }
 0x301   : > { %v2024_v0 = vadd.f32 %v2023_v24, %v1855_v50  ;;  %v2130_v13 = vadd.f32 %v2064_v34, %v727_v54  ;;  %v1856_v59 = vpop.f32.mrf.mxu1 }
 0x302   : > { %v1857_v23 = vadd.f32 %v1856_v59, %v1687_v57 }
 0x303   : > { %v2114_v56 = vadd.f32 %v2024_v0, %v711_v16  ;;  %2194 = vst [vmem:[#allocation2 + $0x58] sm:$0xff] %v2130_v13 }
 0x305   : > { %2178 = vst [vmem:[#allocation2 + $0x1d8] sm:$0xff] %v2114_v56 }
 0x306   : > { %v2065_v4 = vpop.f32.mrf.mxu3 }
 0x307   : > { %v2066_v48 = vadd.f32 %v2065_v4, %v1897_v25 }
 0x308   : > { %v2025_v32 = vpop.f32.mrf.mxu2 }
 0x309   : > { %v2026_v58 = vadd.f32 %v2025_v32, %v1857_v23  ;;  %v2131_v5 = vadd.f32 %v2066_v48, %v728_v2  ;;  %2199 = sbr.rel (%p3731_p13) target bundleno = 929 (0x3a1), region = 70 }
 0x30b   : > { %v2115_v6 = vadd.f32 %v2026_v58, %v712_v14  ;;  %2195 = vst [vmem:[#allocation2 + $0xa0] sm:$0xff] %v2131_v5 }
 0x30d   : > { %2179 = vst [vmem:[#allocation2 + $0xd0] sm:$0xff] %v2115_v6 }
 0x30e   : > { %v2200_v17 = vld [vmem:[#allocation2 + $0xb0] sm:$0xff]  ;;  %v5263_v51 = vld [vmem:[%s5737_s2] ss:$0 sm:$0xff]  ;;  %v2202_v7 = vld [vmem:[#allocation2 + $0xd8] sm:$0xff] }
 0x30f   : > { %v2201_v38 = vld [vmem:[#allocation2 + $0x1b0] sm:$0xff]  ;;  %v5266_v1 = vld [vmem:[%s4833_s8] sm:$0xff]   ;;  %v2203_v9 = vld [vmem:[#allocation2 + $0x18] sm:$0xff]  ;;  %v5272_v18 = vadd.f32 %v5263_v51, %v2200_v17  ;;  %v5278_v20 = vadd.f32 %v5263_v51, %v2202_v7 }
 0x310   : > { %v5269_v10 = vld [vmem:[%s4833_s8 + $0x8] sm:$0xff]   ;;  %v2204_v11 = vld [vmem:[#allocation2 + $0x50] sm:$0xff]  ;;  %v5275_v19 = vadd.f32 %v5263_v51, %v2201_v38  ;;  %v5281_v28 = vadd.f32 %v5263_v51, %v2203_v9  ;;  %v3856_v36 = vunpack.c.l.bf16 %v5266_v1  ;;  %v3857_v40 = vunpack.c.h.bf16 %v5266_v1  ;;  %v2208_v31 = vld [vmem:[#allocation2 + $0x180] sm:$0xff] }
 0x311   : > { %v2205_v12 = vld [vmem:[#allocation2 + $0x168] sm:$0xff]  ;;  %v5286_v21 = vadd.f32 %v5263_v51, %v2204_v11  ;;  %v5292_v30 = vld [vmem:[%s4833_s8 + $0x10] sm:$0xff]   ;;  %v2332_v27 = vmul.f32 0.5, %v5272_v18  ;;  %v2334_v46 = vmul.f32 0.5, %v5278_v20  ;;  %v3860_v42 = vunpack.c.l.bf16 %v5269_v10  ;;  %v5303_v47 = vld [vmem:[%s4833_s8 + $0x18] sm:$0xff]  }
 0x312   : > { %v5289_v22 = vadd.f32 %v5263_v51, %v2205_v12  ;;  %v2206_v55 = vld [vmem:[#allocation2 + $0x130] sm:$0xff]  ;;  %v2207_v26 = vld [vmem:[#allocation2 + $0x48] sm:$0xff]  ;;  %v2333_v29 = vmul.f32 0.5, %v5275_v19  ;;  %v2335_v35 = vmul.f32 0.5, %v5281_v28  ;;  %v3861_v37 = vunpack.c.h.bf16 %v5269_v10  ;;  %v5313_v43 = vld [vmem:[%s4833_s8 + $0x20] sm:$0xff]  }
 0x313   : > { %v2209_v33 = vld [vmem:[#allocation2 + $0x110] sm:$0xff]  ;;  %v2336_v52 = vmul.f32 0.5, %v5286_v21  ;;  %4289 = vtanh.f32 %v2332_v27  ;;  %v3864_v15 = vunpack.c.l.bf16 %v5292_v30  ;;  %v5307_v39 = vadd.f32 %v5263_v51, %v2206_v55  ;;  %v2210_v3 = vld [vmem:[#allocation2 + $0x118] sm:$0xff]  ;;  %v2212_v53 = vld [vmem:[#allocation2 + $0x120] sm:$0xff] }
 0x314   : > { %v2337_v62 = vmul.f32 0.5, %v5289_v22  ;;  %v5310_v41 = vadd.f32 %v5263_v51, %v2207_v26  ;;  %4291 = vtanh.f32 %v2333_v29  ;;  %v3865_v61 = vunpack.c.h.bf16 %v5292_v30  ;;  %v2211_v44 = vld [vmem:[#allocation2 + $0x98] sm:$0xff]  ;;  %v2213_v54 = vld [vmem:[#allocation2 + $0x150] sm:$0xff]  ;;  %v5329_v34 = vld [vmem:[%s4833_s8 + $0x28] sm:$0xff]  }
 0x315   : > { %v5317_v63 = vadd.f32 %v5263_v51, %v2208_v31  ;;  %v5320_v8 = vadd.f32 %v5263_v51, %v2209_v33  ;;  %4293 = vtanh.f32 %v2334_v46  ;;  %v2338_v45 = vmul.f32 0.5, %v5307_v39  ;;  %v2214_v23 = vld [vmem:[#allocation2 + $0x108] sm:$0xff]  ;;  %v2215_v48 = vld [vmem:[#allocation2 + $0x60] sm:$0xff] }
 0x316   : > { %v3868_v49 = vunpack.c.l.bf16 %v5303_v47  ;;  %v3869_v50 = vunpack.c.h.bf16 %v5303_v47  ;;  %4295 = vtanh.f32 %v2335_v35  ;;  %v2339_v60 = vmul.f32 0.5, %v5310_v41 }
 0x317   : > { %v2340_v16 = vmul.f32 0.5, %v5317_v63  ;;  %v3872_v24 = vunpack.c.l.bf16 %v5313_v43  ;;  %4297 = vtanh.f32 %v2336_v52  ;;  %v2341_v0 = vmul.f32 0.5, %v5320_v8 }
 0x318   : > { %v5333_v13 = vadd.f32 %v5263_v51, %v2210_v3  ;;  %v5336_v56 = vadd.f32 %v5263_v51, %v2211_v44  ;;  %4299 = vtanh.f32 %v2337_v62  ;;  %v3873_v57 = vunpack.c.h.bf16 %v5313_v43 }
 0x319   : > { %v5340_v59 = vadd.f32 %v5263_v51, %v2212_v53  ;;  %v5343_v25 = vadd.f32 %v5263_v51, %v2213_v54  ;;  %v4290_v2 = vpop.eup %4289  ;;  %4301 = vtanh.f32 %v2338_v45  ;;  %v3876_v14 = vunpack.c.l.bf16 %v5329_v34 }
 0x31a   : > { %v2342_v4 = vmul.f32 0.5, %v5333_v13  ;;  %v3877_v32 = vunpack.c.h.bf16 %v5329_v34  ;;  %v4292_v58 = vpop.eup %4291  ;;  %v2460_v5 = vmul.f32 0.5, %v4290_v2  ;;  %4303 = vtanh.f32 %v2339_v60 }
 0x31b   : > { %v2343_v6 = vmul.f32 0.5, %v5336_v56  ;;  %v2344_v17 = vmul.f32 0.5, %v5340_v59  ;;  %v4294_v38 = vpop.eup %4293  ;;  %v2461_v7 = vmul.f32 0.5, %v4292_v58  ;;  %4305 = vtanh.f32 %v2340_v16 }
 0x31c   : > { %v2345_v9 = vmul.f32 0.5, %v5343_v25  ;;  %v5352_v11 = vadd.f32 %v5263_v51, %v2214_v23  ;;  %v4296_v12 = vpop.eup %4295  ;;  %v2524_v55 = vadd.f32 0.5, %v2460_v5  ;;  %v2462_v26 = vmul.f32 0.5, %v4294_v38 }
 0x31d   : > { %4307 = vtanh.f32 %v2341_v0  ;;  %v5355_v27 = vadd.f32 %v5263_v51, %v2215_v48  ;;  %v4298_v29 = vpop.eup %4297  ;;  %v2525_v46 = vadd.f32 0.5, %v2461_v7  ;;  %v2463_v31 = vmul.f32 0.5, %v4296_v12 }
 0x31e   : > { %4309 = vtanh.f32 %v2342_v4  ;;  %v2346_v33 = vmul.f32 0.5, %v5352_v11  ;;  %v4300_v35 = vpop.eup %4299  ;;  %v2588_v52 = vmul.f32 %v2524_v55, %v5272_v18  ;;  %v2526_v62 = vadd.f32 0.5, %v2462_v26 }
 0x31f   : > { %v2464_v3 = vmul.f32 0.5, %v4298_v29  ;;  %4311 = vtanh.f32 %v2343_v6  ;;  %v4302_v44 = vpop.eup %4301  ;;  %v2589_v45 = vmul.f32 %v2525_v46, %v5275_v19  ;;  %v2527_v53 = vadd.f32 0.5, %v2463_v31 }
 0x320   : > { %v2465_v54 = vmul.f32 0.5, %v4300_v35  ;;  %4313 = vtanh.f32 %v2344_v17  ;;  %v4304_v60 = vpop.eup %4303  ;;  %v2780_v16 = vadd.f32 %v3856_v36, %v2588_v52  ;;  %v2590_v0 = vmul.f32 %v2526_v62, %v5278_v20 }
 0x321   : > { %v2528_v23 = vadd.f32 0.5, %v2464_v3  ;;  %v2466_v2 = vmul.f32 0.5, %v4302_v44  ;;  %v4306_v4 = vpop.eup %4305  ;;  %v2781_v18 = vadd.f32 %v3857_v40, %v2589_v45  ;;  %v2591_v48 = vmul.f32 %v2527_v53, %v5281_v28  ;;  %v2216_v44 = vld [vmem:[#allocation2 + $0xe0] sm:$0xff]  ;;  %v4147_v53 = vld [vmem:[%s4833_s8 + $0x30] sm:$0xff]  }
 0x322   : > { %v2529_v58 = vadd.f32 0.5, %v2465_v54  ;;  %v2467_v5 = vmul.f32 0.5, %v4304_v60  ;;  %v2782_v6 = vadd.f32 %v3860_v42, %v2590_v0  ;;  %v2468_v38 = vmul.f32 0.5, %v4306_v4  ;;  %v2218_v60 = vld [vmem:[#allocation2 + $0x138] sm:$0xff]  ;;  %v2219_v0 = vld [vmem:[#allocation2 + $0x140] sm:$0xff] }
 0x323   : > { %v4308_v19 = vpop.eup %4307  ;;  %v2592_v17 = vmul.f32 %v2528_v23, %v5286_v21  ;;  %v2530_v36 = vadd.f32 0.5, %v2466_v2  ;;  %v3985_v7 = vpack.c.bf16 %v2781_v18, %v2780_v16  ;;  %v2783_v12 = vadd.f32 %v3861_v37, %v2591_v48  ;;  %v5412_v18 = vld [vmem:[%s4833_s8 + $0x40] sm:$0xff]  }
 0x324   : > { %v4310_v20 = vpop.eup %4309  ;;  %v2593_v1 = vmul.f32 %v2529_v58, %v5289_v22  ;;  %v2531_v40 = vadd.f32 0.5, %v2467_v5  ;;  %v2469_v42 = vmul.f32 0.5, %v4308_v19  ;;  %v2532_v29 = vadd.f32 0.5, %v2468_v38  ;;  %v2220_v19 = vld [vmem:[#allocation2 + $0x80] sm:$0xff] }
 0x325   : > { %v4312_v28 = vpop.eup %4311  ;;  %v2784_v55 = vadd.f32 %v3864_v15, %v2592_v17  ;;  %v2594_v26 = vmul.f32 %v2530_v36, %v5307_v39  ;;  %3986 = vst [vmem:[%s4838_s18] sm:$0xff] %v3985_v7   ;;  %v3990_v46 = vpack.c.bf16 %v2783_v12, %v2782_v6  ;;  %v2470_v22 = vmul.f32 0.5, %v4310_v20  ;;  %v2221_v6 = vld [vmem:[#allocation2 + $0x1a8] sm:$0xff] }
 0x326   : > { %v4314_v21 = vpop.eup %4313  ;;  %v2785_v31 = vadd.f32 %v3865_v61, %v2593_v1  ;;  %v2595_v10 = vmul.f32 %v2531_v40, %v5310_v41  ;;  %v2533_v35 = vadd.f32 0.5, %v2469_v42  ;;  %v2596_v15 = vmul.f32 %v2532_v29, %v5317_v63 }
 0x327   : > { %v2786_v37 = vadd.f32 %v3868_v49, %v2594_v26  ;;  %v2471_v39 = vmul.f32 0.5, %v4312_v28  ;;  %4173 = vst [vmem:[%s4838_s18 + $0x8] sm:$0xff] %v3990_v46   ;;  %v2534_v3 = vadd.f32 0.5, %v2470_v22  ;;  %4315 = vtanh.f32 %v2345_v9  ;;  %v2222_v26 = vld [vmem:[#allocation2 + $0x1b8] sm:$0xff] }
 0x328   : > { %v3995_v52 = vpack.c.bf16 %v2785_v31, %v2784_v55  ;;  %v2787_v62 = vadd.f32 %v3869_v50, %v2595_v10  ;;  %v2597_v30 = vmul.f32 %v2533_v35, %v5320_v8  ;;  %v2788_v41 = vadd.f32 %v3872_v24, %v2596_v15  ;;  %v2217_v50 = vld [vmem:[#allocation2 + $0x188] sm:$0xff]  ;;  %v5396_v24 = vld [vmem:[%s4833_s8 + $0x38] sm:$0xff]  }
 0x329   : > { %v2535_v61 = vadd.f32 0.5, %v2471_v39  ;;  %v2472_v49 = vmul.f32 0.5, %v4314_v21  ;;  %v2598_v45 = vmul.f32 %v2534_v3, %v5333_v13  ;;  %v2347_v47 = vmul.f32 0.5, %v5355_v27  ;;  %v5436_v31 = vld [vmem:[%s4833_s8 + $0x48] sm:$0xff]  }
 0x32a   : > { %4174 = vst [vmem:[%s4838_s18 + $0x10] sm:$0xff] %v3995_v52   ;;  %v4000_v63 = vpack.c.bf16 %v2787_v62, %v2786_v37  ;;  %4317 = vtanh.f32 %v2346_v33  ;;  %v2789_v9 = vadd.f32 %v3873_v57, %v2597_v30  ;;  %v5402_v16 = vadd.f32 %v5263_v51, %v2216_v44  ;;  %v2223_v10 = vld [vmem:[#allocation2 + $0x28] sm:$0xff] }
 0x32b   : > { %v2599_v8 = vmul.f32 %v2535_v61, %v5336_v56  ;;  %v2536_v54 = vadd.f32 0.5, %v2472_v49  ;;  %v2790_v13 = vadd.f32 %v3876_v14, %v2598_v45  ;;  %4319 = vtanh.f32 %v2347_v47  ;;  %v2224_v61 = vld [vmem:[#allocation2 + $0x1e8] sm:$0xff]  ;;  %v2225_v47 = vld [vmem:[#allocation2 + $0xf8] sm:$0xff] }
 0x32c   : > { %4175 = vst [vmem:[%s4838_s18 + $0x18] sm:$0xff] %v4000_v63   ;;  %v4005_v33 = vpack.c.bf16 %v2789_v9, %v2788_v41  ;;  %v3880_v57 = vunpack.c.l.bf16 %v4147_v53  ;;  %v5407_v56 = vadd.f32 %v5263_v51, %v2217_v50  ;;  %v3881_v2 = vunpack.c.h.bf16 %v4147_v53  ;;  %v5452_v53 = vld [vmem:[%s4833_s8 + $0x50] sm:$0xff]  }
 0x32d   : > { %v2791_v43 = vadd.f32 %v3877_v32, %v2599_v8  ;;  %v4316_v23 = vpop.eup %4315  ;;  %v3884_v4 = vunpack.c.l.bf16 %v5396_v24  ;;  %v2348_v14 = vmul.f32 0.5, %v5402_v16  ;;  %v5415_v48 = vadd.f32 %v5263_v51, %v2218_v60 }
 0x32e   : > { %4176 = vst [vmem:[%s4838_s18 + $0x20] sm:$0xff] %v4005_v33   ;;  %v2473_v32 = vmul.f32 0.5, %v4316_v23  ;;  %v2600_v58 = vmul.f32 %v2536_v54, %v5340_v59  ;;  %v2349_v5 = vmul.f32 0.5, %v5407_v56  ;;  %v3885_v36 = vunpack.c.h.bf16 %v5396_v24 }
 0x32f   : > { %v4010_v34 = vpack.c.bf16 %v2791_v43, %v2790_v13  ;;  %4321 = vtanh.f32 %v2348_v14  ;;  %v5422_v38 = vadd.f32 %v5263_v51, %v2219_v0  ;;  %v2350_v20 = vmul.f32 0.5, %v5415_v48 }
 0x330   : > { %v4318_v17 = vpop.eup %4317  ;;  %v2537_v7 = vadd.f32 0.5, %v2473_v32  ;;  %4323 = vtanh.f32 %v2349_v5  ;;  %v3888_v59 = vunpack.c.l.bf16 %v5412_v18  ;;  %v5429_v28 = vadd.f32 %v5263_v51, %v2220_v19 }
 0x331   : > { %4177 = vst [vmem:[%s4838_s18 + $0x28] sm:$0xff] %v4010_v34   ;;  %v2474_v12 = vmul.f32 0.5, %v4318_v17  ;;  %v4320_v1 = vpop.eup %4319  ;;  %v2351_v40 = vmul.f32 0.5, %v5422_v38  ;;  %4325 = vtanh.f32 %v2350_v20  ;;  %v5432_v55 = vadd.f32 %v5263_v51, %v2221_v6  ;;  %v2227_v20 = vld [vmem:[#allocation2 + $0x30] sm:$0xff] }
 0x332   : > { %v2601_v42 = vmul.f32 %v2537_v7, %v5343_v25  ;;  %v2792_v29 = vadd.f32 %v3880_v57, %v2600_v58  ;;  %v2475_v21 = vmul.f32 0.5, %v4320_v1  ;;  %v3889_v22 = vunpack.c.h.bf16 %v5412_v18  ;;  %v2226_v18 = vld [vmem:[#allocation2 + $0x160] sm:$0xff] }
 0x333   : > { %v2538_v46 = vadd.f32 0.5, %v2474_v12  ;;  %4327 = vtanh.f32 %v2351_v40  ;;  %v2352_v37 = vmul.f32 0.5, %v5429_v28  ;;  %v2353_v35 = vmul.f32 0.5, %v5432_v55 }
 0x334   : > { %v2793_v15 = vadd.f32 %v3881_v2, %v2601_v42  ;;  %v2539_v39 = vadd.f32 0.5, %v2475_v21  ;;  %v5443_v25 = vadd.f32 %v5263_v51, %v2222_v26  ;;  %v3892_v3 = vunpack.c.l.bf16 %v5436_v31 }
 0x335   : > { %v2602_v52 = vmul.f32 %v2538_v46, %v5352_v11  ;;  %v4322_v62 = vpop.eup %4321  ;;  %v3893_v30 = vunpack.c.h.bf16 %v5436_v31  ;;  %4329 = vtanh.f32 %v2352_v37  ;;  %v5448_v41 = vadd.f32 %v5263_v51, %v2223_v10 }
 0x336   : > { %v4324_v49 = vpop.eup %4323  ;;  %v4015_v44 = vpack.c.bf16 %v2793_v15, %v2792_v29  ;;  %v2603_v63 = vmul.f32 %v2539_v39, %v5355_v27  ;;  %v2476_v11 = vmul.f32 0.5, %v4322_v62  ;;  %4331 = vtanh.f32 %v2353_v35  ;;  %v2229_v35 = vld [vmem:[#allocation2] sm:$0xff] }
 0x337   : > { %v2794_v45 = vadd.f32 %v3884_v4, %v2602_v52  ;;  %v4326_v50 = vpop.eup %4325  ;;  %v2477_v9 = vmul.f32 0.5, %v4324_v49  ;;  %v2354_v8 = vmul.f32 0.5, %v5443_v25  ;;  %v2355_v54 = vmul.f32 0.5, %v5448_v41  ;;  %v4153_v62 = vld [vmem:[%s4833_s8 + $0x60] sm:$0xff]  }
 0x338   : > { %4178 = vst [vmem:[%s4838_s18 + $0x30] sm:$0xff] %v4015_v44   ;;  %v2795_v24 = vadd.f32 %v3885_v36, %v2603_v63  ;;  %v2540_v60 = vadd.f32 0.5, %v2476_v11  ;;  %v2478_v13 = vmul.f32 0.5, %v4326_v50  ;;  %v5458_v33 = vadd.f32 %v5263_v51, %v2224_v61 }
 0x339   : > { %v4328_v27 = vpop.eup %4327  ;;  %v2541_v43 = vadd.f32 0.5, %v2477_v9  ;;  %v3896_v57 = vunpack.c.l.bf16 %v5452_v53  ;;  %4333 = vtanh.f32 %v2354_v8  ;;  %v5462_v0 = vadd.f32 %v5263_v51, %v2225_v47  ;;  %v2230_v8 = vld [vmem:[#allocation2 + $0xf0] sm:$0xff] }
 0x33a   : > { %v4020_v23 = vpack.c.bf16 %v2795_v24, %v2794_v45  ;;  %v2604_v2 = vmul.f32 %v2540_v60, %v5402_v16  ;;  %v2479_v4 = vmul.f32 0.5, %v4328_v27  ;;  %v2542_v14 = vadd.f32 0.5, %v2478_v13 }
 0x33b   : > { %v4330_v34 = vpop.eup %4329  ;;  %v2605_v32 = vmul.f32 %v2541_v43, %v5407_v56  ;;  %4335 = vtanh.f32 %v2355_v54  ;;  %v2356_v58 = vmul.f32 0.5, %v5458_v33  ;;  %v2357_v5 = vmul.f32 0.5, %v5462_v0  ;;  %v2231_v54 = vld [vmem:[#allocation2 + $0x8] sm:$0xff] }
 0x33c   : > { %4179 = vst [vmem:[%s4838_s18 + $0x38] sm:$0xff] %v4020_v23   ;;  %v2796_v19 = vadd.f32 %v3888_v59, %v2604_v2  ;;  %v2543_v6 = vadd.f32 0.5, %v2479_v4  ;;  %v2606_v17 = vmul.f32 %v2542_v14, %v5415_v48  ;;  %v2480_v36 = vmul.f32 0.5, %v4330_v34  ;;  %v4332_v16 = vpop.eup %4331  ;;  %v4152_v59 = vld [vmem:[%s4833_s8 + $0x58] sm:$0xff]   ;;  %v4154_v4 = vld [vmem:[%s4833_s8 + $0x68] sm:$0xff]  }
 0x33d   : > { %v2797_v7 = vadd.f32 %v3889_v22, %v2605_v32  ;;  %v3897_v12 = vunpack.c.h.bf16 %v5452_v53  ;;  %4337 = vtanh.f32 %v2356_v58  ;;  %v5472_v56 = vadd.f32 %v5263_v51, %v2226_v18 }
 0x33e   : > { %v2607_v1 = vmul.f32 %v2543_v6, %v5422_v38  ;;  %v2798_v40 = vadd.f32 %v3892_v3, %v2606_v17  ;;  %v2481_v26 = vmul.f32 0.5, %v4332_v16  ;;  %v2544_v42 = vadd.f32 0.5, %v2480_v36  ;;  %v2228_v38 = vld [vmem:[#allocation2 + $0x1e0] sm:$0xff]  ;;  %v2233_v16 = vld [vmem:[#allocation2 + $0x1d0] sm:$0xff] }
 0x33f   : > { %v4334_v29 = vpop.eup %4333  ;;  %v4025_v48 = vpack.c.bf16 %v2797_v7, %v2796_v19  ;;  %4339 = vtanh.f32 %v2357_v5  ;;  %v5477_v21 = vadd.f32 %v5263_v51, %v2227_v20  ;;  %v2358_v46 = vmul.f32 0.5, %v5472_v56 }
 0x340   : > { %v2799_v31 = vadd.f32 %v3893_v30, %v2607_v1  ;;  %v2545_v10 = vadd.f32 0.5, %v2481_v26  ;;  %v2608_v22 = vmul.f32 %v2544_v42, %v5429_v28  ;;  %v2482_v37 = vmul.f32 0.5, %v4334_v29  ;;  %v4155_v26 = vld [vmem:[%s4833_s8 + $0x70] sm:$0xff]  }
 0x341   : > { %v4336_v15 = vpop.eup %4335  ;;  %4180 = vst [vmem:[%s4838_s18 + $0x40] sm:$0xff] %v4025_v48   ;;  %v3900_v39 = vunpack.c.l.bf16 %v4152_v59  ;;  %v3901_v52 = vunpack.c.h.bf16 %v4152_v59  ;;  %v2359_v3 = vmul.f32 0.5, %v5477_v21  ;;  %4341 = vtanh.f32 %v2358_v46 }
 0x342   : > { %v4030_v61 = vpack.c.bf16 %v2799_v31, %v2798_v40  ;;  %v2609_v49 = vmul.f32 %v2545_v10, %v5432_v55  ;;  %v2800_v44 = vadd.f32 %v3896_v57, %v2608_v22  ;;  %v2483_v30 = vmul.f32 0.5, %v4336_v15  ;;  %v2234_v31 = vld [vmem:[#allocation2 + $0x100] sm:$0xff]  ;;  %v2235_v10 = vld [vmem:[#allocation2 + $0xc8] sm:$0xff] }
 0x343   : > { %v4338_v63 = vpop.eup %4337  ;;  %v2546_v45 = vadd.f32 0.5, %v2482_v37  ;;  %4343 = vtanh.f32 %v2359_v3  ;;  %v5486_v28 = vadd.f32 %v5263_v51, %v2228_v38  ;;  %v5489_v11 = vadd.f32 %v5263_v51, %v2229_v35 }
 0x344   : > { %4181 = vst [vmem:[%s4838_s18 + $0x48] sm:$0xff] %v4030_v61   ;;  %v2801_v53 = vadd.f32 %v3897_v12, %v2609_v49  ;;  %v2547_v47 = vadd.f32 0.5, %v2483_v30  ;;  %v2484_v50 = vmul.f32 0.5, %v4338_v63  ;;  %v3904_v9 = vunpack.c.l.bf16 %v4153_v62 }
 0x345   : > { %v4340_v55 = vpop.eup %4339  ;;  %v2610_v24 = vmul.f32 %v2546_v45, %v5443_v25  ;;  %v3905_v60 = vunpack.c.h.bf16 %v4153_v62  ;;  %v2360_v13 = vmul.f32 0.5, %v5486_v28  ;;  %v2361_v27 = vmul.f32 0.5, %v5489_v11  ;;  %v4156_v62 = vld [vmem:[%s4833_s8 + $0x78] sm:$0xff]  }
 0x346   : > { %v4035_v43 = vpack.c.bf16 %v2801_v53, %v2800_v44  ;;  %v2611_v57 = vmul.f32 %v2547_v47, %v5448_v41  ;;  %v2485_v23 = vmul.f32 0.5, %v4340_v55  ;;  %v2548_v2 = vadd.f32 0.5, %v2484_v50  ;;  %v2232_v41 = vld [vmem:[#allocation2 + $0x148] sm:$0xff]  ;;  %v2237_v53 = vld [vmem:[#allocation2 + $0x1f8] sm:$0xff] }
 0x347   : > { %v4342_v14 = vpop.eup %4341  ;;  %v2802_v18 = vadd.f32 %v3900_v39, %v2610_v24  ;;  %4345 = vtanh.f32 %v2360_v13  ;;  %v5498_v34 = vadd.f32 %v5263_v51, %v2230_v8  ;;  %v5501_v32 = vadd.f32 %v5263_v51, %v2231_v54 }
 0x348   : > { %4182 = vst [vmem:[%s4838_s18 + $0x50] sm:$0xff] %v4035_v43   ;;  %v2803_v25 = vadd.f32 %v3901_v52, %v2611_v57  ;;  %v2549_v58 = vadd.f32 0.5, %v2485_v23  ;;  %v2612_v5 = vmul.f32 %v2548_v2, %v5458_v33  ;;  %v2486_v19 = vmul.f32 0.5, %v4342_v14  ;;  %v4157_v43 = vld [vmem:[%s4833_s8 + $0x80] sm:$0xff]  }
 0x349   : > { %v4344_v6 = vpop.eup %4343  ;;  %v3908_v17 = vunpack.c.l.bf16 %v4154_v4  ;;  %4347 = vtanh.f32 %v2361_v27  ;;  %v2362_v36 = vmul.f32 0.5, %v5498_v34  ;;  %v2363_v20 = vmul.f32 0.5, %v5501_v32 }
 0x34a   : > { %v4040_v7 = vpack.c.bf16 %v2803_v25, %v2802_v18  ;;  %v2613_v12 = vmul.f32 %v2549_v58, %v5462_v0  ;;  %v2804_v1 = vadd.f32 %v3904_v9, %v2612_v5  ;;  %v2487_v40 = vmul.f32 0.5, %v4344_v6  ;;  %v2238_v25 = vld [vmem:[#allocation2 + $0x20] sm:$0xff] }
 0x34b   : > { %v2550_v42 = vadd.f32 0.5, %v2486_v19  ;;  %v3909_v59 = vunpack.c.h.bf16 %v4154_v4  ;;  %4349 = vtanh.f32 %v2362_v36  ;;  %v5510_v33 = vadd.f32 %v5263_v51, %v2232_v41 }
 0x34c   : > { %4183 = vst [vmem:[%s4838_s18 + $0x58] sm:$0xff] %v4040_v7   ;;  %v2805_v29 = vadd.f32 %v3905_v60, %v2613_v12  ;;  %v2551_v48 = vadd.f32 0.5, %v2487_v40  ;;  %4351 = vtanh.f32 %v2363_v20  ;;  %v5514_v46 = vadd.f32 %v5263_v51, %v2233_v16  ;;  %v2239_v7 = vld [vmem:[#allocation2 + $0x128] sm:$0xff] }
 0x34d   : > { %v4346_v0 = vpop.eup %4345  ;;  %v2614_v22 = vmul.f32 %v2550_v42, %v5472_v56  ;;  %v3912_v37 = vunpack.c.l.bf16 %v4155_v26  ;;  %v3913_v38 = vunpack.c.h.bf16 %v4155_v26  ;;  %v2364_v35 = vmul.f32 0.5, %v5510_v33 }
 0x34e   : > { %v4045_v15 = vpack.c.bf16 %v2805_v29, %v2804_v1  ;;  %v2615_v39 = vmul.f32 %v2551_v48, %v5477_v21  ;;  %v2488_v52 = vmul.f32 0.5, %v4346_v0  ;;  %v2365_v3 = vmul.f32 0.5, %v5514_v46  ;;  %v2236_v21 = vld [vmem:[#allocation2 + $0x40] sm:$0xff]  ;;  %v4158_v1 = vld [vmem:[%s4833_s8 + $0x88] sm:$0xff]  }
 0x34f   : > { %v4348_v61 = vpop.eup %4347  ;;  %v2806_v49 = vadd.f32 %v3908_v17, %v2614_v22  ;;  %4353 = vtanh.f32 %v2364_v35  ;;  %v5522_v44 = vadd.f32 %v5263_v51, %v2234_v31  ;;  %v5525_v30 = vadd.f32 %v5263_v51, %v2235_v10  ;;  %v2240_v10 = vld [vmem:[#allocation2 + $0x1a0] sm:$0xff] }
 0x350   : > { %4184 = vst [vmem:[%s4838_s18 + $0x60] sm:$0xff] %v4045_v15   ;;  %v2807_v56 = vadd.f32 %v3909_v59, %v2615_v39  ;;  %v2489_v63 = vmul.f32 0.5, %v4348_v61  ;;  %v2552_v45 = vadd.f32 0.5, %v2488_v52  ;;  %4355 = vtanh.f32 %v2365_v3  ;;  %v2241_v15 = vld [vmem:[#allocation2 + $0x1f0] sm:$0xff] }
 0x351   : > { %v4350_v47 = vpop.eup %4349  ;;  %v3916_v50 = vunpack.c.l.bf16 %v4156_v62  ;;  %v3917_v9 = vunpack.c.h.bf16 %v4156_v62  ;;  %v2366_v8 = vmul.f32 0.5, %v5522_v44  ;;  %v2367_v54 = vmul.f32 0.5, %v5525_v30  ;;  %v4159_v3 = vld [vmem:[%s4833_s8 + $0x90] sm:$0xff]  }
 0x352   : > { %v4352_v55 = vpop.eup %4351  ;;  %v4050_v24 = vpack.c.bf16 %v2807_v56, %v2806_v49  ;;  %v2553_v60 = vadd.f32 0.5, %v2489_v63  ;;  %v2616_v13 = vmul.f32 %v2552_v45, %v5486_v28  ;;  %v2490_v27 = vmul.f32 0.5, %v4350_v47 }
 0x353   : > { %v2491_v57 = vmul.f32 0.5, %v4352_v55  ;;  %4357 = vtanh.f32 %v2366_v8  ;;  %v5533_v23 = vadd.f32 %v5263_v51, %v2236_v21  ;;  %v5536_v2 = vadd.f32 %v5263_v51, %v2237_v53 }
 0x354   : > { %4185 = vst [vmem:[%s4838_s18 + $0x68] sm:$0xff] %v4050_v24   ;;  %v2617_v4 = vmul.f32 %v2553_v60, %v5489_v11  ;;  %v2808_v14 = vadd.f32 %v3912_v37, %v2616_v13  ;;  %v2554_v18 = vadd.f32 0.5, %v2490_v27  ;;  %4359 = vtanh.f32 %v2367_v54  ;;  %v2242_v54 = vld [vmem:[#allocation2 + $0xe8] sm:$0xff]  ;;  %v4160_v13 = vld [vmem:[%s4833_s8 + $0x98] sm:$0xff]  }
 0x355   : > { %v4354_v58 = vpop.eup %4353  ;;  %v2555_v28 = vadd.f32 0.5, %v2491_v57  ;;  %v3920_v5 = vunpack.c.l.bf16 %v4157_v43  ;;  %v2368_v19 = vmul.f32 0.5, %v5533_v23  ;;  %v2369_v41 = vmul.f32 0.5, %v5536_v2 }
 0x356   : > { %v4356_v6 = vpop.eup %4355  ;;  %v2809_v17 = vadd.f32 %v3913_v38, %v2617_v4  ;;  %v2618_v36 = vmul.f32 %v2554_v18, %v5498_v34  ;;  %v2492_v20 = vmul.f32 0.5, %v4354_v58  ;;  %v3921_v16 = vunpack.c.h.bf16 %v4157_v43  ;;  %v2243_v43 = vld [vmem:[#allocation2 + $0x78] sm:$0xff]  ;;  %v2244_v58 = vld [vmem:[#allocation2 + $0x70] sm:$0xff] }
 0x357   : > { %v2619_v11 = vmul.f32 %v2555_v28, %v5501_v32  ;;  %v2493_v12 = vmul.f32 0.5, %v4356_v6  ;;  %4361 = vtanh.f32 %v2368_v19  ;;  %v5546_v40 = vadd.f32 %v5263_v51, %v2238_v25  ;;  %v2245_v6 = vld [vmem:[#allocation2 + $0x90] sm:$0xff] }
 0x358   : > { %v4055_v26 = vpack.c.bf16 %v2809_v17, %v2808_v14  ;;  %v2810_v42 = vadd.f32 %v3916_v50, %v2618_v36  ;;  %v2556_v59 = vadd.f32 0.5, %v2492_v20  ;;  %4363 = vtanh.f32 %v2369_v41 }
 0x359   : > { %v4358_v29 = vpop.eup %4357  ;;  %v2811_v48 = vadd.f32 %v3917_v9, %v2619_v11  ;;  %v2557_v34 = vadd.f32 0.5, %v2493_v12  ;;  %v5549_v31 = vadd.f32 %v5263_v51, %v2239_v7  ;;  %v2370_v32 = vmul.f32 0.5, %v5546_v40  ;;  %v4161_v7 = vld [vmem:[%s4833_s8 + $0xa0] sm:$0xff]  }
 0x35a   : > { %v4360_v0 = vpop.eup %4359  ;;  %4186 = vst [vmem:[%s4838_s18 + $0x70] sm:$0xff] %v4055_v26   ;;  %v2620_v22 = vmul.f32 %v2556_v59, %v5510_v33  ;;  %v2494_v37 = vmul.f32 0.5, %v4358_v29  ;;  %v3924_v38 = vunpack.c.l.bf16 %v4158_v1  ;;  %v3925_v35 = vunpack.c.h.bf16 %v4158_v1 }
 0x35b   : > { %v4060_v39 = vpack.c.bf16 %v2811_v48, %v2810_v42  ;;  %v2621_v52 = vmul.f32 %v2557_v34, %v5514_v46  ;;  %v2495_v62 = vmul.f32 0.5, %v4360_v0  ;;  %v2371_v61 = vmul.f32 0.5, %v5549_v31 }
 0x35c   : > { %v2812_v49 = vadd.f32 %v3920_v5, %v2620_v22  ;;  %v2558_v56 = vadd.f32 0.5, %v2494_v37  ;;  %4365 = vtanh.f32 %v2370_v32  ;;  %v5558_v63 = vadd.f32 %v5263_v51, %v2240_v10  ;;  %v2246_v10 = vld [vmem:[#allocation2 + $0x1d8] sm:$0xff] }
 0x35d   : > { %v4362_v45 = vpop.eup %4361  ;;  %4187 = vst [vmem:[%s4838_s18 + $0x78] sm:$0xff] %v4060_v39   ;;  %v2813_v33 = vadd.f32 %v3921_v16, %v2621_v52  ;;  %v2559_v21 = vadd.f32 0.5, %v2495_v62  ;;  %4367 = vtanh.f32 %v2371_v61  ;;  %v5562_v53 = vadd.f32 %v5263_v51, %v2241_v15  ;;  %v2247_v39 = vld [vmem:[#allocation2 + $0xd0] sm:$0xff]  ;;  %v2248_v61 = vld [vmem:[#allocation2 + $0xb8] sm:$0xff] }
 0x35e   : > { %v4364_v46 = vpop.eup %4363  ;;  %v2622_v47 = vmul.f32 %v2558_v56, %v5522_v44  ;;  %v2496_v50 = vmul.f32 0.5, %v4362_v45  ;;  %v3928_v9 = vunpack.c.l.bf16 %v4159_v3  ;;  %v2372_v8 = vmul.f32 0.5, %v5558_v63 }
 0x35f   : > { %v4065_v55 = vpack.c.bf16 %v2813_v33, %v2812_v49  ;;  %v2623_v24 = vmul.f32 %v2559_v21, %v5525_v30  ;;  %v2497_v60 = vmul.f32 0.5, %v4364_v46  ;;  %v2373_v27 = vmul.f32 0.5, %v5562_v53 }
 0x360   : > { %v2814_v57 = vadd.f32 %v3924_v38, %v2622_v47  ;;  %v2560_v4 = vadd.f32 0.5, %v2496_v50  ;;  %v3929_v14 = vunpack.c.h.bf16 %v4159_v3  ;;  %4369 = vtanh.f32 %v2372_v8 }
 0x361   : > { %4188 = vst [vmem:[%s4838_s18 + $0x80] sm:$0xff] %v4065_v55   ;;  %v2815_v44 = vadd.f32 %v3925_v35, %v2623_v24  ;;  %v2561_v18 = vadd.f32 0.5, %v2497_v60  ;;  %4371 = vtanh.f32 %v2373_v27  ;;  %v5571_v25 = vadd.f32 %v5263_v51, %v2242_v54  ;;  %v5591_v35 = vld [vmem:[%s4833_s8 + $0xa8] sm:$0xff]   ;;  %v4163_v27 = vld [vmem:[%s4833_s8 + $0xb0] sm:$0xff]  }
 0x362   : > { %v4366_v28 = vpop.eup %4365  ;;  %v2624_v30 = vmul.f32 %v2560_v4, %v5533_v23  ;;  %v3932_v5 = vunpack.c.l.bf16 %v4160_v13  ;;  %v3933_v19 = vunpack.c.h.bf16 %v4160_v13  ;;  %v5575_v41 = vadd.f32 %v5263_v51, %v2243_v43 }
 0x363   : > { %v4368_v17 = vpop.eup %4367  ;;  %v4070_v36 = vpack.c.bf16 %v2815_v44, %v2814_v57  ;;  %v2625_v20 = vmul.f32 %v2561_v18, %v5536_v2  ;;  %v2498_v16 = vmul.f32 0.5, %v4366_v28  ;;  %v2374_v11 = vmul.f32 0.5, %v5571_v25 }
 0x364   : > { %v2816_v12 = vadd.f32 %v3928_v9, %v2624_v30  ;;  %v2499_v1 = vmul.f32 0.5, %v4368_v17  ;;  %v2375_v26 = vmul.f32 0.5, %v5575_v41  ;;  %v5582_v23 = vadd.f32 %v5263_v51, %v2244_v58  ;;  %v2251_v17 = vld [vmem:[#allocation2 + $0x1c8] sm:$0xff] }
 0x365   : > { %4189 = vst [vmem:[%s4838_s18 + $0x88] sm:$0xff] %v4070_v36   ;;  %v2817_v42 = vadd.f32 %v3929_v14, %v2625_v20  ;;  %v2562_v59 = vadd.f32 0.5, %v2498_v16  ;;  %4373 = vtanh.f32 %v2374_v11  ;;  %v5586_v29 = vadd.f32 %v5263_v51, %v2245_v6  ;;  %v2250_v6 = vld [vmem:[#allocation2 + $0xa8] sm:$0xff] }
 0x366   : > { %v4370_v2 = vpop.eup %4369  ;;  %v2563_v48 = vadd.f32 0.5, %v2499_v1  ;;  %v3936_v34 = vunpack.c.l.bf16 %v4161_v7  ;;  %4375 = vtanh.f32 %v2375_v26  ;;  %v2376_v32 = vmul.f32 0.5, %v5582_v23 }
 0x367   : > { %v4372_v0 = vpop.eup %4371  ;;  %v4075_v22 = vpack.c.bf16 %v2817_v42, %v2816_v12  ;;  %v2626_v37 = vmul.f32 %v2562_v59, %v5546_v40  ;;  %v2500_v38 = vmul.f32 0.5, %v4370_v2  ;;  %v2377_v15 = vmul.f32 0.5, %v5586_v29 }
 0x368   : > { %v2627_v52 = vmul.f32 %v2563_v48, %v5549_v31  ;;  %v2501_v62 = vmul.f32 0.5, %v4372_v0  ;;  %v3937_v3 = vunpack.c.h.bf16 %v4161_v7  ;;  %4377 = vtanh.f32 %v2376_v32  ;;  %v2249_v31 = vld [vmem:[#allocation2 + $0x88] sm:$0xff]  ;;  %v4164_v7 = vld [vmem:[%s4833_s8 + $0xb8] sm:$0xff]   ;;  %v2252_v48 = vld [vmem:[#allocation2 + $0x170] sm:$0xff] }
 0x369   : > { %4190 = vst [vmem:[%s4838_s18 + $0x90] sm:$0xff] %v4075_v22   ;;  %v2818_v49 = vadd.f32 %v3932_v5, %v2626_v37  ;;  %v2564_v56 = vadd.f32 0.5, %v2500_v38  ;;  %4379 = vtanh.f32 %v2377_v15  ;;  %v5597_v45 = vadd.f32 %v5263_v51, %v2246_v10  ;;  %v2253_v0 = vld [vmem:[#allocation2 + $0x178] sm:$0xff] }
 0x36a   : > { %v2819_v40 = vadd.f32 %v3933_v19, %v2627_v52  ;;  %v2565_v33 = vadd.f32 0.5, %v2501_v62  ;;  %v3940_v21 = vunpack.c.l.bf16 %v5591_v35  ;;  %v5601_v46 = vadd.f32 %v5263_v51, %v2247_v39 }
 0x36b   : > { %v4374_v47 = vpop.eup %4373  ;;  %v2628_v50 = vmul.f32 %v2564_v56, %v5558_v63  ;;  %v3941_v9 = vunpack.c.h.bf16 %v5591_v35  ;;  %v2378_v8 = vmul.f32 0.5, %v5597_v45  ;;  %v5607_v54 = vadd.f32 %v5263_v51, %v2248_v61  ;;  %v5615_v63 = vld [vmem:[%s5737_s2] ss:$0 sm:$0xff] }
 0x36c   : > { %v4376_v55 = vpop.eup %4375  ;;  %v4080_v24 = vpack.c.bf16 %v2819_v40, %v2818_v49  ;;  %v2629_v60 = vmul.f32 %v2565_v33, %v5562_v53  ;;  %v2502_v13 = vmul.f32 0.5, %v4374_v47  ;;  %v2379_v43 = vmul.f32 0.5, %v5601_v46  ;;  %v4165_v56 = vld [vmem:[%s4833_s8 + $0xc0] sm:$0xff]  }
 0x36d   : > { %v2820_v57 = vadd.f32 %v3936_v34, %v2628_v50  ;;  %v2503_v4 = vmul.f32 0.5, %v4376_v55  ;;  %4381 = vtanh.f32 %v2378_v8  ;;  %v5618_v14 = vadd.f32 %v5615_v63, %v2249_v31  ;;  %v2254_v55 = vld [vmem:[#allocation2 + $0x68] sm:$0xff] }
 0x36e   : > { %v4378_v51 = vpop.eup %4377  ;;  %4191 = vst [vmem:[%s4838_s18 + $0x98] sm:$0xff] %v4080_v24   ;;  %v2821_v44 = vadd.f32 %v3937_v3, %v2629_v60  ;;  %v2566_v53 = vadd.f32 0.5, %v2502_v13  ;;  %4383 = vtanh.f32 %v2379_v43  ;;  %v2380_v18 = vmul.f32 0.5, %v5607_v54  ;;  %v2255_v24 = vld [vmem:[#allocation2 + $0x190] sm:$0xff]  ;;  %v4166_v43 = vld [vmem:[%s4833_s8 + $0xc8] sm:$0xff]  }
 0x36f   : > { %v4380_v58 = vpop.eup %4379  ;;  %v2567_v28 = vadd.f32 0.5, %v2503_v4  ;;  %v2504_v30 = vmul.f32 0.5, %v4378_v51  ;;  %v3944_v5 = vunpack.c.l.bf16 %v4163_v27  ;;  %v2381_v19 = vmul.f32 0.5, %v5618_v14 }
 0x370   : > { %v4085_v36 = vpack.c.bf16 %v2821_v44, %v2820_v57  ;;  %v2630_v20 = vmul.f32 %v2566_v53, %v5571_v25  ;;  %v2505_v16 = vmul.f32 0.5, %v4380_v58  ;;  %4385 = vtanh.f32 %v2380_v18  ;;  %v2256_v57 = vld [vmem:[#allocation2 + $0x198] sm:$0xff] }
 0x371   : > { %v2631_v11 = vmul.f32 %v2567_v28, %v5575_v41  ;;  %v2568_v12 = vadd.f32 0.5, %v2504_v30  ;;  %v3945_v1 = vunpack.c.h.bf16 %v4163_v27  ;;  %4387 = vtanh.f32 %v2381_v19 }
 0x372   : > { %4192 = vst [vmem:[%s4838_s18 + $0xa0] sm:$0xff] %v4085_v36   ;;  %v2822_v26 = vadd.f32 %v3940_v21, %v2630_v20  ;;  %v2569_v42 = vadd.f32 0.5, %v2505_v16  ;;  %v5628_v59 = vadd.f32 %v5615_v63, %v2250_v6  ;;  %v5631_v2 = vadd.f32 %v5615_v63, %v2251_v17  ;;  %v4167_v6 = vld [vmem:[%s4833_s8 + $0xd0] sm:$0xff]  }
 0x373   : > { %v4382_v34 = vpop.eup %4381  ;;  %v2823_v25 = vadd.f32 %v3941_v9, %v2631_v11  ;;  %v2632_v32 = vmul.f32 %v2568_v12, %v5582_v23  ;;  %v3948_v10 = vunpack.c.l.bf16 %v4164_v7  ;;  %v3949_v41 = vunpack.c.h.bf16 %v4164_v7 }
 0x374   : > { %v4384_v22 = vpop.eup %4383  ;;  %v2633_v37 = vmul.f32 %v2569_v42, %v5586_v29  ;;  %v2506_v38 = vmul.f32 0.5, %v4382_v34  ;;  %v2382_v35 = vmul.f32 0.5, %v5628_v59  ;;  %v2383_v15 = vmul.f32 0.5, %v5631_v2 }
 0x375   : > { %v4090_v39 = vpack.c.bf16 %v2823_v25, %v2822_v26  ;;  %v2824_v52 = vadd.f32 %v3944_v5, %v2632_v32  ;;  %v2507_v62 = vmul.f32 0.5, %v4384_v22  ;;  %v5638_v3 = vadd.f32 %v5615_v63, %v2252_v48  ;;  %v2258_v25 = vld [vmem:[#allocation2 + $0xc0] sm:$0xff] }
 0x376   : > { %v4386_v23 = vpop.eup %4385  ;;  %v2825_v61 = vadd.f32 %v3945_v1, %v2633_v37  ;;  %v2570_v49 = vadd.f32 0.5, %v2506_v38  ;;  %4389 = vtanh.f32 %v2382_v35  ;;  %v5642_v40 = vadd.f32 %v5615_v63, %v2253_v0  ;;  %v2259_v22 = vld [vmem:[#allocation2 + $0x1c0] sm:$0xff] }
 0x377   : > { %v4388_v29 = vpop.eup %4387  ;;  %4193 = vst [vmem:[%s4838_s18 + $0xa8] sm:$0xff] %v4090_v39   ;;  %v2571_v33 = vadd.f32 0.5, %v2507_v62  ;;  %v2508_v21 = vmul.f32 0.5, %v4386_v23  ;;  %4391 = vtanh.f32 %v2383_v15  ;;  %v2384_v31 = vmul.f32 0.5, %v5638_v3  ;;  %v4168_v62 = vld [vmem:[%s4833_s8 + $0xd8] sm:$0xff]  }
 0x378   : > { %v4095_v47 = vpack.c.bf16 %v2825_v61, %v2824_v52  ;;  %v2634_v50 = vmul.f32 %v2570_v49, %v5597_v45  ;;  %v2509_v9 = vmul.f32 0.5, %v4388_v29  ;;  %v2385_v8 = vmul.f32 0.5, %v5642_v40  ;;  %v2260_v61 = vld [vmem:[#allocation2 + $0x158] sm:$0xff] }
 0x379   : > { %v2635_v60 = vmul.f32 %v2571_v33, %v5601_v46  ;;  %v2572_v13 = vadd.f32 0.5, %v2508_v21  ;;  %v3952_v27 = vunpack.c.l.bf16 %v4165_v56  ;;  %4393 = vtanh.f32 %v2384_v31  ;;  %v2257_v46 = vld [vmem:[#allocation2 + $0x38] sm:$0xff] }
 0x37a   : > { %4194 = vst [vmem:[%s4838_s18 + $0xb0] sm:$0xff] %v4095_v47   ;;  %v2826_v4 = vadd.f32 %v3948_v10, %v2634_v50  ;;  %v2573_v51 = vadd.f32 0.5, %v2509_v9  ;;  %v3953_v44 = vunpack.c.h.bf16 %v4165_v56  ;;  %4395 = vtanh.f32 %v2385_v8 }
 0x37b   : > { %v2827_v53 = vadd.f32 %v3949_v41, %v2635_v60  ;;  %v2636_v45 = vmul.f32 %v2572_v13, %v5607_v54  ;;  %v5653_v18 = vadd.f32 %v5615_v63, %v2254_v55  ;;  %v5656_v58 = vadd.f32 %v5615_v63, %v2255_v24 }
 0x37c   : > { %v4390_v28 = vpop.eup %4389  ;;  %v2637_v30 = vmul.f32 %v2573_v51, %v5618_v14  ;;  %v3956_v5 = vunpack.c.l.bf16 %v4166_v43  ;;  %v3957_v19 = vunpack.c.h.bf16 %v4166_v43  ;;  %v5661_v17 = vadd.f32 %v5615_v63, %v2256_v57 }
 0x37d   : > { %v4392_v36 = vpop.eup %4391  ;;  %v4100_v20 = vpack.c.bf16 %v2827_v53, %v2826_v4  ;;  %v2828_v54 = vadd.f32 %v3952_v27, %v2636_v45  ;;  %v2510_v16 = vmul.f32 0.5, %v4390_v28  ;;  %v2386_v7 = vmul.f32 0.5, %v5653_v18  ;;  %v4169_v27 = vld [vmem:[%s4833_s8 + $0xe0] sm:$0xff]   ;;  %v2262_v45 = vld [vmem:[#allocation2 + $0x58] sm:$0xff] }
 0x37e   : > { %v2829_v11 = vadd.f32 %v3953_v44, %v2637_v30  ;;  %v2511_v12 = vmul.f32 0.5, %v4392_v36  ;;  %v2387_v1 = vmul.f32 0.5, %v5656_v58  ;;  %v5666_v26 = vadd.f32 %v5615_v63, %v2257_v46  ;;  %v2263_v46 = vld [vmem:[#allocation2 + $0xa0] sm:$0xff] }
 0x37f   : > { %v4394_v14 = vpop.eup %4393  ;;  %4195 = vst [vmem:[%s4838_s18 + $0xb8] sm:$0xff] %v4100_v20   ;;  %v2574_v42 = vadd.f32 0.5, %v2510_v16  ;;  %v3960_v48 = vunpack.c.l.bf16 %v4167_v6  ;;  %4397 = vtanh.f32 %v2386_v7  ;;  %v2388_v34 = vmul.f32 0.5, %v5661_v17 }
 0x380   : > { %v4396_v32 = vpop.eup %4395  ;;  %v4105_v10 = vpack.c.bf16 %v2829_v11, %v2828_v54  ;;  %v2575_v41 = vadd.f32 0.5, %v2511_v12  ;;  %v2512_v0 = vmul.f32 0.5, %v4394_v14  ;;  %4399 = vtanh.f32 %v2387_v1 }
 0x381   : > { %v2638_v37 = vmul.f32 %v2574_v42, %v5628_v59  ;;  %v2513_v38 = vmul.f32 0.5, %v4396_v32  ;;  %v2389_v35 = vmul.f32 0.5, %v5666_v26  ;;  %4401 = vtanh.f32 %v2388_v34  ;;  %v4170_v34 = vld [vmem:[%s4833_s8 + $0xe8] sm:$0xff]  }
 0x382   : > { %4196 = vst [vmem:[%s4838_s18 + $0xc0] sm:$0xff] %v4105_v10   ;;  %v2639_v15 = vmul.f32 %v2575_v41, %v5631_v2  ;;  %v2576_v39 = vadd.f32 0.5, %v2512_v0  ;;  %v3961_v52 = vunpack.c.h.bf16 %v4167_v6  ;;  %v5676_v23 = vadd.f32 %v5615_v63, %v2258_v25  ;;  %v2261_v2 = vld [vmem:[#allocation2 + $0x10] sm:$0xff] }
 0x383   : > { %v2830_v49 = vadd.f32 %v3956_v5, %v2638_v37  ;;  %v2577_v56 = vadd.f32 0.5, %v2513_v38  ;;  %4403 = vtanh.f32 %v2389_v35  ;;  %v5679_v59 = vadd.f32 %v5615_v63, %v2259_v22 }
 0x384   : > { %v2831_v29 = vadd.f32 %v3957_v19, %v2639_v15  ;;  %v2640_v33 = vmul.f32 %v2576_v39, %v5638_v3  ;;  %v2390_v21 = vmul.f32 0.5, %v5676_v23  ;;  %v3964_v50 = vunpack.c.l.bf16 %v4168_v62 }
 0x385   : > { %v4398_v31 = vpop.eup %4397  ;;  %v2641_v47 = vmul.f32 %v2577_v56, %v5642_v40  ;;  %v2391_v9 = vmul.f32 0.5, %v5679_v59  ;;  %v5686_v8 = vadd.f32 %v5615_v63, %v2260_v61  ;;  %v5690_v4 = vadd.f32 %v5615_v63, %v2261_v2 }
 0x386   : > { %v4400_v55 = vpop.eup %4399  ;;  %v4110_v24 = vpack.c.bf16 %v2831_v29, %v2830_v49  ;;  %v2832_v60 = vadd.f32 %v3960_v48, %v2640_v33  ;;  %v2514_v13 = vmul.f32 0.5, %v4398_v31  ;;  %4405 = vtanh.f32 %v2390_v21 }
 0x387   : > { %v4402_v3 = vpop.eup %4401  ;;  %v2833_v43 = vadd.f32 %v3961_v52, %v2641_v47  ;;  %v2515_v57 = vmul.f32 0.5, %v4400_v55  ;;  %4407 = vtanh.f32 %v2391_v9  ;;  %v3965_v51 = vunpack.c.h.bf16 %v4168_v62  ;;  %v4171_v52 = vld [vmem:[%s4833_s8 + $0xf0] sm:$0xff]  }
 0x388   : > { %4197 = vst [vmem:[%s4838_s18 + $0xc8] sm:$0xff] %v4110_v24   ;;  %v2578_v40 = vadd.f32 0.5, %v2514_v13  ;;  %v2516_v44 = vmul.f32 0.5, %v4402_v3  ;;  %v2392_v53 = vmul.f32 0.5, %v5686_v8  ;;  %v3968_v19 = vunpack.c.l.bf16 %v4169_v27  ;;  %v4172_v24 = vld [vmem:[%s4833_s8 + $0xf8] sm:$0xff]  }
 0x389   : > { %v4404_v28 = vpop.eup %4403  ;;  %v4115_v30 = vpack.c.bf16 %v2833_v43, %v2832_v60  ;;  %v2579_v5 = vadd.f32 0.5, %v2515_v57  ;;  %v2393_v6 = vmul.f32 0.5, %v5690_v4  ;;  %v2330_v7 = vadd.f32 %v5615_v63, %v2262_v45 }
 0x38a   : > { %v2642_v36 = vmul.f32 %v2578_v40, %v5653_v18  ;;  %v2517_v20 = vmul.f32 0.5, %v4404_v28  ;;  %v2580_v54 = vadd.f32 0.5, %v2516_v44  ;;  %4409 = vtanh.f32 %v2392_v53 }
 0x38b   : > { %4198 = vst [vmem:[%s4838_s18 + $0xd0] sm:$0xff] %v4115_v30   ;;  %v2643_v16 = vmul.f32 %v2579_v5, %v5656_v58  ;;  %4411 = vtanh.f32 %v2393_v6  ;;  %v2331_v11 = vadd.f32 %v5615_v63, %v2263_v46  ;;  %v3969_v48 = vunpack.c.h.bf16 %v4169_v27 }
 0x38c   : > { %v4406_v12 = vpop.eup %4405  ;;  %v2834_v1 = vadd.f32 %v3964_v50, %v2642_v36  ;;  %v2581_v14 = vadd.f32 0.5, %v2517_v20  ;;  %v2644_v42 = vmul.f32 %v2580_v54, %v5661_v17  ;;  %v2394_v10 = vmul.f32 0.5, %v2330_v7 }
 0x38d   : > { %v4408_v25 = vpop.eup %4407  ;;  %v2835_v18 = vadd.f32 %v3965_v51, %v2643_v16  ;;  %v2518_v32 = vmul.f32 0.5, %v4406_v12  ;;  %v2395_v41 = vmul.f32 0.5, %v2331_v11  ;;  %v3972_v38 = vunpack.c.l.bf16 %v4170_v34 }
 0x38e   : > { %v2645_v58 = vmul.f32 %v2581_v14, %v5666_v26  ;;  %v2836_v0 = vadd.f32 %v3968_v19, %v2644_v42  ;;  %v2519_v22 = vmul.f32 0.5, %v4408_v25  ;;  %4413 = vtanh.f32 %v2394_v10 }
 0x38f   : > { %v4120_v37 = vpack.c.bf16 %v2835_v18, %v2834_v1  ;;  %v2582_v63 = vadd.f32 0.5, %v2518_v32  ;;  %v3973_v39 = vunpack.c.h.bf16 %v4170_v34  ;;  %4415 = vtanh.f32 %v2395_v41 }
 0x390   : > { %v4410_v35 = vpop.eup %4409  ;;  %v2837_v17 = vadd.f32 %v3969_v48, %v2645_v58  ;;  %v2583_v15 = vadd.f32 0.5, %v2519_v22  ;;  %v3976_v2 = vunpack.c.l.bf16 %v4171_v52  ;;  %v3977_v50 = vunpack.c.h.bf16 %v4171_v52 }
 0x391   : > { %v4412_v62 = vpop.eup %4411  ;;  %4199 = vst [vmem:[%s4838_s18 + $0xd8] sm:$0xff] %v4120_v37   ;;  %v2646_v61 = vmul.f32 %v2582_v63, %v5676_v23  ;;  %v2520_v49 = vmul.f32 0.5, %v4410_v35  ;;  %v3980_v40 = vunpack.c.l.bf16 %v4172_v24  ;;  %v3981_v44 = vunpack.c.h.bf16 %v4172_v24 }
 0x392   : > { %v4125_v26 = vpack.c.bf16 %v2837_v17, %v2836_v0  ;;  %v2647_v56 = vmul.f32 %v2583_v15, %v5679_v59  ;;  %v2521_v29 = vmul.f32 0.5, %v4412_v62 }
 0x393   : > { %v2838_v33 = vadd.f32 %v3972_v38, %v2646_v61  ;;  %v2584_v21 = vadd.f32 0.5, %v2520_v49 }
 0x394   : > { %4200 = vst [vmem:[%s4838_s18 + $0xe0] sm:$0xff] %v4125_v26   ;;  %v2839_v31 = vadd.f32 %v3973_v39, %v2647_v56  ;;  %v2585_v47 = vadd.f32 0.5, %v2521_v29  ;;  %v4414_v9 = vpop.eup %4413 }
 0x395   : > { %v2648_v55 = vmul.f32 %v2584_v21, %v5686_v8  ;;  %v4416_v60 = vpop.eup %4415  ;;  %v2522_v27 = vmul.f32 0.5, %v4414_v9 }
 0x396   : > { %v4130_v23 = vpack.c.bf16 %v2839_v31, %v2838_v33  ;;  %v2649_v13 = vmul.f32 %v2585_v47, %v5690_v4  ;;  %v2523_v3 = vmul.f32 0.5, %v4416_v60 }
 0x397   : > { %v2840_v59 = vadd.f32 %v3976_v2, %v2648_v55  ;;  %v2586_v57 = vadd.f32 0.5, %v2522_v27 }
 0x398   : > { %4201 = vst [vmem:[%s4838_s18 + $0xe8] sm:$0xff] %v4130_v23   ;;  %v2841_v43 = vadd.f32 %v3977_v50, %v2649_v13  ;;  %v2587_v51 = vadd.f32 0.5, %v2523_v3 }
 0x399   : > { %v2650_v45 = vmul.f32 %v2586_v57, %v2330_v7 }
 0x39a   : > { %v4135_v53 = vpack.c.bf16 %v2841_v43, %v2840_v59  ;;  %v2651_v46 = vmul.f32 %v2587_v51, %v2331_v11 }
 0x39b   : > { %v2842_v8 = vadd.f32 %v3980_v40, %v2650_v45 }
 0x39c   : > { %4202 = vst [vmem:[%s4838_s18 + $0xf0] sm:$0xff] %v4135_v53   ;;  %v2843_v28 = vadd.f32 %v3981_v44, %v2651_v46 }
 0x39e   : > { %v4140_v30 = vpack.c.bf16 %v2843_v28, %v2842_v8 }
 0x3a0   : > { %4203 = vst [vmem:[%s4838_s18 + $0xf8] sm:$0xff] %v4140_v30  }
 0x3a1 PF: > { %s14_s21 = sadd.s32 1, %s4472_s21   ;;  %s5740_s15 = smov %s4452_s16 }
 0x3a2   : > { %p11_p0 = scmp.ge.s32.totalorder %s14_s21, 8   ;;  %s5741_s16 = smov %s4551_s28 }
 0x3a3   : > { %s5742_s17 = smov %s4464_s19  ;;  %s5743_s18 = smov %s4468_s20 }
 0x3a4   : > { %s5744_s19 = smov %s5747_s22  ;;  %s5745_s20 = smov %s5751_s23 }
 0x3a5   :  { %13 = sbr.rel (!%p11_p0) target bundleno = 4 (0x4), region = 120 }

// kernel: efficientnetv2_forward.21
= control target key start
LH: loop header
LB: loop body
LE: loop exit
PB: predicated region body
PF: predicated region fallthrough
CT: control target
= control target key end

     0   :  { %s919_s12 = smov 0   ;;  %s921_s13 = smov 0   ;;  %s999_s0 = inlined_call_operand.vmem [shape: bf16[256,128], index: 0, kind: input, shape index: {}]   ;;  %s1000_s1 = inlined_call_operand.vmem [shape: bf16[128,128], index: 1, kind: input, shape index: {}]   ;;  %s1001_s2 = inlined_call_operand.vmem [shape: f32[1,128], index: 2, kind: input, shape index: {}]   ;;  %s1002_s3 = inlined_call_operand.vmem [shape: bf16[256,128], index: 3, kind: output, shape index: {}]  }
   0x1   :  { %s923_s14 = smov 0  }
   0x2 LB: > { %s32_s15 = sadd.s32 1, %s893_s13  ;;  %p692_p0 = scmp.ge.s32.totalorder %s897_s14, 1  ;;  %s897_s14 = sphi %s923_s14, %s13_s14   ;;  %s893_s13 = sphi %s921_s13, %s1004_s13   ;;  %s889_s12 = sphi %s919_s12, %s1003_s12  }
   0x3   : > { %p34_p1 = scmp.ge.s32.totalorder %s32_s15, 2  ;;  %p188_p2 = scmp.lt.s32.totalorder %s897_s14, 3 }
   0x5   : > { %s1006_s15 = smov (%p34_p1, %s32_s15), 0  ;;  %p189_p3 = pnand %p692_p0, %p188_p2 }
   0x6   : > { %s693_s24 = sshll.u32 (!%p189_p3), %s889_s12, 4 }
   0x7   : > { %192 = sbr.rel (%p189_p3) target bundleno = 207 (0xcf), region = 32  ;;  %p230_p4 = scmp.lt.s32.totalorder (!%p189_p3), %s693_s24, 31 }
   0xc   : > { %v778_v0 = vld [vmem:[%s1000_s1 + $0x38] sm:$0xff]  ;;  %v777_v1 = vld [vmem:[%s1000_s1 + $0x30] sm:$0xff]  ;;  %v776_v2 = vld [vmem:[%s1000_s1 + $0x28] sm:$0xff]  ;;  %s1008_s24 = smov (!%p230_p4, %s693_s24), 31 }
   0xd   : > { %423 = vmatpush.bf16.msra.mxu0 %v778_v0  ;;  %826 = vmatpush.bf16.msra.mxu1 %v778_v0  ;;  %v775_v3 = vld [vmem:[%s1000_s1 + $0x20] sm:$0xff]  ;;  %v774_v4 = vld [vmem:[%s1000_s1 + $0x18] sm:$0xff]  ;;  %v773_v5 = vld [vmem:[%s1000_s1 + $0x10] sm:$0xff]  ;;  %s694_s4 = sshll.u32 %s1008_s24, 2 }
   0xe   : > { %827 = vmatpush.bf16.msra.mxu2 %v778_v0  ;;  %828 = vmatpush.bf16.msra.mxu3 %v778_v0  ;;  %v772_v6 = vld [vmem:[%s1000_s1 + $0x8] sm:$0xff]  ;;  %v771_v7 = vld [vmem:[%s1000_s1] sm:$0xff]  ;;  %s236_s9 = scalar_lea.vmem %s999_s0, %s694_s4  ;;  %s980_s17 = scalar_lea.vmem %s1002_s3, %s694_s4 }
   0xf   : > { %v763_v8 = vld [vmem:[%s236_s9] sm:$0xff]  ;;  %v765_v9 = vld [vmem:[%s236_s9 + $0x10] sm:$0xff]  ;;  %v764_v12 = vld [vmem:[%s236_s9 + $0x8] sm:$0xff] }
  0x10   : > { %v767_v10 = vld [vmem:[%s236_s9 + $0x20] sm:$0xff]  ;;  %v769_v11 = vld [vmem:[%s236_s9 + $0x30] sm:$0xff]  ;;  %v766_v13 = vld [vmem:[%s236_s9 + $0x18] sm:$0xff] }
  0x11   : > { %424 = vmatpush.bf16.msra.mxu0 %v777_v1  ;;  %829 = vmatpush.bf16.msra.mxu1 %v777_v1  ;;  %v768_v14 = vld [vmem:[%s236_s9 + $0x28] sm:$0xff]  ;;  %v770_v15 = vld [vmem:[%s236_s9 + $0x38] sm:$0xff]  ;;  %v874_v18 = vld [vmem:[%s1001_s2] ss:$0 sm:$0xff] }
  0x12   : > { %830 = vmatpush.bf16.msra.mxu2 %v777_v1  ;;  %831 = vmatpush.bf16.msra.mxu3 %v777_v1 }
  0x15   : > { %425 = vmatpush.bf16.msra.mxu0 %v776_v2  ;;  %832 = vmatpush.bf16.msra.mxu1 %v776_v2 }
  0x16   : > { %833 = vmatpush.bf16.msra.mxu2 %v776_v2  ;;  %834 = vmatpush.bf16.msra.mxu3 %v776_v2 }
  0x19   : > { %426 = vmatpush.bf16.msra.mxu0 %v775_v3  ;;  %835 = vmatpush.bf16.msra.mxu1 %v775_v3 }
  0x1a   : > { %836 = vmatpush.bf16.msra.mxu2 %v775_v3  ;;  %837 = vmatpush.bf16.msra.mxu3 %v775_v3 }
  0x1d   : > { %427 = vmatpush.bf16.msra.mxu0 %v774_v4  ;;  %838 = vmatpush.bf16.msra.mxu1 %v774_v4 }
  0x1e   : > { %839 = vmatpush.bf16.msra.mxu2 %v774_v4  ;;  %840 = vmatpush.bf16.msra.mxu3 %v774_v4 }
  0x21   : > { %428 = vmatpush.bf16.msra.mxu0 %v773_v5  ;;  %841 = vmatpush.bf16.msra.mxu1 %v773_v5 }
  0x22   : > { %842 = vmatpush.bf16.msra.mxu2 %v773_v5  ;;  %843 = vmatpush.bf16.msra.mxu3 %v773_v5 }
  0x25   : > { %429 = vmatpush.bf16.msra.mxu0 %v772_v6  ;;  %844 = vmatpush.bf16.msra.mxu1 %v772_v6 }
  0x26   : > { %845 = vmatpush.bf16.msra.mxu2 %v772_v6  ;;  %846 = vmatpush.bf16.msra.mxu3 %v772_v6 }
  0x29   : > { %430 = vmatpush.bf16.msra.mxu0 %v771_v7  ;;  %847 = vmatpush.bf16.msra.mxu1 %v771_v7 }
  0x2a   : > { %848 = vmatpush.bf16.msra.mxu2 %v771_v7  ;;  %849 = vmatpush.bf16.msra.mxu3 %v771_v7 }
  0x2c   : > { %431 = vmatmul.bf16.vlgmr.msra.gmra.mxu0 %v763_v8  ;;  %441 = vmatmul.bf16.vlgmr.msra.gmra.mxu1 %v765_v9 }
  0x2d   : > { %451 = vmatmul.bf16.vlgmr.msra.gmra.mxu2 %v767_v10  ;;  %461 = vmatmul.bf16.vlgmr.msra.gmra.mxu3 %v769_v11 }
  0x3c   : > { %436 = vmatmul.bf16.gmra.mxu0 %v764_v12  ;;  %446 = vmatmul.bf16.gmra.mxu1 %v766_v13 }
  0x3d   : > { %456 = vmatmul.bf16.gmra.mxu2 %v768_v14  ;;  %466 = vmatmul.bf16.gmra.mxu3 %v770_v15 }
  0xa9   : > { %v432_v16 = vpop.f32.mrf.mxu0  ;;  %v442_v17 = vpop.f32.mrf.mxu1 }
  0xaa   : > { %v527_v23 = vadd.f32 %v874_v18, %v432_v16  ;;  %v531_v24 = vadd.f32 %v874_v18, %v442_v17 }
  0xb0   : > { %v452_v19 = vpop.f32.mrf.mxu2  ;;  %v462_v20 = vpop.f32.mrf.mxu3 }
  0xb1   : > { %v434_v21 = vpop.f32.mrf.mxu0  ;;  %v444_v22 = vpop.f32.mrf.mxu1  ;;  %v535_v31 = vadd.f32 %v874_v18, %v452_v19  ;;  %v539_v32 = vadd.f32 %v874_v18, %v462_v20 }
  0xb2   : > { %v528_v25 = vadd.f32 %v874_v18, %v434_v21  ;;  %v532_v26 = vadd.f32 %v874_v18, %v444_v22 }
  0xb4   : > { %v782_v27 = vpack.c.bf16 %v528_v25, %v527_v23  ;;  %v792_v28 = vpack.c.bf16 %v532_v26, %v531_v24 }
  0xb6   : > { %783 = vst [vmem:[%s980_s17] sm:$0xff] %v782_v27  }
  0xb7   : > { %820 = vst [vmem:[%s980_s17 + $0x10] sm:$0xff] %v792_v28  }
  0xb8   : > { %v454_v29 = vpop.f32.mrf.mxu2  ;;  %v464_v30 = vpop.f32.mrf.mxu3 }
  0xb9   : > { %v536_v33 = vadd.f32 %v874_v18, %v454_v29  ;;  %v540_v34 = vadd.f32 %v874_v18, %v464_v30  ;;  %v437_v35 = vpop.f32.mrf.mxu0  ;;  %v447_v36 = vpop.f32.mrf.mxu1 }
  0xba   : > { %v529_v43 = vadd.f32 %v874_v18, %v437_v35  ;;  %v533_v44 = vadd.f32 %v874_v18, %v447_v36 }
  0xbb   : > { %v802_v37 = vpack.c.bf16 %v536_v33, %v535_v31  ;;  %v812_v38 = vpack.c.bf16 %v540_v34, %v539_v32 }
  0xbd   : > { %822 = vst [vmem:[%s980_s17 + $0x20] sm:$0xff] %v802_v37  }
  0xbe   : > { %824 = vst [vmem:[%s980_s17 + $0x30] sm:$0xff] %v812_v38  }
  0xc0   : > { %v457_v39 = vpop.f32.mrf.mxu2  ;;  %v467_v40 = vpop.f32.mrf.mxu3 }
  0xc1   : > { %v439_v41 = vpop.f32.mrf.mxu0  ;;  %v449_v42 = vpop.f32.mrf.mxu1  ;;  %v537_v51 = vadd.f32 %v874_v18, %v457_v39  ;;  %v541_v52 = vadd.f32 %v874_v18, %v467_v40 }
  0xc2   : > { %v530_v45 = vadd.f32 %v874_v18, %v439_v41  ;;  %v534_v46 = vadd.f32 %v874_v18, %v449_v42 }
  0xc4   : > { %v787_v47 = vpack.c.bf16 %v530_v45, %v529_v43  ;;  %v797_v48 = vpack.c.bf16 %v534_v46, %v533_v44 }
  0xc6   : > { %819 = vst [vmem:[%s980_s17 + $0x8] sm:$0xff] %v787_v47  }
  0xc7   : > { %821 = vst [vmem:[%s980_s17 + $0x18] sm:$0xff] %v797_v48  }
  0xc8   : > { %v459_v49 = vpop.f32.mrf.mxu2  ;;  %v469_v50 = vpop.f32.mrf.mxu3 }
  0xc9   : > { %v538_v53 = vadd.f32 %v874_v18, %v459_v49  ;;  %v542_v54 = vadd.f32 %v874_v18, %v469_v50 }
  0xcb   : > { %v807_v55 = vpack.c.bf16 %v538_v53, %v537_v51  ;;  %v817_v56 = vpack.c.bf16 %v542_v54, %v541_v52 }
  0xcd   : > { %823 = vst [vmem:[%s980_s17 + $0x28] sm:$0xff] %v807_v55  }
  0xce   : > { %825 = vst [vmem:[%s980_s17 + $0x38] sm:$0xff] %v817_v56  }
  0xcf PF: > { %s13_s14 = sadd.s32 1, %s897_s14   ;;  %s1003_s12 = smov %s893_s13 }
  0xd0   : > { %p10_p5 = scmp.ge.s32.totalorder %s13_s14, 4   ;;  %s1004_s13 = smov %s1006_s15 }
  0xd2   :  { %12 = sbr.rel (!%p10_p5) target bundleno = 2 (0x2), region = 76 }

// kernel: efficientnetv2_forward.20
= control target key start
LH: loop header
LB: loop body
LE: loop exit
PB: predicated region body
PF: predicated region fallthrough
CT: control target
= control target key end

     0   :  { %s1714_s12 = smov 0   ;;  %s1716_s13 = smov 0   ;;  %s2081_s0 = inlined_call_operand.vmem [shape: bf16[256,1152], index: 0, kind: input, shape index: {}]   ;;  %s2082_s1 = inlined_call_operand.vmem [shape: bf16[1152,128], index: 1, kind: input, shape index: {}]   ;;  %s2083_s2 = inlined_call_operand.vmem [shape: f32[1,128], index: 2, kind: input, shape index: {}]   ;;  %s2084_s3 = inlined_call_operand.vmem [shape: bf16[256,128], index: 3, kind: output, shape index: {}]  }
   0x1   :  { %s1718_s14 = smov 0   ;;  %s1720_s15 = smov 0  }
   0x2   :  { %s1722_s16 = smov 0   ;;  %s1724_s17 = smov 0  }
   0x3   :  { %s1726_s18 = smov 0  }
   0x4 LB: > { %s25_s19 = sadd.s32 1, %s1683_s16  ;;  %s32_s20 = sadd.s32 1, %s1687_s17  ;;  %s1691_s18 = sphi %s1726_s18, %s13_s18   ;;  %s1687_s17 = sphi %s1724_s17, %s2090_s17   ;;  %s1683_s16 = sphi %s1722_s16, %s2089_s16   ;;  %s1679_s15 = sphi %s1720_s15, %s2088_s15   ;;  %s1675_s14 = sphi %s1718_s14, %s2087_s14   ;;  %s1671_s13 = sphi %s1716_s13, %s2086_s13   ;;  %s1667_s12 = sphi %s1714_s12, %s2085_s12  }
   0x5   : > { %p26_p0 = scmp.ge.s32.totalorder %s25_s19, 3  ;;  %p48_p1 = scmp.ne.s32.totalorder %s1671_s13, %s1667_s12 }
   0x6   : > { %p49_p2 = scmp.eq.s32.totalorder %s1691_s18, 0  ;;  %s41_s24 = sadd.s32 1, %s1671_s13 }
   0x7   : > { %s2092_s19 = smov (%p26_p0, %s25_s19), 0  ;;  %s2094_s20 = smov (!%p26_p0, %s32_s20), %s1687_s17 }
   0x8   : > { %p50_p3 = por %p49_p2, %p48_p1  ;;  %p34_p4 = scmp.ge.s32.totalorder %s2094_s20, 2 }
   0x9   : > { %s37_s21 = ssub.s32 %s1683_s16, %s2092_s19  ;;  %p1189_p6 = scmp.ge.s32.totalorder %s1691_s18, 6 }
   0xa   : > { %s2096_s20 = smov (%p34_p4, %s2094_s20), 0 }
   0xb   : > { %s36_s22 = ssub.s32 %s1687_s17, %s2096_s20  ;;  %162 = sbr.rel (%p1189_p6) target bundleno = 57 (0x39), region = 20 }
   0xc   : > { %s38_s23 = sor.u32 %s37_s21, %s36_s22 }
   0xd   : > { %p39_p5 = scmp.eq.s32.totalorder %s38_s23, 0 }
   0xf   : > { %s1765_s25 = scalar_select %p39_p5, %s1671_s13, %s41_s24  }
  0x10   : > { %165 = sbr.rel (!%p50_p3) target bundleno = 57 (0x39), region = 24  ;;  %s167_s26 = sand.u32 (%p50_p3), 1, %s1671_s13  }
  0x11   : > { %s171_s27 = smul.u32 (%p50_p3), 3, %s1683_s16 }
  0x12   : > { %s1544_s28 = smul.u32 (%p50_p3), 192, %s167_s26 }
  0x13   : > { %s1545_s29 = smul.u32 (%p50_p3), 144, %s1687_s17 }
  0x14   : > { %s1779_s8 = scalar_lea.vmem (%p50_p3), [#allocation3], %s1544_s28 }
  0x15   : > { %s173_s30 = sadd.s32 %s1545_s29, %s171_s27 }
  0x16   : > { %s1192_s4 = sshll.u32 %s173_s30, 2 }
  0x17   : > { %s1774_s7 = scalar_lea.vmem %s2081_s0, %s1192_s4 }
  0x18   : > { %v190_v0 = vld [vmem:[%s1774_s7] sm:$0xff]  ;;  %v194_v2 = vld [vmem:[%s1774_s7 + $0x48] sm:$0xff]  ;;  %v198_v4 = vld [vmem:[%s1774_s7 + $0x90] sm:$0xff] }
  0x19   : > { %v192_v1 = vld [vmem:[%s1774_s7 + $0x24] sm:$0xff]  ;;  %191 = vst [vmem:[%s1779_s8] sm:$0xff] %v190_v0  ;;  %v196_v3 = vld [vmem:[%s1774_s7 + $0x6c] sm:$0xff]  ;;  %v200_v5 = vld [vmem:[%s1774_s7 + $0xb4] sm:$0xff] }
  0x1a   : > { %193 = vst [vmem:[%s1779_s8 + $0xc] sm:$0xff] %v192_v1  ;;  %v202_v6 = vld [vmem:[%s1774_s7 + $0xd8] sm:$0xff]  ;;  %v206_v8 = vld [vmem:[%s1774_s7 + $0x120] sm:$0xff]  ;;  %v210_v10 = vld [vmem:[%s1774_s7 + $0x168] sm:$0xff] }
  0x1b   : > { %195 = vst [vmem:[%s1779_s8 + $0x18] sm:$0xff] %v194_v2  ;;  %v204_v7 = vld [vmem:[%s1774_s7 + $0xfc] sm:$0xff]  ;;  %v208_v9 = vld [vmem:[%s1774_s7 + $0x144] sm:$0xff]  ;;  %v212_v11 = vld [vmem:[%s1774_s7 + $0x18c] sm:$0xff] }
  0x1c   : > { %197 = vst [vmem:[%s1779_s8 + $0x24] sm:$0xff] %v196_v3  ;;  %v214_v12 = vld [vmem:[%s1774_s7 + $0x1b0] sm:$0xff]  ;;  %v218_v14 = vld [vmem:[%s1774_s7 + $0x1f8] sm:$0xff]  ;;  %v1193_v16 = vld [vmem:[%s1774_s7 + $0x8] sm:$0xf] }
  0x1d   : > { %199 = vst [vmem:[%s1779_s8 + $0x30] sm:$0xff] %v198_v4  ;;  %v216_v13 = vld [vmem:[%s1774_s7 + $0x1d4] sm:$0xff]  ;;  %v220_v15 = vld [vmem:[%s1774_s7 + $0x21c] sm:$0xff]  ;;  %v1195_v17 = vld [vmem:[%s1774_s7 + $0x2c] sm:$0xf] }
  0x1e   : > { %201 = vst [vmem:[%s1779_s8 + $0x3c] sm:$0xff] %v200_v5  ;;  %v1197_v18 = vld [vmem:[%s1774_s7 + $0x50] sm:$0xf]  ;;  %v1199_v19 = vld [vmem:[%s1774_s7 + $0x74] sm:$0xf] }
  0x1f   : > { %203 = vst [vmem:[%s1779_s8 + $0x48] sm:$0xff] %v202_v6  ;;  %v1201_v20 = vld [vmem:[%s1774_s7 + $0x98] sm:$0xf]  ;;  %v1203_v21 = vld [vmem:[%s1774_s7 + $0xbc] sm:$0xf] }
  0x20   : > { %205 = vst [vmem:[%s1779_s8 + $0x54] sm:$0xff] %v204_v7  ;;  %v1205_v22 = vld [vmem:[%s1774_s7 + $0xe0] sm:$0xf]  ;;  %v1207_v23 = vld [vmem:[%s1774_s7 + $0x104] sm:$0xf] }
  0x21   : > { %207 = vst [vmem:[%s1779_s8 + $0x60] sm:$0xff] %v206_v8  ;;  %v1209_v24 = vld [vmem:[%s1774_s7 + $0x128] sm:$0xf]  ;;  %v1211_v25 = vld [vmem:[%s1774_s7 + $0x14c] sm:$0xf] }
  0x22   : > { %209 = vst [vmem:[%s1779_s8 + $0x6c] sm:$0xff] %v208_v9  ;;  %v1213_v26 = vld [vmem:[%s1774_s7 + $0x170] sm:$0xf]  ;;  %v1215_v27 = vld [vmem:[%s1774_s7 + $0x194] sm:$0xf] }
  0x23   : > { %211 = vst [vmem:[%s1779_s8 + $0x78] sm:$0xff] %v210_v10  ;;  %v1217_v28 = vld [vmem:[%s1774_s7 + $0x1b8] sm:$0xf]  ;;  %v1219_v29 = vld [vmem:[%s1774_s7 + $0x1dc] sm:$0xf] }
  0x24   : > { %213 = vst [vmem:[%s1779_s8 + $0x84] sm:$0xff] %v212_v11  ;;  %v1221_v30 = vld [vmem:[%s1774_s7 + $0x200] sm:$0xf]  ;;  %v1223_v31 = vld [vmem:[%s1774_s7 + $0x224] sm:$0xf] }
  0x25   : > { %215 = vst [vmem:[%s1779_s8 + $0x90] sm:$0xff] %v214_v12 }
  0x26   : > { %217 = vst [vmem:[%s1779_s8 + $0x9c] sm:$0xff] %v216_v13 }
  0x27   : > { %219 = vst [vmem:[%s1779_s8 + $0xa8] sm:$0xff] %v218_v14 }
  0x28   : > { %221 = vst [vmem:[%s1779_s8 + $0xb4] sm:$0xff] %v220_v15 }
  0x29   : > { %1194 = vst [vmem:[%s1779_s8 + $0x8] sm:$0xf] %v1193_v16 }
  0x2a   : > { %1196 = vst [vmem:[%s1779_s8 + $0x14] sm:$0xf] %v1195_v17 }
  0x2b   : > { %1198 = vst [vmem:[%s1779_s8 + $0x20] sm:$0xf] %v1197_v18 }
  0x2c   : > { %1200 = vst [vmem:[%s1779_s8 + $0x2c] sm:$0xf] %v1199_v19 }
  0x2d   : > { %1202 = vst [vmem:[%s1779_s8 + $0x38] sm:$0xf] %v1201_v20 }
  0x2e   : > { %1204 = vst [vmem:[%s1779_s8 + $0x44] sm:$0xf] %v1203_v21 }
  0x2f   : > { %1206 = vst [vmem:[%s1779_s8 + $0x50] sm:$0xf] %v1205_v22 }
  0x30   : > { %1208 = vst [vmem:[%s1779_s8 + $0x5c] sm:$0xf] %v1207_v23 }
  0x31   : > { %1210 = vst [vmem:[%s1779_s8 + $0x68] sm:$0xf] %v1209_v24 }
  0x32   : > { %1212 = vst [vmem:[%s1779_s8 + $0x74] sm:$0xf] %v1211_v25 }
  0x33   : > { %1214 = vst [vmem:[%s1779_s8 + $0x80] sm:$0xf] %v1213_v26 }
  0x34   : > { %1216 = vst [vmem:[%s1779_s8 + $0x8c] sm:$0xf] %v1215_v27 }
  0x35   : > { %1218 = vst [vmem:[%s1779_s8 + $0x98] sm:$0xf] %v1217_v28 }
  0x36   : > { %1220 = vst [vmem:[%s1779_s8 + $0xa4] sm:$0xf] %v1219_v29 }
  0x37   : > { %1222 = vst [vmem:[%s1779_s8 + $0xb0] sm:$0xf] %v1221_v30 }
  0x38   : > { %1224 = vst [vmem:[%s1779_s8 + $0xbc] sm:$0xf] %v1223_v31 }
  0x39 PF: > { %p1225_p7 = scmp.ge.s32.totalorder %s1691_s18, 1  ;;  %p278_p8 = scmp.lt.s32.totalorder %s1691_s18, 7 }
  0x3b   : > { %p279_p9 = pnand %p1225_p7, %p278_p8 }
  0x3c   : > { %s285_s9 = sand.u32 (!%p279_p9), 1, %s1667_s12   ;;  %s324_s10 = smul.u32 (!%p279_p9), 48, %s1675_s14 }
  0x3d   : > { %282 = sbr.rel (%p279_p9) target bundleno = 389 (0x185), region = 54  ;;  %s1227_s21 = sshll.u32 (!%p279_p9), %s1679_s15, 4 }
  0x3e   : > { %s1546_s11 = smul.u32 (!%p279_p9), 192, %s285_s9  ;;  %p325_p10 = scmp.lt.s32.totalorder (!%p279_p9), %s324_s10, 143 }
  0x3f   : > { %p337_p11 = scmp.lt.s32.totalorder (!%p279_p9), %s1227_s21, 31  ;;  %p1229_p12 = scmp.ne.s32.totalorder (!%p279_p9), %s1675_s14, 0 }
  0x40   : > { %s1857_s12 = scalar_lea.vmem (!%p279_p9), [#allocation3], %s1546_s11 }
  0x42   : > { %s2098_s10 = smov (!%p325_p10, %s324_s10), 143  ;;  %s2100_s21 = smov (!%p337_p11, %s1227_s21), 31 }
  0x43   : > { %s1226_s22 = sshll.u32 %s2098_s10, 2  ;;  %s1228_s27 = sshll.u32 %s2100_s21, 2 }
  0x44   : > { %s1850_s26 = scalar_lea.vmem %s2082_s1, %s1226_s22  ;;  %s1855_s30 = scalar_lea.vmem %s2084_s3, %s1228_s27 }
  0x45   : > { %348 = sbr.rel (%p1229_p12) target bundleno = 91 (0x5b), region = 62 }
  0x4a   : > { %v1693_v32 = vmov 0.0  }
  0x4b   : > { %349 = vst [vmem:[#allocation2 + $0x30] sm:$0xff] %v1693_v32 }
  0x4c   : > { %350 = vst [vmem:[#allocation2] sm:$0xff] %v1693_v32 }
  0x4d   : > { %351 = vst [vmem:[#allocation2 + $0x58] sm:$0xff] %v1693_v32 }
  0x4e   : > { %352 = vst [vmem:[#allocation2 + $0x18] sm:$0xff] %v1693_v32 }
  0x4f   : > { %353 = vst [vmem:[#allocation2 + $0x50] sm:$0xff] %v1693_v32 }
  0x50   : > { %354 = vst [vmem:[#allocation2 + $0x68] sm:$0xff] %v1693_v32 }
  0x51   : > { %355 = vst [vmem:[#allocation2 + $0x8] sm:$0xff] %v1693_v32 }
  0x52   : > { %356 = vst [vmem:[#allocation2 + $0x48] sm:$0xff] %v1693_v32 }
  0x53   : > { %357 = vst [vmem:[#allocation2 + $0x40] sm:$0xff] %v1693_v32 }
  0x54   : > { %358 = vst [vmem:[#allocation2 + $0x20] sm:$0xff] %v1693_v32 }
  0x55   : > { %359 = vst [vmem:[#allocation2 + $0x10] sm:$0xff] %v1693_v32 }
  0x56   : > { %360 = vst [vmem:[#allocation2 + $0x38] sm:$0xff] %v1693_v32 }
  0x57   : > { %361 = vst [vmem:[#allocation2 + $0x60] sm:$0xff] %v1693_v32 }
  0x58   : > { %362 = vst [vmem:[#allocation2 + $0x70] sm:$0xff] %v1693_v32 }
  0x59   : > { %363 = vst [vmem:[#allocation2 + $0x78] sm:$0xff] %v1693_v32 }
  0x5a   : > { %364 = vst [vmem:[#allocation2 + $0x28] sm:$0xff] %v1693_v32 }
  0x5b PF: > { %v1456_v33 = vld [vmem:[%s1850_s26 + $0x38] sm:$0xff]  ;;  %v1455_v36 = vld [vmem:[%s1850_s26 + $0x30] sm:$0xff]  ;;  %v1454_v39 = vld [vmem:[%s1850_s26 + $0x28] sm:$0xff]  ;;  %p1422_p13 = scmp.ne.s32.totalorder %s1675_s14, 2 }
  0x5c   : > { %v1862_v34 = vld [vmem:[%s1850_s26 + $0x78] sm:$0xff]  ;;  %733 = vmatpush.bf16.msra.mxu0 %v1456_v33  ;;  %1520 = vmatpush.bf16.msra.mxu3 %v1456_v33  ;;  %v1871_v37 = vld [vmem:[%s1850_s26 + $0x70] sm:$0xff]  ;;  %v1462_v40 = vld [vmem:[%s1850_s26 + $0x68] sm:$0xff] }
  0x5d   : > { %v1865_v35 = vld [vmem:[%s1850_s26 + $0xb8] sm:$0xff]  ;;  %782 = vmatpush.bf16.msra.mxu1 %v1862_v34  ;;  %v1874_v38 = vld [vmem:[%s1850_s26 + $0xb0] sm:$0xff]  ;;  %v1881_v41 = vld [vmem:[%s1850_s26 + $0xa8] sm:$0xff] }
  0x5e   : > { %831 = vmatpush.bf16.msra.mxu2 %v1865_v35  ;;  %v1453_v42 = vld [vmem:[%s1850_s26 + $0x20] sm:$0xff]  ;;  %v1452_v45 = vld [vmem:[%s1850_s26 + $0x18] sm:$0xff]  ;;  %v1451_v48 = vld [vmem:[%s1850_s26 + $0x10] sm:$0xff] }
  0x5f   : > { %v1461_v43 = vld [vmem:[%s1850_s26 + $0x60] sm:$0xff]  ;;  %v1460_v46 = vld [vmem:[%s1850_s26 + $0x58] sm:$0xff]  ;;  %v1459_v49 = vld [vmem:[%s1850_s26 + $0x50] sm:$0xff] }
  0x60   : > { %734 = vmatpush.bf16.msra.mxu0 %v1455_v36  ;;  %1521 = vmatpush.bf16.msra.mxu3 %v1455_v36  ;;  %v1887_v44 = vld [vmem:[%s1850_s26 + $0xa0] sm:$0xff]  ;;  %v1893_v47 = vld [vmem:[%s1850_s26 + $0x98] sm:$0xff]  ;;  %v1899_v50 = vld [vmem:[%s1850_s26 + $0x90] sm:$0xff] }
  0x61   : > { %783 = vmatpush.bf16.msra.mxu1 %v1871_v37  ;;  %v1450_v51 = vld [vmem:[%s1850_s26 + $0x8] sm:$0xff]  ;;  %v1449_v54 = vld [vmem:[%s1850_s26] sm:$0xff]  ;;  %v1304_v59 = vld [vmem:[%s1857_s12 + $0x90] sm:$0xf] }
  0x62   : > { %832 = vmatpush.bf16.msra.mxu2 %v1874_v38  ;;  %v1458_v52 = vld [vmem:[%s1850_s26 + $0x48] sm:$0xff]  ;;  %v1457_v55 = vld [vmem:[%s1850_s26 + $0x40] sm:$0xff]  ;;  %v1444_v60 = vld [vmem:[%s1857_s12 + $0x98] sm:$0xf0] }
  0x63   : > { %v1905_v53 = vld [vmem:[%s1850_s26 + $0x88] sm:$0xff]  ;;  %v1910_v56 = vld [vmem:[%s1850_s26 + $0x80] sm:$0xff]  ;;  %v1234_v62 = vld [vmem:[%s1857_s12 + $0xc] sm:$0xf0]  ;;  %v1305_v2 = vor.u32 %v1444_v60, %v1304_v59 }
  0x64   : > { %735 = vmatpush.bf16.msra.mxu0 %v1454_v39  ;;  %1522 = vmatpush.bf16.msra.mxu3 %v1454_v39  ;;  %v1232_v57 = vld [vmem:[%s1857_s12] sm:$0xf]  ;;  %v1426_v58 = vld [vmem:[%s1857_s12 + $0x8] sm:$0xf0]  ;;  %v1425_v61 = vld [vmem:[%s1857_s12 + $0x4] sm:$0xf] }
  0x65   : > { %784 = vmatpush.bf16.msra.mxu1 %v1462_v40  ;;  %v1240_v63 = vld [vmem:[%s1857_s12 + $0x8] sm:$0xf]  ;;  %v1427_v0 = vld [vmem:[%s1857_s12 + $0x10] sm:$0xf0]  ;;  %v1233_v1 = vor.u32 %v1426_v58, %v1232_v57  ;;  %v1237_v3 = vor.u32 %v1425_v61, %v1234_v62  ;;  %v1244_v5 = vld [vmem:[%s1857_s12 + $0x18] sm:$0xf] }
  0x66   : > { %833 = vmatpush.bf16.msra.mxu2 %v1881_v41  ;;  %v1241_v4 = vor.u32 %v1427_v0, %v1240_v63  ;;  %v1429_v6 = vld [vmem:[%s1857_s12 + $0x20] sm:$0xf0]  ;;  %v1316_v7 = vld [vmem:[%s1857_s12 + $0xa8] sm:$0xf]  ;;  %v1447_v8 = vld [vmem:[%s1857_s12 + $0xb0] sm:$0xf0] }
  0x67   : > { %v1428_v9 = vld [vmem:[%s1857_s12 + $0x1c] sm:$0xf]  ;;  %v1246_v10 = vld [vmem:[%s1857_s12 + $0x24] sm:$0xf0]  ;;  %v1252_v11 = vld [vmem:[%s1857_s12 + $0x20] sm:$0xf]  ;;  %v1245_v13 = vor.u32 %v1429_v6, %v1244_v5  ;;  %v1317_v14 = vor.u32 %v1447_v8, %v1316_v7 }
  0x68   : > { %736 = vmatpush.bf16.msra.mxu0 %v1453_v42  ;;  %1523 = vmatpush.bf16.msra.mxu3 %v1453_v42  ;;  %v1430_v12 = vld [vmem:[%s1857_s12 + $0x28] sm:$0xf0]  ;;  %v1249_v15 = vor.u32 %v1428_v9, %v1246_v10  ;;  %v1256_v17 = vld [vmem:[%s1857_s12 + $0x30] sm:$0xf]  ;;  %v1432_v18 = vld [vmem:[%s1857_s12 + $0x38] sm:$0xf0] }
  0x69   : > { %785 = vmatpush.bf16.msra.mxu1 %v1461_v43  ;;  %v1253_v16 = vor.u32 %v1430_v12, %v1252_v11  ;;  %v1431_v19 = vld [vmem:[%s1857_s12 + $0x34] sm:$0xf]  ;;  %v1306_v21 = vld [vmem:[%s1857_s12 + $0x9c] sm:$0xf0]  ;;  %v1264_v23 = vld [vmem:[%s1857_s12 + $0x38] sm:$0xf]  ;;  %v1257_v25 = vor.u32 %v1432_v18, %v1256_v17 }
  0x6a   : > { %834 = vmatpush.bf16.msra.mxu2 %v1887_v44  ;;  %v1443_v20 = vld [vmem:[%s1857_s12 + $0x94] sm:$0xf]  ;;  %v1258_v22 = vld [vmem:[%s1857_s12 + $0x3c] sm:$0xf0]  ;;  %v1433_v24 = vld [vmem:[%s1857_s12 + $0x40] sm:$0xf0] }
  0x6b   : > { %v1309_v26 = vor.u32 %v1443_v20, %v1306_v21  ;;  %v1261_v27 = vor.u32 %v1431_v19, %v1258_v22  ;;  %v1265_v28 = vor.u32 %v1433_v24, %v1264_v23  ;;  %v1268_v29 = vld [vmem:[%s1857_s12 + $0x48] sm:$0xf]  ;;  %v1435_v30 = vld [vmem:[%s1857_s12 + $0x50] sm:$0xf0]  ;;  %v1434_v31 = vld [vmem:[%s1857_s12 + $0x4c] sm:$0xf] }
  0x6c   : > { %737 = vmatpush.bf16.msra.mxu0 %v1452_v45  ;;  %1524 = vmatpush.bf16.msra.mxu3 %v1452_v45  ;;  %v1446_v32 = vld [vmem:[%s1857_s12 + $0xac] sm:$0xf]  ;;  %v1318_v33 = vld [vmem:[%s1857_s12 + $0xb4] sm:$0xf0]  ;;  %v1436_v36 = vld [vmem:[%s1857_s12 + $0x58] sm:$0xf0] }
  0x6d   : > { %786 = vmatpush.bf16.msra.mxu1 %v1460_v46  ;;  %v1321_v39 = vor.u32 %v1446_v32, %v1318_v33  ;;  %v1438_v42 = vld [vmem:[%s1857_s12 + $0x68] sm:$0xf0]  ;;  %v1445_v45 = vld [vmem:[%s1857_s12 + $0xa0] sm:$0xf0]  ;;  %v1324_v57 = vld [vmem:[%s1857_s12 + $0xb0] sm:$0xf] }
  0x6e   : > { %835 = vmatpush.bf16.msra.mxu2 %v1893_v47  ;;  %v1294_v58 = vld [vmem:[%s1857_s12 + $0x84] sm:$0xf0]  ;;  %v1300_v59 = vld [vmem:[%s1857_s12 + $0x80] sm:$0xf]  ;;  %v1442_v60 = vld [vmem:[%s1857_s12 + $0x88] sm:$0xf0] }
  0x6f   : > { %v1301_v0 = vor.u32 %v1442_v60, %v1300_v59  ;;  %v365_v5 = vld [vmem:[#allocation2 + $0x30] sm:$0xff]  ;;  %v367_v21 = vld [vmem:[#allocation2 + $0x58] sm:$0xff] }
  0x70   : > { %738 = vmatpush.bf16.msra.mxu0 %v1451_v48  ;;  %1525 = vmatpush.bf16.msra.mxu3 %v1451_v48  ;;  %v1439_v48 = vld [vmem:[%s1857_s12 + $0x70] sm:$0xf0] }
  0x71   : > { %787 = vmatpush.bf16.msra.mxu1 %v1459_v49 }
  0x72   : > { %836 = vmatpush.bf16.msra.mxu2 %v1899_v50 }
  0x74   : > { %739 = vmatpush.bf16.msra.mxu0 %v1450_v51  ;;  %1526 = vmatpush.bf16.msra.mxu3 %v1450_v51 }
  0x75   : > { %788 = vmatpush.bf16.msra.mxu1 %v1458_v52 }
  0x76   : > { %837 = vmatpush.bf16.msra.mxu2 %v1905_v53 }
  0x78   : > { %740 = vmatpush.bf16.msra.mxu0 %v1449_v54  ;;  %1527 = vmatpush.bf16.msra.mxu3 %v1449_v54  ;;  %v1441_v54 = vld [vmem:[%s1857_s12 + $0x80] sm:$0xf0] }
  0x79   : > { %789 = vmatpush.bf16.msra.mxu1 %v1457_v55 }
  0x7a   : > { %838 = vmatpush.bf16.msra.mxu2 %v1910_v56 }
  0x7b   : > { %741 = vmatmul.bf16.vlgmr.msra.gmra.mxu0 %v1233_v1  ;;  %771 = vmatmul.bf16.vlgmr.msra.gmra.mxu3 %v1305_v2 }
  0x7c   : > { %1528 = vmatpush.bf16.msrb.mxu3 %v1862_v34  ;;  %790 = vmatmul.bf16.vlgmr.msra.gmra.mxu1 %v1237_v3  ;;  %v1270_v34 = vld [vmem:[%s1857_s12 + $0x54] sm:$0xf0] }
  0x7d   : > { %839 = vmatmul.bf16.vlgmr.msra.gmra.mxu2 %v1241_v4 }
  0x80   : > { %1529 = vmatpush.bf16.msrb.mxu3 %v1871_v37  ;;  %v1269_v37 = vor.u32 %v1435_v30, %v1268_v29  ;;  %v368_v29 = vld [vmem:[#allocation2 + $0x18] sm:$0xff] }
  0x84   : > { %1530 = vmatpush.bf16.msrb.mxu3 %v1462_v40 }
  0x88   : > { %1531 = vmatpush.bf16.msrb.mxu3 %v1461_v43  ;;  %v1437_v43 = vld [vmem:[%s1857_s12 + $0x64] sm:$0xf] }
  0x8b   : > { %746 = vmatmul.bf16.gmra.mxu0 %v1245_v13  ;;  %776 = vmatmul.bf16.gmra.mxu3 %v1317_v14  ;;  %v366_v13 = vld [vmem:[#allocation2] sm:$0xff] }
  0x8c   : > { %1532 = vmatpush.bf16.msrb.mxu3 %v1460_v46  ;;  %795 = vmatmul.bf16.gmra.mxu1 %v1249_v15  ;;  %v1282_v46 = vld [vmem:[%s1857_s12 + $0x6c] sm:$0xf0] }
  0x8d   : > { %844 = vmatmul.bf16.gmra.mxu2 %v1253_v16  ;;  %v1285_v51 = vor.u32 %v1437_v43, %v1282_v46 }
  0x90   : > { %1533 = vmatpush.bf16.msrb.mxu3 %v1459_v49 }
  0x94   : > { %1534 = vmatpush.bf16.msrb.mxu3 %v1458_v52 }
  0x98   : > { %1535 = vmatpush.bf16.msrb.mxu3 %v1457_v55  ;;  %v1440_v55 = vld [vmem:[%s1857_s12 + $0x7c] sm:$0xf] }
  0x99   : > { %v1297_v63 = vor.u32 %v1440_v55, %v1294_v58 }
  0x9b   : > { %751 = vmatmul.bf16.gmra.mxu0 %v1257_v25  ;;  %820 = vmatmul.bf16.vlgmr.msrb.gmra.mxu3 %v1309_v26 }
  0x9c   : > { %1536 = vmatpush.bf16.msra.mxu3 %v1865_v35  ;;  %800 = vmatmul.bf16.gmra.mxu1 %v1261_v27  ;;  %v1276_v35 = vld [vmem:[%s1857_s12 + $0x50] sm:$0xf] }
  0x9d   : > { %849 = vmatmul.bf16.gmra.mxu2 %v1265_v28  ;;  %v1277_v40 = vor.u32 %v1436_v36, %v1276_v35 }
  0xa0   : > { %1537 = vmatpush.bf16.msra.mxu3 %v1874_v38  ;;  %v1273_v38 = vor.u32 %v1434_v31, %v1270_v34 }
  0xa4   : > { %1538 = vmatpush.bf16.msra.mxu3 %v1881_v41  ;;  %v1280_v41 = vld [vmem:[%s1857_s12 + $0x60] sm:$0xf] }
  0xa5   : > { %v1281_v49 = vor.u32 %v1438_v42, %v1280_v41 }
  0xa8   : > { %1539 = vmatpush.bf16.msra.mxu3 %v1887_v44  ;;  %v1312_v44 = vld [vmem:[%s1857_s12 + $0x98] sm:$0xf] }
  0xab   : > { %756 = vmatmul.bf16.gmra.mxu0 %v1269_v37  ;;  %825 = vmatmul.bf16.gmra.mxu3 %v1321_v39  ;;  %v369_v37 = vld [vmem:[#allocation2 + $0x50] sm:$0xff] }
  0xac   : > { %1540 = vmatpush.bf16.msra.mxu3 %v1893_v47  ;;  %805 = vmatmul.bf16.gmra.mxu1 %v1273_v38  ;;  %v1288_v47 = vld [vmem:[%s1857_s12 + $0x68] sm:$0xf] }
  0xad   : > { %854 = vmatmul.bf16.gmra.mxu2 %v1277_v40  ;;  %v1289_v52 = vor.u32 %v1439_v48, %v1288_v47 }
  0xb0   : > { %1541 = vmatpush.bf16.msra.mxu3 %v1899_v50  ;;  %v1313_v50 = vor.u32 %v1445_v45, %v1312_v44  ;;  %v370_v45 = vld [vmem:[#allocation2 + $0x68] sm:$0xff] }
  0xb4   : > { %1542 = vmatpush.bf16.msra.mxu3 %v1905_v53  ;;  %v1292_v53 = vld [vmem:[%s1857_s12 + $0x78] sm:$0xf] }
  0xb5   : > { %v1293_v61 = vor.u32 %v1441_v54, %v1292_v53  ;;  %v371_v53 = vld [vmem:[#allocation2 + $0x8] sm:$0xff] }
  0xb8   : > { %1543 = vmatpush.bf16.msra.mxu3 %v1910_v56  ;;  %v1448_v56 = vld [vmem:[%s1857_s12 + $0xb8] sm:$0xf0] }
  0xb9   : > { %v1325_v62 = vor.u32 %v1448_v56, %v1324_v57 }
  0xbb   : > { %761 = vmatmul.bf16.gmra.mxu0 %v1281_v49  ;;  %869 = vmatmul.bf16.vlgmr.msra.gmra.mxu3 %v1313_v50 }
  0xbc   : > { %810 = vmatmul.bf16.gmra.mxu1 %v1285_v51 }
  0xbd   : > { %859 = vmatmul.bf16.gmra.mxu2 %v1289_v52 }
  0xcb   : > { %766 = vmatmul.bf16.gmra.mxu0 %v1293_v61  ;;  %874 = vmatmul.bf16.gmra.mxu3 %v1325_v62  ;;  %v372_v61 = vld [vmem:[#allocation2 + $0x48] sm:$0xff] }
  0xcc   : > { %815 = vmatmul.bf16.gmra.mxu1 %v1297_v63 }
  0xcd   : > { %864 = vmatmul.bf16.gmra.mxu2 %v1301_v0 }
  0xf8   : > { %v742_v1 = vpop.f32.mrf.mxu0 }
  0xf9   : > { %v791_v2 = vpop.f32.mrf.mxu1 }
  0xfa   : > { %v792_v3 = vadd.f32 %v791_v2, %v742_v1 }
  0xfe   : > { %v1972_v4 = vpop.f32.mrf.mxu3 }
 0x100   : > { %v840_v6 = vpop.f32.mrf.mxu2  ;;  %v744_v8 = vpop.f32.mrf.mxu0 }
 0x101   : > { %v841_v7 = vadd.f32 %v840_v6, %v792_v3  ;;  %v793_v9 = vpop.f32.mrf.mxu1  ;;  %v377_v6 = vld [vmem:[#allocation2 + $0x60] sm:$0xff] }
 0x102   : > { %v794_v11 = vadd.f32 %v793_v9, %v744_v8  ;;  %v373_v8 = vld [vmem:[#allocation2 + $0x40] sm:$0xff] }
 0x103   : > { %v880_v10 = vadd.f32 %v841_v7, %v365_v5 }
 0x105   : > { %896 = vst [vmem:[#allocation2 + $0x30] sm:$0xff] %v880_v10 }
 0x106   : > { %v1974_v12 = vpop.f32.mrf.mxu3 }
 0x108   : > { %v842_v14 = vpop.f32.mrf.mxu2  ;;  %v747_v16 = vpop.f32.mrf.mxu0 }
 0x109   : > { %v843_v15 = vadd.f32 %v842_v14, %v794_v11  ;;  %v796_v17 = vpop.f32.mrf.mxu1 }
 0x10a   : > { %v797_v19 = vadd.f32 %v796_v17, %v747_v16 }
 0x10b   : > { %v881_v18 = vadd.f32 %v843_v15, %v366_v13 }
 0x10d   : > { %897 = vst [vmem:[#allocation2] sm:$0xff] %v881_v18 }
 0x10e   : > { %v1976_v20 = vpop.f32.mrf.mxu3 }
 0x110   : > { %v845_v22 = vpop.f32.mrf.mxu2  ;;  %v749_v24 = vpop.f32.mrf.mxu0 }
 0x111   : > { %v846_v23 = vadd.f32 %v845_v22, %v797_v19  ;;  %v798_v25 = vpop.f32.mrf.mxu1  ;;  %v378_v19 = vld [vmem:[#allocation2 + $0x70] sm:$0xff]  ;;  %v374_v22 = vld [vmem:[#allocation2 + $0x20] sm:$0xff] }
 0x112   : > { %v799_v27 = vadd.f32 %v798_v25, %v749_v24 }
 0x113   : > { %v882_v26 = vadd.f32 %v846_v23, %v367_v21 }
 0x115   : > { %898 = vst [vmem:[#allocation2 + $0x58] sm:$0xff] %v882_v26 }
 0x116   : > { %v1978_v28 = vpop.f32.mrf.mxu3 }
 0x118   : > { %v847_v30 = vpop.f32.mrf.mxu2  ;;  %v752_v32 = vpop.f32.mrf.mxu0 }
 0x119   : > { %v848_v31 = vadd.f32 %v847_v30, %v799_v27  ;;  %v801_v33 = vpop.f32.mrf.mxu1 }
 0x11a   : > { %v802_v35 = vadd.f32 %v801_v33, %v752_v32  ;;  %v379_v32 = vld [vmem:[#allocation2 + $0x78] sm:$0xff] }
 0x11b   : > { %v883_v34 = vadd.f32 %v848_v31, %v368_v29 }
 0x11d   : > { %899 = vst [vmem:[#allocation2 + $0x18] sm:$0xff] %v883_v34  ;;  %v375_v34 = vld [vmem:[#allocation2 + $0x10] sm:$0xff] }
 0x11e   : > { %v821_v36 = vpop.f32.mrf.mxu3 }
 0x11f   : > { %v822_v5 = vadd.f32 %v821_v36, %v1972_v4 }
 0x120   : > { %v850_v39 = vpop.f32.mrf.mxu2  ;;  %v754_v40 = vpop.f32.mrf.mxu0 }
 0x121   : > { %v851_v38 = vadd.f32 %v850_v39, %v802_v35  ;;  %v803_v41 = vpop.f32.mrf.mxu1 }
 0x122   : > { %v804_v43 = vadd.f32 %v803_v41, %v754_v40 }
 0x123   : > { %v884_v42 = vadd.f32 %v851_v38, %v369_v37 }
 0x125   : > { %900 = vst [vmem:[#allocation2 + $0x50] sm:$0xff] %v884_v42 }
 0x126   : > { %v823_v44 = vpop.f32.mrf.mxu3 }
 0x127   : > { %v824_v17 = vadd.f32 %v823_v44, %v1974_v12 }
 0x128   : > { %v852_v46 = vpop.f32.mrf.mxu2  ;;  %v757_v48 = vpop.f32.mrf.mxu0 }
 0x129   : > { %v853_v47 = vadd.f32 %v852_v46, %v804_v43  ;;  %v806_v49 = vpop.f32.mrf.mxu1  ;;  %v380_v43 = vld [vmem:[#allocation2 + $0x28] sm:$0xff] }
 0x12a   : > { %v807_v51 = vadd.f32 %v806_v49, %v757_v48 }
 0x12b   : > { %v885_v50 = vadd.f32 %v853_v47, %v370_v45  ;;  %v376_v45 = vld [vmem:[#allocation2 + $0x38] sm:$0xff] }
 0x12d   : > { %901 = vst [vmem:[#allocation2 + $0x68] sm:$0xff] %v885_v50 }
 0x12e   : > { %v826_v52 = vpop.f32.mrf.mxu3 }
 0x12f   : > { %v827_v31 = vadd.f32 %v826_v52, %v1976_v20 }
 0x130   : > { %v855_v54 = vpop.f32.mrf.mxu2  ;;  %v759_v57 = vpop.f32.mrf.mxu0 }
 0x131   : > { %v856_v55 = vadd.f32 %v855_v54, %v807_v51  ;;  %v808_v56 = vpop.f32.mrf.mxu1 }
 0x132   : > { %v809_v59 = vadd.f32 %v808_v56, %v759_v57 }
 0x133   : > { %v886_v58 = vadd.f32 %v856_v55, %v371_v53 }
 0x135   : > { %902 = vst [vmem:[#allocation2 + $0x8] sm:$0xff] %v886_v58 }
 0x136   : > { %v828_v60 = vpop.f32.mrf.mxu3 }
 0x137   : > { %v829_v41 = vadd.f32 %v828_v60, %v1978_v28 }
 0x138   : > { %v857_v62 = vpop.f32.mrf.mxu2  ;;  %v762_v0 = vpop.f32.mrf.mxu0 }
 0x139   : > { %v858_v63 = vadd.f32 %v857_v62, %v809_v59  ;;  %v811_v1 = vpop.f32.mrf.mxu1 }
 0x13a   : > { %v812_v3 = vadd.f32 %v811_v1, %v762_v0 }
 0x13b   : > { %v887_v2 = vadd.f32 %v858_v63, %v372_v61 }
 0x13d   : > { %903 = vst [vmem:[#allocation2 + $0x48] sm:$0xff] %v887_v2 }
 0x13e   : > { %v870_v7 = vpop.f32.mrf.mxu3 }
 0x13f   : > { %v871_v10 = vadd.f32 %v870_v7, %v822_v5 }
 0x140   : > { %v860_v9 = vpop.f32.mrf.mxu2  ;;  %v764_v13 = vpop.f32.mrf.mxu0 }
 0x141   : > { %v861_v11 = vadd.f32 %v860_v9, %v812_v3  ;;  %v892_v14 = vadd.f32 %v871_v10, %v377_v6  ;;  %v813_v15 = vpop.f32.mrf.mxu1 }
 0x142   : > { %v814_v18 = vadd.f32 %v813_v15, %v764_v13 }
 0x143   : > { %v888_v16 = vadd.f32 %v861_v11, %v373_v8  ;;  %908 = vst [vmem:[#allocation2 + $0x60] sm:$0xff] %v892_v14 }
 0x145   : > { %904 = vst [vmem:[#allocation2 + $0x40] sm:$0xff] %v888_v16 }
 0x146   : > { %v872_v21 = vpop.f32.mrf.mxu3 }
 0x147   : > { %v873_v4 = vadd.f32 %v872_v21, %v824_v17 }
 0x148   : > { %v862_v23 = vpop.f32.mrf.mxu2  ;;  %v767_v26 = vpop.f32.mrf.mxu0 }
 0x149   : > { %v863_v24 = vadd.f32 %v862_v23, %v814_v18  ;;  %v893_v25 = vadd.f32 %v873_v4, %v378_v19  ;;  %v816_v27 = vpop.f32.mrf.mxu1 }
 0x14a   : > { %v817_v30 = vadd.f32 %v816_v27, %v767_v26 }
 0x14b   : > { %v889_v29 = vadd.f32 %v863_v24, %v374_v22  ;;  %909 = vst [vmem:[#allocation2 + $0x70] sm:$0xff] %v893_v25 }
 0x14d   : > { %905 = vst [vmem:[#allocation2 + $0x20] sm:$0xff] %v889_v29 }
 0x14e   : > { %v875_v33 = vpop.f32.mrf.mxu3 }
 0x14f   : > { %v876_v35 = vadd.f32 %v875_v33, %v827_v31 }
 0x150   : > { %v865_v12 = vpop.f32.mrf.mxu2  ;;  %v769_v38 = vpop.f32.mrf.mxu0 }
 0x151   : > { %v866_v36 = vadd.f32 %v865_v12, %v817_v30  ;;  %v894_v37 = vadd.f32 %v876_v35, %v379_v32  ;;  %v818_v40 = vpop.f32.mrf.mxu1 }
 0x152   : > { %v819_v42 = vadd.f32 %v818_v40, %v769_v38 }
 0x153   : > { %v890_v39 = vadd.f32 %v866_v36, %v375_v34  ;;  %910 = vst [vmem:[#allocation2 + $0x78] sm:$0xff] %v894_v37 }
 0x155   : > { %906 = vst [vmem:[#allocation2 + $0x10] sm:$0xff] %v890_v39 }
 0x156   : > { %v877_v44 = vpop.f32.mrf.mxu3 }
 0x157   : > { %v878_v20 = vadd.f32 %v877_v44, %v829_v41 }
 0x158   : > { %v867_v46 = vpop.f32.mrf.mxu2 }
 0x159   : > { %v868_v47 = vadd.f32 %v867_v46, %v819_v42  ;;  %v895_v48 = vadd.f32 %v878_v20, %v380_v43  ;;  %915 = sbr.rel (%p1422_p13) target bundleno = 389 (0x185), region = 66 }
 0x15b   : > { %v891_v49 = vadd.f32 %v868_v47, %v376_v45  ;;  %911 = vst [vmem:[#allocation2 + $0x28] sm:$0xff] %v895_v48 }
 0x15d   : > { %907 = vst [vmem:[#allocation2 + $0x38] sm:$0xff] %v891_v49 }
 0x15e   : > { %v916_v50 = vld [vmem:[#allocation2 + $0x30] sm:$0xff]  ;;  %v917_v51 = vld [vmem:[#allocation2] sm:$0xff]  ;;  %v918_v52 = vld [vmem:[#allocation2 + $0x58] sm:$0xff] }
 0x15f   : > { %v1604_v28 = vld [vmem:[%s2083_s2] ss:$0 sm:$0xff]  ;;  %v919_v53 = vld [vmem:[#allocation2 + $0x18] sm:$0xff]  ;;  %v920_v54 = vld [vmem:[#allocation2 + $0x50] sm:$0xff] }
 0x160   : > { %v921_v55 = vld [vmem:[#allocation2 + $0x68] sm:$0xff]  ;;  %v1988_v56 = vadd.f32 %v1604_v28, %v916_v50  ;;  %v1990_v58 = vadd.f32 %v1604_v28, %v917_v51  ;;  %v1992_v59 = vadd.f32 %v1604_v28, %v918_v52  ;;  %v1994_v60 = vadd.f32 %v1604_v28, %v919_v53  ;;  %v924_v0 = vld [vmem:[#allocation2 + $0x40] sm:$0xff]  ;;  %v926_v9 = vld [vmem:[#allocation2 + $0x10] sm:$0xff] }
 0x161   : > { %v922_v57 = vld [vmem:[#allocation2 + $0x8] sm:$0xff]  ;;  %v1996_v62 = vadd.f32 %v1604_v28, %v920_v54  ;;  %v1998_v63 = vadd.f32 %v1604_v28, %v921_v55  ;;  %v925_v6 = vld [vmem:[#allocation2 + $0x20] sm:$0xff]  ;;  %v2009_v11 = vadd.f32 %v1604_v28, %v924_v0  ;;  %v929_v17 = vld [vmem:[#allocation2 + $0x70] sm:$0xff]  ;;  %v2015_v19 = vadd.f32 %v1604_v28, %v926_v9 }
 0x162   : > { %v923_v61 = vld [vmem:[#allocation2 + $0x48] sm:$0xff]  ;;  %v952_v1 = vmul.f32 0.5, %v1988_v56  ;;  %v953_v2 = vmul.f32 0.5, %v1990_v58  ;;  %v954_v3 = vmul.f32 0.5, %v1992_v59  ;;  %v2003_v5 = vadd.f32 %v1604_v28, %v922_v57  ;;  %v928_v16 = vld [vmem:[#allocation2 + $0x60] sm:$0xff]  ;;  %v930_v21 = vld [vmem:[#allocation2 + $0x78] sm:$0xff] }
 0x163   : > { %v955_v7 = vmul.f32 0.5, %v1994_v60  ;;  %v2006_v8 = vadd.f32 %v1604_v28, %v923_v61  ;;  %v956_v10 = vmul.f32 0.5, %v1996_v62  ;;  %v957_v14 = vmul.f32 0.5, %v1998_v63  ;;  %v931_v4 = vld [vmem:[#allocation2 + $0x28] sm:$0xff] }
 0x164   : > { %1605 = vtanh.f32 %v952_v1  ;;  %v927_v13 = vld [vmem:[#allocation2 + $0x38] sm:$0xff]  ;;  %v2012_v15 = vadd.f32 %v1604_v28, %v925_v6  ;;  %v958_v18 = vmul.f32 0.5, %v2003_v5  ;;  %v960_v24 = vmul.f32 0.5, %v2009_v11 }
 0x165   : > { %1607 = vtanh.f32 %v953_v2  ;;  %v959_v22 = vmul.f32 0.5, %v2006_v8  ;;  %v2018_v23 = vadd.f32 %v1604_v28, %v927_v13  ;;  %v2021_v25 = vadd.f32 %v1604_v28, %v928_v16 }
 0x166   : > { %1609 = vtanh.f32 %v954_v3  ;;  %v2023_v26 = vadd.f32 %v1604_v28, %v929_v17  ;;  %v961_v27 = vmul.f32 0.5, %v2012_v15  ;;  %v2026_v29 = vadd.f32 %v1604_v28, %v930_v21 }
 0x167   : > { %1611 = vtanh.f32 %v955_v7  ;;  %v962_v31 = vmul.f32 0.5, %v2015_v19  ;;  %v2029_v32 = vadd.f32 %v1604_v28, %v931_v4  ;;  %v963_v12 = vmul.f32 0.5, %v2018_v23 }
 0x168   : > { %1613 = vtanh.f32 %v956_v10  ;;  %v964_v37 = vmul.f32 0.5, %v2021_v25  ;;  %v965_v39 = vmul.f32 0.5, %v2023_v26  ;;  %v966_v42 = vmul.f32 0.5, %v2026_v29 }
 0x169   : > { %1615 = vtanh.f32 %v957_v14  ;;  %v967_v46 = vmul.f32 0.5, %v2029_v32 }
 0x16a   : > { %v1606_v30 = vpop.eup %1605  ;;  %1617 = vtanh.f32 %v958_v18 }
 0x16b   : > { %v1608_v33 = vpop.eup %1607  ;;  %v984_v34 = vmul.f32 0.5, %v1606_v30  ;;  %1619 = vtanh.f32 %v959_v22 }
 0x16c   : > { %v1610_v35 = vpop.eup %1609  ;;  %v985_v36 = vmul.f32 0.5, %v1608_v33  ;;  %1621 = vtanh.f32 %v960_v24 }
 0x16d   : > { %v1612_v38 = vpop.eup %1611  ;;  %v1000_v40 = vadd.f32 0.5, %v984_v34  ;;  %v986_v41 = vmul.f32 0.5, %v1610_v35  ;;  %1623 = vtanh.f32 %v961_v27 }
 0x16e   : > { %v1614_v43 = vpop.eup %1613  ;;  %v1001_v44 = vadd.f32 0.5, %v985_v36  ;;  %v987_v45 = vmul.f32 0.5, %v1612_v38  ;;  %1625 = vtanh.f32 %v962_v31 }
 0x16f   : > { %v1616_v20 = vpop.eup %1615  ;;  %v1016_v47 = vmul.f32 %v1000_v40, %v1988_v56  ;;  %v1002_v48 = vadd.f32 0.5, %v986_v41  ;;  %v988_v49 = vmul.f32 0.5, %v1614_v43  ;;  %1627 = vtanh.f32 %v963_v12 }
 0x170   : > { %v1618_v50 = vpop.eup %1617  ;;  %v1017_v51 = vmul.f32 %v1001_v44, %v1990_v58  ;;  %v1003_v28 = vadd.f32 0.5, %v987_v45  ;;  %v989_v52 = vmul.f32 0.5, %v1616_v20  ;;  %1629 = vtanh.f32 %v964_v37 }
 0x171   : > { %v1620_v53 = vpop.eup %1619  ;;  %v1018_v54 = vmul.f32 %v1002_v48, %v1992_v59  ;;  %v1004_v55 = vadd.f32 0.5, %v988_v49  ;;  %v990_v57 = vmul.f32 0.5, %v1618_v50  ;;  %1631 = vtanh.f32 %v965_v39 }
 0x172   : > { %v1622_v61 = vpop.eup %1621  ;;  %v1476_v0 = vpack.c.bf16 %v1017_v51, %v1016_v47  ;;  %v1019_v56 = vmul.f32 %v1003_v28, %v1994_v60  ;;  %v1005_v1 = vadd.f32 0.5, %v989_v52  ;;  %v991_v2 = vmul.f32 0.5, %v1620_v53 }
 0x173   : > { %v1624_v3 = vpop.eup %1623  ;;  %v1020_v6 = vmul.f32 %v1004_v55, %v1996_v62  ;;  %v1006_v58 = vadd.f32 0.5, %v990_v57  ;;  %v992_v7 = vmul.f32 0.5, %v1622_v61  ;;  %1633 = vtanh.f32 %v966_v42 }
 0x174   : > { %v1626_v9 = vpop.eup %1625  ;;  %1477 = vst [vmem:[%s1855_s30] sm:$0xff] %v1476_v0   ;;  %v1481_v10 = vpack.c.bf16 %v1019_v56, %v1018_v54  ;;  %v1021_v59 = vmul.f32 %v1005_v1, %v1998_v63  ;;  %v1007_v13 = vadd.f32 0.5, %v991_v2  ;;  %v993_v14 = vmul.f32 0.5, %v1624_v3 }
 0x175   : > { %v1628_v16 = vpop.eup %1627  ;;  %v1022_v60 = vmul.f32 %v1006_v58, %v2003_v5  ;;  %v1008_v17 = vadd.f32 0.5, %v992_v7  ;;  %v994_v18 = vmul.f32 0.5, %v1626_v9  ;;  %1635 = vtanh.f32 %v967_v46 }
 0x176   : > { %v1630_v21 = vpop.eup %1629  ;;  %1513 = vst [vmem:[%s1855_s30 + $0x8] sm:$0xff] %v1481_v10   ;;  %v1486_v62 = vpack.c.bf16 %v1021_v59, %v1020_v6  ;;  %v1023_v22 = vmul.f32 %v1007_v13, %v2006_v8  ;;  %v1009_v4 = vadd.f32 0.5, %v993_v14  ;;  %v995_v24 = vmul.f32 0.5, %v1628_v16 }
 0x177   : > { %v1632_v27 = vpop.eup %1631  ;;  %v1024_v63 = vmul.f32 %v1008_v17, %v2009_v11  ;;  %v1010_v30 = vadd.f32 0.5, %v994_v18  ;;  %v996_v31 = vmul.f32 0.5, %v1630_v21 }
 0x178   : > { %1514 = vst [vmem:[%s1855_s30 + $0x10] sm:$0xff] %v1486_v62   ;;  %v1491_v33 = vpack.c.bf16 %v1023_v22, %v1022_v60  ;;  %v1025_v5 = vmul.f32 %v1009_v4, %v2012_v15  ;;  %v1011_v34 = vadd.f32 0.5, %v995_v24  ;;  %v997_v12 = vmul.f32 0.5, %v1632_v27 }
 0x179   : > { %v1634_v35 = vpop.eup %1633  ;;  %v1026_v36 = vmul.f32 %v1010_v30, %v2015_v19  ;;  %v1012_v37 = vadd.f32 0.5, %v996_v31 }
 0x17a   : > { %1515 = vst [vmem:[%s1855_s30 + $0x18] sm:$0xff] %v1491_v33   ;;  %v1496_v8 = vpack.c.bf16 %v1025_v5, %v1024_v63  ;;  %v1027_v39 = vmul.f32 %v1011_v34, %v2018_v23  ;;  %v1013_v11 = vadd.f32 0.5, %v997_v12  ;;  %v998_v38 = vmul.f32 0.5, %v1634_v35 }
 0x17b   : > { %v1636_v40 = vpop.eup %1635  ;;  %v1028_v41 = vmul.f32 %v1012_v37, %v2021_v25 }
 0x17c   : > { %1516 = vst [vmem:[%s1855_s30 + $0x20] sm:$0xff] %v1496_v8   ;;  %v1501_v15 = vpack.c.bf16 %v1027_v39, %v1026_v36  ;;  %v1029_v42 = vmul.f32 %v1013_v11, %v2023_v26  ;;  %v999_v43 = vmul.f32 0.5, %v1636_v40  ;;  %v1014_v44 = vadd.f32 0.5, %v998_v38 }
 0x17e   : > { %1517 = vst [vmem:[%s1855_s30 + $0x28] sm:$0xff] %v1501_v15   ;;  %v1506_v19 = vpack.c.bf16 %v1029_v42, %v1028_v41  ;;  %v1015_v45 = vadd.f32 0.5, %v999_v43  ;;  %v1030_v46 = vmul.f32 %v1014_v44, %v2026_v29 }
 0x180   : > { %1518 = vst [vmem:[%s1855_s30 + $0x30] sm:$0xff] %v1506_v19   ;;  %v1031_v23 = vmul.f32 %v1015_v45, %v2029_v32 }
 0x182   : > { %v1511_v20 = vpack.c.bf16 %v1031_v23, %v1030_v46 }
 0x184   : > { %1519 = vst [vmem:[%s1855_s30 + $0x38] sm:$0xff] %v1511_v20  }
 0x185 PF: > { %s13_s18 = sadd.s32 1, %s1691_s18   ;;  %s2085_s12 = smov %s1671_s13 }
 0x186   : > { %p10_p0 = scmp.ge.s32.totalorder %s13_s18, 8   ;;  %s2086_s13 = smov %s1765_s25 }
 0x187   : > { %s2087_s14 = smov %s1683_s16  ;;  %s2088_s15 = smov %s1687_s17 }
 0x188   : > { %s2089_s16 = smov %s2092_s19  ;;  %s2090_s17 = smov %s2096_s20 }
 0x189   :  { %12 = sbr.rel (!%p10_p0) target bundleno = 4 (0x4), region = 113 }

// kernel: efficientnetv2_forward.25
= control target key start
LH: loop header
LB: loop body
LE: loop exit
PB: predicated region body
PF: predicated region fallthrough
CT: control target
= control target key end

     0   :  { %s472_s9 = smov 0   ;;  %s474_s10 = smov 0   ;;  %s526_s0 = inlined_call_operand.vmem [shape: bf16[2,32,128], index: 0, kind: input, shape index: {}, may-alias: {0,1}]   ;;  %s527_s1 = inlined_call_operand.vmem [shape: bf16[2,32,128], index: 1, kind: input, shape index: {}, may-alias: {0,1}]   ;;  %s528_s2 = inlined_call_operand.vmem [shape: bf16[2,32,128], index: 2, kind: output, shape index: {}]  }
   0x1   :  { %s476_s11 = smov 0   ;;  %s478_s12 = smov 0  }
   0x2   :  { %s480_s13 = smov 0  }
   0x3 LB: > { %s21_s14 = sadd.s32 1, %s447_s11  ;;  %s24_s15 = sadd.s32 1, %s451_s12  ;;  %s455_s13 = sphi %s480_s13, %s12_s13   ;;  %s451_s12 = sphi %s478_s12, %s532_s12   ;;  %s447_s11 = sphi %s476_s11, %s531_s11   ;;  %s443_s10 = sphi %s474_s10, %s530_s10   ;;  %s439_s9 = sphi %s472_s9, %s529_s9  }
   0x4   : > { %p22_p0 = scmp.ge.s32.totalorder %s21_s14, 2  ;;  %p352_p1 = scmp.ge.s32.totalorder %s455_s13, 1 }
   0x5   : > { %p154_p2 = scmp.lt.s32.totalorder %s455_s13, 5 }
   0x6   : > { %s534_s14 = smov (%p22_p0, %s21_s14), 0  ;;  %s536_s15 = smov (!%p22_p0, %s24_s15), %s451_s12 }
   0x7   : > { %p155_p3 = pnand %p352_p1, %p154_p2  ;;  %p26_p4 = scmp.ge.s32.totalorder %s536_s15, 2 }
   0x8   : > { %s353_s16 = sshll.u32 (!%p155_p3), %s439_s9, 1  ;;  %p195_p5 = scmp.lt.s32.totalorder (!%p155_p3), %s443_s10, 1 }
   0x9   : > { %s538_s15 = smov (%p26_p4, %s536_s15), 0  ;;  %158 = sbr.rel (%p155_p3) target bundleno = 28 (0x1c), region = 28 }
   0xa   : > { %p197_p6 = scmp.lt.s32.totalorder (!%p155_p3), %s353_s16, 3  ;;  %s204_s17 = ssub.s32 (!%p155_p3), 1, %s443_s10 }
   0xb   : > { %p206_p7 = scmp.lt.s32.totalorder (!%p155_p3), %s204_s17, 1 }
   0xe   : > { %s540_s10 = smov (!%p195_p5, %s443_s10), 1  ;;  %s542_s16 = smov (!%p197_p6, %s353_s16), 3 }
   0xf   : > { %s354_s18 = sshll.u32 %s540_s10, 2  ;;  %s544_s17 = smov (!%p206_p7, %s204_s17), 1 }
  0x10   : > { %s200_s19 = sadd.s32 %s354_s18, %s542_s16  ;;  %s357_s24 = sshll.u32 %s544_s17, 2 }
  0x11   : > { %s355_s20 = sshll.u32 %s200_s19, 2  ;;  %s211_s25 = sadd.s32 %s357_s24, %s542_s16 }
  0x12   : > { %s202_s23 = scalar_lea.vmem %s526_s0, %s355_s20  ;;  %s358_s26 = sshll.u32 %s211_s25, 2 }
  0x13   : > { %v365_v0 = vld [vmem:[%s202_s23] sm:$0xff]   ;;  %s213_s29 = scalar_lea.vmem %s527_s1, %s358_s26  ;;  %s224_s4 = scalar_lea.vmem %s528_s2, %s355_s20 }
  0x14   : > { %v366_v1 = vunpack.c.l.bf16 %v365_v0  ;;  %v367_v2 = vunpack.c.h.bf16 %v365_v0  ;;  %v369_v3 = vld [vmem:[%s213_s29] sm:$0xff]  }
  0x15   : > { %v370_v4 = vunpack.c.l.bf16 %v369_v3  ;;  %v371_v5 = vunpack.c.h.bf16 %v369_v3 }
  0x17   : > { %v234_v6 = vadd.f32 %v370_v4, %v366_v1  ;;  %v235_v7 = vadd.f32 %v371_v5, %v367_v2 }
  0x19   : > { %v375_v8 = vpack.c.bf16 %v235_v7, %v234_v6 }
  0x1b   : > { %376 = vst [vmem:[%s224_s4] sm:$0xff] %v375_v8  }
  0x1c PF: > { %s12_s13 = sadd.s32 1, %s455_s13   ;;  %s529_s9 = smov %s447_s11 }
  0x1d   : > { %p9_p8 = scmp.ge.s32.totalorder %s12_s13, 6   ;;  %s530_s10 = smov %s451_s12 }
  0x1e   : > { %s531_s11 = smov %s534_s14  ;;  %s532_s12 = smov %s538_s15 }
  0x1f   :  { %11 = sbr.rel (!%p9_p8) target bundleno = 3 (0x3), region = 61 }

// kernel: efficientnetv2_forward.24
= control target key start
LH: loop header
LB: loop body
LE: loop exit
PB: predicated region body
PF: predicated region fallthrough
CT: control target
= control target key end

     0   :  { %s663_s12 = smov 0   ;;  %s665_s13 = smov 0   ;;  %s723_s0 = inlined_call_operand.vmem [shape: bf16[64,128], index: 0, kind: input, shape index: {}]   ;;  %s724_s1 = inlined_call_operand.vmem [shape: bf16[128,128], index: 1, kind: input, shape index: {}]   ;;  %s725_s2 = inlined_call_operand.vmem [shape: f32[1,128], index: 2, kind: input, shape index: {}]   ;;  %s726_s3 = inlined_call_operand.vmem [shape: bf16[64,128], index: 3, kind: output, shape index: {}]  }
   0x1   :  { %s667_s14 = smov 0  }
   0x2 LB: > { %s32_s15 = sadd.s32 1, %s637_s13  ;;  %p518_p0 = scmp.ge.s32.totalorder %s641_s14, 1  ;;  %s641_s14 = sphi %s667_s14, %s13_s14   ;;  %s637_s13 = sphi %s665_s13, %s728_s13   ;;  %s633_s12 = sphi %s663_s12, %s727_s12  }
   0x3   : > { %p34_p1 = scmp.ge.s32.totalorder %s32_s15, 2  ;;  %p188_p2 = scmp.lt.s32.totalorder %s641_s14, 3 }
   0x5   : > { %s730_s15 = smov (%p34_p1, %s32_s15), 0  ;;  %p189_p3 = pnand %p518_p0, %p188_p2 }
   0x6   : > { %s519_s24 = sshll.u32 (!%p189_p3), %s633_s12, 2 }
   0x7   : > { %192 = sbr.rel (%p189_p3) target bundleno = 184 (0xb8), region = 32  ;;  %p230_p4 = scmp.lt.s32.totalorder (!%p189_p3), %s519_s24, 7 }
   0xc   : > { %v574_v0 = vld [vmem:[%s724_s1 + $0x38] sm:$0xff]  ;;  %v573_v1 = vld [vmem:[%s724_s1 + $0x30] sm:$0xff]  ;;  %v572_v2 = vld [vmem:[%s724_s1 + $0x28] sm:$0xff]  ;;  %s732_s24 = smov (!%p230_p4, %s519_s24), 7 }
   0xd   : > { %351 = vmatpush.bf16.msra.mxu0 %v574_v0  ;;  %586 = vmatpush.bf16.msra.mxu1 %v574_v0  ;;  %v571_v3 = vld [vmem:[%s724_s1 + $0x20] sm:$0xff]  ;;  %v570_v4 = vld [vmem:[%s724_s1 + $0x18] sm:$0xff]  ;;  %v569_v5 = vld [vmem:[%s724_s1 + $0x10] sm:$0xff]  ;;  %s520_s4 = sshll.u32 %s732_s24, 2 }
   0xe   : > { %v568_v6 = vld [vmem:[%s724_s1 + $0x8] sm:$0xff]  ;;  %v567_v7 = vld [vmem:[%s724_s1] sm:$0xff]  ;;  %s236_s9 = scalar_lea.vmem %s723_s0, %s520_s4  ;;  %s257_s17 = scalar_lea.vmem %s726_s3, %s520_s4 }
   0xf   : > { %v565_v8 = vld [vmem:[%s236_s9] sm:$0xff]  ;;  %v566_v9 = vld [vmem:[%s236_s9 + $0x8] sm:$0xff] }
  0x10   : > { %v618_v12 = vld [vmem:[%s725_s2] ss:$0 sm:$0xff] }
  0x11   : > { %352 = vmatpush.bf16.msra.mxu0 %v573_v1  ;;  %587 = vmatpush.bf16.msra.mxu1 %v573_v1 }
  0x15   : > { %353 = vmatpush.bf16.msra.mxu0 %v572_v2  ;;  %588 = vmatpush.bf16.msra.mxu1 %v572_v2 }
  0x19   : > { %354 = vmatpush.bf16.msra.mxu0 %v571_v3  ;;  %589 = vmatpush.bf16.msra.mxu1 %v571_v3 }
  0x1d   : > { %355 = vmatpush.bf16.msra.mxu0 %v570_v4  ;;  %590 = vmatpush.bf16.msra.mxu1 %v570_v4 }
  0x21   : > { %356 = vmatpush.bf16.msra.mxu0 %v569_v5  ;;  %591 = vmatpush.bf16.msra.mxu1 %v569_v5 }
  0x25   : > { %357 = vmatpush.bf16.msra.mxu0 %v568_v6  ;;  %592 = vmatpush.bf16.msra.mxu1 %v568_v6 }
  0x29   : > { %358 = vmatpush.bf16.msra.mxu0 %v567_v7  ;;  %593 = vmatpush.bf16.msra.mxu1 %v567_v7 }
  0x2c   : > { %359 = vmatmul.bf16.vlgmr.msra.gmra.mxu0 %v565_v8  ;;  %364 = vmatmul.bf16.vlgmr.msra.gmra.mxu1 %v566_v9 }
  0xa9   : > { %v360_v10 = vpop.f32.mrf.mxu0  ;;  %v365_v11 = vpop.f32.mrf.mxu1 }
  0xaa   : > { %v389_v15 = vadd.f32 %v618_v12, %v360_v10  ;;  %v391_v16 = vadd.f32 %v618_v12, %v365_v11 }
  0xb1   : > { %v362_v13 = vpop.f32.mrf.mxu0  ;;  %v367_v14 = vpop.f32.mrf.mxu1 }
  0xb2   : > { %v390_v17 = vadd.f32 %v618_v12, %v362_v13  ;;  %v392_v18 = vadd.f32 %v618_v12, %v367_v14 }
  0xb4   : > { %v578_v19 = vpack.c.bf16 %v390_v17, %v389_v15  ;;  %v583_v20 = vpack.c.bf16 %v392_v18, %v391_v16 }
  0xb6   : > { %579 = vst [vmem:[%s257_s17] sm:$0xff] %v578_v19  }
  0xb7   : > { %585 = vst [vmem:[%s257_s17 + $0x8] sm:$0xff] %v583_v20  }
  0xb8 PF: > { %s13_s14 = sadd.s32 1, %s641_s14   ;;  %s727_s12 = smov %s637_s13 }
  0xb9   : > { %p10_p5 = scmp.ge.s32.totalorder %s13_s14, 4   ;;  %s728_s13 = smov %s730_s15 }
  0xbb   :  { %12 = sbr.rel (!%p10_p5) target bundleno = 2 (0x2), region = 76 }

// kernel: efficientnetv2_forward.23
= control target key start
LH: loop header
LB: loop body
LE: loop exit
PB: predicated region body
PF: predicated region fallthrough
CT: control target
= control target key end

     0   :  { %s1110_s12 = smov 0   ;;  %s1112_s13 = smov 0   ;;  %s1251_s0 = inlined_call_operand.vmem [shape: bf16[64,1152], index: 0, kind: input, shape index: {}]   ;;  %s1252_s1 = inlined_call_operand.vmem [shape: bf16[1152,128], index: 1, kind: input, shape index: {}]   ;;  %s1253_s2 = inlined_call_operand.vmem [shape: f32[1,128], index: 2, kind: input, shape index: {}]   ;;  %s1254_s3 = inlined_call_operand.vmem [shape: bf16[64,128], index: 3, kind: output, shape index: {}]  }
   0x1   :  { %s1114_s14 = smov 0   ;;  %s1116_s15 = smov 0  }
   0x2   :  { %s1118_s16 = smov 0   ;;  %s1120_s17 = smov 0  }
   0x3   :  { %s1122_s18 = smov 0  }
   0x4 LB: > { %s25_s19 = sadd.s32 1, %s1079_s16  ;;  %s32_s20 = sadd.s32 1, %s1083_s17  ;;  %s1087_s18 = sphi %s1122_s18, %s13_s18   ;;  %s1083_s17 = sphi %s1120_s17, %s1260_s17   ;;  %s1079_s16 = sphi %s1118_s16, %s1259_s16   ;;  %s1075_s15 = sphi %s1116_s15, %s1258_s15   ;;  %s1071_s14 = sphi %s1114_s14, %s1257_s14   ;;  %s1067_s13 = sphi %s1112_s13, %s1256_s13   ;;  %s1063_s12 = sphi %s1110_s12, %s1255_s12  }
   0x5   : > { %p26_p0 = scmp.ge.s32.totalorder %s25_s19, 3  ;;  %p48_p1 = scmp.ne.s32.totalorder %s1067_s13, %s1063_s12 }
   0x6   : > { %p49_p2 = scmp.eq.s32.totalorder %s1087_s18, 0  ;;  %s41_s24 = sadd.s32 1, %s1067_s13 }
   0x7   : > { %s1262_s19 = smov (%p26_p0, %s25_s19), 0  ;;  %s1264_s20 = smov (!%p26_p0, %s32_s20), %s1083_s17 }
   0x8   : > { %p50_p3 = por %p49_p2, %p48_p1  ;;  %p34_p4 = scmp.ge.s32.totalorder %s1264_s20, 2 }
   0x9   : > { %s37_s21 = ssub.s32 %s1079_s16, %s1262_s19  ;;  %p775_p6 = scmp.ge.s32.totalorder %s1087_s18, 6 }
   0xa   : > { %s1266_s20 = smov (%p34_p4, %s1264_s20), 0 }
   0xb   : > { %s36_s22 = ssub.s32 %s1083_s17, %s1266_s20  ;;  %162 = sbr.rel (%p775_p6) target bundleno = 33 (0x21), region = 20 }
   0xc   : > { %s38_s23 = sor.u32 %s37_s21, %s36_s22 }
   0xd   : > { %p39_p5 = scmp.eq.s32.totalorder %s38_s23, 0 }
   0xf   : > { %s1161_s25 = scalar_select %p39_p5, %s1067_s13, %s41_s24  }
  0x10   : > { %165 = sbr.rel (!%p50_p3) target bundleno = 33 (0x21), region = 24  ;;  %s167_s26 = sand.u32 (%p50_p3), 1, %s1067_s13  }
  0x11   : > { %s171_s27 = smul.u32 (%p50_p3), 3, %s1079_s16 }
  0x12   : > { %s964_s28 = smul.u32 (%p50_p3), 48, %s167_s26 }
  0x13   : > { %s965_s29 = smul.u32 (%p50_p3), 36, %s1083_s17 }
  0x14   : > { %s169_s8 = scalar_lea.vmem (%p50_p3), [#allocation3], %s964_s28 }
  0x15   : > { %s173_s30 = sadd.s32 %s965_s29, %s171_s27 }
  0x16   : > { %s778_s4 = sshll.u32 %s173_s30, 2 }
  0x17   : > { %s175_s7 = scalar_lea.vmem %s1251_s0, %s778_s4 }
  0x18   : > { %v190_v0 = vld [vmem:[%s175_s7] sm:$0xff]  ;;  %v194_v2 = vld [vmem:[%s175_s7 + $0x48] sm:$0xff]  ;;  %v783_v6 = vld [vmem:[%s175_s7 + $0x50] sm:$0xf] }
  0x19   : > { %v192_v1 = vld [vmem:[%s175_s7 + $0x24] sm:$0xff]  ;;  %191 = vst [vmem:[%s169_s8] sm:$0xff] %v190_v0  ;;  %v196_v3 = vld [vmem:[%s175_s7 + $0x6c] sm:$0xff]  ;;  %v785_v7 = vld [vmem:[%s175_s7 + $0x74] sm:$0xf] }
  0x1a   : > { %193 = vst [vmem:[%s169_s8 + $0xc] sm:$0xff] %v192_v1  ;;  %v779_v4 = vld [vmem:[%s175_s7 + $0x8] sm:$0xf]  ;;  %v781_v5 = vld [vmem:[%s175_s7 + $0x2c] sm:$0xf] }
  0x1b   : > { %195 = vst [vmem:[%s169_s8 + $0x18] sm:$0xff] %v194_v2 }
  0x1c   : > { %197 = vst [vmem:[%s169_s8 + $0x24] sm:$0xff] %v196_v3 }
  0x1d   : > { %780 = vst [vmem:[%s169_s8 + $0x8] sm:$0xf] %v779_v4 }
  0x1e   : > { %782 = vst [vmem:[%s169_s8 + $0x14] sm:$0xf] %v781_v5 }
  0x1f   : > { %784 = vst [vmem:[%s169_s8 + $0x20] sm:$0xf] %v783_v6 }
  0x20   : > { %786 = vst [vmem:[%s169_s8 + $0x2c] sm:$0xf] %v785_v7 }
  0x21 PF: > { %p787_p7 = scmp.ge.s32.totalorder %s1087_s18, 1  ;;  %p230_p8 = scmp.lt.s32.totalorder %s1087_s18, 7 }
  0x23   : > { %p231_p9 = pnand %p787_p7, %p230_p8 }
  0x24   : > { %s237_s9 = sand.u32 (!%p231_p9), 1, %s1063_s12   ;;  %s276_s10 = smul.u32 (!%p231_p9), 48, %s1071_s14 }
  0x25   : > { %234 = sbr.rel (%p231_p9) target bundleno = 277 (0x115), region = 54  ;;  %s789_s21 = sshll.u32 (!%p231_p9), %s1075_s15, 2 }
  0x26   : > { %s966_s11 = smul.u32 (!%p231_p9), 48, %s237_s9  ;;  %p277_p10 = scmp.lt.s32.totalorder (!%p231_p9), %s276_s10, 143 }
  0x27   : > { %p289_p11 = scmp.lt.s32.totalorder (!%p231_p9), %s789_s21, 7  ;;  %p791_p12 = scmp.ne.s32.totalorder (!%p231_p9), %s1071_s14, 0 }
  0x28   : > { %s1185_s12 = scalar_lea.vmem (!%p231_p9), [#allocation3], %s966_s11 }
  0x2a   : > { %s1268_s10 = smov (!%p277_p10, %s276_s10), 143  ;;  %s1270_s21 = smov (!%p289_p11, %s789_s21), 7 }
  0x2b   : > { %s788_s22 = sshll.u32 %s1268_s10, 2  ;;  %s790_s27 = sshll.u32 %s1270_s21, 2 }
  0x2c   : > { %s1178_s26 = scalar_lea.vmem %s1252_s1, %s788_s22  ;;  %s1183_s30 = scalar_lea.vmem %s1254_s3, %s790_s27 }
  0x2d   : > { %300 = sbr.rel (%p791_p12) target bundleno = 55 (0x37), region = 62 }
  0x32   : > { %v1089_v8 = vmov 0.0  }
  0x33   : > { %301 = vst [vmem:[#allocation2 + $0x10] sm:$0xff] %v1089_v8 }
  0x34   : > { %302 = vst [vmem:[#allocation2] sm:$0xff] %v1089_v8 }
  0x35   : > { %303 = vst [vmem:[#allocation2 + $0x18] sm:$0xff] %v1089_v8 }
  0x36   : > { %304 = vst [vmem:[#allocation2 + $0x8] sm:$0xff] %v1089_v8 }
  0x37 PF: > { %v928_v9 = vld [vmem:[%s1178_s26 + $0x38] sm:$0xff]  ;;  %v927_v12 = vld [vmem:[%s1178_s26 + $0x30] sm:$0xff]  ;;  %v926_v15 = vld [vmem:[%s1178_s26 + $0x28] sm:$0xff]  ;;  %p912_p13 = scmp.ne.s32.totalorder %s1071_s14, 2 }
  0x38   : > { %v936_v10 = vld [vmem:[%s1178_s26 + $0x78] sm:$0xff]  ;;  %541 = vmatpush.bf16.msra.mxu0 %v928_v9  ;;  %v935_v13 = vld [vmem:[%s1178_s26 + $0x70] sm:$0xff]  ;;  %956 = vmatpush.bf16.msra.mxu3 %v928_v9  ;;  %v934_v16 = vld [vmem:[%s1178_s26 + $0x68] sm:$0xff] }
  0x39   : > { %v944_v11 = vld [vmem:[%s1178_s26 + $0xb8] sm:$0xff]  ;;  %560 = vmatpush.bf16.msra.mxu1 %v936_v10  ;;  %v943_v14 = vld [vmem:[%s1178_s26 + $0xb0] sm:$0xff]  ;;  %v942_v17 = vld [vmem:[%s1178_s26 + $0xa8] sm:$0xff] }
  0x3a   : > { %579 = vmatpush.bf16.msra.mxu2 %v944_v11  ;;  %v925_v18 = vld [vmem:[%s1178_s26 + $0x20] sm:$0xff]  ;;  %v924_v21 = vld [vmem:[%s1178_s26 + $0x18] sm:$0xff]  ;;  %v923_v24 = vld [vmem:[%s1178_s26 + $0x10] sm:$0xff] }
  0x3b   : > { %v933_v19 = vld [vmem:[%s1178_s26 + $0x60] sm:$0xff]  ;;  %v932_v22 = vld [vmem:[%s1178_s26 + $0x58] sm:$0xff]  ;;  %v931_v25 = vld [vmem:[%s1178_s26 + $0x50] sm:$0xff] }
  0x3c   : > { %542 = vmatpush.bf16.msra.mxu0 %v927_v12  ;;  %957 = vmatpush.bf16.msra.mxu3 %v927_v12  ;;  %v941_v20 = vld [vmem:[%s1178_s26 + $0xa0] sm:$0xff]  ;;  %v940_v23 = vld [vmem:[%s1178_s26 + $0x98] sm:$0xff]  ;;  %v939_v26 = vld [vmem:[%s1178_s26 + $0x90] sm:$0xff] }
  0x3d   : > { %561 = vmatpush.bf16.msra.mxu1 %v935_v13  ;;  %v922_v27 = vld [vmem:[%s1178_s26 + $0x8] sm:$0xff]  ;;  %v921_v30 = vld [vmem:[%s1178_s26] sm:$0xff]  ;;  %v305_v54 = vld [vmem:[#allocation2 + $0x10] sm:$0xff] }
  0x3e   : > { %580 = vmatpush.bf16.msra.mxu2 %v943_v14  ;;  %v930_v28 = vld [vmem:[%s1178_s26 + $0x48] sm:$0xff]  ;;  %v929_v31 = vld [vmem:[%s1178_s26 + $0x40] sm:$0xff]  ;;  %v307_v4 = vld [vmem:[#allocation2 + $0x18] sm:$0xff] }
  0x3f   : > { %v938_v29 = vld [vmem:[%s1178_s26 + $0x88] sm:$0xff]  ;;  %v937_v32 = vld [vmem:[%s1178_s26 + $0x80] sm:$0xff] }
  0x40   : > { %543 = vmatpush.bf16.msra.mxu0 %v926_v15  ;;  %958 = vmatpush.bf16.msra.mxu3 %v926_v15  ;;  %v794_v33 = vld [vmem:[%s1185_s12] sm:$0xf]  ;;  %v916_v34 = vld [vmem:[%s1185_s12 + $0x8] sm:$0xf0]  ;;  %v915_v35 = vld [vmem:[%s1185_s12 + $0x4] sm:$0xf] }
  0x41   : > { %562 = vmatpush.bf16.msra.mxu1 %v934_v16  ;;  %v796_v36 = vld [vmem:[%s1185_s12 + $0xc] sm:$0xf0]  ;;  %v802_v37 = vld [vmem:[%s1185_s12 + $0x8] sm:$0xf]  ;;  %v917_v38 = vld [vmem:[%s1185_s12 + $0x10] sm:$0xf0]  ;;  %v795_v41 = vor.u32 %v916_v34, %v794_v33 }
  0x42   : > { %581 = vmatpush.bf16.msra.mxu2 %v942_v17  ;;  %v806_v39 = vld [vmem:[%s1185_s12 + $0x18] sm:$0xf]  ;;  %v919_v40 = vld [vmem:[%s1185_s12 + $0x20] sm:$0xf0]  ;;  %v799_v42 = vor.u32 %v915_v35, %v796_v36  ;;  %v803_v43 = vor.u32 %v917_v38, %v802_v37  ;;  %v918_v45 = vld [vmem:[%s1185_s12 + $0x1c] sm:$0xf] }
  0x43   : > { %v807_v44 = vor.u32 %v919_v40, %v806_v39  ;;  %v808_v46 = vld [vmem:[%s1185_s12 + $0x24] sm:$0xf0]  ;;  %v814_v47 = vld [vmem:[%s1185_s12 + $0x20] sm:$0xf]  ;;  %v920_v48 = vld [vmem:[%s1185_s12 + $0x28] sm:$0xf0] }
  0x44   : > { %544 = vmatpush.bf16.msra.mxu0 %v925_v18  ;;  %959 = vmatpush.bf16.msra.mxu3 %v925_v18  ;;  %v811_v49 = vor.u32 %v918_v45, %v808_v46  ;;  %v815_v50 = vor.u32 %v920_v48, %v814_v47  ;;  %v306_v61 = vld [vmem:[#allocation2] sm:$0xff]  ;;  %v308_v11 = vld [vmem:[#allocation2 + $0x8] sm:$0xff] }
  0x45   : > { %563 = vmatpush.bf16.msra.mxu1 %v933_v19 }
  0x46   : > { %582 = vmatpush.bf16.msra.mxu2 %v941_v20 }
  0x48   : > { %545 = vmatpush.bf16.msra.mxu0 %v924_v21  ;;  %960 = vmatpush.bf16.msra.mxu3 %v924_v21 }
  0x49   : > { %564 = vmatpush.bf16.msra.mxu1 %v932_v22 }
  0x4a   : > { %583 = vmatpush.bf16.msra.mxu2 %v940_v23 }
  0x4c   : > { %546 = vmatpush.bf16.msra.mxu0 %v923_v24  ;;  %961 = vmatpush.bf16.msra.mxu3 %v923_v24 }
  0x4d   : > { %565 = vmatpush.bf16.msra.mxu1 %v931_v25 }
  0x4e   : > { %584 = vmatpush.bf16.msra.mxu2 %v939_v26 }
  0x50   : > { %547 = vmatpush.bf16.msra.mxu0 %v922_v27  ;;  %962 = vmatpush.bf16.msra.mxu3 %v922_v27 }
  0x51   : > { %566 = vmatpush.bf16.msra.mxu1 %v930_v28 }
  0x52   : > { %585 = vmatpush.bf16.msra.mxu2 %v938_v29 }
  0x54   : > { %548 = vmatpush.bf16.msra.mxu0 %v921_v30  ;;  %963 = vmatpush.bf16.msra.mxu3 %v921_v30 }
  0x55   : > { %567 = vmatpush.bf16.msra.mxu1 %v929_v31 }
  0x56   : > { %586 = vmatpush.bf16.msra.mxu2 %v937_v32 }
  0x57   : > { %549 = vmatmul.bf16.vlgmr.msra.gmra.mxu0 %v795_v41  ;;  %554 = vmatmul.bf16.vlgmr.msra.gmra.mxu3 %v807_v44 }
  0x58   : > { %568 = vmatmul.bf16.vlgmr.msra.gmra.mxu1 %v799_v42 }
  0x59   : > { %587 = vmatmul.bf16.vlgmr.msra.gmra.mxu2 %v803_v43 }
  0x68   : > { %573 = vmatmul.bf16.gmra.mxu1 %v811_v49 }
  0x69   : > { %592 = vmatmul.bf16.gmra.mxu2 %v815_v50 }
  0xd4   : > { %v550_v52 = vpop.f32.mrf.mxu0 }
  0xd5   : > { %v569_v51 = vpop.f32.mrf.mxu1 }
  0xd6   : > { %v570_v53 = vadd.f32 %v569_v51, %v550_v52 }
  0xda   : > { %v555_v2 = vpop.f32.mrf.mxu3 }
  0xdc   : > { %v588_v55 = vpop.f32.mrf.mxu2  ;;  %v552_v59 = vpop.f32.mrf.mxu0 }
  0xdd   : > { %v589_v56 = vadd.f32 %v588_v55, %v570_v53  ;;  %v571_v57 = vpop.f32.mrf.mxu1 }
  0xde   : > { %v572_v60 = vadd.f32 %v571_v57, %v552_v59 }
  0xdf   : > { %v598_v58 = vadd.f32 %v589_v56, %v305_v54 }
  0xe1   : > { %602 = vst [vmem:[#allocation2 + $0x10] sm:$0xff] %v598_v58 }
  0xe2   : > { %v557_v9 = vpop.f32.mrf.mxu3 }
  0xe4   : > { %v590_v62 = vpop.f32.mrf.mxu2 }
  0xe5   : > { %v591_v63 = vadd.f32 %v590_v62, %v572_v60  ;;  %v574_v0 = vpop.f32.mrf.mxu1 }
  0xe6   : > { %v575_v3 = vadd.f32 %v574_v0, %v555_v2 }
  0xe7   : > { %v599_v1 = vadd.f32 %v591_v63, %v306_v61 }
  0xe9   : > { %603 = vst [vmem:[#allocation2] sm:$0xff] %v599_v1 }
  0xec   : > { %v593_v5 = vpop.f32.mrf.mxu2 }
  0xed   : > { %v594_v6 = vadd.f32 %v593_v5, %v575_v3  ;;  %v576_v8 = vpop.f32.mrf.mxu1 }
  0xee   : > { %v577_v10 = vadd.f32 %v576_v8, %v557_v9 }
  0xef   : > { %v600_v7 = vadd.f32 %v594_v6, %v307_v4 }
  0xf1   : > { %604 = vst [vmem:[#allocation2 + $0x18] sm:$0xff] %v600_v7 }
  0xf4   : > { %v595_v12 = vpop.f32.mrf.mxu2 }
  0xf5   : > { %v596_v13 = vadd.f32 %v595_v12, %v577_v10  ;;  %609 = sbr.rel (%p912_p13) target bundleno = 277 (0x115), region = 66 }
  0xf7   : > { %v601_v14 = vadd.f32 %v596_v13, %v308_v11 }
  0xf9   : > { %605 = vst [vmem:[#allocation2 + $0x8] sm:$0xff] %v601_v14 }
  0xfa   : > { %v610_v15 = vld [vmem:[#allocation2 + $0x10] sm:$0xff]  ;;  %v611_v16 = vld [vmem:[#allocation2] sm:$0xff]  ;;  %v612_v18 = vld [vmem:[#allocation2 + $0x18] sm:$0xff] }
  0xfb   : > { %v1024_v17 = vld [vmem:[%s1253_s2] ss:$0 sm:$0xff] }
  0xfc   : > { %v618_v20 = vadd.f32 %v1024_v17, %v610_v15  ;;  %v619_v21 = vadd.f32 %v1024_v17, %v611_v16  ;;  %v620_v22 = vadd.f32 %v1024_v17, %v612_v18 }
  0xfe   : > { %v622_v24 = vmul.f32 0.5, %v618_v20  ;;  %v623_v25 = vmul.f32 0.5, %v619_v21  ;;  %v624_v26 = vmul.f32 0.5, %v620_v22 }
 0x100   : > { %v613_v19 = vld [vmem:[#allocation2 + $0x8] sm:$0xff]  ;;  %1025 = vtanh.f32 %v622_v24 }
 0x101   : > { %v621_v23 = vadd.f32 %v1024_v17, %v613_v19  ;;  %1027 = vtanh.f32 %v623_v25 }
 0x102   : > { %1029 = vtanh.f32 %v624_v26 }
 0x103   : > { %v625_v27 = vmul.f32 0.5, %v621_v23 }
 0x105   : > { %1031 = vtanh.f32 %v625_v27 }
 0x106   : > { %v1026_v28 = vpop.eup %1025 }
 0x107   : > { %v1028_v29 = vpop.eup %1027  ;;  %v630_v30 = vmul.f32 0.5, %v1026_v28 }
 0x108   : > { %v1030_v31 = vpop.eup %1029  ;;  %v631_v32 = vmul.f32 0.5, %v1028_v29 }
 0x109   : > { %v634_v34 = vadd.f32 0.5, %v630_v30  ;;  %v632_v35 = vmul.f32 0.5, %v1030_v31 }
 0x10a   : > { %v635_v36 = vadd.f32 0.5, %v631_v32 }
 0x10b   : > { %v1032_v33 = vpop.eup %1031  ;;  %v638_v38 = vmul.f32 %v634_v34, %v618_v20  ;;  %v636_v39 = vadd.f32 0.5, %v632_v35 }
 0x10c   : > { %v633_v37 = vmul.f32 0.5, %v1032_v33  ;;  %v639_v40 = vmul.f32 %v635_v36, %v619_v21 }
 0x10d   : > { %v640_v42 = vmul.f32 %v636_v39, %v620_v22 }
 0x10e   : > { %v637_v41 = vadd.f32 0.5, %v633_v37  ;;  %v948_v43 = vpack.c.bf16 %v639_v40, %v638_v38 }
 0x110   : > { %v641_v44 = vmul.f32 %v637_v41, %v621_v23  ;;  %949 = vst [vmem:[%s1183_s30] sm:$0xff] %v948_v43  }
 0x112   : > { %v953_v45 = vpack.c.bf16 %v641_v44, %v640_v42 }
 0x114   : > { %955 = vst [vmem:[%s1183_s30 + $0x8] sm:$0xff] %v953_v45  }
 0x115 PF: > { %s13_s18 = sadd.s32 1, %s1087_s18   ;;  %s1255_s12 = smov %s1067_s13 }
 0x116   : > { %p10_p0 = scmp.ge.s32.totalorder %s13_s18, 8   ;;  %s1256_s13 = smov %s1161_s25 }
 0x117   : > { %s1257_s14 = smov %s1079_s16  ;;  %s1258_s15 = smov %s1083_s17 }
 0x118   : > { %s1259_s16 = smov %s1262_s19  ;;  %s1260_s17 = smov %s1266_s20 }
 0x119   :  { %12 = sbr.rel (!%p10_p0) target bundleno = 4 (0x4), region = 113 }

// kernel: efficientnetv2_forward.26
= control target key start
LH: loop header
LB: loop body
LE: loop exit
PB: predicated region body
PF: predicated region fallthrough
CT: control target
= control target key end

     0   :  { %s691_s12 = smov 0   ;;  %s693_s13 = smov 0   ;;  %s758_s0 = inlined_call_operand.vmem [shape: bf16[64,128], index: 0, kind: input, shape index: {}]   ;;  %s759_s1 = inlined_call_operand.vmem [shape: bf16[128,128], index: 1, kind: input, shape index: {}]   ;;  %s760_s2 = inlined_call_operand.vmem [shape: f32[1,128], index: 2, kind: input, shape index: {}]   ;;  %s761_s3 = inlined_call_operand.vmem [shape: bf16[64,128], index: 3, kind: output, shape index: {}]  }
   0x1   :  { %s695_s14 = smov 0  }
   0x2 LB: > { %s32_s15 = sadd.s32 1, %s665_s13  ;;  %p538_p0 = scmp.ge.s32.totalorder %s669_s14, 1  ;;  %s669_s14 = sphi %s695_s14, %s13_s14   ;;  %s665_s13 = sphi %s693_s13, %s763_s13   ;;  %s661_s12 = sphi %s691_s12, %s762_s12  }
   0x3   : > { %p34_p1 = scmp.ge.s32.totalorder %s32_s15, 2  ;;  %p188_p2 = scmp.lt.s32.totalorder %s669_s14, 3 }
   0x5   : > { %s765_s15 = smov (%p34_p1, %s32_s15), 0  ;;  %p189_p3 = pnand %p538_p0, %p188_p2 }
   0x6   : > { %s539_s24 = sshll.u32 (!%p189_p3), %s661_s12, 2 }
   0x7   : > { %192 = sbr.rel (%p189_p3) target bundleno = 199 (0xc7), region = 32  ;;  %p230_p4 = scmp.lt.s32.totalorder (!%p189_p3), %s539_s24, 7 }
   0xc   : > { %v594_v0 = vld [vmem:[%s759_s1 + $0x38] sm:$0xff]  ;;  %v593_v1 = vld [vmem:[%s759_s1 + $0x30] sm:$0xff]  ;;  %v592_v2 = vld [vmem:[%s759_s1 + $0x28] sm:$0xff]  ;;  %s767_s24 = smov (!%p230_p4, %s539_s24), 7 }
   0xd   : > { %351 = vmatpush.bf16.msra.mxu0 %v594_v0  ;;  %606 = vmatpush.bf16.msra.mxu1 %v594_v0  ;;  %v591_v3 = vld [vmem:[%s759_s1 + $0x20] sm:$0xff]  ;;  %v590_v4 = vld [vmem:[%s759_s1 + $0x18] sm:$0xff]  ;;  %v589_v5 = vld [vmem:[%s759_s1 + $0x10] sm:$0xff]  ;;  %s540_s4 = sshll.u32 %s767_s24, 2 }
   0xe   : > { %v588_v6 = vld [vmem:[%s759_s1 + $0x8] sm:$0xff]  ;;  %v587_v7 = vld [vmem:[%s759_s1] sm:$0xff]  ;;  %s236_s9 = scalar_lea.vmem %s758_s0, %s540_s4  ;;  %s257_s17 = scalar_lea.vmem %s761_s3, %s540_s4 }
   0xf   : > { %v585_v8 = vld [vmem:[%s236_s9] sm:$0xff]  ;;  %v586_v9 = vld [vmem:[%s236_s9 + $0x8] sm:$0xff] }
  0x10   : > { %v638_v10 = vld [vmem:[%s760_s2] ss:$0 sm:$0xff] }
  0x11   : > { %352 = vmatpush.bf16.msra.mxu0 %v593_v1  ;;  %607 = vmatpush.bf16.msra.mxu1 %v593_v1 }
  0x15   : > { %353 = vmatpush.bf16.msra.mxu0 %v592_v2  ;;  %608 = vmatpush.bf16.msra.mxu1 %v592_v2 }
  0x19   : > { %354 = vmatpush.bf16.msra.mxu0 %v591_v3  ;;  %609 = vmatpush.bf16.msra.mxu1 %v591_v3 }
  0x1d   : > { %355 = vmatpush.bf16.msra.mxu0 %v590_v4  ;;  %610 = vmatpush.bf16.msra.mxu1 %v590_v4 }
  0x21   : > { %356 = vmatpush.bf16.msra.mxu0 %v589_v5  ;;  %611 = vmatpush.bf16.msra.mxu1 %v589_v5 }
  0x25   : > { %357 = vmatpush.bf16.msra.mxu0 %v588_v6  ;;  %612 = vmatpush.bf16.msra.mxu1 %v588_v6 }
  0x29   : > { %358 = vmatpush.bf16.msra.mxu0 %v587_v7  ;;  %613 = vmatpush.bf16.msra.mxu1 %v587_v7 }
  0x2c   : > { %359 = vmatmul.bf16.vlgmr.msra.gmra.mxu0 %v585_v8  ;;  %364 = vmatmul.bf16.vlgmr.msra.gmra.mxu1 %v586_v9 }
  0xa9   : > { %v360_v11 = vpop.f32.mrf.mxu0  ;;  %v365_v12 = vpop.f32.mrf.mxu1 }
  0xaa   : > { %v389_v13 = vadd.f32 %v638_v10, %v360_v11  ;;  %v391_v14 = vadd.f32 %v638_v10, %v365_v12 }
  0xac   : > { %v393_v15 = vmul.f32 0.5, %v389_v13  ;;  %v395_v16 = vmul.f32 0.5, %v391_v14 }
  0xae   : > { %639 = vtanh.f32 %v393_v15 }
  0xaf   : > { %641 = vtanh.f32 %v395_v16 }
  0xb1   : > { %v362_v17 = vpop.f32.mrf.mxu0  ;;  %v367_v18 = vpop.f32.mrf.mxu1 }
  0xb2   : > { %v390_v19 = vadd.f32 %v638_v10, %v362_v17  ;;  %v392_v20 = vadd.f32 %v638_v10, %v367_v18 }
  0xb4   : > { %v394_v21 = vmul.f32 0.5, %v390_v19  ;;  %v396_v22 = vmul.f32 0.5, %v392_v20  ;;  %v640_v23 = vpop.eup %639 }
  0xb5   : > { %v642_v24 = vpop.eup %641  ;;  %v401_v25 = vmul.f32 0.5, %v640_v23 }
  0xb6   : > { %643 = vtanh.f32 %v394_v21  ;;  %v403_v26 = vmul.f32 0.5, %v642_v24 }
  0xb7   : > { %645 = vtanh.f32 %v396_v22  ;;  %v405_v29 = vadd.f32 0.5, %v401_v25 }
  0xb8   : > { %v407_v31 = vadd.f32 0.5, %v403_v26 }
  0xb9   : > { %v409_v35 = vmul.f32 %v405_v29, %v389_v13 }
  0xba   : > { %v411_v37 = vmul.f32 %v407_v31, %v391_v14 }
  0xbc   : > { %v644_v27 = vpop.eup %643 }
  0xbd   : > { %v646_v28 = vpop.eup %645  ;;  %v402_v30 = vmul.f32 0.5, %v644_v27 }
  0xbe   : > { %v404_v32 = vmul.f32 0.5, %v646_v28 }
  0xbf   : > { %v406_v33 = vadd.f32 0.5, %v402_v30 }
  0xc0   : > { %v408_v34 = vadd.f32 0.5, %v404_v32 }
  0xc1   : > { %v410_v36 = vmul.f32 %v406_v33, %v390_v19 }
  0xc2   : > { %v412_v38 = vmul.f32 %v408_v34, %v392_v20 }
  0xc3   : > { %v598_v39 = vpack.c.bf16 %v410_v36, %v409_v35 }
  0xc4   : > { %v603_v40 = vpack.c.bf16 %v412_v38, %v411_v37 }
  0xc5   : > { %599 = vst [vmem:[%s257_s17] sm:$0xff] %v598_v39  }
  0xc6   : > { %605 = vst [vmem:[%s257_s17 + $0x8] sm:$0xff] %v603_v40  }
  0xc7 PF: > { %s13_s14 = sadd.s32 1, %s669_s14   ;;  %s762_s12 = smov %s665_s13 }
  0xc8   : > { %p10_p5 = scmp.ge.s32.totalorder %s13_s14, 4   ;;  %s763_s13 = smov %s765_s15 }
  0xca   :  { %12 = sbr.rel (!%p10_p5) target bundleno = 2 (0x2), region = 76 }

// kernel: efficientnetv2_forward.29
= control target key start
LH: loop header
LB: loop body
LE: loop exit
PB: predicated region body
PF: predicated region fallthrough
CT: control target
= control target key end

     0   :  { %s374_s9 = smov 0   ;;  %s376_s10 = smov 0   ;;  %s403_s0 = inlined_call_operand.vmem [shape: bf16[2,8,128], index: 0, kind: input, shape index: {}, may-alias: {0,1}]   ;;  %s404_s1 = inlined_call_operand.vmem [shape: bf16[2,8,128], index: 1, kind: input, shape index: {}, may-alias: {0,1}]   ;;  %s405_s2 = inlined_call_operand.vmem [shape: bf16[2,8,128], index: 2, kind: output, shape index: {}]  }
   0x1   :  { %s378_s11 = smov 0  }
   0x2 LB: > { %s24_s12 = sadd.s32 1, %s353_s10  ;;  %p305_p0 = scmp.ge.s32.totalorder %s357_s11, 1  ;;  %s357_s11 = sphi %s378_s11, %s12_s11   ;;  %s353_s10 = sphi %s376_s10, %s407_s10   ;;  %s349_s9 = sphi %s374_s9, %s406_s9  }
   0x3   : > { %p26_p1 = scmp.ge.s32.totalorder %s24_s12, 2  ;;  %p148_p2 = scmp.lt.s32.totalorder %s357_s11, 3 }
   0x5   : > { %s409_s12 = smov (%p26_p1, %s24_s12), 0  ;;  %p149_p3 = pnand %p305_p0, %p148_p2 }
   0x6   : > { %p182_p4 = scmp.lt.s32.totalorder (!%p149_p3), %s349_s9, 1  ;;  %s189_s13 = ssub.s32 (!%p149_p3), 1, %s349_s9 }
   0x7   : > { %152 = sbr.rel (%p149_p3) target bundleno = 24 (0x18), region = 28  ;;  %p190_p5 = scmp.lt.s32.totalorder (!%p149_p3), %s189_s13, 1 }
   0xc   : > { %s411_s9 = smov (!%p182_p4, %s349_s9), 1  ;;  %s413_s13 = smov (!%p190_p5, %s189_s13), 1 }
   0xd   : > { %s306_s14 = sshll.u32 %s411_s9, 2  ;;  %s307_s18 = sshll.u32 %s413_s13, 2 }
   0xe   : > { %s188_s17 = scalar_lea.vmem %s403_s0, %s306_s14  ;;  %s196_s21 = scalar_lea.vmem %s404_s1, %s307_s18 }
   0xf   : > { %v205_v0 = vld [vmem:[%s188_s17] sm:$0xf]  ;;  %s204_s24 = scalar_lea.vmem %s405_s2, %s306_s14 }
  0x10   : > { %v206_v1 = vunpack.c.l.bf16 %v205_v0  ;;  %v207_v2 = vld [vmem:[%s196_s21] sm:$0xf] }
  0x11   : > { %v208_v3 = vunpack.c.l.bf16 %v207_v2 }
  0x13   : > { %v209_v4 = vadd.f32 %v208_v3, %v206_v1 }
  0x15   : > { %v210_v5 = vpack.c.bf16 %v209_v4, %v209_v4 }
  0x17   : > { %211 = vst [vmem:[%s204_s24] sm:$0xf] %v210_v5 }
  0x18 PF: > { %s12_s11 = sadd.s32 1, %s357_s11   ;;  %s406_s9 = smov %s353_s10 }
  0x19   : > { %p9_p6 = scmp.ge.s32.totalorder %s12_s11, 4   ;;  %s407_s10 = smov %s409_s12 }
  0x1b   :  { %11 = sbr.rel (!%p9_p6) target bundleno = 2 (0x2), region = 61 }

// kernel: efficientnetv2_forward.30
= control target key start
LH: loop header
LB: loop body
LE: loop exit
PB: predicated region body
PF: predicated region fallthrough
CT: control target
= control target key end

     0   :  { %s583_s12 = smov 0   ;;  %s585_s13 = smov 0   ;;  %s643_s0 = inlined_call_operand.vmem [shape: bf16[16,128], index: 0, kind: input, shape index: {}]   ;;  %s644_s1 = inlined_call_operand.vmem [shape: bf16[128,128], index: 1, kind: input, shape index: {}]   ;;  %s645_s2 = inlined_call_operand.vmem [shape: f32[1,128], index: 2, kind: input, shape index: {}]   ;;  %s646_s3 = inlined_call_operand.vmem [shape: bf16[16,128], index: 3, kind: output, shape index: {}]  }
   0x1   :  { %s587_s14 = smov 0  }
   0x2 LB: > { %s32_s15 = sadd.s32 1, %s557_s13  ;;  %p467_p0 = scmp.ge.s32.totalorder %s561_s14, 1  ;;  %s561_s14 = sphi %s587_s14, %s13_s14   ;;  %s557_s13 = sphi %s585_s13, %s648_s13   ;;  %s553_s12 = sphi %s583_s12, %s647_s12  }
   0x3   : > { %p34_p1 = scmp.ge.s32.totalorder %s32_s15, 2  ;;  %p186_p2 = scmp.lt.s32.totalorder %s561_s14, 3 }
   0x5   : > { %s650_s15 = smov (%p34_p1, %s32_s15), 0  ;;  %p187_p3 = pnand %p467_p0, %p186_p2 }
   0x6   : > { %p225_p4 = scmp.lt.s32.totalorder (!%p187_p3), %s553_s12, 1 }
   0x7   : > { %190 = sbr.rel (%p187_p3) target bundleno = 190 (0xbe), region = 32 }
   0xc   : > { %v511_v0 = vld [vmem:[%s644_s1 + $0x38] sm:$0xff]  ;;  %v510_v1 = vld [vmem:[%s644_s1 + $0x30] sm:$0xff]  ;;  %v509_v2 = vld [vmem:[%s644_s1 + $0x28] sm:$0xff]  ;;  %s652_s12 = smov (!%p225_p4, %s553_s12), 1 }
   0xd   : > { %322 = vmatpush.bf16.msra.mxu0 %v511_v0  ;;  %v508_v3 = vld [vmem:[%s644_s1 + $0x20] sm:$0xff]  ;;  %v507_v4 = vld [vmem:[%s644_s1 + $0x18] sm:$0xff]  ;;  %v506_v5 = vld [vmem:[%s644_s1 + $0x10] sm:$0xff]  ;;  %s468_s30 = sshll.u32 %s652_s12, 2 }
   0xe   : > { %v505_v6 = vld [vmem:[%s644_s1 + $0x8] sm:$0xff]  ;;  %v504_v7 = vld [vmem:[%s644_s1] sm:$0xff]  ;;  %s231_s8 = scalar_lea.vmem %s643_s0, %s468_s30  ;;  %s250_s16 = scalar_lea.vmem %s646_s3, %s468_s30 }
   0xf   : > { %v257_v8 = vld [vmem:[%s231_s8] sm:$0xf] }
  0x10   : > { %v536_v9 = vld [vmem:[%s645_s2] ss:$0 sm:$0xff] }
  0x11   : > { %323 = vmatpush.bf16.msra.mxu0 %v510_v1 }
  0x15   : > { %324 = vmatpush.bf16.msra.mxu0 %v509_v2 }
  0x19   : > { %325 = vmatpush.bf16.msra.mxu0 %v508_v3 }
  0x1d   : > { %326 = vmatpush.bf16.msra.mxu0 %v507_v4 }
  0x21   : > { %327 = vmatpush.bf16.msra.mxu0 %v506_v5 }
  0x25   : > { %328 = vmatpush.bf16.msra.mxu0 %v505_v6 }
  0x29   : > { %329 = vmatpush.bf16.msra.mxu0 %v504_v7 }
  0x2c   : > { %330 = vmatmul.bf16.vlgmr.msra.gmra.mxu0 %v257_v8 }
  0xa9   : > { %v331_v10 = vpop.f32.mrf.mxu0 }
  0xaa   : > { %v345_v11 = vadd.f32 %v536_v9, %v331_v10 }
  0xac   : > { %v346_v12 = vmul.f32 0.5, %v345_v11 }
  0xae   : > { %537 = vtanh.f32 %v346_v12 }
  0xb1   : > { %v333_v13 = vpop.f32.mrf.mxu0 }
  0xb4   : > { %v538_v14 = vpop.eup %537 }
  0xb5   : > { %v348_v15 = vmul.f32 0.5, %v538_v14 }
  0xb7   : > { %v349_v16 = vadd.f32 0.5, %v348_v15 }
  0xb9   : > { %v350_v17 = vmul.f32 %v349_v16, %v345_v11 }
  0xbb   : > { %v351_v18 = vpack.c.bf16 %v350_v17, %v350_v17 }
  0xbd   : > { %352 = vst [vmem:[%s250_s16] sm:$0xf] %v351_v18 }
  0xbe PF: > { %s13_s14 = sadd.s32 1, %s561_s14   ;;  %s647_s12 = smov %s557_s13 }
  0xbf   : > { %p10_p5 = scmp.ge.s32.totalorder %s13_s14, 4   ;;  %s648_s13 = smov %s650_s15 }
  0xc1   :  { %12 = sbr.rel (!%p10_p5) target bundleno = 2 (0x2), region = 76 }

// kernel: efficientnetv2_forward.27
= control target key start
LH: loop header
LB: loop body
LE: loop exit
PB: predicated region body
PF: predicated region fallthrough
CT: control target
= control target key end

     0   :  { %s491_s12 = smov 0   ;;  %s493_s13 = smov 0   ;;  %s575_s0 = inlined_call_operand.vmem [shape: bf16[9,16,128], index: 0, kind: input, shape index: {}]   ;;  %s576_s1 = inlined_call_operand.vmem [shape: bf16[9,1,128], index: 1, kind: input, shape index: {}]   ;;  %s577_s2 = inlined_call_operand.vmem [shape: f32[1,128], index: 2, kind: input, shape index: {}]   ;;  %s578_s3 = inlined_call_operand.vmem [shape: bf16[16,128], index: 3, kind: output, shape index: {}]  }
   0x1   :  { %s495_s14 = smov 0  }
   0x2 LB: > { %s393_s15 = sadd.s32 4294967295, %s469_s14   ;;  %s508_s16 = sadd.s32 1, %s469_s14   ;;  %s469_s14 = sphi %s495_s14, %s581_s14   ;;  %s465_s13 = sphi %s493_s13, %s580_s13   ;;  %s461_s12 = sphi %s491_s12, %s579_s12  }
   0x3   : > { %s17_s17 = ssub.s32 %s469_s14, %s508_s16  ;;  %s20_s18 = sadd.s32 1, %s465_s13 }
   0x4   : > { %p18_p0 = scmp.eq.s32.totalorder %s17_s17, 0  ;;  %p27_p1 = scmp.ne.s32.totalorder %s465_s13, %s461_s12 }
   0x5   : > { %p28_p2 = scmp.eq.s32.totalorder %s469_s14, 0  ;;  %p396_p4 = scmp.ge.s32.totalorder %s469_s14, 2 }
   0x6   : > { %s517_s19 = scalar_select %p18_p0, %s465_s13, %s20_s18  }
   0x7   : > { %p29_p3 = por %p28_p2, %p27_p1  ;;  %127 = sbr.rel (%p396_p4) target bundleno = 26 (0x1a), region = 24 }
   0xc   : > { %130 = sbr.rel (!%p29_p3) target bundleno = 26 (0x1a), region = 28  ;;  %s132_s20 = sand.u32 (%p29_p3), 1, %s465_s13  }
   0xd   : > { %s397_s21 = sshll.u32 (%p29_p3), %s469_s14, 2  ;;  %s418_s22 = smul.u32 (%p29_p3), 36, %s132_s20 }
   0xe   : > { %s136_s25 = scalar_lea.vmem (%p29_p3), %s575_s0, %s397_s21 }
   0xf   : > { %v153_v0 = vld [vmem:[%s136_s25] sm:$0xf] (%p29_p3)  ;;  %v155_v1 = vld [vmem:[%s136_s25 + $0x8] sm:$0xf] (%p29_p3)  ;;  %v157_v2 = vld [vmem:[%s136_s25 + $0x10] sm:$0xf] (%p29_p3) }
  0x10   : > { %s134_s26 = scalar_lea.vmem (%p29_p3), [#allocation2], %s418_s22  ;;  %v159_v3 = vld [vmem:[%s136_s25 + $0x18] sm:$0xf] (%p29_p3)  ;;  %v161_v4 = vld [vmem:[%s136_s25 + $0x20] sm:$0xf] (%p29_p3) }
  0x11   : > { %154 = vst [vmem:[%s134_s26] sm:$0xf] %v153_v0  ;;  %v163_v5 = vld [vmem:[%s136_s25 + $0x28] sm:$0xf]  ;;  %v165_v6 = vld [vmem:[%s136_s25 + $0x30] sm:$0xf] }
  0x12   : > { %156 = vst [vmem:[%s134_s26 + $0x4] sm:$0xf] %v155_v1  ;;  %v167_v7 = vld [vmem:[%s136_s25 + $0x38] sm:$0xf]  ;;  %v169_v8 = vld [vmem:[%s136_s25 + $0x40] sm:$0xf] }
  0x13   : > { %158 = vst [vmem:[%s134_s26 + $0x8] sm:$0xf] %v157_v2 }
  0x14   : > { %160 = vst [vmem:[%s134_s26 + $0xc] sm:$0xf] %v159_v3 }
  0x15   : > { %162 = vst [vmem:[%s134_s26 + $0x10] sm:$0xf] %v161_v4 }
  0x16   : > { %164 = vst [vmem:[%s134_s26 + $0x14] sm:$0xf] %v163_v5 }
  0x17   : > { %166 = vst [vmem:[%s134_s26 + $0x18] sm:$0xf] %v165_v6 }
  0x18   : > { %168 = vst [vmem:[%s134_s26 + $0x1c] sm:$0xf] %v167_v7 }
  0x19   : > { %170 = vst [vmem:[%s134_s26 + $0x20] sm:$0xf] %v169_v8 }
  0x1a PF: > { %p398_p5 = scmp.ge.s32.totalorder %s469_s14, 1  ;;  %p211_p6 = scmp.lt.s32.totalorder %s469_s14, 3 }
  0x1c   : > { %p212_p7 = pnand %p398_p5, %p211_p6 }
  0x1d   : > { %s218_s27 = sand.u32 (!%p212_p7), 1, %s461_s12   ;;  %p240_p8 = scmp.lt.s32.totalorder (!%p212_p7), %s393_s15, 1 }
  0x1e   : > { %215 = sbr.rel (%p212_p7) target bundleno = 79 (0x4f), region = 69 }
  0x1f   : > { %s419_s5 = smul.u32 (!%p212_p7), 36, %s218_s27 }
  0x21   : > { %s220_s21 = scalar_lea.vmem (!%p212_p7), [#allocation2], %s419_s5 }
  0x23   : > { %v246_v9 = vld [vmem:[%s576_s1] sm:$0x1]  ;;  %v401_v10 = vld [vmem:[%s576_s1 + $0x1] sm:$0x1]  ;;  %v403_v13 = vld [vmem:[%s576_s1 + $0x2] sm:$0x1] }
  0x24   : > { %v247_v11 = vunpack.c.l.bf16 %v246_v9  ;;  %v255_v12 = vunpack.c.l.bf16 %v401_v10  ;;  %v405_v14 = vld [vmem:[%s576_s1 + $0x3] sm:$0x1]  ;;  %v264_v15 = vunpack.c.l.bf16 %v403_v13  ;;  %v407_v17 = vld [vmem:[%s576_s1 + $0x4] sm:$0x1]  ;;  %v409_v18 = vld [vmem:[%s576_s1 + $0x5] sm:$0x1] }
  0x25   : > { %v273_v16 = vunpack.c.l.bf16 %v405_v14  ;;  %v282_v21 = vunpack.c.l.bf16 %v407_v17  ;;  %v411_v22 = vld [vmem:[%s576_s1 + $0x6] sm:$0x1]  ;;  %v402_v24 = vld [vmem:[%s220_s21 + $0x8] sm:$0xff]   ;;  %v406_v27 = vld [vmem:[%s220_s21 + $0x10] sm:$0xff]   ;;  %v291_v28 = vunpack.c.l.bf16 %v409_v18  ;;  %s583_s15 = smov (!%p240_p8, %s393_s15), 1 }
  0x26   : > { %v248_v19 = vperm.slane %v247_v11, 0  ;;  %v256_v20 = vperm.slane %v255_v12, 0  ;;  %v244_v23 = vld [vmem:[%s220_s21] sm:$0xff]   ;;  %v265_v25 = vperm.slane %v264_v15, 0  ;;  %v261_v31 = vunpack.c.l.bf16 %v402_v24  ;;  %v410_v41 = vld [vmem:[%s220_s21 + $0x18] sm:$0xff]   ;;  %s399_s28 = sshll.u32 %s583_s15, 2 }
  0x27   : > { %v274_v26 = vperm.slane %v273_v16, 0  ;;  %v245_v29 = vunpack.c.l.bf16 %v244_v23  ;;  %v252_v30 = vunpack.c.h.bf16 %v244_v23  ;;  %v270_v32 = vunpack.c.h.bf16 %v402_v24  ;;  %v413_v35 = vld [vmem:[%s576_s1 + $0x7] sm:$0x1]  ;;  %v415_v42 = vld [vmem:[%s576_s1 + $0x8] sm:$0x1]  ;;  %s243_s4 = scalar_lea.vmem %s578_s3, %s399_s28 }
  0x28   : > { %v279_v33 = vunpack.c.l.bf16 %v406_v27  ;;  %v283_v34 = vperm.slane %v282_v21, 0  ;;  %v266_v38 = vmul.f32 %v265_v25, %v261_v31  ;;  %v300_v39 = vunpack.c.l.bf16 %v411_v22  ;;  %v414_v52 = vld [vmem:[%s220_s21 + $0x20] sm:$0xf] }
  0x29   : > { %v249_v36 = vmul.f32 %v248_v19, %v245_v29  ;;  %v257_v37 = vmul.f32 %v256_v20, %v252_v30  ;;  %v288_v40 = vunpack.c.h.bf16 %v406_v27  ;;  %v275_v44 = vmul.f32 %v274_v26, %v270_v32  ;;  %v444_v2 = vld [vmem:[%s577_s2] ss:$0 sm:$0xff] }
  0x2a   : > { %v292_v45 = vperm.slane %v291_v28, 0  ;;  %v309_v46 = vunpack.c.l.bf16 %v413_v35  ;;  %v284_v47 = vmul.f32 %v283_v34, %v279_v33  ;;  %v297_v49 = vunpack.c.l.bf16 %v410_v41 }
  0x2b   : > { %v258_v43 = vadd.f32 %v257_v37, %v249_v36  ;;  %v301_v50 = vperm.slane %v300_v39, 0  ;;  %v318_v51 = vunpack.c.l.bf16 %v415_v42  ;;  %v306_v55 = vunpack.c.h.bf16 %v410_v41 }
  0x2c   : > { %v293_v54 = vmul.f32 %v292_v45, %v288_v40  ;;  %v310_v56 = vperm.slane %v309_v46, 0  ;;  %v315_v59 = vunpack.c.l.bf16 %v414_v52 }
  0x2d   : > { %v267_v48 = vadd.f32 %v266_v38, %v258_v43  ;;  %v302_v58 = vmul.f32 %v301_v50, %v297_v49  ;;  %v319_v60 = vperm.slane %v318_v51, 0 }
  0x2e   : > { %v311_v62 = vmul.f32 %v310_v56, %v306_v55 }
  0x2f   : > { %v276_v53 = vadd.f32 %v275_v44, %v267_v48  ;;  %v320_v0 = vmul.f32 %v319_v60, %v315_v59 }
  0x31   : > { %v285_v57 = vadd.f32 %v284_v47, %v276_v53 }
  0x33   : > { %v294_v61 = vadd.f32 %v293_v54, %v285_v57 }
  0x35   : > { %v303_v63 = vadd.f32 %v302_v58, %v294_v61 }
  0x37   : > { %v312_v1 = vadd.f32 %v311_v62, %v303_v63 }
  0x39   : > { %v321_v3 = vadd.f32 %v320_v0, %v312_v1 }
  0x3b   : > { %v326_v4 = vadd.f32 %v444_v2, %v321_v3 }
  0x3d   : > { %v327_v5 = vmul.f32 0.5, %v326_v4 }
  0x3f   : > { %445 = vtanh.f32 %v327_v5 }
  0x45   : > { %v446_v6 = vpop.eup %445 }
  0x46   : > { %v329_v7 = vmul.f32 0.5, %v446_v6 }
  0x48   : > { %v330_v8 = vadd.f32 0.5, %v329_v7 }
  0x4a   : > { %v331_v9 = vmul.f32 %v330_v8, %v326_v4 }
  0x4c   : > { %v332_v10 = vpack.c.bf16 %v331_v9, %v331_v9 }
  0x4e   : > { %333 = vst [vmem:[%s243_s4] sm:$0xf] %v332_v10 }
  0x4f PF: > { %p10_p9 = scmp.ge.s32.totalorder %s508_s16, 4   ;;  %s579_s12 = smov %s465_s13 }
  0x50   : > { %s580_s13 = smov %s517_s19  ;;  %s581_s14 = smov %s508_s16 }
  0x51   :  { %12 = sbr.rel (!%p10_p9) target bundleno = 2 (0x2), region = 124 }

// kernel: efficientnetv2_forward.28
= control target key start
LH: loop header
LB: loop body
LE: loop exit
PB: predicated region body
PF: predicated region fallthrough
CT: control target
= control target key end

     0   :  { %s576_s12 = smov 0   ;;  %s578_s13 = smov 0   ;;  %s636_s0 = inlined_call_operand.vmem [shape: bf16[16,128], index: 0, kind: input, shape index: {}]   ;;  %s637_s1 = inlined_call_operand.vmem [shape: bf16[128,128], index: 1, kind: input, shape index: {}]   ;;  %s638_s2 = inlined_call_operand.vmem [shape: f32[1,128], index: 2, kind: input, shape index: {}]   ;;  %s639_s3 = inlined_call_operand.vmem [shape: bf16[16,128], index: 3, kind: output, shape index: {}]  }
   0x1   :  { %s580_s14 = smov 0  }
   0x2 LB: > { %s32_s15 = sadd.s32 1, %s550_s13  ;;  %p462_p0 = scmp.ge.s32.totalorder %s554_s14, 1  ;;  %s554_s14 = sphi %s580_s14, %s13_s14   ;;  %s550_s13 = sphi %s578_s13, %s641_s13   ;;  %s546_s12 = sphi %s576_s12, %s640_s12  }
   0x3   : > { %p34_p1 = scmp.ge.s32.totalorder %s32_s15, 2  ;;  %p186_p2 = scmp.lt.s32.totalorder %s554_s14, 3 }
   0x5   : > { %s643_s15 = smov (%p34_p1, %s32_s15), 0  ;;  %p187_p3 = pnand %p462_p0, %p186_p2 }
   0x6   : > { %p225_p4 = scmp.lt.s32.totalorder (!%p187_p3), %s546_s12, 1 }
   0x7   : > { %190 = sbr.rel (%p187_p3) target bundleno = 178 (0xb2), region = 32 }
   0xc   : > { %v506_v0 = vld [vmem:[%s637_s1 + $0x38] sm:$0xff]  ;;  %v505_v1 = vld [vmem:[%s637_s1 + $0x30] sm:$0xff]  ;;  %v504_v2 = vld [vmem:[%s637_s1 + $0x28] sm:$0xff]  ;;  %s645_s12 = smov (!%p225_p4, %s546_s12), 1 }
   0xd   : > { %322 = vmatpush.bf16.msra.mxu0 %v506_v0  ;;  %v503_v3 = vld [vmem:[%s637_s1 + $0x20] sm:$0xff]  ;;  %v502_v4 = vld [vmem:[%s637_s1 + $0x18] sm:$0xff]  ;;  %v501_v5 = vld [vmem:[%s637_s1 + $0x10] sm:$0xff]  ;;  %s463_s30 = sshll.u32 %s645_s12, 2 }
   0xe   : > { %v500_v6 = vld [vmem:[%s637_s1 + $0x8] sm:$0xff]  ;;  %v499_v7 = vld [vmem:[%s637_s1] sm:$0xff]  ;;  %s231_s8 = scalar_lea.vmem %s636_s0, %s463_s30  ;;  %s250_s16 = scalar_lea.vmem %s639_s3, %s463_s30 }
   0xf   : > { %v257_v8 = vld [vmem:[%s231_s8] sm:$0xf] }
  0x10   : > { %v531_v9 = vld [vmem:[%s638_s2] ss:$0 sm:$0xff] }
  0x11   : > { %323 = vmatpush.bf16.msra.mxu0 %v505_v1 }
  0x15   : > { %324 = vmatpush.bf16.msra.mxu0 %v504_v2 }
  0x19   : > { %325 = vmatpush.bf16.msra.mxu0 %v503_v3 }
  0x1d   : > { %326 = vmatpush.bf16.msra.mxu0 %v502_v4 }
  0x21   : > { %327 = vmatpush.bf16.msra.mxu0 %v501_v5 }
  0x25   : > { %328 = vmatpush.bf16.msra.mxu0 %v500_v6 }
  0x29   : > { %329 = vmatpush.bf16.msra.mxu0 %v499_v7 }
  0x2c   : > { %330 = vmatmul.bf16.vlgmr.msra.gmra.mxu0 %v257_v8 }
  0xa9   : > { %v331_v10 = vpop.f32.mrf.mxu0 }
  0xaa   : > { %v345_v11 = vadd.f32 %v531_v9, %v331_v10 }
  0xac   : > { %v346_v12 = vpack.c.bf16 %v345_v11, %v345_v11 }
  0xae   : > { %347 = vst [vmem:[%s250_s16] sm:$0xf] %v346_v12 }
  0xb1   : > { %v333_v13 = vpop.f32.mrf.mxu0 }
  0xb2 PF: > { %s13_s14 = sadd.s32 1, %s554_s14   ;;  %s640_s12 = smov %s550_s13 }
  0xb3   : > { %p10_p5 = scmp.ge.s32.totalorder %s13_s14, 4   ;;  %s641_s13 = smov %s643_s15 }
  0xb5   :  { %12 = sbr.rel (!%p10_p5) target bundleno = 2 (0x2), region = 76 }

// kernel: efficientnetv2_forward.32
= control target key start
LH: loop header
LB: loop body
LE: loop exit
PB: predicated region body
PF: predicated region fallthrough
CT: control target
= control target key end

     0   :  { %s655_s15 = smov 0   ;;  %s657_s16 = smov 0   ;;  %s718_s0 = inlined_call_operand.vmem [shape: bf16[16,128], index: 0, kind: input, shape index: {}]   ;;  %s719_s1 = inlined_call_operand.vmem [shape: bf16[128,128], index: 1, kind: input, shape index: {}]   ;;  %s720_s2 = inlined_call_operand.vmem [shape: f32[1,128], index: 2, kind: input, shape index: {}]   ;;  %s721_s3 = inlined_call_operand.vmem [shape: bf16[16,128], index: 3, kind: input, shape index: {}]   ;;  %s722_s4 = inlined_call_operand.vmem [shape: bf16[16,128], index: 4, kind: output, shape index: {}]  }
   0x1   :  { %s659_s17 = smov 0  }
   0x2 LB: > { %s33_s18 = sadd.s32 1, %s624_s16  ;;  %p535_p0 = scmp.ge.s32.totalorder %s628_s17, 1  ;;  %s628_s17 = sphi %s659_s17, %s14_s17   ;;  %s624_s16 = sphi %s657_s16, %s724_s16   ;;  %s620_s15 = sphi %s655_s15, %s723_s15  }
   0x3   : > { %p35_p1 = scmp.ge.s32.totalorder %s33_s18, 2  ;;  %p225_p2 = scmp.lt.s32.totalorder %s628_s17, 3 }
   0x5   : > { %s726_s18 = smov (%p35_p1, %s33_s18), 0  ;;  %p226_p3 = pnand %p535_p0, %p225_p2 }
   0x6   : > { %p273_p4 = scmp.lt.s32.totalorder (!%p226_p3), %s620_s15, 1 }
   0x7   : > { %229 = sbr.rel (%p226_p3) target bundleno = 178 (0xb2), region = 36 }
   0xc   : > { %v580_v0 = vld [vmem:[%s719_s1 + $0x38] sm:$0xff]  ;;  %v579_v1 = vld [vmem:[%s719_s1 + $0x30] sm:$0xff]  ;;  %v578_v2 = vld [vmem:[%s719_s1 + $0x28] sm:$0xff]  ;;  %s728_s15 = smov (!%p273_p4, %s620_s15), 1 }
   0xd   : > { %377 = vmatpush.bf16.msra.mxu0 %v580_v0  ;;  %v577_v3 = vld [vmem:[%s719_s1 + $0x20] sm:$0xff]  ;;  %v576_v4 = vld [vmem:[%s719_s1 + $0x18] sm:$0xff]  ;;  %v575_v5 = vld [vmem:[%s719_s1 + $0x10] sm:$0xff]  ;;  %s536_s7 = sshll.u32 %s728_s15, 2 }
   0xe   : > { %v574_v6 = vld [vmem:[%s719_s1 + $0x8] sm:$0xff]  ;;  %v573_v7 = vld [vmem:[%s719_s1] sm:$0xff]  ;;  %s279_s12 = scalar_lea.vmem %s718_s0, %s536_s7  ;;  %s298_s19 = scalar_lea.vmem %s721_s3, %s536_s7 }
   0xf   : > { %v312_v8 = vld [vmem:[%s279_s12] sm:$0xf]  ;;  %s305_s23 = scalar_lea.vmem %s722_s4, %s536_s7 }
  0x10   : > { %v401_v9 = vld [vmem:[%s298_s19] sm:$0xf] }
  0x11   : > { %378 = vmatpush.bf16.msra.mxu0 %v579_v1  ;;  %v605_v10 = vld [vmem:[%s720_s2] ss:$0 sm:$0xff]  ;;  %v402_v11 = vunpack.c.l.bf16 %v401_v9 }
  0x15   : > { %379 = vmatpush.bf16.msra.mxu0 %v578_v2 }
  0x19   : > { %380 = vmatpush.bf16.msra.mxu0 %v577_v3 }
  0x1d   : > { %381 = vmatpush.bf16.msra.mxu0 %v576_v4 }
  0x21   : > { %382 = vmatpush.bf16.msra.mxu0 %v575_v5 }
  0x25   : > { %383 = vmatpush.bf16.msra.mxu0 %v574_v6 }
  0x29   : > { %384 = vmatpush.bf16.msra.mxu0 %v573_v7 }
  0x2c   : > { %385 = vmatmul.bf16.vlgmr.msra.gmra.mxu0 %v312_v8 }
  0xa9   : > { %v386_v12 = vpop.f32.mrf.mxu0 }
  0xaa   : > { %v400_v13 = vadd.f32 %v605_v10, %v386_v12 }
  0xac   : > { %v403_v14 = vadd.f32 %v402_v11, %v400_v13 }
  0xae   : > { %v404_v15 = vpack.c.bf16 %v403_v14, %v403_v14 }
  0xb0   : > { %405 = vst [vmem:[%s305_s23] sm:$0xf] %v404_v15 }
  0xb1   : > { %v388_v16 = vpop.f32.mrf.mxu0 }
  0xb2 PF: > { %s14_s17 = sadd.s32 1, %s628_s17   ;;  %s723_s15 = smov %s624_s16 }
  0xb3   : > { %p11_p5 = scmp.ge.s32.totalorder %s14_s17, 4   ;;  %s724_s16 = smov %s726_s18 }
  0xb5   :  { %13 = sbr.rel (!%p11_p5) target bundleno = 2 (0x2), region = 83 }

</bundles_post_ra>
